<compile_context>
chip_gen: v7x
topology: tpu7x:2x2x1
jax: 0.10.0
libtpu: 0.0.40
codegen_flags: <defaults>
</compile_context>

<pallas_src>
import jax
import jax.numpy as jnp
from jax import lax
from jax.experimental import pallas as pl
from jax.experimental.pallas import tpu as pltpu

INPUT_SIZE = 28 * 28          # 784
HIDDEN_SIZES = [500, 300]
OUTPUT_SIZE = 10
BN_EPS = 1e-5

# Lane-padded feature widths (multiples of 128 -> dense MXU N tiles, unmasked stores).
H1_PAD = 512                  # 500 -> 512
H2_PAD = 384                  # 300 -> 384
OUT_PAD = 128                 # 10  -> 128


def _bn_relu(h, gamma, beta):
    """Training-mode BatchNorm1d (full-batch biased stats) + ReLU, single sweep.

    One reduction pass (sum and sum-of-squares share the same vreg sweep),
    var = E[h^2] - mean^2, then a single FMA per element.  Padded lanes stay
    exactly zero because gamma/beta pads are zero.
    """
    inv_n = jnp.float32(1.0 / h.shape[0])
    mean = jnp.sum(h, axis=0, keepdims=True) * inv_n
    mean_sq = jnp.sum(h * h, axis=0, keepdims=True) * inv_n
    var = mean_sq - mean * mean
    scale = gamma * lax.rsqrt(var + BN_EPS)          # gamma / sqrt(var + eps)
    shift = beta - mean * scale
    return jnp.maximum(h * scale + shift, 0.0)


def mlp_kernel(x_ref,
               w1_ref, g1_ref, be1_ref,
               w2_ref, g2_ref, be2_ref,
               w3_ref, b3_ref,
               out_ref):
    # ---- Layer 1: Linear(784 -> 512pad) ----
    # In-kernel bf16 cast (cheap VPU op, hidden under DMA); f32 MXU accumulate.
    # b1 omitted: a pre-BN bias cancels exactly in the mean subtraction.
    x_bf16 = x_ref[...].astype(jnp.bfloat16)
    h1 = jnp.dot(x_bf16, w1_ref[...], preferred_element_type=jnp.float32)
    h1 = _bn_relu(h1, g1_ref[...], be1_ref[...])      # f32 VPU math

    # ---- Layer 2: Linear(512pad -> 384pad), b2 omitted (cancels in BN) ----
    h2 = jnp.dot(h1.astype(jnp.bfloat16), w2_ref[...],
                 preferred_element_type=jnp.float32)
    h2 = _bn_relu(h2, g2_ref[...], be2_ref[...])

    # ---- Layer 3: Linear(384pad -> 128pad) + masked LogSoftmax over 10 real lanes ----
    logits = jnp.dot(h2.astype(jnp.bfloat16), w3_ref[...],
                     preferred_element_type=jnp.float32) + b3_ref[...]
    lane = lax.broadcasted_iota(jnp.int32, logits.shape, 1)
    valid = lane < OUTPUT_SIZE
    neg_inf = jnp.float32(-jnp.inf)
    logits = jnp.where(valid, logits, neg_inf)        # exclude padded lanes from LSE
    m = jnp.max(logits, axis=1, keepdims=True)
    shifted = logits - m                              # padded lanes -> -inf, exp -> 0
    lse = jnp.log(jnp.sum(jnp.exp(shifted), axis=1, keepdims=True))
    out_ref[...] = jnp.where(valid, shifted - lse, 0.0)   # lane-dense (B,128) store


def _pad_cols(a, n):
    return jnp.pad(a, ((0, 0), (0, n - a.shape[1])))


def init_params(key):
    """PyTorch-style init (uniform(+-1/sqrt(fan_in))), pre-padded, weights in bf16.

    b1/b2 are generated for init parity with the nn.Module (and used by the
    pure-JAX reference) but are NOT consumed by the Pallas kernel: they cancel
    exactly in BatchNorm's mean subtraction.
    """
    sizes = [INPUT_SIZE] + HIDDEN_SIZES + [OUTPUT_SIZE]
    pads = [INPUT_SIZE, H1_PAD, H2_PAD, OUT_PAD]
    params = {}
    keys = jax.random.split(key, 2 * (len(sizes) - 1))
    for i in range(len(sizes) - 1):
        fan_in, fan_out = sizes[i], sizes[i + 1]
        in_pad, out_pad = pads[i], pads[i + 1]
        bound = 1.0 / (fan_in ** 0.5)
        # weights stored as [in, out] (transposed vs torch's [out, in]), zero-padded.
        w = jax.random.uniform(keys[2 * i], (fan_in, fan_out), jnp.float32, -bound, bound)
        b = jax.random.uniform(keys[2 * i + 1], (1, fan_out), jnp.float32, -bound, bound)
        w_padded = jnp.zeros((in_pad, out_pad), jnp.float32).at[:fan_in, :fan_out].set(w)
        params[f"w{i + 1}"] = w_padded.astype(jnp.bfloat16)   # bf16 MXU operand
        params[f"b{i + 1}"] = _pad_cols(b, out_pad)           # f32
        if i < len(sizes) - 2:
            params[f"g{i + 1}"] = _pad_cols(jnp.ones((1, fan_out), jnp.float32), out_pad)
            params[f"be{i + 1}"] = _pad_cols(jnp.zeros((1, fan_out), jnp.float32), out_pad)
    return params


def neural_net_forward(x, params):
    """x: any shape with trailing 28*28 elements per sample (NCHW images ok)."""
    x2d = x.reshape(-1, INPUT_SIZE)        # glue: x.view(-1, 784); stays f32 (cast in-kernel)
    B = x2d.shape[0]

    args = (
        x2d,
        params["w1"], params["g1"], params["be1"],
        params["w2"], params["g2"], params["be2"],
        params["w3"], params["b3"],
    )
    vmem_spec = pl.BlockSpec(memory_space=pltpu.MemorySpace.VMEM)
    out_padded = pl.pallas_call(
        mlp_kernel,
        out_shape=jax.ShapeDtypeStruct((B, OUT_PAD), jnp.float32),
        in_specs=[vmem_spec] * len(args),
        out_specs=vmem_spec,
        # Actual residency at B=256 is ~3-4 MiB; 16 MiB leaves Mosaic headroom
        # and fits comfortably inside v7x's 64 MiB per-core VMEM.
        compiler_params=pltpu.CompilerParams(vmem_limit_bytes=16 * 1024 * 1024),
    )(*args)
    # TODO(synk): keep the padded (B,128) slab if the consumer can fuse the
    # slice; materializing (B,10) here is a small extra XLA op + HBM trip.
    return out_padded[:, :OUTPUT_SIZE]


def reference_forward(x, params):
    """Pure-JAX reference mirroring the nn.Module math (includes b1/b2, centered
    variance), with the same bf16 matmul inputs / f32 accumulation."""
    x2d = x.reshape(-1, INPUT_SIZE)

    def bn_relu(h, g, be):
        mean = jnp.mean(h, axis=0, keepdims=True)
        c = h - mean
        var = jnp.mean(c * c, axis=0, keepdims=True)
        return jnp.maximum(c * (g * lax.rsqrt(var + BN_EPS)) + be, 0.0)

    h1 = jnp.dot(x2d.astype(jnp.bfloat16), params["w1"],
                 preferred_element_type=jnp.float32) + params["b1"]
    h1 = bn_relu(h1, params["g1"], params["be1"])
    h2 = jnp.dot(h1.astype(jnp.bfloat16), params["w2"],
                 preferred_element_type=jnp.float32) + params["b2"]
    h2 = bn_relu(h2, params["g2"], params["be2"])
    logits = jnp.dot(h2.astype(jnp.bfloat16), params["w3"],
                     preferred_element_type=jnp.float32) + params["b3"]
    return jax.nn.log_softmax(logits[:, :OUTPUT_SIZE], axis=1)


if __name__ == "__main__":
    key = jax.random.PRNGKey(0)
    k_param, k_x = jax.random.split(key)

    params = init_params(k_param)
    # MNIST-like batch in NCHW; 256 rows so the MXU M dimension is actually filled
    # (BatchNorm training mode also needs B > 1).
    B = 256
    x = jax.random.normal(k_x, (B, 1, 28, 28), jnp.float32)

    out = neural_net_forward(x, params)
    out = jax.block_until_ready(out)

    assert out.shape == (B, OUTPUT_SIZE), out.shape
    # log-softmax rows should (log-)sum to ~1
    row_sums = jnp.sum(jnp.exp(out), axis=1)
    assert jnp.allclose(row_sums, 1.0, atol=1e-4), row_sums
    # match the module-faithful pure-JAX reference (which keeps b1/b2 and the
    # centered-variance BN formulation)
    ref = reference_forward(x, params)
    assert jnp.allclose(out, ref, atol=1e-2, rtol=1e-2), float(jnp.max(jnp.abs(out - ref)))

    print("KERNEL_OK")
</pallas_src>

<mosaic_0001>
module attributes {stable_mosaic.version = 11 : i64} {
  func.func @mlp_kernel(%arg0: memref<256x784xf32, #tpu.memory_space<vmem>>, %arg1: memref<784x512xbf16, #tpu.memory_space<vmem>>, %arg2: memref<1x512xf32, #tpu.memory_space<vmem>>, %arg3: memref<1x512xf32, #tpu.memory_space<vmem>>, %arg4: memref<512x384xbf16, #tpu.memory_space<vmem>>, %arg5: memref<1x384xf32, #tpu.memory_space<vmem>>, %arg6: memref<1x384xf32, #tpu.memory_space<vmem>>, %arg7: memref<384x128xbf16, #tpu.memory_space<vmem>>, %arg8: memref<1x128xf32, #tpu.memory_space<vmem>>, %arg9: memref<256x128xf32, #tpu.memory_space<vmem>>) attributes {dimension_semantics = [], scalar_prefetch = 0 : i64, scratch_operands = 0 : i64, tpu.core_type = #tpu.core_type<tc>} {
    %c0 = arith.constant 0 : index
    %c0_0 = arith.constant 0 : index
    %0 = vector.load %arg0[%c0, %c0_0] : memref<256x784xf32, #tpu.memory_space<vmem>>, vector<256x784xf32>
    %1 = arith.truncf %0 : vector<256x784xf32> to vector<256x784xbf16>
    %c0_1 = arith.constant 0 : index
    %c0_2 = arith.constant 0 : index
    %2 = vector.load %arg1[%c0_1, %c0_2] : memref<784x512xbf16, #tpu.memory_space<vmem>>, vector<784x512xbf16>
    %cst = arith.constant dense<0.000000e+00> : vector<256x512xf32>
    %3 = tpu.matmul %1, %2, %cst {dimension_numbers = #tpu.dot_dimension_numbers<[1], [0], [0], [1], [0, 0, 1, 1], [], []>} : vector<256x784xbf16>, vector<784x512xbf16>, vector<256x512xf32> -> vector<256x512xf32>
    %c0_3 = arith.constant 0 : index
    %c0_4 = arith.constant 0 : index
    %4 = vector.load %arg2[%c0_3, %c0_4] : memref<1x512xf32, #tpu.memory_space<vmem>>, vector<1x512xf32>
    %c0_5 = arith.constant 0 : index
    %c0_6 = arith.constant 0 : index
    %5 = vector.load %arg3[%c0_5, %c0_6] : memref<1x512xf32, #tpu.memory_space<vmem>>, vector<1x512xf32>
    %cst_7 = arith.constant dense<0.000000e+00> : vector<512xf32>
    %6 = vector.multi_reduction <add>, %3, %cst_7 [0] : vector<256x512xf32> to vector<512xf32>
    %7 = vector.shape_cast %6 : vector<512xf32> to vector<1x512xf32>
    %cst_8 = arith.constant 3.906250e-03 : f32
    %8 = vector.broadcast %cst_8 : f32 to vector<1x512xf32>
    %9 = arith.mulf %7, %8 : vector<1x512xf32>
    %10 = arith.mulf %3, %3 : vector<256x512xf32>
    %cst_9 = arith.constant dense<0.000000e+00> : vector<512xf32>
    %11 = vector.multi_reduction <add>, %10, %cst_9 [0] : vector<256x512xf32> to vector<512xf32>
    %12 = vector.shape_cast %11 : vector<512xf32> to vector<1x512xf32>
    %cst_10 = arith.constant 3.906250e-03 : f32
    %13 = vector.broadcast %cst_10 : f32 to vector<1x512xf32>
    %14 = arith.mulf %12, %13 : vector<1x512xf32>
    %15 = arith.mulf %9, %9 : vector<1x512xf32>
    %16 = arith.subf %14, %15 : vector<1x512xf32>
    %cst_11 = arith.constant 9.99999974E-6 : f32
    %17 = vector.broadcast %cst_11 : f32 to vector<1x512xf32>
    %18 = arith.addf %16, %17 : vector<1x512xf32>
    %19 = math.rsqrt %18 : vector<1x512xf32>
    %20 = arith.mulf %4, %19 : vector<1x512xf32>
    %21 = arith.mulf %9, %20 : vector<1x512xf32>
    %22 = arith.subf %5, %21 : vector<1x512xf32>
    %23 = vector.broadcast %20 : vector<1x512xf32> to vector<256x512xf32>
    %24 = arith.mulf %3, %23 : vector<256x512xf32>
    %25 = vector.broadcast %22 : vector<1x512xf32> to vector<256x512xf32>
    %26 = arith.addf %24, %25 : vector<256x512xf32>
    %cst_12 = arith.constant 0.000000e+00 : f32
    %27 = vector.broadcast %cst_12 : f32 to vector<256x512xf32>
    %28 = arith.maximumf %26, %27 : vector<256x512xf32>
    %29 = arith.truncf %28 : vector<256x512xf32> to vector<256x512xbf16>
    %c0_13 = arith.constant 0 : index
    %c0_14 = arith.constant 0 : index
    %30 = vector.load %arg4[%c0_13, %c0_14] : memref<512x384xbf16, #tpu.memory_space<vmem>>, vector<512x384xbf16>
    %cst_15 = arith.constant dense<0.000000e+00> : vector<256x384xf32>
    %31 = tpu.matmul %29, %30, %cst_15 {dimension_numbers = #tpu.dot_dimension_numbers<[1], [0], [0], [1], [0, 0, 1, 1], [], []>} : vector<256x512xbf16>, vector<512x384xbf16>, vector<256x384xf32> -> vector<256x384xf32>
    %c0_16 = arith.constant 0 : index
    %c0_17 = arith.constant 0 : index
    %32 = vector.load %arg5[%c0_16, %c0_17] : memref<1x384xf32, #tpu.memory_space<vmem>>, vector<1x384xf32>
    %c0_18 = arith.constant 0 : index
    %c0_19 = arith.constant 0 : index
    %33 = vector.load %arg6[%c0_18, %c0_19] : memref<1x384xf32, #tpu.memory_space<vmem>>, vector<1x384xf32>
    %cst_20 = arith.constant dense<0.000000e+00> : vector<384xf32>
    %34 = vector.multi_reduction <add>, %31, %cst_20 [0] : vector<256x384xf32> to vector<384xf32>
    %35 = vector.shape_cast %34 : vector<384xf32> to vector<1x384xf32>
    %cst_21 = arith.constant 3.906250e-03 : f32
    %36 = vector.broadcast %cst_21 : f32 to vector<1x384xf32>
    %37 = arith.mulf %35, %36 : vector<1x384xf32>
    %38 = arith.mulf %31, %31 : vector<256x384xf32>
    %cst_22 = arith.constant dense<0.000000e+00> : vector<384xf32>
    %39 = vector.multi_reduction <add>, %38, %cst_22 [0] : vector<256x384xf32> to vector<384xf32>
    %40 = vector.shape_cast %39 : vector<384xf32> to vector<1x384xf32>
    %cst_23 = arith.constant 3.906250e-03 : f32
    %41 = vector.broadcast %cst_23 : f32 to vector<1x384xf32>
    %42 = arith.mulf %40, %41 : vector<1x384xf32>
    %43 = arith.mulf %37, %37 : vector<1x384xf32>
    %44 = arith.subf %42, %43 : vector<1x384xf32>
    %cst_24 = arith.constant 9.99999974E-6 : f32
    %45 = vector.broadcast %cst_24 : f32 to vector<1x384xf32>
    %46 = arith.addf %44, %45 : vector<1x384xf32>
    %47 = math.rsqrt %46 : vector<1x384xf32>
    %48 = arith.mulf %32, %47 : vector<1x384xf32>
    %49 = arith.mulf %37, %48 : vector<1x384xf32>
    %50 = arith.subf %33, %49 : vector<1x384xf32>
    %51 = vector.broadcast %48 : vector<1x384xf32> to vector<256x384xf32>
    %52 = arith.mulf %31, %51 : vector<256x384xf32>
    %53 = vector.broadcast %50 : vector<1x384xf32> to vector<256x384xf32>
    %54 = arith.addf %52, %53 : vector<256x384xf32>
    %cst_25 = arith.constant 0.000000e+00 : f32
    %55 = vector.broadcast %cst_25 : f32 to vector<256x384xf32>
    %56 = arith.maximumf %54, %55 : vector<256x384xf32>
    %57 = arith.truncf %56 : vector<256x384xf32> to vector<256x384xbf16>
    %c0_26 = arith.constant 0 : index
    %c0_27 = arith.constant 0 : index
    %58 = vector.load %arg7[%c0_26, %c0_27] : memref<384x128xbf16, #tpu.memory_space<vmem>>, vector<384x128xbf16>
    %cst_28 = arith.constant dense<0.000000e+00> : vector<256x128xf32>
    %59 = tpu.matmul %57, %58, %cst_28 {dimension_numbers = #tpu.dot_dimension_numbers<[1], [0], [0], [1], [0, 0, 1, 1], [], []>} : vector<256x384xbf16>, vector<384x128xbf16>, vector<256x128xf32> -> vector<256x128xf32>
    %c0_29 = arith.constant 0 : index
    %c0_30 = arith.constant 0 : index
    %60 = vector.load %arg8[%c0_29, %c0_30] : memref<1x128xf32, #tpu.memory_space<vmem>>, vector<1x128xf32>
    %61 = vector.broadcast %60 : vector<1x128xf32> to vector<256x128xf32>
    %62 = arith.addf %59, %61 : vector<256x128xf32>
    %63 = tpu.iota {dimensions = array<i32: 1>} : vector<256x128xi32>
    %c10_i32 = arith.constant 10 : i32
    %64 = vector.broadcast %c10_i32 : i32 to vector<256x128xi32>
    %65 = arith.cmpi slt, %63, %64 : vector<256x128xi32>
    %cst_31 = arith.constant 0xFF800000 : f32
    %66 = vector.broadcast %cst_31 : f32 to vector<256x128xf32>
    %67 = arith.select %65, %62, %66 : vector<256x128xi1>, vector<256x128xf32>
    %cst_32 = arith.constant dense<0xFF800000> : vector<256xf32>
    %68 = vector.multi_reduction <maximumf>, %67, %cst_32 [1] : vector<256x128xf32> to vector<256xf32>
    %69 = vector.shape_cast %68 : vector<256xf32> to vector<256x1xf32>
    %70 = vector.broadcast %69 : vector<256x1xf32> to vector<256x128xf32>
    %71 = arith.subf %67, %70 : vector<256x128xf32>
    %72 = math.exp %71 : vector<256x128xf32>
    %cst_33 = arith.constant dense<0.000000e+00> : vector<256xf32>
    %73 = vector.multi_reduction <add>, %72, %cst_33 [1] : vector<256x128xf32> to vector<256xf32>
    %74 = vector.shape_cast %73 : vector<256xf32> to vector<256x1xf32>
    %75 = math.log %74 : vector<256x1xf32>
    %76 = vector.broadcast %75 : vector<256x1xf32> to vector<256x128xf32>
    %77 = arith.subf %71, %76 : vector<256x128xf32>
    %cst_34 = arith.constant 0.000000e+00 : f32
    %78 = vector.broadcast %cst_34 : f32 to vector<256x128xf32>
    %79 = arith.select %65, %77, %78 : vector<256x128xi1>, vector<256x128xf32>
    %c0_35 = arith.constant 0 : index
    %c0_36 = arith.constant 0 : index
    %80 = vector.load %arg9[%c0_35, %c0_36] : memref<256x128xf32, #tpu.memory_space<vmem>>, vector<256x128xf32>
    tpu.vector_store %arg9[%c0_35, %c0_36], %79 {strides = array<i32>} : memref<256x128xf32, #tpu.memory_space<vmem>>, vector<256x128xf32>,
    return
  }
}

</mosaic_0001>

<bundles_post_ra>
// kernel: tpu_custom_call.1
= control target key start
LH: loop header
LB: loop body
LE: loop exit
PB: predicated region body
PF: predicated region fallthrough
CT: control target
= control target key end

     0   :  { %v9038_v2 = vmov 0   ;;  %vm1546_vm0 = vcmask 130048   ;;  %s14896_s0 = inlined_call_operand.vmem [shape: f32[256,784], index: 0, kind: input, shape index: {}]   ;;  %s14897_s1 = inlined_call_operand.vmem [shape: bf16[784,512], index: 1, kind: input, shape index: {}]   ;;  %s14898_s2 = inlined_call_operand.vmem [shape: f32[1,512], index: 2, kind: input, shape index: {}]   ;;  %s14899_s3 = inlined_call_operand.vmem [shape: f32[1,512], index: 3, kind: input, shape index: {}]   ;;  %s14900_s4 = inlined_call_operand.vmem [shape: bf16[512,384], index: 4, kind: input, shape index: {}]   ;;  %s14901_s5 = inlined_call_operand.vmem [shape: f32[1,384], index: 5, kind: input, shape index: {}]   ;;  %s14902_s6 = inlined_call_operand.vmem [shape: f32[1,384], index: 6, kind: input, shape index: {}]   ;;  %s14903_s7 = inlined_call_operand.vmem [shape: bf16[384,128], index: 7, kind: input, shape index: {}]   ;;  %s14904_s8 = inlined_call_operand.vmem [shape: f32[1,128], index: 8, kind: input, shape index: {}]   ;;  %s14905_s9 = inlined_call_operand.hbm [shape: f32[256,128], index: 9, kind: output, shape index: {}]  }
   0x1   :  { %v8424_v0 = vld [vmem:[%s14897_s1 + $0x4] ss:$16 sps:$4 sm:$0xff]   ;;  %2286 = vmatprep.mubr.bf16.mxu1 %v9038_v2  ;;  %v8428_v3 = vld [vmem:[%s14897_s1] ss:$16 sps:$4 sm:$0xff]   ;;  %v159_v7 = vld [vmem:[%s14896_s0 + $0x3e8] sm:$0xff] }
   0x2   :  { %v8426_v1 = vld [vmem:[%s14897_s1 + $0x604] ss:$16 sps:$4 sm:$0xff]   ;;  %1595 = vmatprep.subr.bf16.mxu0 %v8424_v0  ;;  %v8429_v4 = vld [vmem:[%s14897_s1 + $0x600] ss:$16 sps:$4 sm:$0xff]   ;;  %v8432_v9 = vld [vmem:[%s14897_s1 + $0x8] ss:$16 sps:$4 sm:$0xff]  }
   0x3   :  { %7969 = vmatprep.subr.bf16.mxu1 %v8426_v1  ;;  %v8430_v5 = vld [vmem:[%s14897_s1 + $0x24] ss:$16 sps:$4 sm:$0xff]   ;;  %1596 = vmatpush1.bf16.msra.mxu0 %v8428_v3  ;;  %v8434_v10 = vld [vmem:[%s14897_s1 + $0xc] ss:$16 sps:$4 sm:$0xff]   ;;  %v8435_v11 = vld [vmem:[%s14897_s1 + $0x20] ss:$16 sps:$4 sm:$0xff]  }
   0x4   :  { %v152_v6 = vld [vmem:[%s14896_s0 + $0x3b0] sm:$0xff]  ;;  %7970 = vmatpush1.bf16.msra.mxu1 %v8429_v4  ;;  %1597 = vmatprep.subr.bf16.mxu0 %v8430_v5  ;;  %v8438_v13 = vld [vmem:[%s14897_s1 + $0x28] ss:$16 sps:$4 sm:$0xff]   ;;  %v8440_v14 = vld [vmem:[%s14897_s1 + $0x2c] ss:$16 sps:$4 sm:$0xff]  }
   0x5   :  { %v9115_v8 = vpack.c.bf16 %v159_v7, %v152_v6  ;;  %v8436_v12 = vld [vmem:[%s14897_s1 + $0x44] ss:$16 sps:$4 sm:$0xff]   ;;  %2367 = vmatprep.subr.bf16.mxu1 %v8434_v10  ;;  %v8441_v15 = vld [vmem:[%s14897_s1 + $0x40] ss:$16 sps:$4 sm:$0xff]   ;;  %v173_v18 = vld [vmem:[%s14896_s0 + $0x458] sm:$0xff] }
   0x6   :  { %v8442_v16 = vld [vmem:[%s14897_s1 + $0x64] ss:$16 sps:$4 sm:$0xff]   ;;  %v8444_v20 = vld [vmem:[%s14897_s1 + $0x48] ss:$16 sps:$4 sm:$0xff]   ;;  %v8446_v21 = vld [vmem:[%s14897_s1 + $0x4c] ss:$16 sps:$4 sm:$0xff]  }
   0x7   :  { %7416 = vmatmul.mubr.msk.bf16.vlgmr.msra.gmra.mrb[0].mxu1 %vm1546_vm0, %v9115_v8  ;;  %1598 = vmatpush1.bf16.msra.mxu0 %v8435_v11  ;;  %v166_v17 = vld [vmem:[%s14896_s0 + $0x420] sm:$0xff]  ;;  %v8450_v24 = vld [vmem:[%s14897_s1 + $0x68] ss:$16 sps:$4 sm:$0xff]   ;;  %v8452_v25 = vld [vmem:[%s14897_s1 + $0x6c] ss:$16 sps:$4 sm:$0xff]  }
   0x8   :  { %2368 = vmatpush1.bf16.msra.mxu1 %v8432_v9  ;;  %1599 = vmatprep.subr.bf16.mxu0 %v8436_v12  ;;  %v9150_v19 = vpack.c.bf16 %v173_v18, %v166_v17  ;;  %v8447_v22 = vld [vmem:[%s14897_s1 + $0x60] ss:$16 sps:$4 sm:$0xff]   ;;  %v8448_v23 = vld [vmem:[%s14897_s1 + $0x84] ss:$16 sps:$4 sm:$0xff]   ;;  %v187_v28 = vld [vmem:[%s14896_s0 + $0x4c8] sm:$0xff] }
   0x9   :  { %2296 = vmatprep.mubr.bf16.mxu1 %v9038_v2  ;;  %2369 = vmatprep.subr.bf16.mxu1 %v8440_v14  ;;  %v8453_v26 = vld [vmem:[%s14897_s1 + $0x80] ss:$16 sps:$4 sm:$0xff]   ;;  %v8454_v29 = vld [vmem:[%s14897_s1 + $0xa4] ss:$16 sps:$4 sm:$0xff]   ;;  %v8458_v30 = vld [vmem:[%s14897_s1 + $0x8c] ss:$16 sps:$4 sm:$0xff]  }
   0xa   :  { %v180_v27 = vld [vmem:[%s14896_s0 + $0x490] sm:$0xff]  ;;  %v8456_v32 = vld [vmem:[%s14897_s1 + $0x88] ss:$16 sps:$4 sm:$0xff]   ;;  %v8464_v35 = vld [vmem:[%s14897_s1 + $0xac] ss:$16 sps:$4 sm:$0xff]  }
   0xb   :  { %1600 = vmatpush1.bf16.msra.mxu0 %v8441_v15  ;;  %v9188_v31 = vpack.c.bf16 %v187_v28, %v180_v27  ;;  %v8459_v33 = vld [vmem:[%s14897_s1 + $0xa0] ss:$16 sps:$4 sm:$0xff]   ;;  %v8460_v34 = vld [vmem:[%s14897_s1 + $0xc4] ss:$16 sps:$4 sm:$0xff]   ;;  %v8462_v36 = vld [vmem:[%s14897_s1 + $0xa8] ss:$16 sps:$4 sm:$0xff]  }
   0xc   :  { %2370 = vmatpush1.bf16.msra.mxu1 %v8438_v13  ;;  %1601 = vmatprep.subr.bf16.mxu0 %v8442_v16  ;;  %v8465_v37 = vld [vmem:[%s14897_s1 + $0xc0] ss:$16 sps:$4 sm:$0xff]   ;;  %v8466_v38 = vld [vmem:[%s14897_s1 + $0xe4] ss:$16 sps:$4 sm:$0xff]   ;;  %v201_v40 = vld [vmem:[%s14896_s0 + $0x538] sm:$0xff] }
   0xd   :  { %2371 = vmatprep.subr.bf16.mxu1 %v8446_v21  ;;  %v194_v39 = vld [vmem:[%s14896_s0 + $0x500] sm:$0xff]  ;;  %v8470_v41 = vld [vmem:[%s14897_s1 + $0xcc] ss:$16 sps:$4 sm:$0xff]   ;;  %v8468_v43 = vld [vmem:[%s14897_s1 + $0xc8] ss:$16 sps:$4 sm:$0xff]  }
   0xe   :  { %v9223_v42 = vpack.c.bf16 %v201_v40, %v194_v39  ;;  %v8471_v44 = vld [vmem:[%s14897_s1 + $0xe0] ss:$16 sps:$4 sm:$0xff]   ;;  %v8472_v45 = vld [vmem:[%s14897_s1 + $0x104] ss:$16 sps:$4 sm:$0xff]   ;;  %v8476_v46 = vld [vmem:[%s14897_s1 + $0xec] ss:$16 sps:$4 sm:$0xff]  }
   0xf   :  { %7417 = vmatmul.mubr.msk.bf16.gmra.mrb[4].mxu1 %vm1546_vm0, %v9150_v19  ;;  %1602 = vmatpush1.bf16.msra.mxu0 %v8447_v22  ;;  %v8474_v47 = vld [vmem:[%s14897_s1 + $0xe8] ss:$16 sps:$4 sm:$0xff]   ;;  %v8477_v48 = vld [vmem:[%s14897_s1 + $0x100] ss:$16 sps:$4 sm:$0xff]   ;;  %v8478_v51 = vld [vmem:[%s14897_s1 + $0x124] ss:$16 sps:$4 sm:$0xff]  }
  0x10   :  { %2372 = vmatpush1.bf16.msra.mxu1 %v8444_v20  ;;  %1603 = vmatprep.subr.bf16.mxu0 %v8448_v23  ;;  %v208_v49 = vld [vmem:[%s14896_s0 + $0x570] sm:$0xff]  ;;  %v215_v50 = vld [vmem:[%s14896_s0 + $0x5a8] sm:$0xff]  ;;  %v222_v60 = vld [vmem:[%s14896_s0 + $0x5e0] sm:$0xff] }
  0x11   :  { %2373 = vmatprep.subr.bf16.mxu1 %v8452_v25  ;;  %2306 = vmatprep.mubr.bf16.mxu1 %v9038_v2  ;;  %v8482_v52 = vld [vmem:[%s14897_s1 + $0x10c] ss:$16 sps:$4 sm:$0xff]   ;;  %v9258_v53 = vpack.c.bf16 %v215_v50, %v208_v49  ;;  %v8480_v54 = vld [vmem:[%s14897_s1 + $0x108] ss:$16 sps:$4 sm:$0xff]   ;;  %v8483_v55 = vld [vmem:[%s14897_s1 + $0x120] ss:$16 sps:$4 sm:$0xff]  }
  0x12   :  { %v8484_v56 = vld [vmem:[%s14897_s1 + $0x144] ss:$16 sps:$4 sm:$0xff]   ;;  %v8488_v57 = vld [vmem:[%s14897_s1 + $0x12c] ss:$16 sps:$4 sm:$0xff]   ;;  %v8486_v58 = vld [vmem:[%s14897_s1 + $0x128] ss:$16 sps:$4 sm:$0xff]  }
  0x13   :  { %1604 = vmatpush1.bf16.msra.mxu0 %v8453_v26  ;;  %v8489_v59 = vld [vmem:[%s14897_s1 + $0x140] ss:$16 sps:$4 sm:$0xff]   ;;  %v229_v61 = vld [vmem:[%s14896_s0 + $0x618] sm:$0xff]  ;;  %v8490_v62 = vld [vmem:[%s14897_s1 + $0x164] ss:$16 sps:$4 sm:$0xff]  }
  0x14   :  { %2374 = vmatpush1.bf16.msra.mxu1 %v8450_v24  ;;  %1605 = vmatprep.subr.bf16.mxu0 %v8454_v29  ;;  %v8494_v63 = vld [vmem:[%s14897_s1 + $0x14c] ss:$16 sps:$4 sm:$0xff]   ;;  %v9293_v0 = vpack.c.bf16 %v229_v61, %v222_v60  ;;  %v8492_v1 = vld [vmem:[%s14897_s1 + $0x148] ss:$16 sps:$4 sm:$0xff]   ;;  %v8495_v3 = vld [vmem:[%s14897_s1 + $0x160] ss:$16 sps:$4 sm:$0xff]  }
  0x15   :  { %2375 = vmatprep.subr.bf16.mxu1 %v8458_v30  ;;  %v8496_v4 = vld [vmem:[%s14897_s1 + $0x184] ss:$16 sps:$4 sm:$0xff]   ;;  %v8500_v5 = vld [vmem:[%s14897_s1 + $0x16c] ss:$16 sps:$4 sm:$0xff]   ;;  %v8498_v6 = vld [vmem:[%s14897_s1 + $0x168] ss:$16 sps:$4 sm:$0xff]  }
  0x16   :  { %v8501_v7 = vld [vmem:[%s14897_s1 + $0x180] ss:$16 sps:$4 sm:$0xff]   ;;  %v8502_v9 = vld [vmem:[%s14897_s1 + $0x1a4] ss:$16 sps:$4 sm:$0xff]   ;;  %v243_v11 = vld [vmem:[%s14896_s0 + $0x688] sm:$0xff] }
  0x17   :  { %7418 = vmatmul.mubr.msk.bf16.gmra.mrb[8].mxu1 %vm1546_vm0, %v9188_v31  ;;  %1606 = vmatpush1.bf16.msra.mxu0 %v8459_v33  ;;  %v236_v10 = vld [vmem:[%s14896_s0 + $0x650] sm:$0xff]  ;;  %v35_v12 = vld [vmem:[%s14896_s0 + $0x8] sm:$0xff]  ;;  %v42_v13 = vld [vmem:[%s14896_s0 + $0x40] sm:$0xff] }
  0x18   :  { %2376 = vmatpush1.bf16.msra.mxu1 %v8456_v32  ;;  %1607 = vmatprep.subr.bf16.mxu0 %v8460_v34  ;;  %v8506_v14 = vld [vmem:[%s14897_s1 + $0x18c] ss:$16 sps:$4 sm:$0xff]   ;;  %v259_v15 = vpack.c.bf16 %v42_v13, %v35_v12  ;;  %v9334_v16 = vpack.c.bf16 %v243_v11, %v236_v10  ;;  %v8504_v17 = vld [vmem:[%s14897_s1 + $0x188] ss:$16 sps:$4 sm:$0xff]   ;;  %v8507_v18 = vld [vmem:[%s14897_s1 + $0x1a0] ss:$16 sps:$4 sm:$0xff]  }
  0x19   :  { %2377 = vmatprep.subr.bf16.mxu1 %v8464_v35  ;;  %2316 = vmatprep.mubr.bf16.mxu1 %v9038_v2  ;;  %v8508_v20 = vld [vmem:[%s14897_s1 + $0x1c4] ss:$16 sps:$4 sm:$0xff]   ;;  %v8512_v21 = vld [vmem:[%s14897_s1 + $0x1ac] ss:$16 sps:$4 sm:$0xff]   ;;  %v8510_v22 = vld [vmem:[%s14897_s1 + $0x1a8] ss:$16 sps:$4 sm:$0xff]  }
  0x1a   :  { %1627 = vmatprep.mubr.bf16.mxu0 %v259_v15  ;;  %v8513_v23 = vld [vmem:[%s14897_s1 + $0x1c0] ss:$16 sps:$4 sm:$0xff]   ;;  %v257_v25 = vld [vmem:[%s14896_s0 + $0x6f8] sm:$0xff]  ;;  %v8514_v26 = vld [vmem:[%s14897_s1 + $0x1e4] ss:$16 sps:$4 sm:$0xff]  }
  0x1b   :  { %1608 = vmatpush1.bf16.msra.mxu0 %v8465_v37  ;;  %v250_v24 = vld [vmem:[%s14896_s0 + $0x6c0] sm:$0xff]  ;;  %v8518_v27 = vld [vmem:[%s14897_s1 + $0x1cc] ss:$16 sps:$4 sm:$0xff]   ;;  %v8516_v28 = vld [vmem:[%s14897_s1 + $0x1c8] ss:$16 sps:$4 sm:$0xff]  }
  0x1c   :  { %2378 = vmatpush1.bf16.msra.mxu1 %v8462_v36  ;;  %1609 = vmatprep.subr.bf16.mxu0 %v8466_v38  ;;  %v9372_v29 = vpack.c.bf16 %v257_v25, %v250_v24  ;;  %v8519_v30 = vld [vmem:[%s14897_s1 + $0x1e0] ss:$16 sps:$4 sm:$0xff]   ;;  %v41_v33 = vld [vmem:[%s14896_s0 + $0x38] sm:$0xff]  ;;  %v8537_v37 = vld [vmem:[%s14897_s1 + $0x204] ss:$16 sps:$4 sm:$0xff]  }
  0x1d   :  { %2379 = vmatprep.subr.bf16.mxu1 %v8470_v41  ;;  %v34_v32 = vld [vmem:[%s14896_s0] sm:$0xff]  ;;  %v8522_v34 = vld [vmem:[%s14897_s1 + $0x1ec] ss:$16 sps:$4 sm:$0xff]   ;;  %v56_v36 = vld [vmem:[%s14896_s0 + $0xb0] sm:$0xff] }
  0x1e   :  { %v49_v35 = vld [vmem:[%s14896_s0 + $0x78] sm:$0xff]  ;;  %v258_v38 = vpack.c.bf16 %v41_v33, %v34_v32  ;;  %v63_v49 = vld [vmem:[%s14896_s0 + $0xe8] sm:$0xff]  ;;  %v70_v50 = vld [vmem:[%s14896_s0 + $0x120] sm:$0xff] }
  0x1f   :  { %7419 = vmatmul.mubr.msk.bf16.gmra.mrb[12].mxu1 %vm1546_vm0, %v9223_v42  ;;  %1610 = vmatpush1.bf16.msra.mxu0 %v8471_v44  ;;  %v8520_v39 = vld [vmem:[%s14897_s1 + $0x1e8] ss:$16 sps:$4 sm:$0xff]   ;;  %v8525_v40 = vld [vmem:[%s14897_s1 + $0x20c] ss:$16 sps:$4 sm:$0xff]   ;;  %v266_v41 = vpack.c.bf16 %v56_v36, %v49_v35  ;;  %v8555_v60 = vld [vmem:[%s14897_s1 + $0x264] ss:$16 sps:$4 sm:$0xff]  }
  0x20   :  { %2380 = vmatpush1.bf16.msra.mxu1 %v8468_v43  ;;  %1611 = vmatprep.subr.bf16.mxu0 %v8472_v45  ;;  %v8535_v43 = vld [vmem:[%s14897_s1 + $0x200] ss:$16 sps:$4 sm:$0xff]   ;;  %v8523_v44 = vld [vmem:[%s14897_s1 + $0x208] ss:$16 sps:$4 sm:$0xff]   ;;  %v8543_v45 = vld [vmem:[%s14897_s1 + $0x224] ss:$16 sps:$4 sm:$0xff]  }
  0x21   :  { %2381 = vmatprep.subr.bf16.mxu1 %v8476_v46  ;;  %2326 = vmatprep.mubr.bf16.mxu1 %v9038_v2  ;;  %v48_v46 = vld [vmem:[%s14896_s0 + $0x70] sm:$0xff]  ;;  %v69_v61 = vld [vmem:[%s14896_s0 + $0x118] sm:$0xff] }
  0x22   :  { %v8540_v10 = vld [vmem:[%s14897_s1 + $0x28c] ss:$16 sps:$4 sm:$0xff]   ;;  %v8559_v11 = vld [vmem:[%s14897_s1 + $0x280] ss:$16 sps:$4 sm:$0xff]   ;;  %v8567_v13 = vld [vmem:[%s14897_s1 + $0x2a4] ss:$16 sps:$4 sm:$0xff]  }
  0x23   :  { %1612 = vmatpush1.bf16.msra.mxu0 %v8477_v48  ;;  %v8528_v48 = vld [vmem:[%s14897_s1 + $0x22c] ss:$16 sps:$4 sm:$0xff]   ;;  %v76_v12 = vld [vmem:[%s14896_s0 + $0x150] sm:$0xff]  ;;  %v8544_v25 = vld [vmem:[%s14897_s1 + $0x2a8] ss:$16 sps:$4 sm:$0xff]  }
  0x24   :  { %2382 = vmatpush1.bf16.msra.mxu1 %v8474_v47  ;;  %1613 = vmatprep.subr.bf16.mxu0 %v8478_v51  ;;  %v55_v47 = vld [vmem:[%s14896_s0 + $0xa8] sm:$0xff]  ;;  %v8541_v51 = vld [vmem:[%s14897_s1 + $0x220] ss:$16 sps:$4 sm:$0xff]   ;;  %v97_v32 = vld [vmem:[%s14896_s0 + $0x1f8] sm:$0xff] }
  0x25   :  { %2383 = vmatprep.subr.bf16.mxu1 %v8482_v52  ;;  %v8549_v52 = vld [vmem:[%s14897_s1 + $0x244] ss:$16 sps:$4 sm:$0xff]   ;;  %v105_v33 = vld [vmem:[%s14896_s0 + $0x238] sm:$0xff] }
  0x26   :  { %v8550_v35 = vld [vmem:[%s14897_s1 + $0x2c8] ss:$16 sps:$4 sm:$0xff]   ;;  %v8558_v36 = vld [vmem:[%s14897_s1 + $0x2ec] ss:$16 sps:$4 sm:$0xff]  }
  0x27   :  { %7420 = vmatmul.mubr.msk.bf16.gmra.mrb[16].mxu1 %vm1546_vm0, %v9258_v53  ;;  %1614 = vmatpush1.bf16.msra.mxu0 %v8483_v55  ;;  %v8526_v55 = vld [vmem:[%s14897_s1 + $0x228] ss:$16 sps:$4 sm:$0xff]  }
  0x28   :  { %2384 = vmatpush1.bf16.msra.mxu1 %v8480_v54  ;;  %1615 = vmatprep.subr.bf16.mxu0 %v8484_v56  ;;  %v265_v54 = vpack.c.bf16 %v55_v47, %v48_v46  ;;  %v273_v56 = vpack.c.bf16 %v70_v50, %v63_v49  ;;  %v111_v46 = vld [vmem:[%s14896_s0 + $0x268] sm:$0xff]  ;;  %v8588_v47 = vld [vmem:[%s14897_s1 + $0x324] ss:$16 sps:$4 sm:$0xff]  }
  0x29   :  { %2385 = vmatprep.subr.bf16.mxu1 %v8488_v57  ;;  %2336 = vmatprep.mubr.bf16.mxu1 %v9038_v2  ;;  %v8531_v57 = vld [vmem:[%s14897_s1 + $0x24c] ss:$16 sps:$4 sm:$0xff]   ;;  %v126_v49 = vld [vmem:[%s14896_s0 + $0x2e0] sm:$0xff]  ;;  %v8562_v50 = vld [vmem:[%s14897_s1 + $0x308] ss:$16 sps:$4 sm:$0xff]  }
  0x2b   :  { %1616 = vmatpush1.bf16.msra.mxu0 %v8489_v59  ;;  %v62_v59 = vld [vmem:[%s14896_s0 + $0xe0] sm:$0xff] }
  0x2c   :  { %2386 = vmatpush1.bf16.msra.mxu1 %v8486_v58  ;;  %1617 = vmatprep.subr.bf16.mxu0 %v8490_v62  ;;  %v8547_v58 = vld [vmem:[%s14897_s1 + $0x240] ss:$16 sps:$4 sm:$0xff]   ;;  %v8529_v62 = vld [vmem:[%s14897_s1 + $0x248] ss:$16 sps:$4 sm:$0xff]  }
  0x2d   :  { %2387 = vmatprep.subr.bf16.mxu1 %v8494_v63  ;;  %v77_v63 = vld [vmem:[%s14896_s0 + $0x158] sm:$0xff] }
  0x2f   :  { %7421 = vmatmul.mubr.msk.bf16.gmra.mrb[20].mxu1 %vm1546_vm0, %v9293_v0  ;;  %1618 = vmatpush1.bf16.msra.mxu0 %v8495_v3  ;;  %v8534_v3 = vld [vmem:[%s14897_s1 + $0x26c] ss:$16 sps:$4 sm:$0xff]  }
  0x30   :  { %2388 = vmatpush1.bf16.msra.mxu1 %v8492_v1  ;;  %1619 = vmatprep.subr.bf16.mxu0 %v8496_v4  ;;  %v84_v1 = vld [vmem:[%s14896_s0 + $0x190] sm:$0xff] }
  0x31   :  { %2389 = vmatprep.subr.bf16.mxu1 %v8500_v5  ;;  %2346 = vmatprep.mubr.bf16.mxu1 %v9038_v2  ;;  %v8553_v4 = vld [vmem:[%s14897_s1 + $0x260] ss:$16 sps:$4 sm:$0xff]   ;;  %v8561_v5 = vld [vmem:[%s14897_s1 + $0x284] ss:$16 sps:$4 sm:$0xff]  }
  0x33   :  { %1620 = vmatpush1.bf16.msra.mxu0 %v8501_v7  ;;  %v280_v7 = vpack.c.bf16 %v84_v1, %v77_v63  ;;  %v133_v63 = vld [vmem:[%s14896_s0 + $0x318] sm:$0xff]  ;;  %v140_v1 = vld [vmem:[%s14896_s0 + $0x350] sm:$0xff] }
  0x34   :  { %2390 = vmatpush1.bf16.msra.mxu1 %v8498_v6  ;;  %1621 = vmatprep.subr.bf16.mxu0 %v8502_v9  ;;  %v272_v6 = vpack.c.bf16 %v69_v61, %v62_v59  ;;  %v8532_v9 = vld [vmem:[%s14897_s1 + $0x268] ss:$16 sps:$4 sm:$0xff]   ;;  %v8592_v59 = vld [vmem:[%s14897_s1 + $0x340] ss:$16 sps:$4 sm:$0xff]   ;;  %v8597_v61 = vld [vmem:[%s14897_s1 + $0x364] ss:$16 sps:$4 sm:$0xff]  }
  0x35   :  { %2391 = vmatprep.subr.bf16.mxu1 %v8506_v14  ;;  %v83_v14 = vld [vmem:[%s14896_s0 + $0x188] sm:$0xff] }
  0x37   :  { %7422 = vmatmul.mubr.msk.bf16.gmra.mrb[24].mxu1 %vm1546_vm0, %v9334_v16  ;;  %1622 = vmatpush1.bf16.msra.mxu0 %v8507_v18  ;;  %v8538_v18 = vld [vmem:[%s14897_s1 + $0x288] ss:$16 sps:$4 sm:$0xff]  }
  0x38   :  { %2392 = vmatpush1.bf16.msra.mxu1 %v8504_v17  ;;  %1623 = vmatprep.subr.bf16.mxu0 %v8508_v20  ;;  %v98_v17 = vld [vmem:[%s14896_s0 + $0x200] sm:$0xff]  ;;  %v8546_v20 = vld [vmem:[%s14897_s1 + $0x2ac] ss:$16 sps:$4 sm:$0xff]  }
  0x39   :  { %2393 = vmatprep.subr.bf16.mxu1 %v8512_v21  ;;  %2356 = vmatprep.mubr.bf16.mxu1 %v9038_v2  ;;  %v8565_v21 = vld [vmem:[%s14897_s1 + $0x2a0] ss:$16 sps:$4 sm:$0xff]  }
  0x3b   :  { %1624 = vmatpush1.bf16.msra.mxu0 %v8513_v23  ;;  %v279_v23 = vpack.c.bf16 %v83_v14, %v76_v12  ;;  %v8601_v12 = vld [vmem:[%s14897_s1 + $0x380] ss:$16 sps:$4 sm:$0xff]   ;;  %v8606_v14 = vld [vmem:[%s14897_s1 + $0x3a4] ss:$16 sps:$4 sm:$0xff]  }
  0x3c   :  { %2394 = vmatpush1.bf16.msra.mxu1 %v8510_v22  ;;  %1625 = vmatprep.subr.bf16.mxu0 %v8514_v26  ;;  %v8573_v22 = vld [vmem:[%s14897_s1 + $0x2c4] ss:$16 sps:$4 sm:$0xff]   ;;  %v8552_v26 = vld [vmem:[%s14897_s1 + $0x2cc] ss:$16 sps:$4 sm:$0xff]  }
  0x3d   :  { %2395 = vmatprep.subr.bf16.mxu1 %v8518_v27  ;;  %v8571_v27 = vld [vmem:[%s14897_s1 + $0x2c0] ss:$16 sps:$4 sm:$0xff]  }
  0x3f   :  { %7423 = vmatmul.mubr.msk.bf16.gmra.mrb[28].mxu1 %vm1546_vm0, %v9372_v29  ;;  %1626 = vmatpush1.bf16.msra.mxu0 %v8519_v30  ;;  %v8579_v30 = vld [vmem:[%s14897_s1 + $0x2e4] ss:$16 sps:$4 sm:$0xff]  }
  0x40   :  { %2396 = vmatpush1.bf16.msra.mxu1 %v8516_v28  ;;  %2399 = vmatprep.mubr.bf16.mxu1 %v259_v15  ;;  %v91_v15 = vld [vmem:[%s14896_s0 + $0x1c8] sm:$0xff]  ;;  %v90_v28 = vld [vmem:[%s14896_s0 + $0x1c0] sm:$0xff] }
  0x41   :  { %2397 = vmatprep.subr.bf16.mxu1 %v8522_v34  ;;  %1788 = vmatprep.subr.bf16.mxu0 %v8537_v37  ;;  %v287_v24 = vpack.c.bf16 %v98_v17, %v91_v15  ;;  %v112_v34 = vld [vmem:[%s14896_s0 + $0x270] sm:$0xff]  ;;  %v139_v15 = vld [vmem:[%s14896_s0 + $0x348] sm:$0xff] }
  0x42   :  { %1628 = vmatmul.mubr.bf16.vlgmr.msra.gmra.mrb[0].mxu0 %v258_v38  ;;  %v8577_v37 = vld [vmem:[%s14897_s1 + $0x2e0] ss:$16 sps:$4 sm:$0xff]   ;;  %v147_v17 = vld [vmem:[%s14896_s0 + $0x388] sm:$0xff] }
  0x43   :  { %1637 = vmatprep.mubr.bf16.mxu0 %v266_v41  ;;  %1789 = vmatpush1.bf16.msra.mxu0 %v8535_v43  ;;  %v8564_v43 = vld [vmem:[%s14897_s1 + $0x30c] ss:$16 sps:$4 sm:$0xff]  }
  0x44   :  { %2398 = vmatpush1.bf16.msra.mxu1 %v8520_v39  ;;  %1790 = vmatprep.subr.bf16.mxu0 %v8543_v45  ;;  %v286_v39 = vpack.c.bf16 %v97_v32, %v90_v28  ;;  %v104_v45 = vld [vmem:[%s14896_s0 + $0x230] sm:$0xff] }
  0x45   :  { %2560 = vmatprep.subr.bf16.mxu1 %v8525_v40  ;;  %v294_v40 = vpack.c.bf16 %v112_v34, %v105_v33  ;;  %v8610_v28 = vld [vmem:[%s14897_s1 + $0x3c0] ss:$16 sps:$4 sm:$0xff]   ;;  %v8615_v32 = vld [vmem:[%s14897_s1 + $0x3e4] ss:$16 sps:$4 sm:$0xff]   ;;  %v153_v33 = vld [vmem:[%s14896_s0 + $0x3b8] sm:$0xff] }
  0x46   :  { %v161_v34 = vld [vmem:[%s14896_s0 + $0x3f8] sm:$0xff] }
  0x47   :  { %2400 = vmatmul.mubr.bf16.vlgmr.msra.gmra.mrb[32].mxu1 %v258_v38  ;;  %1791 = vmatpush1.bf16.msra.mxu0 %v8541_v51  ;;  %v8585_v38 = vld [vmem:[%s14897_s1 + $0x304] ss:$16 sps:$4 sm:$0xff]   ;;  %v8570_v51 = vld [vmem:[%s14897_s1 + $0x32c] ss:$16 sps:$4 sm:$0xff]  }
  0x48   :  { %2561 = vmatpush1.bf16.msra.mxu1 %v8523_v44  ;;  %2409 = vmatprep.mubr.bf16.mxu1 %v266_v41  ;;  %v8556_v41 = vld [vmem:[%s14897_s1 + $0x2e8] ss:$16 sps:$4 sm:$0xff]   ;;  %v8583_v44 = vld [vmem:[%s14897_s1 + $0x300] ss:$16 sps:$4 sm:$0xff]  }
  0x49   :  { %2562 = vmatprep.subr.bf16.mxu1 %v8528_v48  ;;  %1792 = vmatprep.subr.bf16.mxu0 %v8549_v52  ;;  %v119_v48 = vld [vmem:[%s14896_s0 + $0x2a8] sm:$0xff]  ;;  %v8586_v52 = vld [vmem:[%s14897_s1 + $0x320] ss:$16 sps:$4 sm:$0xff]  }
  0x4a   :  { %1638 = vmatmul.mubr.bf16.gmra.mrb[4].mxu0 %v265_v54 }
  0x4b   :  { %1647 = vmatprep.mubr.bf16.mxu0 %v273_v56  ;;  %1793 = vmatpush1.bf16.msra.mxu0 %v8547_v58  ;;  %v8576_v58 = vld [vmem:[%s14897_s1 + $0x34c] ss:$16 sps:$4 sm:$0xff]  }
  0x4c   :  { %2563 = vmatpush1.bf16.msra.mxu1 %v8526_v55  ;;  %1794 = vmatprep.subr.bf16.mxu0 %v8555_v60  ;;  %v293_v55 = vpack.c.bf16 %v111_v46, %v104_v45  ;;  %v118_v60 = vld [vmem:[%s14896_s0 + $0x2a0] sm:$0xff]  ;;  %v160_v45 = vld [vmem:[%s14896_s0 + $0x3f0] sm:$0xff]  ;;  %v167_v46 = vld [vmem:[%s14896_s0 + $0x428] sm:$0xff] }
  0x4d   :  { %2564 = vmatprep.subr.bf16.mxu1 %v8531_v57  ;;  %v301_v57 = vpack.c.bf16 %v126_v49, %v119_v48  ;;  %v182_v48 = vld [vmem:[%s14896_s0 + $0x4a0] sm:$0xff]  ;;  %v321_v49 = vpack.c.bf16 %v167_v46, %v160_v45  ;;  %v72_v45 = vld [vmem:[%s14896_s0 + $0x130] sm:$0xff] }
  0x4e   :  { %v8637_v46 = vld [vmem:[%s14897_s1 + $0x420] ss:$16 sps:$4 sm:$0xff]  }
  0x4f   :  { %2410 = vmatmul.mubr.bf16.gmra.mrb[36].mxu1 %v265_v54  ;;  %1795 = vmatpush1.bf16.msra.mxu0 %v8553_v4  ;;  %v8594_v54 = vld [vmem:[%s14897_s1 + $0x344] ss:$16 sps:$4 sm:$0xff]   ;;  %v8582_v4 = vld [vmem:[%s14897_s1 + $0x36c] ss:$16 sps:$4 sm:$0xff]  }
  0x50   :  { %2419 = vmatprep.mubr.bf16.mxu1 %v273_v56  ;;  %2565 = vmatpush1.bf16.msra.mxu1 %v8529_v62  ;;  %v8568_v56 = vld [vmem:[%s14897_s1 + $0x328] ss:$16 sps:$4 sm:$0xff]  }
  0x51   :  { %2566 = vmatprep.subr.bf16.mxu1 %v8534_v3  ;;  %1796 = vmatprep.subr.bf16.mxu0 %v8561_v5  ;;  %v125_v62 = vld [vmem:[%s14896_s0 + $0x2d8] sm:$0xff]  ;;  %v8595_v5 = vld [vmem:[%s14897_s1 + $0x360] ss:$16 sps:$4 sm:$0xff]  }
  0x52   :  { %1648 = vmatmul.mubr.bf16.gmra.mrb[8].mxu0 %v272_v6  ;;  %v8574_v3 = vld [vmem:[%s14897_s1 + $0x348] ss:$16 sps:$4 sm:$0xff]  }
  0x53   :  { %1657 = vmatprep.mubr.bf16.mxu0 %v280_v7  ;;  %1797 = vmatpush1.bf16.msra.mxu0 %v8559_v11  ;;  %v8591_v11 = vld [vmem:[%s14897_s1 + $0x38c] ss:$16 sps:$4 sm:$0xff]  }
  0x54   :  { %2567 = vmatpush1.bf16.msra.mxu1 %v8532_v9  ;;  %1798 = vmatprep.subr.bf16.mxu0 %v8567_v13  ;;  %v308_v9 = vpack.c.bf16 %v140_v1, %v133_v63  ;;  %v132_v13 = vld [vmem:[%s14896_s0 + $0x310] sm:$0xff]  ;;  %v202_v1 = vld [vmem:[%s14896_s0 + $0x540] sm:$0xff] }
  0x55   :  { %2568 = vmatprep.subr.bf16.mxu1 %v8540_v10  ;;  %v8580_v10 = vld [vmem:[%s14897_s1 + $0x368] ss:$16 sps:$4 sm:$0xff]  }
  0x57   :  { %2420 = vmatmul.mubr.bf16.gmra.mrb[40].mxu1 %v272_v6  ;;  %1799 = vmatpush1.bf16.msra.mxu0 %v8565_v21  ;;  %v8603_v6 = vld [vmem:[%s14897_s1 + $0x384] ss:$16 sps:$4 sm:$0xff]   ;;  %v8600_v21 = vld [vmem:[%s14897_s1 + $0x3ac] ss:$16 sps:$4 sm:$0xff]  }
  0x58   :  { %2429 = vmatprep.mubr.bf16.mxu1 %v280_v7  ;;  %2569 = vmatpush1.bf16.msra.mxu1 %v8538_v18  ;;  %v300_v7 = vpack.c.bf16 %v125_v62, %v118_v60  ;;  %v154_v18 = vld [vmem:[%s14896_s0 + $0x3c0] sm:$0xff]  ;;  %v203_v60 = vld [vmem:[%s14896_s0 + $0x548] sm:$0xff] }
  0x59   :  { %2570 = vmatprep.subr.bf16.mxu1 %v8546_v20  ;;  %1800 = vmatprep.subr.bf16.mxu0 %v8573_v22  ;;  %v8589_v20 = vld [vmem:[%s14897_s1 + $0x388] ss:$16 sps:$4 sm:$0xff]   ;;  %v8604_v22 = vld [vmem:[%s14897_s1 + $0x3a0] ss:$16 sps:$4 sm:$0xff]  }
  0x5a   :  { %1658 = vmatmul.mubr.bf16.gmra.mrb[12].mxu0 %v279_v23 }
  0x5b   :  { %1667 = vmatprep.mubr.bf16.mxu0 %v287_v24  ;;  %1801 = vmatpush1.bf16.msra.mxu0 %v8571_v27  ;;  %v8609_v27 = vld [vmem:[%s14897_s1 + $0x3cc] ss:$16 sps:$4 sm:$0xff]  }
  0x5c   :  { %2571 = vmatpush1.bf16.msra.mxu1 %v8544_v25  ;;  %1802 = vmatprep.subr.bf16.mxu0 %v8579_v30  ;;  %v315_v25 = vpack.c.bf16 %v154_v18, %v147_v17  ;;  %v146_v30 = vld [vmem:[%s14896_s0 + $0x380] sm:$0xff]  ;;  %v237_v17 = vld [vmem:[%s14896_s0 + $0x658] sm:$0xff] }
  0x5d   :  { %2572 = vmatprep.subr.bf16.mxu1 %v8552_v26  ;;  %v8598_v26 = vld [vmem:[%s14897_s1 + $0x3a8] ss:$16 sps:$4 sm:$0xff]  }
  0x5e   :  { %v245_v18 = vld [vmem:[%s14896_s0 + $0x698] sm:$0xff] }
  0x5f   :  { %2430 = vmatmul.mubr.bf16.gmra.mrb[44].mxu1 %v279_v23  ;;  %1803 = vmatpush1.bf16.msra.mxu0 %v8577_v37  ;;  %v8612_v23 = vld [vmem:[%s14897_s1 + $0x3c4] ss:$16 sps:$4 sm:$0xff]   ;;  %v8613_v37 = vld [vmem:[%s14897_s1 + $0x3e0] ss:$16 sps:$4 sm:$0xff]  }
  0x60   :  { %2439 = vmatprep.mubr.bf16.mxu1 %v287_v24  ;;  %2573 = vmatpush1.bf16.msra.mxu1 %v8550_v35  ;;  %v307_v24 = vpack.c.bf16 %v139_v15, %v132_v13  ;;  %v168_v35 = vld [vmem:[%s14896_s0 + $0x430] sm:$0xff]  ;;  %v230_v15 = vld [vmem:[%s14896_s0 + $0x620] sm:$0xff] }
  0x61   :  { %2574 = vmatprep.subr.bf16.mxu1 %v8558_v36  ;;  %1804 = vmatprep.subr.bf16.mxu0 %v8585_v38  ;;  %v8607_v36 = vld [vmem:[%s14897_s1 + $0x3c8] ss:$16 sps:$4 sm:$0xff]   ;;  %v8618_v38 = vld [vmem:[%s14897_s1 + $0x3ec] ss:$16 sps:$4 sm:$0xff]  }
  0x62   :  { %1668 = vmatmul.mubr.bf16.gmra.mrb[16].mxu0 %v286_v39 }
  0x63   :  { %1677 = vmatprep.mubr.bf16.mxu0 %v294_v40  ;;  %1805 = vmatpush1.bf16.msra.mxu0 %v8583_v44  ;;  %v8621_v44 = vld [vmem:[%s14897_s1 + $0x40c] ss:$16 sps:$4 sm:$0xff]  }
  0x64   :  { %2575 = vmatpush1.bf16.msra.mxu1 %v8556_v41  ;;  %1806 = vmatprep.subr.bf16.mxu0 %v8588_v47  ;;  %v322_v41 = vpack.c.bf16 %v168_v35, %v161_v34  ;;  %v175_v47 = vld [vmem:[%s14896_s0 + $0x468] sm:$0xff]  ;;  %v58_v34 = vld [vmem:[%s14896_s0 + $0xc0] sm:$0xff] }
  0x65   :  { %2576 = vmatprep.subr.bf16.mxu1 %v8564_v43  ;;  %v8616_v43 = vld [vmem:[%s14897_s1 + $0x3e8] ss:$16 sps:$4 sm:$0xff]  }
  0x67   :  { %2440 = vmatmul.mubr.bf16.gmra.mrb[48].mxu1 %v286_v39  ;;  %1807 = vmatpush1.bf16.msra.mxu0 %v8586_v52  ;;  %v8633_v39 = vld [vmem:[%s14897_s1 + $0x404] ss:$16 sps:$4 sm:$0xff]   ;;  %v181_v52 = vld [vmem:[%s14896_s0 + $0x498] sm:$0xff] }
  0x68   :  { %2449 = vmatprep.mubr.bf16.mxu1 %v294_v40  ;;  %2577 = vmatpush1.bf16.msra.mxu1 %v8562_v50  ;;  %v314_v40 = vpack.c.bf16 %v153_v33, %v146_v30  ;;  %v329_v50 = vpack.c.bf16 %v182_v48, %v175_v47  ;;  %v36_v30 = vld [vmem:[%s14896_s0 + $0x10] sm:$0xff]  ;;  %v51_v33 = vld [vmem:[%s14896_s0 + $0x88] sm:$0xff] }
  0x69   :  { %2578 = vmatprep.subr.bf16.mxu1 %v8570_v51  ;;  %1808 = vmatprep.subr.bf16.mxu0 %v8594_v54  ;;  %v174_v51 = vld [vmem:[%s14896_s0 + $0x460] sm:$0xff]  ;;  %v189_v54 = vld [vmem:[%s14896_s0 + $0x4d8] sm:$0xff] }
  0x6a   :  { %1678 = vmatmul.mubr.bf16.gmra.mrb[20].mxu0 %v293_v55  ;;  %v8645_v47 = vld [vmem:[%s14897_s1 + $0x444] ss:$16 sps:$4 sm:$0xff]  }
  0x6b   :  { %1687 = vmatprep.mubr.bf16.mxu0 %v301_v57  ;;  %1809 = vmatpush1.bf16.msra.mxu0 %v8592_v59  ;;  %v195_v59 = vld [vmem:[%s14896_s0 + $0x508] sm:$0xff] }
  0x6c   :  { %2579 = vmatpush1.bf16.msra.mxu1 %v8568_v56  ;;  %1810 = vmatprep.subr.bf16.mxu0 %v8597_v61  ;;  %v328_v56 = vpack.c.bf16 %v181_v52, %v174_v51  ;;  %v210_v61 = vld [vmem:[%s14896_s0 + $0x580] sm:$0xff]  ;;  %v8627_v51 = vld [vmem:[%s14897_s1 + $0x44c] ss:$16 sps:$4 sm:$0xff]  }
  0x6d   :  { %2580 = vmatprep.subr.bf16.mxu1 %v8576_v58  ;;  %v188_v58 = vld [vmem:[%s14896_s0 + $0x4d0] sm:$0xff]  ;;  %v343_v63 = vpack.c.bf16 %v210_v61, %v203_v60  ;;  %v8630_v60 = vld [vmem:[%s14897_s1 + $0x46c] ss:$16 sps:$4 sm:$0xff]  }
  0x6e   :  { %v335_v62 = vpack.c.bf16 %v195_v59, %v188_v58  ;;  %v8643_v52 = vld [vmem:[%s14897_s1 + $0x440] ss:$16 sps:$4 sm:$0xff]   ;;  %v79_v58 = vld [vmem:[%s14896_s0 + $0x168] sm:$0xff] }
  0x6f   :  { %2450 = vmatmul.mubr.bf16.gmra.mrb[52].mxu1 %v293_v55  ;;  %1811 = vmatpush1.bf16.msra.mxu0 %v8595_v5  ;;  %v196_v55 = vld [vmem:[%s14896_s0 + $0x510] sm:$0xff]  ;;  %v86_v59 = vld [vmem:[%s14896_s0 + $0x1a0] sm:$0xff] }
  0x70   :  { %2459 = vmatprep.mubr.bf16.mxu1 %v301_v57  ;;  %2581 = vmatpush1.bf16.msra.mxu1 %v8574_v3  ;;  %v336_v57 = vpack.c.bf16 %v196_v55, %v189_v54  ;;  %v209_v3 = vld [vmem:[%s14896_s0 + $0x578] sm:$0xff]  ;;  %v224_v5 = vld [vmem:[%s14896_s0 + $0x5f0] sm:$0xff] }
  0x71   :  { %2582 = vmatprep.subr.bf16.mxu1 %v8582_v4  ;;  %1812 = vmatprep.subr.bf16.mxu0 %v8603_v6  ;;  %v217_v4 = vld [vmem:[%s14896_s0 + $0x5b8] sm:$0xff]  ;;  %v342_v6 = vpack.c.bf16 %v209_v3, %v202_v1  ;;  %v8651_v54 = vld [vmem:[%s14897_s1 + $0x464] ss:$16 sps:$4 sm:$0xff]   ;;  %v8649_v61 = vld [vmem:[%s14897_s1 + $0x460] ss:$16 sps:$4 sm:$0xff]  }
  0x72   :  { %1688 = vmatmul.mubr.bf16.gmra.mrb[24].mxu0 %v300_v7  ;;  %v64_v55 = vld [vmem:[%s14896_s0 + $0xf0] sm:$0xff]  ;;  %v8628_v1 = vld [vmem:[%s14897_s1 + $0x468] ss:$16 sps:$4 sm:$0xff]   ;;  %v8636_v3 = vld [vmem:[%s14897_s1 + $0x48c] ss:$16 sps:$4 sm:$0xff]  }
  0x73   :  { %1697 = vmatprep.mubr.bf16.mxu0 %v308_v9  ;;  %1813 = vmatpush1.bf16.msra.mxu0 %v8601_v12  ;;  %v238_v12 = vld [vmem:[%s14896_s0 + $0x660] sm:$0xff] }
  0x74   :  { %2583 = vmatpush1.bf16.msra.mxu1 %v8580_v10  ;;  %1814 = vmatprep.subr.bf16.mxu0 %v8606_v14  ;;  %v223_v10 = vld [vmem:[%s14896_s0 + $0x5e8] sm:$0xff] }
  0x75   :  { %2584 = vmatprep.subr.bf16.mxu1 %v8591_v11  ;;  %v231_v11 = vld [vmem:[%s14896_s0 + $0x628] sm:$0xff] }
  0x76   :  { %v357_v14 = vpack.c.bf16 %v238_v12, %v231_v11  ;;  %v93_v11 = vld [vmem:[%s14896_s0 + $0x1d8] sm:$0xff]  ;;  %v100_v12 = vld [vmem:[%s14896_s0 + $0x210] sm:$0xff] }
  0x77   :  { %2460 = vmatmul.mubr.bf16.gmra.mrb[56].mxu1 %v300_v7  ;;  %1815 = vmatpush1.bf16.msra.mxu0 %v8604_v22  ;;  %v350_v7 = vpack.c.bf16 %v224_v5, %v217_v4  ;;  %v8655_v4 = vld [vmem:[%s14897_s1 + $0x480] ss:$16 sps:$4 sm:$0xff]   ;;  %v282_v5 = vpack.c.bf16 %v86_v59, %v79_v58  ;;  %v8664_v59 = vld [vmem:[%s14897_s1 + $0x528] ss:$16 sps:$4 sm:$0xff]  }
  0x78   :  { %2469 = vmatprep.mubr.bf16.mxu1 %v308_v9  ;;  %2585 = vmatpush1.bf16.msra.mxu1 %v8589_v20  ;;  %v216_v9 = vld [vmem:[%s14896_s0 + $0x5b0] sm:$0xff] }
  0x79   :  { %2586 = vmatprep.subr.bf16.mxu1 %v8600_v21  ;;  %1816 = vmatprep.subr.bf16.mxu0 %v8612_v23  ;;  %v349_v13 = vpack.c.bf16 %v223_v10, %v216_v9  ;;  %v252_v20 = vld [vmem:[%s14896_s0 + $0x6d0] sm:$0xff]  ;;  %v356_v21 = vpack.c.bf16 %v237_v17, %v230_v15  ;;  %v85_v9 = vld [vmem:[%s14896_s0 + $0x198] sm:$0xff] }
  0x7a   :  { %1698 = vmatmul.mubr.bf16.gmra.mrb[28].mxu0 %v307_v24  ;;  %v364_v22 = vpack.c.bf16 %v252_v20, %v245_v18  ;;  %v244_v23 = vld [vmem:[%s14896_s0 + $0x690] sm:$0xff]  ;;  %v8634_v10 = vld [vmem:[%s14897_s1 + $0x488] ss:$16 sps:$4 sm:$0xff]   ;;  %v8648_v20 = vld [vmem:[%s14897_s1 + $0x4cc] ss:$16 sps:$4 sm:$0xff]  }
  0x7b   :  { %1707 = vmatprep.mubr.bf16.mxu0 %v315_v25  ;;  %1817 = vmatpush1.bf16.msra.mxu0 %v8610_v28  ;;  %v8669_v15 = vld [vmem:[%s14897_s1 + $0x4c4] ss:$16 sps:$4 sm:$0xff]   ;;  %v8640_v18 = vld [vmem:[%s14897_s1 + $0x4a8] ss:$16 sps:$4 sm:$0xff]  }
  0x7c   :  { %2587 = vmatpush1.bf16.msra.mxu1 %v8598_v26  ;;  %1818 = vmatprep.subr.bf16.mxu0 %v8615_v32  ;;  %v44_v26 = vld [vmem:[%s14896_s0 + $0x50] sm:$0xff]  ;;  %v43_v32 = vld [vmem:[%s14896_s0 + $0x48] sm:$0xff] }
  0x7d   :  { %2588 = vmatprep.subr.bf16.mxu1 %v8609_v27  ;;  %v260_v35 = vpack.c.bf16 %v43_v32, %v36_v30  ;;  %v107_v30 = vld [vmem:[%s14896_s0 + $0x248] sm:$0xff]  ;;  %v114_v32 = vld [vmem:[%s14896_s0 + $0x280] sm:$0xff] }
  0x7f   :  { %2470 = vmatmul.mubr.bf16.gmra.mrb[60].mxu1 %v307_v24  ;;  %1819 = vmatpush1.bf16.msra.mxu0 %v8613_v37  ;;  %v251_v24 = vld [vmem:[%s14896_s0 + $0x6c8] sm:$0xff]  ;;  %v8631_v37 = vld [vmem:[%s14897_s1 + $0x400] ss:$16 sps:$4 sm:$0xff]  }
  0x80   :  { %2479 = vmatprep.mubr.bf16.mxu1 %v315_v25  ;;  %2589 = vmatpush1.bf16.msra.mxu1 %v8607_v36  ;;  %v37_v25 = vld [vmem:[%s14896_s0 + $0x18] sm:$0xff]  ;;  %v363_v27 = vpack.c.bf16 %v251_v24, %v244_v23  ;;  %v268_v36 = vpack.c.bf16 %v58_v34, %v51_v33  ;;  %v8675_v23 = vld [vmem:[%s14897_s1 + $0x4e4] ss:$16 sps:$4 sm:$0xff]   ;;  %v8673_v34 = vld [vmem:[%s14897_s1 + $0x4e0] ss:$16 sps:$4 sm:$0xff]  }
  0x81   :  { %2590 = vmatprep.subr.bf16.mxu1 %v8618_v38  ;;  %1981 = vmatprep.subr.bf16.mxu0 %v8633_v39  ;;  %v261_v28 = vpack.c.bf16 %v44_v26, %v37_v25  ;;  %v8639_v38 = vld [vmem:[%s14897_s1 + $0x424] ss:$16 sps:$4 sm:$0xff]   ;;  %v8619_v39 = vld [vmem:[%s14897_s1 + $0x408] ss:$16 sps:$4 sm:$0xff]   ;;  %v8654_v33 = vld [vmem:[%s14897_s1 + $0x4ec] ss:$16 sps:$4 sm:$0xff]  }
  0x82   :  { %1708 = vmatmul.mubr.bf16.gmra.mrb[32].mxu0 %v314_v40  ;;  %v92_v25 = vld [vmem:[%s14896_s0 + $0x1d0] sm:$0xff]  ;;  %v99_v26 = vld [vmem:[%s14896_s0 + $0x208] sm:$0xff] }
  0x83   :  { %1717 = vmatprep.mubr.bf16.mxu0 %v322_v41 }
  0x84   :  { %2591 = vmatpush1.bf16.msra.mxu1 %v8616_v43  ;;  %v8624_v43 = vld [vmem:[%s14897_s1 + $0x42c] ss:$16 sps:$4 sm:$0xff]  }
  0x85   :  { %2753 = vmatprep.subr.bf16.mxu1 %v8621_v44  ;;  %v65_v44 = vld [vmem:[%s14896_s0 + $0xf8] sm:$0xff] }
  0x87   :  { %2480 = vmatmul.mubr.bf16.gmra.mrb[64].mxu1 %v314_v40  ;;  %v50_v40 = vld [vmem:[%s14896_s0 + $0x80] sm:$0xff] }
  0x88   :  { %2489 = vmatprep.mubr.bf16.mxu1 %v322_v41  ;;  %v57_v41 = vld [vmem:[%s14896_s0 + $0xb8] sm:$0xff] }
  0x89   :  { %v267_v48 = vpack.c.bf16 %v57_v41, %v50_v40  ;;  %v8660_v40 = vld [vmem:[%s14897_s1 + $0x50c] ss:$16 sps:$4 sm:$0xff]   ;;  %v8679_v41 = vld [vmem:[%s14897_s1 + $0x500] ss:$16 sps:$4 sm:$0xff]  }
  0x8a   :  { %1718 = vmatmul.mubr.bf16.gmra.mrb[36].mxu0 %v321_v49 }
  0x8b   :  { %1727 = vmatprep.mubr.bf16.mxu0 %v329_v50 }
  0x8f   :  { %2490 = vmatmul.mubr.bf16.gmra.mrb[68].mxu1 %v321_v49  ;;  %v8622_v49 = vld [vmem:[%s14897_s1 + $0x428] ss:$16 sps:$4 sm:$0xff]  }
  0x90   :  { %2499 = vmatprep.mubr.bf16.mxu1 %v329_v50  ;;  %v275_v50 = vpack.c.bf16 %v72_v45, %v65_v44  ;;  %v8684_v44 = vld [vmem:[%s14897_s1 + $0x524] ss:$16 sps:$4 sm:$0xff]  }
  0x92   :  { %1728 = vmatmul.mubr.bf16.gmra.mrb[40].mxu0 %v328_v56 }
  0x93   :  { %1737 = vmatprep.mubr.bf16.mxu0 %v336_v57 }
  0x97   :  { %2500 = vmatmul.mubr.bf16.gmra.mrb[72].mxu1 %v328_v56  ;;  %v71_v56 = vld [vmem:[%s14896_s0 + $0x128] sm:$0xff] }
  0x98   :  { %2509 = vmatprep.mubr.bf16.mxu1 %v336_v57  ;;  %v8625_v57 = vld [vmem:[%s14897_s1 + $0x448] ss:$16 sps:$4 sm:$0xff]  }
  0x9a   :  { %1738 = vmatmul.mubr.bf16.gmra.mrb[44].mxu0 %v335_v62 }
  0x9b   :  { %1747 = vmatprep.mubr.bf16.mxu0 %v343_v63 }
  0x9f   :  { %2510 = vmatmul.mubr.bf16.gmra.mrb[76].mxu1 %v335_v62  ;;  %v8657_v62 = vld [vmem:[%s14897_s1 + $0x484] ss:$16 sps:$4 sm:$0xff]  }
  0xa0   :  { %2519 = vmatprep.mubr.bf16.mxu1 %v343_v63  ;;  %v274_v63 = vpack.c.bf16 %v71_v56, %v64_v55  ;;  %v8690_v55 = vld [vmem:[%s14897_s1 + $0x544] ss:$16 sps:$4 sm:$0xff]  }
  0xa2   :  { %1748 = vmatmul.mubr.bf16.gmra.mrb[48].mxu0 %v342_v6 }
  0xa3   :  { %1757 = vmatprep.mubr.bf16.mxu0 %v350_v7 }
  0xa7   :  { %2520 = vmatmul.mubr.bf16.gmra.mrb[80].mxu1 %v342_v6  ;;  %v8663_v6 = vld [vmem:[%s14897_s1 + $0x4a4] ss:$16 sps:$4 sm:$0xff]  }
  0xa8   :  { %2529 = vmatprep.mubr.bf16.mxu1 %v350_v7  ;;  %v78_v7 = vld [vmem:[%s14896_s0 + $0x160] sm:$0xff] }
  0xa9   :  { %v281_v17 = vpack.c.bf16 %v85_v9, %v78_v7  ;;  %v8678_v7 = vld [vmem:[%s14897_s1 + $0x56c] ss:$16 sps:$4 sm:$0xff]   ;;  %v8691_v9 = vld [vmem:[%s14897_s1 + $0x560] ss:$16 sps:$4 sm:$0xff]  }
  0xaa   :  { %1758 = vmatmul.mubr.bf16.gmra.mrb[52].mxu0 %v349_v13 }
  0xab   :  { %1767 = vmatprep.mubr.bf16.mxu0 %v357_v14 }
  0xaf   :  { %2530 = vmatmul.mubr.bf16.gmra.mrb[84].mxu1 %v349_v13  ;;  %v8642_v13 = vld [vmem:[%s14897_s1 + $0x4ac] ss:$16 sps:$4 sm:$0xff]  }
  0xb0   :  { %2539 = vmatprep.mubr.bf16.mxu1 %v357_v14  ;;  %v8661_v14 = vld [vmem:[%s14897_s1 + $0x4a0] ss:$16 sps:$4 sm:$0xff]  }
  0xb2   :  { %1768 = vmatmul.mubr.bf16.gmra.mrb[56].mxu0 %v356_v21 }
  0xb3   :  { %1777 = vmatprep.mubr.bf16.mxu0 %v364_v22 }
  0xb7   :  { %2540 = vmatmul.mubr.bf16.gmra.mrb[88].mxu1 %v356_v21  ;;  %v8667_v21 = vld [vmem:[%s14897_s1 + $0x4c0] ss:$16 sps:$4 sm:$0xff]  }
  0xb8   :  { %2549 = vmatprep.mubr.bf16.mxu1 %v364_v22  ;;  %v289_v22 = vpack.c.bf16 %v100_v12, %v93_v11  ;;  %v135_v11 = vld [vmem:[%s14896_s0 + $0x328] sm:$0xff]  ;;  %v8699_v12 = vld [vmem:[%s14897_s1 + $0x584] ss:$16 sps:$4 sm:$0xff]  }
  0xba   :  { %1778 = vmatmul.mubr.bf16.gmra.mrb[60].mxu0 %v363_v27 }
  0xbb   :  { %1820 = vmatprep.mubr.bf16.mxu0 %v261_v28 }
  0xbf   :  { %2550 = vmatmul.mubr.bf16.gmra.mrb[92].mxu1 %v363_v27  ;;  %v8646_v27 = vld [vmem:[%s14897_s1 + $0x4c8] ss:$16 sps:$4 sm:$0xff]  }
  0xc0   :  { %2592 = vmatprep.mubr.bf16.mxu1 %v261_v28 }
  0xc2   :  { %1821 = vmatmul.mubr.bf16.vlgmr.msra.gmra.mrb[0].mxu0 %v260_v35 }
  0xc3   :  { %1830 = vmatprep.mubr.bf16.mxu0 %v268_v36  ;;  %1982 = vmatpush1.bf16.msra.mxu0 %v8631_v37 }
  0xc4   :  { %1983 = vmatprep.subr.bf16.mxu0 %v8639_v38  ;;  %v288_v38 = vpack.c.bf16 %v99_v26, %v92_v25  ;;  %v134_v25 = vld [vmem:[%s14896_s0 + $0x320] sm:$0xff]  ;;  %v8685_v26 = vld [vmem:[%s14897_s1 + $0x588] ss:$16 sps:$4 sm:$0xff]  }
  0xc7   :  { %2593 = vmatmul.mubr.bf16.vlgmr.msra.gmra.mrb[32].mxu1 %v260_v35  ;;  %1984 = vmatpush1.bf16.msra.mxu0 %v8637_v46  ;;  %v106_v46 = vld [vmem:[%s14896_s0 + $0x240] sm:$0xff] }
  0xc8   :  { %2754 = vmatpush1.bf16.msra.mxu1 %v8619_v39  ;;  %2602 = vmatprep.mubr.bf16.mxu1 %v268_v36  ;;  %v8681_v36 = vld [vmem:[%s14897_s1 + $0x504] ss:$16 sps:$4 sm:$0xff]   ;;  %v8652_v39 = vld [vmem:[%s14897_s1 + $0x4e8] ss:$16 sps:$4 sm:$0xff]  }
  0xc9   :  { %2755 = vmatprep.subr.bf16.mxu1 %v8624_v43  ;;  %1985 = vmatprep.subr.bf16.mxu0 %v8645_v47  ;;  %v296_v43 = vpack.c.bf16 %v114_v32, %v107_v30  ;;  %v113_v47 = vld [vmem:[%s14896_s0 + $0x278] sm:$0xff] }
  0xca   :  { %1831 = vmatmul.mubr.bf16.gmra.mrb[4].mxu0 %v267_v48  ;;  %v295_v58 = vpack.c.bf16 %v113_v47, %v106_v46  ;;  %v141_v30 = vld [vmem:[%s14896_s0 + $0x358] sm:$0xff]  ;;  %v8706_v46 = vld [vmem:[%s14897_s1 + $0x5c0] ss:$16 sps:$4 sm:$0xff]  }
  0xcb   :  { %1840 = vmatprep.mubr.bf16.mxu0 %v275_v50  ;;  %1986 = vmatpush1.bf16.msra.mxu0 %v8643_v52  ;;  %v8696_v32 = vld [vmem:[%s14897_s1 + $0x5ac] ss:$16 sps:$4 sm:$0xff]  }
  0xcc   :  { %2756 = vmatpush1.bf16.msra.mxu1 %v8622_v49  ;;  %1987 = vmatprep.subr.bf16.mxu0 %v8651_v54  ;;  %v121_v54 = vld [vmem:[%s14896_s0 + $0x2b8] sm:$0xff] }
  0xcd   :  { %2757 = vmatprep.subr.bf16.mxu1 %v8627_v51  ;;  %v8682_v51 = vld [vmem:[%s14897_s1 + $0x520] ss:$16 sps:$4 sm:$0xff]  }
  0xcf   :  { %2603 = vmatmul.mubr.bf16.gmra.mrb[36].mxu1 %v267_v48  ;;  %1988 = vmatpush1.bf16.msra.mxu0 %v8649_v61  ;;  %v8658_v48 = vld [vmem:[%s14897_s1 + $0x508] ss:$16 sps:$4 sm:$0xff]   ;;  %v8688_v61 = vld [vmem:[%s14897_s1 + $0x540] ss:$16 sps:$4 sm:$0xff]  }
  0xd0   :  { %2612 = vmatprep.mubr.bf16.mxu1 %v275_v50  ;;  %2758 = vmatpush1.bf16.msra.mxu1 %v8625_v57  ;;  %v8666_v50 = vld [vmem:[%s14897_s1 + $0x52c] ss:$16 sps:$4 sm:$0xff]   ;;  %v128_v57 = vld [vmem:[%s14896_s0 + $0x2f0] sm:$0xff] }
  0xd1   :  { %2759 = vmatprep.subr.bf16.mxu1 %v8630_v60  ;;  %1989 = vmatprep.subr.bf16.mxu0 %v8657_v62  ;;  %v8672_v60 = vld [vmem:[%s14897_s1 + $0x54c] ss:$16 sps:$4 sm:$0xff]   ;;  %v303_v62 = vpack.c.bf16 %v128_v57, %v121_v54 }
  0xd2   :  { %1841 = vmatmul.mubr.bf16.gmra.mrb[8].mxu0 %v274_v63 }
  0xd3   :  { %1850 = vmatprep.mubr.bf16.mxu0 %v282_v5  ;;  %1990 = vmatpush1.bf16.msra.mxu0 %v8655_v4  ;;  %v8670_v4 = vld [vmem:[%s14897_s1 + $0x548] ss:$16 sps:$4 sm:$0xff]  }
  0xd4   :  { %2760 = vmatpush1.bf16.msra.mxu1 %v8628_v1  ;;  %1991 = vmatprep.subr.bf16.mxu0 %v8663_v6  ;;  %v127_v6 = vld [vmem:[%s14896_s0 + $0x2e8] sm:$0xff] }
  0xd5   :  { %2761 = vmatprep.subr.bf16.mxu1 %v8636_v3  ;;  %v120_v3 = vld [vmem:[%s14896_s0 + $0x2b0] sm:$0xff] }
  0xd7   :  { %2613 = vmatmul.mubr.bf16.gmra.mrb[40].mxu1 %v274_v63  ;;  %1992 = vmatpush1.bf16.msra.mxu0 %v8661_v14  ;;  %v8693_v63 = vld [vmem:[%s14897_s1 + $0x564] ss:$16 sps:$4 sm:$0xff]  }
  0xd8   :  { %2622 = vmatprep.mubr.bf16.mxu1 %v282_v5  ;;  %2762 = vmatpush1.bf16.msra.mxu1 %v8634_v10  ;;  %v142_v14 = vld [vmem:[%s14896_s0 + $0x360] sm:$0xff] }
  0xd9   :  { %2763 = vmatprep.subr.bf16.mxu1 %v8642_v13  ;;  %1993 = vmatprep.subr.bf16.mxu0 %v8669_v15  ;;  %v302_v15 = vpack.c.bf16 %v127_v6, %v120_v3 }
  0xda   :  { %v9901_v24 = vpop.f32.mrb[0].mxu1  ;;  %1851 = vmatmul.mubr.bf16.gmra.mrb[12].mxu0 %v281_v17 }
  0xdb   :  { %v9912_v28 = vpop.f32.mrb[1].mxu1  ;;  %1860 = vmatprep.mubr.bf16.mxu0 %v289_v22  ;;  %1994 = vmatpush1.bf16.msra.mxu0 %v8667_v21  ;;  %v310_v21 = vpack.c.bf16 %v142_v14, %v135_v11 }
  0xdc   :  { %v9926_v35 = vpop.f32.mrb[2].mxu1  ;;  %2764 = vmatpush1.bf16.msra.mxu1 %v8640_v18  ;;  %1995 = vmatprep.subr.bf16.mxu0 %v8675_v23  ;;  %v8687_v18 = vld [vmem:[%s14897_s1 + $0x58c] ss:$16 sps:$4 sm:$0xff]  }
  0xdd   :  { %v9931_v37 = vpop.f32.mrb[3].mxu1  ;;  %2765 = vmatprep.subr.bf16.mxu1 %v8648_v20  ;;  %v8697_v20 = vld [vmem:[%s14897_s1 + $0x580] ss:$16 sps:$4 sm:$0xff]  }
  0xdf   :  { %2623 = vmatmul.mubr.bf16.gmra.mrb[44].mxu1 %v281_v17  ;;  %1996 = vmatpush1.bf16.msra.mxu0 %v8673_v34  ;;  %v8676_v17 = vld [vmem:[%s14897_s1 + $0x568] ss:$16 sps:$4 sm:$0xff]  }
  0xe0   :  { %2632 = vmatprep.mubr.bf16.mxu1 %v289_v22  ;;  %2766 = vmatpush1.bf16.msra.mxu1 %v8646_v27  ;;  %v8702_v22 = vld [vmem:[%s14897_s1 + $0x5a4] ss:$16 sps:$4 sm:$0xff]  }
  0xe1   :  { %2767 = vmatprep.subr.bf16.mxu1 %v8654_v33  ;;  %1997 = vmatprep.subr.bf16.mxu0 %v8681_v36  ;;  %v8700_v33 = vld [vmem:[%s14897_s1 + $0x5a0] ss:$16 sps:$4 sm:$0xff]   ;;  %v149_v36 = vld [vmem:[%s14896_s0 + $0x398] sm:$0xff] }
  0xe2   :  { %v9945_v45 = vpop.f32.mrb[4].mxu1  ;;  %1861 = vmatmul.mubr.bf16.gmra.mrb[16].mxu0 %v288_v38 }
  0xe3   :  { %v9956_v49 = vpop.f32.mrb[5].mxu1  ;;  %1870 = vmatprep.mubr.bf16.mxu0 %v296_v43  ;;  %1998 = vmatpush1.bf16.msra.mxu0 %v8679_v41  ;;  %v309_v41 = vpack.c.bf16 %v141_v30, %v134_v25 }
  0xe4   :  { %v9964_v52 = vpop.f32.mrb[6].mxu1  ;;  %2768 = vmatpush1.bf16.msra.mxu1 %v8652_v39  ;;  %1999 = vmatprep.subr.bf16.mxu0 %v8684_v44  ;;  %v8705_v44 = vld [vmem:[%s14897_s1 + $0x5cc] ss:$16 sps:$4 sm:$0xff]  }
  0xe5   :  { %v9972_v56 = vpop.f32.mrb[7].mxu1  ;;  %2769 = vmatprep.subr.bf16.mxu1 %v8660_v40  ;;  %v156_v40 = vld [vmem:[%s14896_s0 + $0x3d0] sm:$0xff] }
  0xe6   :  { %v317_v47 = vpack.c.bf16 %v156_v40, %v149_v36 }
  0xe7   :  { %2633 = vmatmul.mubr.bf16.gmra.mrb[48].mxu1 %v288_v38  ;;  %2000 = vmatpush1.bf16.msra.mxu0 %v8682_v51  ;;  %v8708_v38 = vld [vmem:[%s14897_s1 + $0x5c4] ss:$16 sps:$4 sm:$0xff]  }
  0xe8   :  { %2642 = vmatprep.mubr.bf16.mxu1 %v296_v43  ;;  %2770 = vmatpush1.bf16.msra.mxu1 %v8658_v48  ;;  %v8694_v43 = vld [vmem:[%s14897_s1 + $0x5a8] ss:$16 sps:$4 sm:$0xff]   ;;  %v8711_v48 = vld [vmem:[%s14897_s1 + $0x5e4] ss:$16 sps:$4 sm:$0xff]  }
  0xe9   :  { %2771 = vmatprep.subr.bf16.mxu1 %v8666_v50  ;;  %2001 = vmatprep.subr.bf16.mxu0 %v8690_v55  ;;  %v148_v51 = vld [vmem:[%s14896_s0 + $0x390] sm:$0xff]  ;;  %v155_v55 = vld [vmem:[%s14896_s0 + $0x3c8] sm:$0xff] }
  0xea   :  { %v9989_v1 = vpop.f32.mrb[8].mxu1  ;;  %1871 = vmatmul.mubr.bf16.gmra.mrb[20].mxu0 %v295_v58 }
  0xeb   :  { %v9997_v5 = vpop.f32.mrb[9].mxu1  ;;  %1880 = vmatprep.mubr.bf16.mxu0 %v303_v62  ;;  %2002 = vmatpush1.bf16.msra.mxu0 %v8688_v61 }
  0xec   :  { %v10008_v10 = vpop.f32.mrb[10].mxu1  ;;  %2772 = vmatpush1.bf16.msra.mxu1 %v8664_v59  ;;  %2003 = vmatprep.subr.bf16.mxu0 %v8693_v63  ;;  %v8703_v59 = vld [vmem:[%s14897_s1 + $0x5c8] ss:$16 sps:$4 sm:$0xff]  }
  0xed   :  { %v10016_v13 = vpop.f32.mrb[11].mxu1  ;;  %2773 = vmatprep.subr.bf16.mxu1 %v8672_v60 }
  0xef   :  { %2643 = vmatmul.mubr.bf16.gmra.mrb[52].mxu1 %v295_v58  ;;  %2004 = vmatpush1.bf16.msra.mxu0 %v8691_v9  ;;  %v163_v58 = vld [vmem:[%s14896_s0 + $0x408] sm:$0xff] }
  0xf0   :  { %2652 = vmatprep.mubr.bf16.mxu1 %v303_v62  ;;  %2774 = vmatpush1.bf16.msra.mxu1 %v8670_v4 }
  0xf1   :  { %2775 = vmatprep.subr.bf16.mxu1 %v8678_v7  ;;  %2005 = vmatprep.subr.bf16.mxu0 %v8699_v12 }
  0xf2   :  { %v10033_v23 = vpop.f32.mrb[12].mxu1  ;;  %1881 = vmatmul.mubr.bf16.gmra.mrb[24].mxu0 %v302_v15 }
  0xf3   :  { %v10041_v27 = vpop.f32.mrb[13].mxu1  ;;  %1890 = vmatprep.mubr.bf16.mxu0 %v310_v21  ;;  %2006 = vmatpush1.bf16.msra.mxu0 %v8697_v20 }
  0xf4   :  { %v10052_v34 = vpop.f32.mrb[14].mxu1  ;;  %2776 = vmatpush1.bf16.msra.mxu1 %v8676_v17  ;;  %2007 = vmatprep.subr.bf16.mxu0 %v8702_v22 }
  0xf5   :  { %v10060_v39 = vpop.f32.mrb[15].mxu1  ;;  %2777 = vmatprep.subr.bf16.mxu1 %v8687_v18 }
  0xf7   :  { %2653 = vmatmul.mubr.bf16.gmra.mrb[56].mxu1 %v302_v15  ;;  %2008 = vmatpush1.bf16.msra.mxu0 %v8700_v33 }
  0xf8   :  { %2662 = vmatprep.mubr.bf16.mxu1 %v310_v21  ;;  %2778 = vmatpush1.bf16.msra.mxu1 %v8685_v26 }
  0xf9   :  { %2779 = vmatprep.subr.bf16.mxu1 %v8696_v32  ;;  %2009 = vmatprep.subr.bf16.mxu0 %v8708_v38 }
  0xfa   :  { %v10077_v50 = vpop.f32.mrb[16].mxu1  ;;  %1891 = vmatmul.mubr.bf16.gmra.mrb[28].mxu0 %v309_v41 }
  0xfb   :  { %v10082_v54 = vpop.f32.mrb[17].mxu1  ;;  %1900 = vmatprep.mubr.bf16.mxu0 %v317_v47 }
  0xfc   :  { %v10087_v57 = vpop.f32.mrb[18].mxu1  ;;  %2780 = vmatpush1.bf16.msra.mxu1 %v8694_v43 }
  0xfd   :  { %14 = vsyncpa [#allocation3], 0  ;;  %v10095_v60 = vpop.f32.mrb[19].mxu1  ;;  %v170_v61 = vld [vmem:[%s14896_s0 + $0x440] sm:$0xff]  ;;  %2781 = vmatprep.subr.bf16.mxu1 %v8705_v44  ;;  %2010 = vmatpush1.bf16.msra.mxu0 %v8706_v46  ;;  %v8714_v63 = vld [vmem:[%s14897_s1 + $0x5ec] ss:$16 sps:$4 sm:$0xff]   ;;  %v316_v3 = vpack.c.bf16 %v155_v55, %v148_v51 }
  0xfe   :  { %v8709_v62 = vld [vmem:[%s14897_s1 + $0x5e0] ss:$16 sps:$4 sm:$0xff]   ;;  %2011 = vmatprep.subr.bf16.mxu0 %v8711_v48  ;;  %v324_v4 = vpack.c.bf16 %v170_v61, %v163_v58  ;;  %v8712_v6 = vld [vmem:[%s14897_s1 + $0x5e8] ss:$16 sps:$4 sm:$0xff]   ;;  %v8717_v7 = vld [vmem:[%s14897_s1 + $0x60c] ss:$16 sps:$4 sm:$0xff]  }
  0xff   :  { %2663 = vmatmul.mubr.bf16.gmra.mrb[60].mxu1 %v309_v41  ;;  %v9012_v11 = vld [vmem:[%s14897_s1 + $0x604] ss:$16 sps:$4 sm:$0xff]   ;;  %v169_v17 = vld [vmem:[%s14896_s0 + $0x438] sm:$0xff]  ;;  %v183_v36 = vld [vmem:[%s14896_s0 + $0x4a8] sm:$0xff] }
 0x100   :  { %2672 = vmatprep.mubr.bf16.mxu1 %v317_v47  ;;  %2782 = vmatpush1.bf16.msra.mxu1 %v8703_v59  ;;  %v162_v15 = vld [vmem:[%s14896_s0 + $0x400] sm:$0xff]  ;;  %v177_v20 = vld [vmem:[%s14896_s0 + $0x478] sm:$0xff]  ;;  %v184_v21 = vld [vmem:[%s14896_s0 + $0x4b0] sm:$0xff] }
 0x101   :  { %2783 = vmatprep.subr.bf16.mxu1 %v8714_v63  ;;  %2012 = vmatpush1.bf16.msra.mxu0 %v8709_v62  ;;  %v323_v22 = vpack.c.bf16 %v169_v17, %v162_v15  ;;  %v331_v25 = vpack.c.bf16 %v184_v21, %v177_v20  ;;  %v176_v33 = vld [vmem:[%s14896_s0 + $0x470] sm:$0xff]  ;;  %v191_v40 = vld [vmem:[%s14896_s0 + $0x4e8] sm:$0xff]  ;;  %v198_v41 = vld [vmem:[%s14896_s0 + $0x520] sm:$0xff] }
 0x102   :  { %v10112_v9 = vpop.f32.mrb[20].mxu1  ;;  %2174 = vmatprep.subr.bf16.mxu0 %v9012_v11  ;;  %1901 = vmatmul.mubr.bf16.gmra.mrb[32].mxu0 %v316_v3  ;;  %v330_v43 = vpack.c.bf16 %v183_v36, %v176_v33  ;;  %v338_v44 = vpack.c.bf16 %v198_v41, %v191_v40  ;;  %v190_v51 = vld [vmem:[%s14896_s0 + $0x4e0] sm:$0xff]  ;;  %v197_v55 = vld [vmem:[%s14896_s0 + $0x518] sm:$0xff]  ;;  %v212_v61 = vld [vmem:[%s14896_s0 + $0x590] sm:$0xff] }
 0x103   :  { %v10117_v12 = vpop.f32.mrb[21].mxu1  ;;  %1910 = vmatprep.mubr.bf16.mxu0 %v324_v4  ;;  %v205_v59 = vld [vmem:[%s14896_s0 + $0x558] sm:$0xff]  ;;  %v337_v62 = vpack.c.bf16 %v197_v55, %v190_v51  ;;  %v218_v17 = vld [vmem:[%s14896_s0 + $0x5c0] sm:$0xff]  ;;  %v232_v36 = vld [vmem:[%s14896_s0 + $0x630] sm:$0xff] }
 0x104   :  { %v10119_v14 = vpop.f32.mrb[22].mxu1  ;;  %2784 = vmatpush1.bf16.msra.mxu1 %v8712_v6  ;;  %v345_v63 = vpack.c.bf16 %v212_v61, %v205_v59  ;;  %v219_v6 = vld [vmem:[%s14896_s0 + $0x5c8] sm:$0xff]  ;;  %v225_v20 = vld [vmem:[%s14896_s0 + $0x5f8] sm:$0xff]  ;;  %v246_v55 = vld [vmem:[%s14896_s0 + $0x6a0] sm:$0xff] }
 0x105   :  { %v10127_v18 = vpop.f32.mrb[23].mxu1  ;;  %2946 = vmatprep.subr.bf16.mxu1 %v8717_v7  ;;  %v226_v7 = vld [vmem:[%s14896_s0 + $0x600] sm:$0xff]  ;;  %v233_v21 = vld [vmem:[%s14896_s0 + $0x638] sm:$0xff]  ;;  %v239_v40 = vld [vmem:[%s14896_s0 + $0x668] sm:$0xff] }
 0x106   :  { %v352_v15 = vpack.c.bf16 %v226_v7, %v219_v6  ;;  %v247_v41 = vld [vmem:[%s14896_s0 + $0x6a8] sm:$0xff]  ;;  %v253_v59 = vld [vmem:[%s14896_s0 + $0x6d8] sm:$0xff] }
 0x107   :  { %2673 = vmatmul.mubr.bf16.gmra.mrb[64].mxu1 %v316_v3  ;;  %v204_v3 = vld [vmem:[%s14896_s0 + $0x550] sm:$0xff]  ;;  %v39_v61 = vld [vmem:[%s14896_s0 + $0x28] sm:$0xff]  ;;  %v45_v6 = vld [vmem:[%s14896_s0 + $0x58] sm:$0xff] }
 0x108   :  { %2682 = vmatprep.mubr.bf16.mxu1 %v324_v4  ;;  %v211_v4 = vld [vmem:[%s14896_s0 + $0x588] sm:$0xff]  ;;  %v53_v7 = vld [vmem:[%s14896_s0 + $0x98] sm:$0xff] }
 0x109   :  { %v344_v11 = vpack.c.bf16 %v211_v4, %v204_v3  ;;  %v38_v4 = vld [vmem:[%s14896_s0 + $0x20] sm:$0xff] }
 0x10a   :  { %v10135_v26 = vpop.f32.mrb[24].mxu1  ;;  %1911 = vmatmul.mubr.bf16.gmra.mrb[36].mxu0 %v323_v22 }
 0x10b   :  { %v10137_v30 = vpop.f32.mrb[25].mxu1  ;;  %1920 = vmatprep.mubr.bf16.mxu0 %v331_v25 }
 0x10c   :  { %v10139_v32 = vpop.f32.mrb[26].mxu1 }
 0x10d   :  { %v10147_v38 = vpop.f32.mrb[27].mxu1 }
 0x10f   :  { %2683 = vmatmul.mubr.bf16.gmra.mrb[68].mxu1 %v323_v22  ;;  %v240_v22 = vld [vmem:[%s14896_s0 + $0x670] sm:$0xff] }
 0x110   :  { %2692 = vmatprep.mubr.bf16.mxu1 %v331_v25  ;;  %v351_v25 = vpack.c.bf16 %v225_v20, %v218_v17  ;;  %v359_v33 = vpack.c.bf16 %v240_v22, %v233_v21  ;;  %v8715_v20 = vld [vmem:[%s14897_s1 + $0x608] ss:$16 sps:$4 sm:$0xff]   ;;  %v52_v21 = vld [vmem:[%s14896_s0 + $0x90] sm:$0xff] }
 0x111   :  { %v59_v22 = vld [vmem:[%s14896_s0 + $0xc8] sm:$0xff] }
 0x112   :  { %v10155_v46 = vpop.f32.mrb[28].mxu1  ;;  %1921 = vmatmul.mubr.bf16.gmra.mrb[40].mxu0 %v330_v43 }
 0x113   :  { %v10157_v47 = vpop.f32.mrb[29].mxu1  ;;  %1930 = vmatprep.mubr.bf16.mxu0 %v338_v44 }
 0x114   :  { %v10159_v48 = vpop.f32.mrb[30].mxu1 }
 0x115   :  { %v10167_v58 = vpop.f32.mrb[31].mxu1 }
 0x117   :  { %2693 = vmatmul.mubr.bf16.gmra.mrb[72].mxu1 %v330_v43  ;;  %v254_v43 = vld [vmem:[%s14896_s0 + $0x6e0] sm:$0xff] }
 0x118   :  { %2702 = vmatprep.mubr.bf16.mxu1 %v338_v44  ;;  %v358_v44 = vpack.c.bf16 %v239_v40, %v232_v36  ;;  %v366_v51 = vpack.c.bf16 %v254_v43, %v247_v41  ;;  %v74_v36 = vld [vmem:[%s14896_s0 + $0x140] sm:$0xff]  ;;  %v269_v40 = vpack.c.bf16 %v59_v22, %v52_v21 }
 0x119   :  { %v66_v43 = vld [vmem:[%s14896_s0 + $0x100] sm:$0xff] }
 0x11a   :  { %1931 = vmatmul.mubr.bf16.gmra.mrb[44].mxu0 %v337_v62 }
 0x11b   :  { %1940 = vmatprep.mubr.bf16.mxu0 %v345_v63 }
 0x11f   :  { %2703 = vmatmul.mubr.bf16.gmra.mrb[76].mxu1 %v337_v62  ;;  %v46_v62 = vld [vmem:[%s14896_s0 + $0x60] sm:$0xff] }
 0x120   :  { %2712 = vmatprep.mubr.bf16.mxu1 %v345_v63  ;;  %v365_v63 = vpack.c.bf16 %v253_v59, %v246_v55  ;;  %v263_v3 = vpack.c.bf16 %v46_v62, %v39_v61  ;;  %v88_v55 = vld [vmem:[%s14896_s0 + $0x1b0] sm:$0xff] }
 0x121   :  { %v80_v62 = vld [vmem:[%s14896_s0 + $0x170] sm:$0xff] }
 0x122   :  { %1941 = vmatmul.mubr.bf16.gmra.mrb[48].mxu0 %v344_v11 }
 0x123   :  { %1950 = vmatprep.mubr.bf16.mxu0 %v352_v15 }
 0x127   :  { %2713 = vmatmul.mubr.bf16.gmra.mrb[80].mxu1 %v344_v11  ;;  %v60_v11 = vld [vmem:[%s14896_s0 + $0xd0] sm:$0xff] }
 0x128   :  { %2722 = vmatprep.mubr.bf16.mxu1 %v352_v15  ;;  %v262_v15 = vpack.c.bf16 %v45_v6, %v38_v4  ;;  %v270_v17 = vpack.c.bf16 %v60_v11, %v53_v7  ;;  %v102_v4 = vld [vmem:[%s14896_s0 + $0x220] sm:$0xff] }
 0x129   :  { %v94_v11 = vld [vmem:[%s14896_s0 + $0x1e0] sm:$0xff] }
 0x12a   :  { %1951 = vmatmul.mubr.bf16.gmra.mrb[52].mxu0 %v351_v25 }
 0x12b   :  { %1960 = vmatprep.mubr.bf16.mxu0 %v359_v33 }
 0x12f   :  { %2723 = vmatmul.mubr.bf16.gmra.mrb[84].mxu1 %v351_v25  ;;  %v9013_v25 = vld [vmem:[%s14897_s1 + $0x600] ss:$16 sps:$4 sm:$0xff]  }
 0x130   :  { %2732 = vmatprep.mubr.bf16.mxu1 %v359_v33  ;;  %v67_v33 = vld [vmem:[%s14896_s0 + $0x108] sm:$0xff] }
 0x131   :  { %v277_v41 = vpack.c.bf16 %v74_v36, %v67_v33  ;;  %v115_v33 = vld [vmem:[%s14896_s0 + $0x288] sm:$0xff] }
 0x132   :  { %1961 = vmatmul.mubr.bf16.gmra.mrb[56].mxu0 %v358_v44  ;;  %v123_v36 = vld [vmem:[%s14896_s0 + $0x2c8] sm:$0xff] }
 0x133   :  { %1970 = vmatprep.mubr.bf16.mxu0 %v366_v51 }
 0x137   :  { %2733 = vmatmul.mubr.bf16.gmra.mrb[88].mxu1 %v358_v44  ;;  %v73_v44 = vld [vmem:[%s14896_s0 + $0x138] sm:$0xff] }
 0x138   :  { %2742 = vmatprep.mubr.bf16.mxu1 %v366_v51  ;;  %v81_v51 = vld [vmem:[%s14896_s0 + $0x178] sm:$0xff]  ;;  %v276_v59 = vpack.c.bf16 %v73_v44, %v66_v43  ;;  %v122_v44 = vld [vmem:[%s14896_s0 + $0x2c0] sm:$0xff] }
 0x139   :  { %v284_v61 = vpack.c.bf16 %v88_v55, %v81_v51  ;;  %v129_v51 = vld [vmem:[%s14896_s0 + $0x2f8] sm:$0xff] }
 0x13a   :  { %1971 = vmatmul.mubr.bf16.gmra.mrb[60].mxu0 %v365_v63  ;;  %v137_v55 = vld [vmem:[%s14896_s0 + $0x338] sm:$0xff] }
 0x13b   :  { %2013 = vmatprep.mubr.bf16.mxu0 %v263_v3 }
 0x13f   :  { %2743 = vmatmul.mubr.bf16.gmra.mrb[92].mxu1 %v365_v63  ;;  %v87_v63 = vld [vmem:[%s14896_s0 + $0x1a8] sm:$0xff] }
 0x140   :  { %2785 = vmatprep.mubr.bf16.mxu1 %v263_v3  ;;  %v95_v3 = vld [vmem:[%s14896_s0 + $0x1e8] sm:$0xff]  ;;  %v283_v6 = vpack.c.bf16 %v87_v63, %v80_v62  ;;  %v136_v63 = vld [vmem:[%s14896_s0 + $0x330] sm:$0xff] }
 0x141   :  { %v291_v7 = vpack.c.bf16 %v102_v4, %v95_v3  ;;  %v143_v3 = vld [vmem:[%s14896_s0 + $0x368] sm:$0xff] }
 0x142   :  { %2014 = vmatmul.mubr.bf16.vlgmr.msra.gmra.mrb[0].mxu0 %v262_v15  ;;  %v151_v4 = vld [vmem:[%s14896_s0 + $0x3a8] sm:$0xff] }
 0x143   :  { %2023 = vmatprep.mubr.bf16.mxu0 %v270_v17  ;;  %2175 = vmatpush1.bf16.msra.mxu0 %v9013_v25  ;;  %v108_v25 = vld [vmem:[%s14896_s0 + $0x250] sm:$0xff] }
 0x147   :  { %2786 = vmatmul.mubr.bf16.vlgmr.msra.gmra.mrb[32].mxu1 %v262_v15  ;;  %v101_v15 = vld [vmem:[%s14896_s0 + $0x218] sm:$0xff] }
 0x148   :  { %2947 = vmatpush1.bf16.msra.mxu1 %v8715_v20  ;;  %2795 = vmatprep.mubr.bf16.mxu1 %v270_v17  ;;  %v109_v17 = vld [vmem:[%s14896_s0 + $0x258] sm:$0xff]  ;;  %v116_v20 = vld [vmem:[%s14896_s0 + $0x290] sm:$0xff]  ;;  %v290_v21 = vpack.c.bf16 %v101_v15, %v94_v11  ;;  %v150_v15 = vld [vmem:[%s14896_s0 + $0x3a0] sm:$0xff] }
 0x149   :  { %v298_v22 = vpack.c.bf16 %v116_v20, %v109_v17  ;;  %v157_v17 = vld [vmem:[%s14896_s0 + $0x3d8] sm:$0xff] }
 0x14a   :  { %2024 = vmatmul.mubr.bf16.gmra.mrb[4].mxu0 %v269_v40  ;;  %v165_v20 = vld [vmem:[%s14896_s0 + $0x418] sm:$0xff] }
 0x14b   :  { %2033 = vmatprep.mubr.bf16.mxu0 %v277_v41 }
 0x14f   :  { %2796 = vmatmul.mubr.bf16.gmra.mrb[36].mxu1 %v269_v40  ;;  %v130_v40 = vld [vmem:[%s14896_s0 + $0x300] sm:$0xff] }
 0x150   :  { %2805 = vmatprep.mubr.bf16.mxu1 %v277_v41  ;;  %v297_v41 = vpack.c.bf16 %v115_v33, %v108_v25  ;;  %v305_v43 = vpack.c.bf16 %v130_v40, %v123_v36  ;;  %v164_v33 = vld [vmem:[%s14896_s0 + $0x410] sm:$0xff]  ;;  %v171_v36 = vld [vmem:[%s14896_s0 + $0x448] sm:$0xff] }
 0x151   :  { %v179_v40 = vld [vmem:[%s14896_s0 + $0x488] sm:$0xff] }
 0x152   :  { %2034 = vmatmul.mubr.bf16.gmra.mrb[8].mxu0 %v276_v59 }
 0x153   :  { %2043 = vmatprep.mubr.bf16.mxu0 %v284_v61 }
 0x157   :  { %2806 = vmatmul.mubr.bf16.gmra.mrb[40].mxu1 %v276_v59  ;;  %v144_v59 = vld [vmem:[%s14896_s0 + $0x370] sm:$0xff] }
 0x158   :  { %2815 = vmatprep.mubr.bf16.mxu1 %v284_v61  ;;  %v304_v61 = vpack.c.bf16 %v129_v51, %v122_v44  ;;  %v312_v62 = vpack.c.bf16 %v144_v59, %v137_v55  ;;  %v178_v51 = vld [vmem:[%s14896_s0 + $0x480] sm:$0xff]  ;;  %v185_v55 = vld [vmem:[%s14896_s0 + $0x4b8] sm:$0xff] }
 0x159   :  { %v193_v59 = vld [vmem:[%s14896_s0 + $0x4f8] sm:$0xff] }
 0x15a   :  { %2044 = vmatmul.mubr.bf16.gmra.mrb[12].mxu0 %v283_v6 }
 0x15b   :  { %2053 = vmatprep.mubr.bf16.mxu0 %v291_v7 }
 0x15f   :  { %2816 = vmatmul.mubr.bf16.gmra.mrb[44].mxu1 %v283_v6  ;;  %v158_v6 = vld [vmem:[%s14896_s0 + $0x3e0] sm:$0xff] }
 0x160   :  { %2825 = vmatprep.mubr.bf16.mxu1 %v291_v7  ;;  %v311_v7 = vpack.c.bf16 %v143_v3, %v136_v63  ;;  %v319_v11 = vpack.c.bf16 %v158_v6, %v151_v4  ;;  %v192_v3 = vld [vmem:[%s14896_s0 + $0x4f0] sm:$0xff]  ;;  %v199_v4 = vld [vmem:[%s14896_s0 + $0x528] sm:$0xff] }
 0x161   :  { %v207_v6 = vld [vmem:[%s14896_s0 + $0x568] sm:$0xff] }
 0x162   :  { %2054 = vmatmul.mubr.bf16.gmra.mrb[16].mxu0 %v290_v21 }
 0x163   :  { %2063 = vmatprep.mubr.bf16.mxu0 %v298_v22 }
 0x167   :  { %2826 = vmatmul.mubr.bf16.gmra.mrb[48].mxu1 %v290_v21  ;;  %v172_v21 = vld [vmem:[%s14896_s0 + $0x450] sm:$0xff] }
 0x168   :  { %2835 = vmatprep.mubr.bf16.mxu1 %v298_v22  ;;  %v318_v22 = vpack.c.bf16 %v157_v17, %v150_v15  ;;  %v326_v25 = vpack.c.bf16 %v172_v21, %v165_v20  ;;  %v206_v17 = vld [vmem:[%s14896_s0 + $0x560] sm:$0xff]  ;;  %v213_v20 = vld [vmem:[%s14896_s0 + $0x598] sm:$0xff] }
 0x169   :  { %v221_v21 = vld [vmem:[%s14896_s0 + $0x5d8] sm:$0xff] }
 0x16a   :  { %2064 = vmatmul.mubr.bf16.gmra.mrb[20].mxu0 %v297_v41 }
 0x16b   :  { %2073 = vmatprep.mubr.bf16.mxu0 %v305_v43 }
 0x16f   :  { %2836 = vmatmul.mubr.bf16.gmra.mrb[52].mxu1 %v297_v41  ;;  %v186_v41 = vld [vmem:[%s14896_s0 + $0x4c0] sm:$0xff] }
 0x170   :  { %2845 = vmatprep.mubr.bf16.mxu1 %v305_v43  ;;  %v325_v43 = vpack.c.bf16 %v171_v36, %v164_v33  ;;  %v333_v44 = vpack.c.bf16 %v186_v41, %v179_v40  ;;  %v220_v36 = vld [vmem:[%s14896_s0 + $0x5d0] sm:$0xff]  ;;  %v227_v40 = vld [vmem:[%s14896_s0 + $0x608] sm:$0xff] }
 0x171   :  { %v235_v41 = vld [vmem:[%s14896_s0 + $0x648] sm:$0xff] }
 0x172   :  { %2074 = vmatmul.mubr.bf16.gmra.mrb[24].mxu0 %v304_v61 }
 0x173   :  { %2083 = vmatprep.mubr.bf16.mxu0 %v312_v62 }
 0x177   :  { %2846 = vmatmul.mubr.bf16.gmra.mrb[56].mxu1 %v304_v61  ;;  %v200_v61 = vld [vmem:[%s14896_s0 + $0x530] sm:$0xff] }
 0x178   :  { %2855 = vmatprep.mubr.bf16.mxu1 %v312_v62  ;;  %v332_v62 = vpack.c.bf16 %v185_v55, %v178_v51  ;;  %v340_v63 = vpack.c.bf16 %v200_v61, %v193_v59  ;;  %v234_v55 = vld [vmem:[%s14896_s0 + $0x640] sm:$0xff]  ;;  %v241_v59 = vld [vmem:[%s14896_s0 + $0x678] sm:$0xff] }
 0x179   :  { %v249_v61 = vld [vmem:[%s14896_s0 + $0x6b8] sm:$0xff] }
 0x17a   :  { %2084 = vmatmul.mubr.bf16.gmra.mrb[28].mxu0 %v311_v7 }
 0x17b   :  { %2093 = vmatprep.mubr.bf16.mxu0 %v319_v11 }
 0x17f   :  { %2856 = vmatmul.mubr.bf16.gmra.mrb[60].mxu1 %v311_v7  ;;  %v214_v7 = vld [vmem:[%s14896_s0 + $0x5a0] sm:$0xff] }
 0x180   :  { %2865 = vmatprep.mubr.bf16.mxu1 %v319_v11  ;;  %v339_v11 = vpack.c.bf16 %v199_v4, %v192_v3  ;;  %v347_v15 = vpack.c.bf16 %v214_v7, %v207_v6  ;;  %v248_v4 = vld [vmem:[%s14896_s0 + $0x6b0] sm:$0xff]  ;;  %v255_v6 = vld [vmem:[%s14896_s0 + $0x6e8] sm:$0xff] }
 0x181   :  { %v367_v7 = vpack.c.bf16 %v255_v6, %v248_v4  ;;  %v138_v6 = vld [vmem:[%s14896_s0 + $0x340] sm:$0xff] }
 0x182   :  { %2094 = vmatmul.mubr.bf16.gmra.mrb[32].mxu0 %v318_v22 }
 0x183   :  { %2103 = vmatprep.mubr.bf16.mxu0 %v326_v25 }
 0x187   :  { %2866 = vmatmul.mubr.bf16.gmra.mrb[64].mxu1 %v318_v22  ;;  %v228_v22 = vld [vmem:[%s14896_s0 + $0x610] sm:$0xff] }
 0x188   :  { %2875 = vmatprep.mubr.bf16.mxu1 %v326_v25  ;;  %v346_v25 = vpack.c.bf16 %v213_v20, %v206_v17  ;;  %v354_v33 = vpack.c.bf16 %v228_v22, %v221_v21  ;;  %v54_v20 = vld [vmem:[%s14896_s0 + $0xa0] sm:$0xff]  ;;  %v61_v21 = vld [vmem:[%s14896_s0 + $0xd8] sm:$0xff] }
 0x189   :  { %v271_v22 = vpack.c.bf16 %v61_v21, %v54_v20 }
 0x18a   :  { %2104 = vmatmul.mubr.bf16.gmra.mrb[36].mxu0 %v325_v43 }
 0x18b   :  { %2113 = vmatprep.mubr.bf16.mxu0 %v333_v44 }
 0x18f   :  { %2876 = vmatmul.mubr.bf16.gmra.mrb[68].mxu1 %v325_v43  ;;  %v242_v43 = vld [vmem:[%s14896_s0 + $0x680] sm:$0xff] }
 0x190   :  { %2885 = vmatprep.mubr.bf16.mxu1 %v333_v44  ;;  %v353_v44 = vpack.c.bf16 %v227_v40, %v220_v36  ;;  %v361_v51 = vpack.c.bf16 %v242_v43, %v235_v41  ;;  %v82_v40 = vld [vmem:[%s14896_s0 + $0x180] sm:$0xff]  ;;  %v89_v41 = vld [vmem:[%s14896_s0 + $0x1b8] sm:$0xff] }
 0x191   :  { %v285_v43 = vpack.c.bf16 %v89_v41, %v82_v40 }
 0x192   :  { %2114 = vmatmul.mubr.bf16.gmra.mrb[40].mxu0 %v332_v62 }
 0x193   :  { %2123 = vmatprep.mubr.bf16.mxu0 %v340_v63 }
 0x197   :  { %2886 = vmatmul.mubr.bf16.gmra.mrb[72].mxu1 %v332_v62  ;;  %v256_v62 = vld [vmem:[%s14896_s0 + $0x6f0] sm:$0xff] }
 0x198   :  { %2895 = vmatprep.mubr.bf16.mxu1 %v340_v63  ;;  %v360_v63 = vpack.c.bf16 %v241_v59, %v234_v55  ;;  %v368_v3 = vpack.c.bf16 %v256_v62, %v249_v61  ;;  %v110_v59 = vld [vmem:[%s14896_s0 + $0x260] sm:$0xff]  ;;  %v117_v61 = vld [vmem:[%s14896_s0 + $0x298] sm:$0xff] }
 0x199   :  { %v299_v62 = vpack.c.bf16 %v117_v61, %v110_v59 }
 0x19a   :  { %2124 = vmatmul.mubr.bf16.gmra.mrb[44].mxu0 %v339_v11 }
 0x19b   :  { %2133 = vmatprep.mubr.bf16.mxu0 %v347_v15 }
 0x19f   :  { %2896 = vmatmul.mubr.bf16.gmra.mrb[76].mxu1 %v339_v11  ;;  %v40_v11 = vld [vmem:[%s14896_s0 + $0x30] sm:$0xff] }
 0x1a0   :  { %2905 = vmatprep.mubr.bf16.mxu1 %v347_v15  ;;  %v47_v15 = vld [vmem:[%s14896_s0 + $0x68] sm:$0xff] }
 0x1a1   :  { %v264_v17 = vpack.c.bf16 %v47_v15, %v40_v11 }
 0x1a2   :  { %2134 = vmatmul.mubr.bf16.gmra.mrb[48].mxu0 %v346_v25 }
 0x1a3   :  { %2143 = vmatprep.mubr.bf16.mxu0 %v354_v33 }
 0x1a7   :  { %2906 = vmatmul.mubr.bf16.gmra.mrb[80].mxu1 %v346_v25  ;;  %v68_v25 = vld [vmem:[%s14896_s0 + $0x110] sm:$0xff] }
 0x1a8   :  { %2915 = vmatprep.mubr.bf16.mxu1 %v354_v33  ;;  %v75_v33 = vld [vmem:[%s14896_s0 + $0x148] sm:$0xff] }
 0x1a9   :  { %v278_v36 = vpack.c.bf16 %v75_v33, %v68_v25 }
 0x1aa   :  { %2144 = vmatmul.mubr.bf16.gmra.mrb[52].mxu0 %v353_v44 }
 0x1ab   :  { %2153 = vmatprep.mubr.bf16.mxu0 %v361_v51 }
 0x1af   :  { %2916 = vmatmul.mubr.bf16.gmra.mrb[84].mxu1 %v353_v44  ;;  %v96_v44 = vld [vmem:[%s14896_s0 + $0x1f0] sm:$0xff] }
 0x1b0   :  { %2925 = vmatprep.mubr.bf16.mxu1 %v361_v51  ;;  %v103_v51 = vld [vmem:[%s14896_s0 + $0x228] sm:$0xff] }
 0x1b1   :  { %v292_v55 = vpack.c.bf16 %v103_v51, %v96_v44 }
 0x1b2   :  { %2154 = vmatmul.mubr.bf16.gmra.mrb[56].mxu0 %v360_v63 }
 0x1b3   :  { %2163 = vmatprep.mubr.bf16.mxu0 %v368_v3 }
 0x1b7   :  { %2926 = vmatmul.mubr.bf16.gmra.mrb[88].mxu1 %v360_v63  ;;  %v124_v63 = vld [vmem:[%s14896_s0 + $0x2d0] sm:$0xff] }
 0x1b8   :  { %2935 = vmatprep.mubr.bf16.mxu1 %v368_v3  ;;  %v131_v3 = vld [vmem:[%s14896_s0 + $0x308] sm:$0xff] }
 0x1b9   :  { %v306_v4 = vpack.c.bf16 %v131_v3, %v124_v63 }
 0x1ba   :  { %2164 = vmatmul.mubr.bf16.gmra.mrb[60].mxu0 %v367_v7 }
 0x1bb   :  { %2206 = vmatprep.mubr.bf16.mxu0 %v9038_v2 }
 0x1bf   :  { %2936 = vmatmul.mubr.bf16.gmra.mrb[92].mxu1 %v367_v7  ;;  %v145_v7 = vld [vmem:[%s14896_s0 + $0x378] sm:$0xff] }
 0x1c0   :  { %2978 = vmatprep.mubr.bf16.mxu1 %v9038_v2  ;;  %v313_v11 = vpack.c.bf16 %v145_v7, %v138_v6 }
 0x1c2   :  { %7408 = vmatmul.mubr.msk.bf16.vlgmr.msra.gmra.mrb[0].mxu0 %vm1546_vm0, %v264_v17 }
 0x1c3   :  { %2216 = vmatprep.mubr.bf16.mxu0 %v9038_v2 }
 0x1c7   :  { %7424 = vmatmul.mubr.msk.bf16.vlgmr.msra.gmra.mrb[32].mxu1 %vm1546_vm0, %v264_v17 }
 0x1c8   :  { %2988 = vmatprep.mubr.bf16.mxu1 %v9038_v2 }
 0x1ca   :  { %7409 = vmatmul.mubr.msk.bf16.gmra.mrb[4].mxu0 %vm1546_vm0, %v271_v22 }
 0x1cb   :  { %2226 = vmatprep.mubr.bf16.mxu0 %v9038_v2 }
 0x1cf   :  { %7425 = vmatmul.mubr.msk.bf16.gmra.mrb[36].mxu1 %vm1546_vm0, %v271_v22 }
 0x1d0   :  { %2998 = vmatprep.mubr.bf16.mxu1 %v9038_v2 }
 0x1d2   :  { %7410 = vmatmul.mubr.msk.bf16.gmra.mrb[8].mxu0 %vm1546_vm0, %v278_v36 }
 0x1d3   :  { %2236 = vmatprep.mubr.bf16.mxu0 %v9038_v2 }
 0x1d7   :  { %7426 = vmatmul.mubr.msk.bf16.gmra.mrb[40].mxu1 %vm1546_vm0, %v278_v36 }
 0x1d8   :  { %3008 = vmatprep.mubr.bf16.mxu1 %v9038_v2 }
 0x1da   :  { %7411 = vmatmul.mubr.msk.bf16.gmra.mrb[12].mxu0 %vm1546_vm0, %v285_v43 }
 0x1db   :  { %2246 = vmatprep.mubr.bf16.mxu0 %v9038_v2 }
 0x1df   :  { %7427 = vmatmul.mubr.msk.bf16.gmra.mrb[44].mxu1 %vm1546_vm0, %v285_v43 }
 0x1e0   :  { %3018 = vmatprep.mubr.bf16.mxu1 %v9038_v2 }
 0x1e2   :  { %7412 = vmatmul.mubr.msk.bf16.gmra.mrb[16].mxu0 %vm1546_vm0, %v292_v55 }
 0x1e3   :  { %2256 = vmatprep.mubr.bf16.mxu0 %v9038_v2 }
 0x1e7   :  { %7428 = vmatmul.mubr.msk.bf16.gmra.mrb[48].mxu1 %vm1546_vm0, %v292_v55 }
 0x1e8   :  { %3028 = vmatprep.mubr.bf16.mxu1 %v9038_v2 }
 0x1ea   :  { %7413 = vmatmul.mubr.msk.bf16.gmra.mrb[20].mxu0 %vm1546_vm0, %v299_v62 }
 0x1eb   :  { %2266 = vmatprep.mubr.bf16.mxu0 %v9038_v2 }
 0x1ef   :  { %7429 = vmatmul.mubr.msk.bf16.gmra.mrb[52].mxu1 %vm1546_vm0, %v299_v62  ;;  %v8722_v62 = vld [vmem:[%s14900_s4 + $0xf8] ss:$12 sps:$4 sm:$0xff]  }
 0x1f0   :  { %3038 = vmatprep.mubr.bf16.mxu1 %v9038_v2 }
 0x1f2   :  { %7414 = vmatmul.mubr.msk.bf16.gmra.mrb[24].mxu0 %vm1546_vm0, %v306_v4 }
 0x1f3   :  { %2276 = vmatprep.mubr.bf16.mxu0 %v9038_v2 }
 0x1f7   :  { %7430 = vmatmul.mubr.msk.bf16.gmra.mrb[56].mxu1 %vm1546_vm0, %v306_v4  ;;  %v8723_v4 = vld [vmem:[%s14900_s4 + $0x38] ss:$12 sps:$4 sm:$0xff]  }
 0x1f8   :  { %3048 = vmatprep.mubr.bf16.mxu1 %v9038_v2 }
 0x1fa   :  { %7415 = vmatmul.mubr.msk.bf16.gmra.mrb[28].mxu0 %vm1546_vm0, %v313_v11 }
 0x1ff   :  { %7431 = vmatmul.mubr.msk.bf16.gmra.mrb[60].mxu1 %vm1546_vm0, %v313_v11 }
 0x200   :  { %3058 = vmatprep.mubr.bf16.mxu1 %v9038_v2 }
 0x207   :  { %7432 = vmatmul.mubr.msk.bf16.gmra.mrb[64].mxu1 %vm1546_vm0, %v9115_v8 }
 0x208   :  { %3068 = vmatprep.mubr.bf16.mxu1 %v9038_v2 }
 0x20f   :  { %7433 = vmatmul.mubr.msk.bf16.gmra.mrb[68].mxu1 %vm1546_vm0, %v9150_v19 }
 0x210   :  { %3078 = vmatprep.mubr.bf16.mxu1 %v9038_v2 }
 0x217   :  { %7434 = vmatmul.mubr.msk.bf16.gmra.mrb[72].mxu1 %vm1546_vm0, %v9188_v31 }
 0x218   :  { %3088 = vmatprep.mubr.bf16.mxu1 %v9038_v2 }
 0x21f   :  { %7435 = vmatmul.mubr.msk.bf16.gmra.mrb[76].mxu1 %vm1546_vm0, %v9223_v42 }
 0x220   :  { %3098 = vmatprep.mubr.bf16.mxu1 %v9038_v2 }
 0x227   :  { %7436 = vmatmul.mubr.msk.bf16.gmra.mrb[80].mxu1 %vm1546_vm0, %v9258_v53 }
 0x228   :  { %3108 = vmatprep.mubr.bf16.mxu1 %v9038_v2 }
 0x22f   :  { %7437 = vmatmul.mubr.msk.bf16.gmra.mrb[84].mxu1 %vm1546_vm0, %v9293_v0 }
 0x230   :  { %3118 = vmatprep.mubr.bf16.mxu1 %v9038_v2 }
 0x237   :  { %7438 = vmatmul.mubr.msk.bf16.gmra.mrb[88].mxu1 %vm1546_vm0, %v9334_v16 }
 0x238   :  { %3128 = vmatprep.mubr.bf16.mxu1 %v9038_v2 }
 0x23f   :  { %7439 = vmatmul.mubr.msk.bf16.gmra.mrb[92].mxu1 %vm1546_vm0, %v9372_v29 }
 0x255   :  { %v2095_v8 = vpop.f32.mrb[32].mxu0 }
 0x256   :  { %v10520_v19 = vadd.f32 %v9901_v24, %v2095_v8  ;;  %v2097_v31 = vpop.f32.mrb[33].mxu0 }
 0x257   :  { %v10523_v42 = vadd.f32 %v9912_v28, %v2097_v31  ;;  %v2099_v53 = vpop.f32.mrb[34].mxu0 }
 0x258   :  { %15094 = vst [vmem:[#allocation5_spill] sm:$0xff] %v10520_v19  ;;  %v10526_v0 = vadd.f32 %v9926_v35, %v2099_v53  ;;  %v2101_v15 = vpop.f32.mrb[35].mxu0 }
 0x259   :  { %15095 = vst [vmem:[#allocation6_spill] sm:$0xff] %v10523_v42  ;;  %v10529_v16 = vadd.f32 %v9931_v37, %v2101_v15 }
 0x25d   :  { %v2105_v2 = vpop.f32.mrb[36].mxu0 }
 0x25e   :  { %v10532_v17 = vadd.f32 %v9945_v45, %v2105_v2  ;;  %v2107_v29 = vpop.f32.mrb[37].mxu0 }
 0x25f   :  { %v10535_v24 = vadd.f32 %v9956_v49, %v2107_v29  ;;  %v2109_v20 = vpop.f32.mrb[38].mxu0 }
 0x260   :  { %v10538_v28 = vadd.f32 %v9964_v52, %v2109_v20  ;;  %v2111_v21 = vpop.f32.mrb[39].mxu0 }
 0x261   :  { %v10541_v35 = vadd.f32 %v9972_v56, %v2111_v21 }
 0x265   :  { %v2115_v22 = vpop.f32.mrb[40].mxu0 }
 0x266   :  { %v10544_v37 = vadd.f32 %v9989_v1, %v2115_v22  ;;  %v2117_v25 = vpop.f32.mrb[41].mxu0 }
 0x267   :  { %v10547_v45 = vadd.f32 %v9997_v5, %v2117_v25  ;;  %v2119_v33 = vpop.f32.mrb[42].mxu0 }
 0x268   :  { %v10550_v49 = vadd.f32 %v10008_v10, %v2119_v33  ;;  %v2121_v36 = vpop.f32.mrb[43].mxu0 }
 0x269   :  { %v10553_v52 = vadd.f32 %v10016_v13, %v2121_v36  ;;  %v8718_v13 = vld [vmem:[%s14900_s4 + $0xc8] ss:$12 sps:$4 sm:$0xff]  }
 0x26a   :  { %7561 = vmatprep.subr.bf16.mxu1 %v8718_v13 }
 0x26d   :  { %v2125_v40 = vpop.f32.mrb[44].mxu0 }
 0x26e   :  { %v10556_v56 = vadd.f32 %v10033_v23, %v2125_v40  ;;  %v2127_v41 = vpop.f32.mrb[45].mxu0  ;;  %v8719_v23 = vld [vmem:[%s14900_s4 + $0x8] ss:$12 sps:$4 sm:$0xff]  }
 0x26f   :  { %v10559_v1 = vadd.f32 %v10041_v27, %v2127_v41  ;;  %v2129_v43 = vpop.f32.mrb[46].mxu0  ;;  %v8720_v27 = vld [vmem:[%s14900_s4 + $0xe0] ss:$12 sps:$4 sm:$0xff]   ;;  %7562 = vmatpush3.bf16.msra.mxu1 %v8719_v23 }
 0x270   :  { %v10562_v5 = vadd.f32 %v10052_v34, %v2129_v43  ;;  %v2131_v44 = vpop.f32.mrb[47].mxu0  ;;  %7563 = vmatprep.subr.bf16.mxu1 %v8720_v27 }
 0x271   :  { %v10565_v10 = vadd.f32 %v10060_v39, %v2131_v44  ;;  %v8721_v39 = vld [vmem:[%s14900_s4 + $0x20] ss:$12 sps:$4 sm:$0xff]  }
 0x273   :  { %7564 = vmatpush3.bf16.msra.mxu1 %v8721_v39 }
 0x274   :  { %7565 = vmatprep.subr.bf16.mxu1 %v8722_v62 }
 0x275   :  { %v2135_v51 = vpop.f32.mrb[48].mxu0 }
 0x276   :  { %v10577_v34 = vadd.f32 %v10077_v50, %v2135_v51  ;;  %v2137_v55 = vpop.f32.mrb[49].mxu0 }
 0x277   :  { %v10583_v59 = vadd.f32 %v10082_v54, %v2137_v55  ;;  %v2139_v61 = vpop.f32.mrb[50].mxu0  ;;  %7566 = vmatpush3.bf16.msra.mxu1 %v8723_v4 }
 0x278   :  { %15096 = vst [vmem:[#allocation7_spill] sm:$0xff] %v10577_v34  ;;  %v10589_v63 = vadd.f32 %v10087_v57, %v2139_v61  ;;  %v2141_v50 = vpop.f32.mrb[51].mxu0 }
 0x279   :  { %15097 = vst [vmem:[#allocation8_spill] sm:$0xff] %v10583_v59  ;;  %v10592_v3 = vadd.f32 %v10095_v60, %v2141_v50 }
 0x27a   :  { %15098 = vst [vmem:[#allocation9_spill] sm:$0xff] %v10589_v63 }
 0x27b   :  { %15099 = vst [vmem:[#allocation10_spill] sm:$0xff] %v10592_v3 }
 0x27d   :  { %v2145_v54 = vpop.f32.mrb[52].mxu0 }
 0x27e   :  { %v10598_v6 = vadd.f32 %v10112_v9, %v2145_v54  ;;  %v2147_v7 = vpop.f32.mrb[53].mxu0 }
 0x27f   :  { %v10601_v11 = vadd.f32 %v10117_v12, %v2147_v7  ;;  %v2149_v57 = vpop.f32.mrb[54].mxu0  ;;  %v8724_v12 = vld [vmem:[%s14900_s4 + $0x110] ss:$12 sps:$4 sm:$0xff]  }
 0x280   :  { %15100 = vst [vmem:[#allocation11_spill] sm:$0xff] %v10598_v6  ;;  %v10604_v8 = vadd.f32 %v10119_v14, %v2149_v57  ;;  %v2151_v60 = vpop.f32.mrb[55].mxu0  ;;  %v8725_v14 = vld [vmem:[%s14900_s4 + $0x50] ss:$12 sps:$4 sm:$0xff]   ;;  %7567 = vmatprep.subr.bf16.mxu1 %v8724_v12 }
 0x281   :  { %15101 = vst [vmem:[#allocation12_spill] sm:$0xff] %v10601_v11  ;;  %v10607_v31 = vadd.f32 %v10127_v18, %v2151_v60  ;;  %7568 = vmatpush3.bf16.msra.mxu1 %v8725_v14 }
 0x282   :  { %15102 = vst [vmem:[#allocation13_spill] sm:$0xff] %v10604_v8 }
 0x283   :  { %15103 = vst [vmem:[#allocation14_spill] sm:$0xff] %v10607_v31 }
 0x285   :  { %v2155_v53 = vpop.f32.mrb[56].mxu0 }
 0x286   :  { %v10610_v15 = vadd.f32 %v10135_v26, %v2155_v53  ;;  %v2157_v2 = vpop.f32.mrb[57].mxu0 }
 0x287   :  { %v10613_v9 = vadd.f32 %v10137_v30, %v2157_v2  ;;  %v2159_v29 = vpop.f32.mrb[58].mxu0 }
 0x288   :  { %15104 = vst [vmem:[#allocation15_spill] sm:$0xff] %v10610_v15  ;;  %v10622_v18 = vadd.f32 %v10139_v32, %v2159_v29  ;;  %v2161_v20 = vpop.f32.mrb[59].mxu0 }
 0x289   :  { %15105 = vst [vmem:[#allocation16_spill] sm:$0xff] %v10613_v9  ;;  %v10625_v26 = vadd.f32 %v10147_v38, %v2161_v20 }
 0x28a   :  { %15106 = vst [vmem:[#allocation17_spill] sm:$0xff] %v10622_v18 }
 0x28b   :  { %15107 = vst [vmem:[#allocation18_spill] sm:$0xff] %v10625_v26 }
 0x28d   :  { %v2165_v30 = vpop.f32.mrb[60].mxu0 }
 0x28e   :  { %v10628_v21 = vadd.f32 %v10155_v46, %v2165_v30  ;;  %v2167_v22 = vpop.f32.mrb[61].mxu0 }
 0x28f   :  { %v10631_v25 = vadd.f32 %v10157_v47, %v2167_v22  ;;  %v2169_v33 = vpop.f32.mrb[62].mxu0 }
 0x290   :  { %15108 = vst [vmem:[#allocation19_spill] sm:$0xff] %v10628_v21  ;;  %v10634_v36 = vadd.f32 %v10159_v48, %v2169_v33  ;;  %v2171_v32 = vpop.f32.mrb[63].mxu0 }
 0x291   :  { %15109 = vst [vmem:[#allocation20_spill] sm:$0xff] %v10631_v25  ;;  %v10637_v40 = vadd.f32 %v10167_v58, %v2171_v32 }
 0x292   :  { %15110 = vst [vmem:[#allocation21_spill] sm:$0xff] %v10634_v36 }
 0x293   :  { %15111 = vst [vmem:[#allocation22_spill] sm:$0xff] %v10637_v40 }
 0x295   :  { %v10639_v38 = vpop.f32.mrb[0].mxu0 }
 0x296   :  { %15112 = vst [vmem:[#allocation23_spill] sm:$0xff] %v10639_v38  ;;  %v10641_v41 = vpop.f32.mrb[1].mxu0  ;;  %v3293_v46 = vmul.f32 %v10639_v38, %v10639_v38 }
 0x297   :  { %15113 = vst [vmem:[#allocation24_spill] sm:$0xff] %v10641_v41  ;;  %v10643_v43 = vpop.f32.mrb[2].mxu0  ;;  %v3294_v58 = vmul.f32 %v10641_v41, %v10641_v41 }
 0x298   :  { %15114 = vst [vmem:[#allocation25_spill] sm:$0xff] %v10643_v43  ;;  %v3141_v47 = vadd.f32 %v10643_v43, %v10639_v38  ;;  %v3297_v48 = vmul.f32 %v10643_v43, %v10643_v43  ;;  %v10651_v44 = vpop.f32.mrb[3].mxu0 }
 0x299   :  { %15115 = vst [vmem:[#allocation26_spill] sm:$0xff] %v10651_v44  ;;  %v3178_v13 = vadd.f32 %v10651_v44, %v10641_v41  ;;  %v3298_v23 = vmul.f32 %v10651_v44, %v10651_v44 }
 0x29a   :  { %v10659_v27 = vpop.f32.mrb[32].mxu1  ;;  %v3421_v51 = vadd.f32 %v3297_v48, %v3293_v46 }
 0x29b   :  { %15116 = vst [vmem:[#allocation27_spill] sm:$0xff] %v10659_v27  ;;  %v10661_v55 = vpop.f32.mrb[33].mxu1  ;;  %v3458_v39 = vadd.f32 %v3298_v23, %v3294_v58  ;;  %v3295_v62 = vmul.f32 %v10659_v27, %v10659_v27 }
 0x29c   :  { %15117 = vst [vmem:[#allocation28_spill] sm:$0xff] %v10661_v55  ;;  %v10663_v61 = vpop.f32.mrb[34].mxu1  ;;  %v3296_v7 = vmul.f32 %v10661_v55, %v10661_v55 }
 0x29d   :  { %15118 = vst [vmem:[#allocation29_spill] sm:$0xff] %v10663_v61  ;;  %v3215_v50 = vadd.f32 %v10663_v61, %v10659_v27  ;;  %v3299_v4 = vmul.f32 %v10663_v61, %v10663_v61  ;;  %v10671_v54 = vpop.f32.mrb[35].mxu1  ;;  %v10679_v53 = vpop.f32.mrb[4].mxu0 }
 0x29e   :  { %15119 = vst [vmem:[#allocation30_spill] sm:$0xff] %v10671_v54  ;;  %v3252_v57 = vadd.f32 %v10671_v54, %v10661_v55  ;;  %v3300_v60 = vmul.f32 %v10671_v54, %v10671_v54  ;;  %15120 = vst [vmem:[#allocation31_spill] sm:$0xff] %v10679_v53  ;;  %v3142_v29 = vadd.f32 %v3141_v47, %v10679_v53  ;;  %v10684_v14 = vpop.f32.mrb[5].mxu0 }
 0x29f   :  { %v3495_v2 = vadd.f32 %v3299_v4, %v3295_v62  ;;  %v3301_v12 = vmul.f32 %v10679_v53, %v10679_v53  ;;  %15121 = vst [vmem:[#allocation32_spill] sm:$0xff] %v10684_v14  ;;  %v3179_v30 = vadd.f32 %v3178_v13, %v10684_v14  ;;  %v3302_v22 = vmul.f32 %v10684_v14, %v10684_v14  ;;  %v10689_v33 = vpop.f32.mrb[6].mxu0 }
 0x2a0   :  { %v3532_v20 = vadd.f32 %v3300_v60, %v3296_v7  ;;  %15122 = vst [vmem:[#allocation33_spill] sm:$0xff] %v10689_v33  ;;  %v3143_v46 = vadd.f32 %v3142_v29, %v10689_v33  ;;  %v3305_v48 = vmul.f32 %v10689_v33, %v10689_v33  ;;  %v10694_v47 = vpop.f32.mrb[7].mxu0 }
 0x2a1   :  { %v3422_v32 = vadd.f32 %v3421_v51, %v3301_v12  ;;  %15123 = vst [vmem:[#allocation34_spill] sm:$0xff] %v10694_v47  ;;  %v3459_v58 = vadd.f32 %v3458_v39, %v3302_v22  ;;  %v3180_v23 = vadd.f32 %v3179_v30, %v10694_v47  ;;  %v3306_v62 = vmul.f32 %v10694_v47, %v10694_v47 }
 0x2a2   :  { %v10699_v13 = vpop.f32.mrb[36].mxu1 }
 0x2a3   :  { %15124 = vst [vmem:[#allocation35_spill] sm:$0xff] %v10699_v13  ;;  %v3423_v4 = vadd.f32 %v3422_v32, %v3305_v48  ;;  %v3216_v7 = vadd.f32 %v3215_v50, %v10699_v13  ;;  %v3303_v51 = vmul.f32 %v10699_v13, %v10699_v13  ;;  %v10704_v60 = vpop.f32.mrb[37].mxu1  ;;  %v3460_v29 = vadd.f32 %v3459_v58, %v3306_v62 }
 0x2a4   :  { %15125 = vst [vmem:[#allocation36_spill] sm:$0xff] %v10704_v60  ;;  %v3253_v12 = vadd.f32 %v3252_v57, %v10704_v60  ;;  %v3304_v39 = vmul.f32 %v10704_v60, %v10704_v60  ;;  %v10709_v30 = vpop.f32.mrb[38].mxu1 }
 0x2a5   :  { %15126 = vst [vmem:[#allocation37_spill] sm:$0xff] %v10709_v30  ;;  %v3496_v22 = vadd.f32 %v3495_v2, %v3303_v51  ;;  %v3217_v47 = vadd.f32 %v3216_v7, %v10709_v30  ;;  %v3307_v32 = vmul.f32 %v10709_v30, %v10709_v30  ;;  %v10714_v50 = vpop.f32.mrb[39].mxu1  ;;  %v10719_v57 = vpop.f32.mrb[8].mxu0 }
 0x2a6   :  { %15127 = vst [vmem:[#allocation38_spill] sm:$0xff] %v10714_v50  ;;  %v3533_v48 = vadd.f32 %v3532_v20, %v3304_v39  ;;  %v3254_v33 = vadd.f32 %v3253_v12, %v10714_v50  ;;  %v3308_v58 = vmul.f32 %v10714_v50, %v10714_v50  ;;  %15128 = vst [vmem:[#allocation39_spill] sm:$0xff] %v10719_v57  ;;  %v10724_v7 = vpop.f32.mrb[9].mxu0 }
 0x2a7   :  { %v3497_v62 = vadd.f32 %v3496_v22, %v3307_v32  ;;  %v3144_v60 = vadd.f32 %v3143_v46, %v10719_v57  ;;  %v3309_v2 = vmul.f32 %v10719_v57, %v10719_v57  ;;  %15129 = vst [vmem:[#allocation40_spill] sm:$0xff] %v10724_v7  ;;  %v3181_v30 = vadd.f32 %v3180_v23, %v10724_v7  ;;  %v10729_v12 = vpop.f32.mrb[10].mxu0 }
 0x2a8   :  { %v3534_v51 = vadd.f32 %v3533_v48, %v3308_v58  ;;  %v3310_v20 = vmul.f32 %v10724_v7, %v10724_v7  ;;  %15130 = vst [vmem:[#allocation41_spill] sm:$0xff] %v10729_v12  ;;  %v3313_v22 = vmul.f32 %v10729_v12, %v10729_v12  ;;  %v10734_v46 = vpop.f32.mrb[11].mxu0 }
 0x2a9   :  { %v3424_v39 = vadd.f32 %v3423_v4, %v3309_v2  ;;  %v3145_v50 = vadd.f32 %v3144_v60, %v10729_v12  ;;  %15131 = vst [vmem:[#allocation42_spill] sm:$0xff] %v10734_v46  ;;  %v3182_v57 = vadd.f32 %v3181_v30, %v10734_v46  ;;  %v3314_v48 = vmul.f32 %v10734_v46, %v10734_v46 }
 0x2aa   :  { %v3461_v32 = vadd.f32 %v3460_v29, %v3310_v20  ;;  %v10739_v23 = vpop.f32.mrb[40].mxu1 }
 0x2ab   :  { %15132 = vst [vmem:[#allocation43_spill] sm:$0xff] %v10739_v23  ;;  %v3425_v58 = vadd.f32 %v3424_v39, %v3313_v22  ;;  %v3218_v7 = vadd.f32 %v3217_v47, %v10739_v23  ;;  %v3311_v4 = vmul.f32 %v10739_v23, %v10739_v23  ;;  %v10744_v60 = vpop.f32.mrb[41].mxu1 }
 0x2ac   :  { %15133 = vst [vmem:[#allocation44_spill] sm:$0xff] %v10744_v60  ;;  %v3462_v2 = vadd.f32 %v3461_v32, %v3314_v48  ;;  %v3255_v12 = vadd.f32 %v3254_v33, %v10744_v60  ;;  %v3312_v29 = vmul.f32 %v10744_v60, %v10744_v60  ;;  %v10749_v30 = vpop.f32.mrb[42].mxu1 }
 0x2ad   :  { %15134 = vst [vmem:[#allocation45_spill] sm:$0xff] %v10749_v30  ;;  %v3498_v20 = vadd.f32 %v3497_v62, %v3311_v4  ;;  %v3219_v46 = vadd.f32 %v3218_v7, %v10749_v30  ;;  %v3315_v39 = vmul.f32 %v10749_v30, %v10749_v30  ;;  %v10754_v47 = vpop.f32.mrb[43].mxu1  ;;  %v10759_v33 = vpop.f32.mrb[12].mxu0 }
 0x2ae   :  { %15135 = vst [vmem:[#allocation46_spill] sm:$0xff] %v10754_v47  ;;  %v3535_v22 = vadd.f32 %v3534_v51, %v3312_v29  ;;  %v3256_v23 = vadd.f32 %v3255_v12, %v10754_v47  ;;  %v3316_v32 = vmul.f32 %v10754_v47, %v10754_v47  ;;  %15136 = vst [vmem:[#allocation47_spill] sm:$0xff] %v10759_v33  ;;  %v10764_v7 = vpop.f32.mrb[13].mxu0 }
 0x2af   :  { %v3499_v48 = vadd.f32 %v3498_v20, %v3315_v39  ;;  %v3146_v60 = vadd.f32 %v3145_v50, %v10759_v33  ;;  %v3317_v62 = vmul.f32 %v10759_v33, %v10759_v33  ;;  %15137 = vst [vmem:[#allocation48_spill] sm:$0xff] %v10764_v7  ;;  %v3183_v30 = vadd.f32 %v3182_v57, %v10764_v7  ;;  %v10769_v12 = vpop.f32.mrb[14].mxu0 }
 0x2b0   :  { %v3536_v4 = vadd.f32 %v3535_v22, %v3316_v32  ;;  %v3318_v51 = vmul.f32 %v10764_v7, %v10764_v7  ;;  %15138 = vst [vmem:[#allocation49_spill] sm:$0xff] %v10769_v12  ;;  %v3321_v20 = vmul.f32 %v10769_v12, %v10769_v12  ;;  %v10774_v50 = vpop.f32.mrb[15].mxu0 }
 0x2b1   :  { %v3426_v29 = vadd.f32 %v3425_v58, %v3317_v62  ;;  %v3147_v47 = vadd.f32 %v3146_v60, %v10769_v12  ;;  %15139 = vst [vmem:[#allocation50_spill] sm:$0xff] %v10774_v50  ;;  %v3184_v33 = vadd.f32 %v3183_v30, %v10774_v50  ;;  %v3322_v22 = vmul.f32 %v10774_v50, %v10774_v50 }
 0x2b2   :  { %v3463_v39 = vadd.f32 %v3462_v2, %v3318_v51  ;;  %v10779_v57 = vpop.f32.mrb[44].mxu1 }
 0x2b3   :  { %15140 = vst [vmem:[#allocation51_spill] sm:$0xff] %v10779_v57  ;;  %v3427_v32 = vadd.f32 %v3426_v29, %v3321_v20  ;;  %v3220_v7 = vadd.f32 %v3219_v46, %v10779_v57  ;;  %v3319_v58 = vmul.f32 %v10779_v57, %v10779_v57  ;;  %v10784_v60 = vpop.f32.mrb[45].mxu1 }
 0x2b4   :  { %15141 = vst [vmem:[#allocation52_spill] sm:$0xff] %v10784_v60  ;;  %v3464_v62 = vadd.f32 %v3463_v39, %v3322_v22  ;;  %v3257_v12 = vadd.f32 %v3256_v23, %v10784_v60  ;;  %v3320_v2 = vmul.f32 %v10784_v60, %v10784_v60  ;;  %v10789_v30 = vpop.f32.mrb[46].mxu1 }
 0x2b5   :  { %15142 = vst [vmem:[#allocation53_spill] sm:$0xff] %v10789_v30  ;;  %v3500_v51 = vadd.f32 %v3499_v48, %v3319_v58  ;;  %v3221_v50 = vadd.f32 %v3220_v7, %v10789_v30  ;;  %v3323_v29 = vmul.f32 %v10789_v30, %v10789_v30  ;;  %v10794_v46 = vpop.f32.mrb[47].mxu1  ;;  %v10799_v23 = vpop.f32.mrb[16].mxu0 }
 0x2b6   :  { %15143 = vst [vmem:[#allocation54_spill] sm:$0xff] %v10794_v46  ;;  %v3537_v20 = vadd.f32 %v3536_v4, %v3320_v2  ;;  %v3258_v57 = vadd.f32 %v3257_v12, %v10794_v46  ;;  %v3324_v39 = vmul.f32 %v10794_v46, %v10794_v46  ;;  %15144 = vst [vmem:[#allocation55_spill] sm:$0xff] %v10799_v23  ;;  %v10804_v7 = vpop.f32.mrb[17].mxu0 }
 0x2b7   :  { %v3501_v22 = vadd.f32 %v3500_v51, %v3323_v29  ;;  %v3148_v60 = vadd.f32 %v3147_v47, %v10799_v23  ;;  %v3325_v48 = vmul.f32 %v10799_v23, %v10799_v23  ;;  %15145 = vst [vmem:[#allocation56_spill] sm:$0xff] %v10804_v7  ;;  %v3185_v30 = vadd.f32 %v3184_v33, %v10804_v7  ;;  %v10809_v12 = vpop.f32.mrb[18].mxu0 }
 0x2b8   :  { %v3538_v58 = vadd.f32 %v3537_v20, %v3324_v39  ;;  %v3326_v4 = vmul.f32 %v10804_v7, %v10804_v7  ;;  %15146 = vst [vmem:[#allocation57_spill] sm:$0xff] %v10809_v12  ;;  %v3329_v51 = vmul.f32 %v10809_v12, %v10809_v12  ;;  %v10814_v47 = vpop.f32.mrb[19].mxu0 }
 0x2b9   :  { %v3428_v2 = vadd.f32 %v3427_v32, %v3325_v48  ;;  %v3149_v46 = vadd.f32 %v3148_v60, %v10809_v12  ;;  %15147 = vst [vmem:[#allocation58_spill] sm:$0xff] %v10814_v47  ;;  %v3186_v23 = vadd.f32 %v3185_v30, %v10814_v47  ;;  %v3330_v20 = vmul.f32 %v10814_v47, %v10814_v47 }
 0x2ba   :  { %v3465_v29 = vadd.f32 %v3464_v62, %v3326_v4  ;;  %v10819_v33 = vpop.f32.mrb[48].mxu1 }
 0x2bb   :  { %15148 = vst [vmem:[#allocation59_spill] sm:$0xff] %v10819_v33  ;;  %v3429_v39 = vadd.f32 %v3428_v2, %v3329_v51  ;;  %v3222_v7 = vadd.f32 %v3221_v50, %v10819_v33  ;;  %v3327_v32 = vmul.f32 %v10819_v33, %v10819_v33  ;;  %v10824_v60 = vpop.f32.mrb[49].mxu1 }
 0x2bc   :  { %15149 = vst [vmem:[#allocation60_spill] sm:$0xff] %v10824_v60  ;;  %v3466_v48 = vadd.f32 %v3465_v29, %v3330_v20  ;;  %v3259_v12 = vadd.f32 %v3258_v57, %v10824_v60  ;;  %v3328_v62 = vmul.f32 %v10824_v60, %v10824_v60  ;;  %v10829_v30 = vpop.f32.mrb[50].mxu1 }
 0x2bd   :  { %15150 = vst [vmem:[#allocation61_spill] sm:$0xff] %v10829_v30  ;;  %v3502_v4 = vadd.f32 %v3501_v22, %v3327_v32  ;;  %v3223_v47 = vadd.f32 %v3222_v7, %v10829_v30  ;;  %v3331_v2 = vmul.f32 %v10829_v30, %v10829_v30  ;;  %v10834_v50 = vpop.f32.mrb[51].mxu1  ;;  %v10839_v57 = vpop.f32.mrb[20].mxu0 }
 0x2be   :  { %15151 = vst [vmem:[#allocation62_spill] sm:$0xff] %v10834_v50  ;;  %v3539_v51 = vadd.f32 %v3538_v58, %v3328_v62  ;;  %v3260_v33 = vadd.f32 %v3259_v12, %v10834_v50  ;;  %v3332_v29 = vmul.f32 %v10834_v50, %v10834_v50  ;;  %15152 = vst [vmem:[#allocation63_spill] sm:$0xff] %v10839_v57  ;;  %v10844_v7 = vpop.f32.mrb[21].mxu0 }
 0x2bf   :  { %v3503_v20 = vadd.f32 %v3502_v4, %v3331_v2  ;;  %v3150_v60 = vadd.f32 %v3149_v46, %v10839_v57  ;;  %v3333_v22 = vmul.f32 %v10839_v57, %v10839_v57  ;;  %15153 = vst [vmem:[#allocation64_spill] sm:$0xff] %v10844_v7  ;;  %v3187_v30 = vadd.f32 %v3186_v23, %v10844_v7  ;;  %v10849_v12 = vpop.f32.mrb[22].mxu0 }
 0x2c0   :  { %v3540_v32 = vadd.f32 %v3539_v51, %v3332_v29  ;;  %v3334_v58 = vmul.f32 %v10844_v7, %v10844_v7  ;;  %15154 = vst [vmem:[#allocation65_spill] sm:$0xff] %v10849_v12  ;;  %v3337_v4 = vmul.f32 %v10849_v12, %v10849_v12  ;;  %v10854_v46 = vpop.f32.mrb[23].mxu0  ;;  %v10858_v2 = vmul.f32 %v10520_v19, %v10520_v19 }
 0x2c1   :  { %v3430_v62 = vadd.f32 %v3429_v39, %v3333_v22  ;;  %v3151_v50 = vadd.f32 %v3150_v60, %v10849_v12  ;;  %15155 = vst [vmem:[#allocation66_spill] sm:$0xff] %v10854_v46  ;;  %v3188_v23 = vadd.f32 %v3187_v30, %v10854_v46  ;;  %v3338_v29 = vmul.f32 %v10854_v46, %v10854_v46 }
 0x2c2   :  { %v3467_v51 = vadd.f32 %v3466_v48, %v3334_v58  ;;  %v10863_v7 = vpop.f32.mrb[52].mxu1  ;;  %v10867_v39 = vmul.f32 %v10523_v42, %v10523_v42  ;;  %v8728_v48 = vld [vmem:[%s14900_s4 + $0x4] ss:$12 sps:$4 sm:$0xff]   ;;  %v10879_v30 = vmul.f32 %v10526_v0, %v10526_v0 }
 0x2c3   :  { %15156 = vst [vmem:[#allocation67_spill] sm:$0xff] %v10863_v7  ;;  %v3431_v60 = vadd.f32 %v3430_v62, %v3337_v4  ;;  %v3224_v22 = vadd.f32 %v3223_v47, %v10863_v7  ;;  %v3335_v12 = vmul.f32 %v10863_v7, %v10863_v7  ;;  %v10872_v57 = vpop.f32.mrb[53].mxu1  ;;  %v8726_v4 = vld [vmem:[%s14900_s4] ss:$12 sps:$4 sm:$0xff]   ;;  %v10891_v7 = vmul.f32 %v10529_v16, %v10529_v16 }
 0x2c4   :  { %15157 = vst [vmem:[#allocation68_spill] sm:$0xff] %v10872_v57  ;;  %v3468_v58 = vadd.f32 %v3467_v51, %v3338_v29  ;;  %v3261_v46 = vadd.f32 %v3260_v33, %v10872_v57  ;;  %v3336_v62 = vmul.f32 %v10872_v57, %v10872_v57  ;;  %v10884_v47 = vpop.f32.mrb[54].mxu1  ;;  %4783 = vmatprep.subr.bf16.mxu0 %v8728_v48 }
 0x2c5   :  { %15158 = vst [vmem:[#allocation69_spill] sm:$0xff] %v10884_v47  ;;  %v3504_v13 = vadd.f32 %v3503_v20, %v3335_v12  ;;  %v3225_v14 = vadd.f32 %v3224_v22, %v10884_v47  ;;  %v3339_v51 = vmul.f32 %v10884_v47, %v10884_v47  ;;  %v10896_v33 = vpop.f32.mrb[55].mxu1  ;;  %v10900_v29 = vmul.f32 %v10532_v17, %v10532_v17  ;;  %v10905_v61 = vpop.f32.mrb[24].mxu0 }
 0x2c6   :  { %15159 = vst [vmem:[#allocation70_spill] sm:$0xff] %v10896_v33  ;;  %v3541_v57 = vadd.f32 %v3540_v32, %v3336_v62  ;;  %v3262_v53 = vadd.f32 %v3261_v46, %v10896_v33  ;;  %v3340_v54 = vmul.f32 %v10896_v33, %v10896_v33  ;;  %15160 = vst [vmem:[#allocation71_spill] sm:$0xff] %v10905_v61  ;;  %4784 = vmatpush1.bf16.msra.mxu0 %v8726_v4  ;;  %v10914_v47 = vpop.f32.mrb[25].mxu0  ;;  %v8733_v32 = vld [vmem:[%s14900_s4 + $0x1c] ss:$12 sps:$4 sm:$0xff]  }
 0x2c7   :  { %v10909_v20 = vmul.f32 %v10535_v24, %v10535_v24  ;;  %v3505_v12 = vadd.f32 %v3504_v13, %v3339_v51  ;;  %v3152_v22 = vadd.f32 %v3151_v50, %v10905_v61  ;;  %v3341_v48 = vmul.f32 %v10905_v61, %v10905_v61  ;;  %15161 = vst [vmem:[#allocation72_spill] sm:$0xff] %v10914_v47  ;;  %v10926_v50 = vpop.f32.mrb[26].mxu0  ;;  %v8731_v51 = vld [vmem:[%s14900_s4 + $0x18] ss:$12 sps:$4 sm:$0xff]  }
 0x2c8   :  { %v10921_v46 = vmul.f32 %v10538_v28, %v10538_v28  ;;  %v3542_v62 = vadd.f32 %v3541_v57, %v3340_v54  ;;  %v3189_v4 = vadd.f32 %v3188_v23, %v10914_v47  ;;  %v3342_v13 = vmul.f32 %v10914_v47, %v10914_v47  ;;  %15162 = vst [vmem:[#allocation73_spill] sm:$0xff] %v10926_v50  ;;  %v10938_v57 = vpop.f32.mrb[27].mxu0 }
 0x2c9   :  { %v10933_v61 = vmul.f32 %v10541_v35, %v10541_v35  ;;  %v3432_v33 = vadd.f32 %v3431_v60, %v3341_v48  ;;  %v3153_v44 = vadd.f32 %v3152_v22, %v10926_v50  ;;  %v3345_v54 = vmul.f32 %v10926_v50, %v10926_v50  ;;  %15163 = vst [vmem:[#allocation74_spill] sm:$0xff] %v10938_v57 }
 0x2ca   :  { %4785 = vmatprep.subr.bf16.mxu0 %v8733_v32  ;;  %v10942_v23 = vmul.f32 %v10544_v37, %v10544_v37  ;;  %v3469_v47 = vadd.f32 %v3468_v58, %v3342_v13  ;;  %v3190_v43 = vadd.f32 %v3189_v4, %v10938_v57  ;;  %v3346_v55 = vmul.f32 %v10938_v57, %v10938_v57  ;;  %v10947_v27 = vpop.f32.mrb[56].mxu1  ;;  %v8736_v58 = vld [vmem:[%s14900_s4 + $0x34] ss:$12 sps:$4 sm:$0xff]  }
 0x2cb   :  { %15164 = vst [vmem:[#allocation75_spill] sm:$0xff] %v10947_v27  ;;  %4786 = vmatpush1.bf16.msra.mxu0 %v8731_v51  ;;  %v10951_v60 = vmul.f32 %v10547_v45, %v10547_v45  ;;  %v3433_v22 = vadd.f32 %v3432_v33, %v3345_v54  ;;  %v3226_v48 = vadd.f32 %v3225_v14, %v10947_v27  ;;  %v10956_v50 = vpop.f32.mrb[57].mxu1  ;;  %v8734_v54 = vld [vmem:[%s14900_s4 + $0x30] ss:$12 sps:$4 sm:$0xff]  }
 0x2cc   :  { %v3343_v32 = vmul.f32 %v10947_v27, %v10947_v27  ;;  %15165 = vst [vmem:[#allocation76_spill] sm:$0xff] %v10956_v50  ;;  %v10963_v4 = vmul.f32 %v10550_v49, %v10550_v49  ;;  %v3470_v13 = vadd.f32 %v3469_v47, %v3346_v55  ;;  %v3263_v51 = vadd.f32 %v3262_v53, %v10956_v50  ;;  %v10968_v14 = vpop.f32.mrb[58].mxu1 }
 0x2cd   :  { %v3344_v33 = vmul.f32 %v10956_v50, %v10956_v50  ;;  %15166 = vst [vmem:[#allocation77_spill] sm:$0xff] %v10968_v14  ;;  %v10975_v57 = vmul.f32 %v10553_v52, %v10553_v52  ;;  %v3227_v41 = vadd.f32 %v3226_v48, %v10968_v14  ;;  %v3347_v55 = vmul.f32 %v10968_v14, %v10968_v14  ;;  %v10980_v53 = vpop.f32.mrb[59].mxu1  ;;  %v10989_v36 = vpop.f32.mrb[28].mxu0 }
 0x2ce   :  { %v3506_v27 = vadd.f32 %v3505_v12, %v3343_v32  ;;  %15167 = vst [vmem:[#allocation78_spill] sm:$0xff] %v10980_v53  ;;  %4787 = vmatprep.subr.bf16.mxu0 %v8736_v58  ;;  %v10984_v47 = vmul.f32 %v10556_v56, %v10556_v56  ;;  %v3264_v38 = vadd.f32 %v3263_v51, %v10980_v53  ;;  %15168 = vst [vmem:[#allocation79_spill] sm:$0xff] %v10989_v36  ;;  %v10998_v14 = vpop.f32.mrb[29].mxu0 }
 0x2cf   :  { %v3543_v50 = vadd.f32 %v3542_v62, %v3344_v33  ;;  %v3348_v40 = vmul.f32 %v10980_v53, %v10980_v53  ;;  %4788 = vmatpush1.bf16.msra.mxu0 %v8734_v54  ;;  %v10993_v12 = vmul.f32 %v10559_v1, %v10559_v1  ;;  %v3154_v32 = vadd.f32 %v3153_v44, %v10989_v36  ;;  %v8739_v62 = vld [vmem:[%s14900_s4 + $0x4c] ss:$12 sps:$4 sm:$0xff]   ;;  %v11010_v44 = vpop.f32.mrb[30].mxu0 }
 0x2d0   :  { %v3507_v48 = vadd.f32 %v3506_v27, %v3347_v55  ;;  %v3349_v58 = vmul.f32 %v10989_v36, %v10989_v36  ;;  %15169 = vst [vmem:[#allocation80_spill] sm:$0xff] %v10998_v14  ;;  %v11005_v51 = vmul.f32 %v10562_v5, %v10562_v5  ;;  %v3191_v54 = vadd.f32 %v3190_v43, %v10998_v14  ;;  %v8737_v55 = vld [vmem:[%s14900_s4 + $0x48] ss:$12 sps:$4 sm:$0xff]   ;;  %v11022_v43 = vpop.f32.mrb[31].mxu0 }
 0x2d1   :  { %v3544_v33 = vadd.f32 %v3543_v50, %v3348_v40  ;;  %v3350_v27 = vmul.f32 %v10998_v14, %v10998_v14  ;;  %15170 = vst [vmem:[#allocation81_spill] sm:$0xff] %v11010_v44  ;;  %v11017_v36 = vmul.f32 %v10565_v10, %v10565_v10  ;;  %v3155_v25 = vadd.f32 %v3154_v32, %v11010_v44 }
 0x2d2   :  { %v3434_v53 = vadd.f32 %v3433_v22, %v3349_v58  ;;  %v3353_v40 = vmul.f32 %v11010_v44, %v11010_v44  ;;  %15171 = vst [vmem:[#allocation82_spill] sm:$0xff] %v11022_v43  ;;  %4789 = vmatprep.subr.bf16.mxu0 %v8739_v62  ;;  %v11026_v50 = vmul.f32 %v10577_v34, %v10577_v34  ;;  %v11031_v18 = vpop.f32.mrb[60].mxu1 }
 0x2d3   :  { %v3471_v14 = vadd.f32 %v3470_v13, %v3350_v27  ;;  %v3192_v21 = vadd.f32 %v3191_v54, %v11022_v43  ;;  %v3354_v26 = vmul.f32 %v11022_v43, %v11022_v43  ;;  %15172 = vst [vmem:[#allocation83_spill] sm:$0xff] %v11031_v18  ;;  %4790 = vmatpush1.bf16.msra.mxu0 %v8737_v55  ;;  %v11037_v44 = vpop.f32.mrb[61].mxu1  ;;  %v8742_v13 = vld [vmem:[%s14900_s4 + $0x64] ss:$12 sps:$4 sm:$0xff]  }
 0x2d4   :  { %v3156_v22 = vadd.f32 %v10520_v19, %v3155_v25  ;;  %v3435_v32 = vadd.f32 %v3434_v53, %v3353_v40  ;;  %v3228_v58 = vadd.f32 %v3227_v41, %v11031_v18  ;;  %v3351_v62 = vmul.f32 %v11031_v18, %v11031_v18  ;;  %15173 = vst [vmem:[#allocation84_spill] sm:$0xff] %v11037_v44  ;;  %v11046_v53 = vpop.f32.mrb[62].mxu1  ;;  %v8740_v41 = vld [vmem:[%s14900_s4 + $0x60] ss:$12 sps:$4 sm:$0xff]  }
 0x2d5   :  { %v3193_v54 = vadd.f32 %v10523_v42, %v3192_v21  ;;  %v3472_v27 = vadd.f32 %v3471_v14, %v3354_v26  ;;  %v3265_v43 = vadd.f32 %v3264_v38, %v11037_v44  ;;  %v3352_v25 = vmul.f32 %v11037_v44, %v11037_v44  ;;  %v11054_v21 = vpop.f32.mrb[63].mxu1  ;;  %4791 = vmatprep.subr.bf16.mxu0 %v8742_v13 }
 0x2d6   :  { %v3157_v55 = vadd.f32 %v10526_v0, %v3156_v22  ;;  %v3436_v40 = vadd.f32 %v3435_v32, %v10858_v2  ;;  %v3508_v19 = vadd.f32 %v3507_v48, %v3351_v62  ;;  %v3229_v18 = vadd.f32 %v3228_v58, %v11046_v53  ;;  %v8747_v32 = vld [vmem:[%s14900_s4 + $0x7c] ss:$12 sps:$4 sm:$0xff]  }
 0x2d7   :  { %v3194_v26 = vadd.f32 %v10529_v16, %v3193_v54  ;;  %v3473_v38 = vadd.f32 %v3472_v27, %v10867_v39  ;;  %v3545_v14 = vadd.f32 %v3544_v33, %v3352_v25  ;;  %v3355_v42 = vmul.f32 %v11046_v53, %v11046_v53  ;;  %4792 = vmatpush1.bf16.msra.mxu0 %v8740_v41 }
 0x2d8   :  { %v3158_v44 = vadd.f32 %v10532_v17, %v3157_v55  ;;  %v3437_v22 = vadd.f32 %v3436_v40, %v10879_v30  ;;  %v3266_v2 = vadd.f32 %v3265_v43, %v11054_v21  ;;  %v3356_v48 = vmul.f32 %v11054_v21, %v11054_v21  ;;  %v8745_v30 = vld [vmem:[%s14900_s4 + $0x78] ss:$12 sps:$4 sm:$0xff]   ;;  %4793 = vmatprep.subr.bf16.mxu0 %v8747_v32 }
 0x2d9   :  { %v11070_v39 = vmul.f32 %v10583_v59, %v10583_v59  ;;  %v3195_v33 = vadd.f32 %v10535_v24, %v3194_v26  ;;  %v3474_v58 = vadd.f32 %v3473_v38, %v10891_v7  ;;  %v3509_v62 = vadd.f32 %v3508_v19, %v3355_v42  ;;  %v8750_v38 = vld [vmem:[%s14900_s4 + $0x94] ss:$12 sps:$4 sm:$0xff]  }
 0x2da   :  { %v11079_v43 = vmul.f32 %v10589_v63, %v10589_v63  ;;  %v3159_v13 = vadd.f32 %v10538_v28, %v3158_v44  ;;  %v3438_v54 = vadd.f32 %v3437_v22, %v10900_v29  ;;  %v3546_v27 = vadd.f32 %v3545_v14, %v3356_v48  ;;  %v11093_v41 = vpop.f32.mrb[64].mxu1 }
 0x2db   :  { %v11085_v25 = vmul.f32 %v10592_v3, %v10592_v3  ;;  %v11089_v19 = vmul.f32 %v10598_v6, %v10598_v6  ;;  %v3196_v42 = vadd.f32 %v10541_v35, %v3195_v33  ;;  %v3475_v7 = vadd.f32 %v3474_v58, %v10909_v20  ;;  %4794 = vmatpush1.bf16.msra.mxu0 %v8745_v30  ;;  %v11100_v26 = vpop.f32.mrb[65].mxu1 }
 0x2dc   :  { %v3160_v44 = vadd.f32 %v10544_v37, %v3159_v13  ;;  %v3439_v29 = vadd.f32 %v3438_v54, %v10921_v46  ;;  %v3230_v55 = vadd.f32 %v3229_v18, %v11093_v41  ;;  %v3359_v40 = vmul.f32 %v11093_v41, %v11093_v41  ;;  %v11110_v48 = vpop.f32.mrb[66].mxu1  ;;  %v8748_v18 = vld [vmem:[%s14900_s4 + $0x90] ss:$12 sps:$4 sm:$0xff]   ;;  %4795 = vmatprep.subr.bf16.mxu0 %v8750_v38 }
 0x2dd   :  { %v3197_v20 = vadd.f32 %v10547_v45, %v3196_v42  ;;  %v3476_v14 = vadd.f32 %v3475_v7, %v10933_v61  ;;  %v3267_v22 = vadd.f32 %v3266_v2, %v11100_v26  ;;  %v3360_v46 = vmul.f32 %v11100_v26, %v11100_v26  ;;  %v11118_v13 = vpop.f32.mrb[67].mxu1 }
 0x2de   :  { %v3161_v32 = vadd.f32 %v10550_v49, %v3160_v44  ;;  %v3440_v33 = vadd.f32 %v3439_v29, %v10942_v23  ;;  %v3510_v58 = vadd.f32 %v3509_v62, %v3359_v40  ;;  %v3231_v30 = vadd.f32 %v3230_v55, %v11110_v48  ;;  %v8753_v29 = vld [vmem:[%s14900_s4 + $0xac] ss:$12 sps:$4 sm:$0xff]  }
 0x2df   :  { %v3198_v61 = vadd.f32 %v10553_v52, %v3197_v20  ;;  %v3477_v2 = vadd.f32 %v3476_v14, %v10951_v60  ;;  %v3547_v54 = vadd.f32 %v3546_v27, %v3360_v46  ;;  %v3363_v42 = vmul.f32 %v11110_v48, %v11110_v48  ;;  %4796 = vmatpush1.bf16.msra.mxu0 %v8748_v18 }
 0x2e0   :  { %v3162_v7 = vadd.f32 %v10556_v56, %v3161_v32  ;;  %v3441_v44 = vadd.f32 %v3440_v33, %v10963_v4  ;;  %v3268_v23 = vadd.f32 %v3267_v22, %v11118_v13  ;;  %v3364_v62 = vmul.f32 %v11118_v13, %v11118_v13  ;;  %v8751_v4 = vld [vmem:[%s14900_s4 + $0xa8] ss:$12 sps:$4 sm:$0xff]   ;;  %4797 = vmatprep.subr.bf16.mxu0 %v8753_v29 }
 0x2e1   :  { %v3398_v60 = vmul.f32 %v10601_v11, %v10601_v11  ;;  %v3199_v27 = vadd.f32 %v10559_v1, %v3198_v61  ;;  %v3478_v55 = vadd.f32 %v3477_v2, %v10975_v57  ;;  %v3511_v40 = vadd.f32 %v3510_v58, %v3363_v42  ;;  %v8756_v42 = vld [vmem:[%s14900_s4 + $0xc4] ss:$12 sps:$4 sm:$0xff]  }
 0x2e2   :  { %v3401_v38 = vmul.f32 %v10604_v8, %v10604_v8  ;;  %v3163_v20 = vadd.f32 %v10562_v5, %v3162_v7  ;;  %v3442_v14 = vadd.f32 %v3441_v44, %v10984_v47  ;;  %v3548_v22 = vadd.f32 %v3547_v54, %v3364_v62  ;;  %v11149_v33 = vpop.f32.mrb[68].mxu1 }
 0x2e3   :  { %v3402_v46 = vmul.f32 %v10607_v31, %v10607_v31  ;;  %v3405_v57 = vmul.f32 %v10610_v15, %v10610_v15  ;;  %v3200_v18 = vadd.f32 %v10565_v10, %v3199_v27  ;;  %v3479_v32 = vadd.f32 %v3478_v55, %v10993_v12  ;;  %4798 = vmatpush1.bf16.msra.mxu0 %v8751_v4  ;;  %v11156_v54 = vpop.f32.mrb[69].mxu1 }
 0x2e4   :  { %v3164_v58 = vadd.f32 %v10577_v34, %v3163_v20  ;;  %v3443_v61 = vadd.f32 %v3442_v14, %v11005_v51  ;;  %v3232_v47 = vadd.f32 %v3231_v30, %v11149_v33  ;;  %v3367_v2 = vmul.f32 %v11149_v33, %v11149_v33  ;;  %v11166_v62 = vpop.f32.mrb[70].mxu1  ;;  %v8754_v30 = vld [vmem:[%s14900_s4 + $0xc0] ss:$12 sps:$4 sm:$0xff]   ;;  %4799 = vmatprep.subr.bf16.mxu0 %v8756_v42 }
 0x2e5   :  { %v3201_v12 = vadd.f32 %v10583_v59, %v3200_v18  ;;  %v3480_v7 = vadd.f32 %v3479_v32, %v11017_v36  ;;  %v3269_v44 = vadd.f32 %v3268_v23, %v11156_v54  ;;  %v3368_v51 = vmul.f32 %v11156_v54, %v11156_v54  ;;  %v11174_v20 = vpop.f32.mrb[71].mxu1  ;;  %v15174_v42 = vld [vmem:[#allocation17_spill] sm:$0xff] }
 0x2e6   :  { %v3165_v29 = vadd.f32 %v10589_v63, %v3164_v58  ;;  %v3444_v27 = vadd.f32 %v3443_v61, %v11026_v50  ;;  %v3512_v55 = vadd.f32 %v3511_v40, %v3367_v2  ;;  %v3233_v4 = vadd.f32 %v3232_v47, %v11166_v62  ;;  %v8761_v61 = vld [vmem:[%s14900_s4 + $0xdc] ss:$12 sps:$4 sm:$0xff]  }
 0x2e7   :  { %v3202_v36 = vadd.f32 %v10592_v3, %v3201_v12  ;;  %v3481_v23 = vadd.f32 %v3480_v7, %v11070_v39  ;;  %v3549_v14 = vadd.f32 %v3548_v22, %v3368_v51  ;;  %v3371_v18 = vmul.f32 %v11166_v62, %v11166_v62  ;;  %4800 = vmatpush1.bf16.msra.mxu0 %v8754_v30  ;;  %v15175_v30 = vld [vmem:[#allocation18_spill] sm:$0xff] }
 0x2e8   :  { %v3166_v32 = vadd.f32 %v10598_v6, %v3165_v29  ;;  %v3445_v58 = vadd.f32 %v3444_v27, %v11079_v43  ;;  %v3270_v50 = vadd.f32 %v3269_v44, %v11174_v20  ;;  %v3372_v40 = vmul.f32 %v11174_v20, %v11174_v20  ;;  %v8759_v43 = vld [vmem:[%s14900_s4 + $0xd8] ss:$12 sps:$4 sm:$0xff]   ;;  %4801 = vmatprep.subr.bf16.mxu0 %v8761_v61  ;;  %v15176_v27 = vld [vmem:[#allocation19_spill] sm:$0xff] }
 0x2e9   :  { %v3406_v39 = vmul.f32 %v10613_v9, %v10613_v9  ;;  %v3203_v22 = vadd.f32 %v10601_v11, %v3202_v36  ;;  %v3482_v47 = vadd.f32 %v3481_v23, %v11085_v25  ;;  %v3513_v2 = vadd.f32 %v3512_v55, %v3371_v18 }
 0x2ea   :  { %v3409_v12 = vmul.f32 %v15174_v42, %v15174_v42  ;;  %v3167_v7 = vadd.f32 %v10604_v8, %v3166_v32  ;;  %v3446_v44 = vadd.f32 %v3445_v58, %v11089_v19  ;;  %v3550_v51 = vadd.f32 %v3549_v14, %v3372_v40  ;;  %v11204_v23 = vpop.f32.mrb[72].mxu1  ;;  %v8764_v58 = vld [vmem:[%s14900_s4 + $0xf4] ss:$12 sps:$4 sm:$0xff]  }
 0x2eb   :  { %v3410_v29 = vmul.f32 %v15175_v30, %v15175_v30  ;;  %v3413_v25 = vmul.f32 %v15176_v27, %v15176_v27  ;;  %v3204_v55 = vadd.f32 %v10607_v31, %v3203_v22  ;;  %v3483_v36 = vadd.f32 %v3482_v47, %v3398_v60  ;;  %4802 = vmatpush1.bf16.msra.mxu0 %v8759_v43  ;;  %v11210_v14 = vpop.f32.mrb[73].mxu1 }
 0x2ec   :  { %v3168_v18 = vadd.f32 %v10610_v15, %v3167_v7  ;;  %v3447_v11 = vadd.f32 %v3446_v44, %v3401_v38  ;;  %v3234_v32 = vadd.f32 %v3233_v4, %v11204_v23  ;;  %v3375_v19 = vmul.f32 %v11204_v23, %v11204_v23  ;;  %v11219_v38 = vpop.f32.mrb[74].mxu1  ;;  %v8762_v4 = vld [vmem:[%s14900_s4 + $0xf0] ss:$12 sps:$4 sm:$0xff]   ;;  %4803 = vmatprep.subr.bf16.mxu0 %v8764_v58  ;;  %v15178_v58 = vld [vmem:[#allocation21_spill] sm:$0xff] }
 0x2ed   :  { %v3205_v40 = vadd.f32 %v10613_v9, %v3204_v55  ;;  %v3484_v60 = vadd.f32 %v3483_v36, %v3402_v46  ;;  %v3271_v61 = vadd.f32 %v3270_v50, %v11210_v14  ;;  %v3376_v22 = vmul.f32 %v11210_v14, %v11210_v14  ;;  %v11226_v15 = vpop.f32.mrb[75].mxu1 }
 0x2ee   :  { %v3169_v47 = vadd.f32 %v15174_v42, %v3168_v18  ;;  %v3448_v43 = vadd.f32 %v3447_v11, %v3405_v57  ;;  %v3514_v7 = vadd.f32 %v3513_v2, %v3375_v19  ;;  %v3235_v44 = vadd.f32 %v3234_v32, %v11219_v38  ;;  %v8767_v57 = vld [vmem:[%s14900_s4 + $0x10c] ss:$12 sps:$4 sm:$0xff]  }
 0x2ef   :  { %v3206_v46 = vadd.f32 %v15175_v30, %v3205_v40  ;;  %v3485_v50 = vadd.f32 %v3484_v60, %v3406_v39  ;;  %v3551_v55 = vadd.f32 %v3550_v51, %v3376_v22  ;;  %v3379_v36 = vmul.f32 %v11219_v38, %v11219_v38  ;;  %4804 = vmatpush1.bf16.msra.mxu0 %v8762_v4  ;;  %v15177_v2 = vld [vmem:[#allocation20_spill] sm:$0xff]  ;;  %v15179_v4 = vld [vmem:[#allocation22_spill] sm:$0xff] }
 0x2f0   :  { %v3170_v9 = vadd.f32 %v15176_v27, %v3169_v47  ;;  %v3449_v31 = vadd.f32 %v3448_v43, %v3409_v12  ;;  %v3272_v18 = vadd.f32 %v3271_v61, %v11226_v15  ;;  %v3380_v11 = vmul.f32 %v11226_v15, %v11226_v15  ;;  %v8765_v12 = vld [vmem:[%s14900_s4 + $0x108] ss:$12 sps:$4 sm:$0xff]   ;;  %4805 = vmatprep.subr.bf16.mxu0 %v8767_v57 }
 0x2f1   :  { %v3414_v39 = vmul.f32 %v15177_v2, %v15177_v2  ;;  %v3207_v51 = vadd.f32 %v15177_v2, %v3206_v46  ;;  %v3486_v32 = vadd.f32 %v3485_v50, %v3410_v29  ;;  %v3515_v19 = vadd.f32 %v3514_v7, %v3379_v36 }
 0x2f2   :  { %v3417_v40 = vmul.f32 %v15178_v58, %v15178_v58  ;;  %v3450_v60 = vadd.f32 %v3449_v31, %v3413_v25  ;;  %v3552_v61 = vadd.f32 %v3551_v55, %v3380_v11  ;;  %v3171_v22 = vadd.f32 %v15178_v58, %v3170_v9  ;;  %v11249_v27 = vpop.f32.mrb[76].mxu1  ;;  %v8729_v9 = vld [vmem:[%s14900_s4 + $0x128] ss:$12 sps:$4 sm:$0xff]   ;;  %v8770_v55 = vld [vmem:[%s14900_s4 + $0x124] ss:$12 sps:$4 sm:$0xff]  }
 0x2f3   :  { %v3418_v47 = vmul.f32 %v15179_v4, %v15179_v4  ;;  %v3487_v43 = vadd.f32 %v3486_v32, %v3414_v39  ;;  %v3208_v29 = vadd.f32 %v15179_v4, %v3207_v51  ;;  %4806 = vmatpush1.bf16.msra.mxu0 %v8765_v12  ;;  %v3236_v46 = vadd.f32 %v3235_v44, %v11249_v27  ;;  %v11255_v31 = vpop.f32.mrb[77].mxu1  ;;  %v8730_v51 = vld [vmem:[%s14900_s4 + $0x68] ss:$12 sps:$4 sm:$0xff]   ;;  %v8768_v32 = vld [vmem:[%s14900_s4 + $0x120] ss:$12 sps:$4 sm:$0xff]  }
 0x2f4   :  { %v3451_v7 = vadd.f32 %v3450_v60, %v3417_v40  ;;  %v3383_v50 = vmul.f32 %v11249_v27, %v11249_v27  ;;  %v3172_v25 = vrot.slane %v3171_v22, 4  ;;  %v3273_v11 = vadd.f32 %v3272_v18, %v11255_v31  ;;  %v11266_v57 = vpop.f32.mrb[78].mxu1  ;;  %7569 = vmatprep.subr.bf16.mxu1 %v8729_v9  ;;  %4807 = vmatprep.subr.bf16.mxu0 %v8770_v55 }
 0x2f5   :  { %v3488_v36 = vadd.f32 %v3487_v43, %v3418_v47  ;;  %v3384_v44 = vmul.f32 %v11255_v31, %v11255_v31  ;;  %v3209_v39 = vrot.slane %v3208_v29, 4  ;;  %v3237_v40 = vadd.f32 %v3236_v46, %v11266_v57  ;;  %v11277_v60 = vpop.f32.mrb[79].mxu1  ;;  %7570 = vmatpush3.bf16.msra.mxu1 %v8730_v51  ;;  %v8743_v46 = vld [vmem:[%s14900_s4 + $0x140] ss:$12 sps:$4 sm:$0xff]  }
 0x2f6   :  { %v3516_v12 = vadd.f32 %v3515_v19, %v3383_v50  ;;  %v3387_v18 = vmul.f32 %v11266_v57, %v11266_v57  ;;  %v3173_v47 = vadd.f32 %v3172_v25, %v3171_v22  ;;  %v3274_v4 = vadd.f32 %v3273_v11, %v11277_v60  ;;  %7571 = vmatprep.subr.bf16.mxu1 %v8743_v46 }
 0x2f7   :  { %v3553_v43 = vadd.f32 %v3552_v61, %v3384_v44  ;;  %v3388_v58 = vmul.f32 %v11277_v60, %v11277_v60  ;;  %v3210_v2 = vadd.f32 %v3209_v39, %v3208_v29  ;;  %v3452_v19 = vrot.slane %v3451_v7, 4  ;;  %v8744_v61 = vld [vmem:[%s14900_s4 + $0x80] ss:$12 sps:$4 sm:$0xff]   ;;  %4808 = vmatpush1.bf16.msra.mxu0 %v8768_v32  ;;  %v8773_v29 = vld [vmem:[%s14900_s4 + $0x138] ss:$12 sps:$4 sm:$0xff]  }
 0x2f8   :  { %v3517_v30 = vadd.f32 %v3516_v12, %v3387_v18  ;;  %v3174_v42 = vrot.slane %v3173_v47, 2  ;;  %v3489_v50 = vrot.slane %v3488_v36, 4  ;;  %v8775_v44 = vld [vmem:[%s14900_s4 + $0x13c] ss:$12 sps:$4 sm:$0xff]  }
 0x2f9   :  { %v3554_v8 = vadd.f32 %v3553_v43, %v3388_v58  ;;  %v3211_v22 = vrot.slane %v3210_v2, 2  ;;  %v3453_v9 = vadd.f32 %v3452_v19, %v3451_v7  ;;  %7572 = vmatpush3.bf16.msra.mxu1 %v8744_v61  ;;  %v8757_v7 = vld [vmem:[%s14900_s4 + $0x158] ss:$12 sps:$4 sm:$0xff]   ;;  %4809 = vmatprep.subr.bf16.mxu0 %v8775_v44  ;;  %v8776_v61 = vld [vmem:[%s14900_s4 + $0x150] ss:$12 sps:$4 sm:$0xff]  }
 0x2fa   :  { %v3175_v25 = vadd.f32 %v3174_v42, %v3173_v47  ;;  %v3490_v11 = vadd.f32 %v3489_v50, %v3488_v36  ;;  %v11294_v55 = vpop.f32.mrb[80].mxu1  ;;  %v8758_v43 = vld [vmem:[%s14900_s4 + $0x98] ss:$12 sps:$4 sm:$0xff]   ;;  %7573 = vmatprep.subr.bf16.mxu1 %v8757_v7  ;;  %v8778_v44 = vld [vmem:[%s14900_s4 + $0x154] ss:$12 sps:$4 sm:$0xff]  }
 0x2fb   :  { %15180 = vst [vmem:[#allocation85_spill] sm:$0xff] %v11294_v55  ;;  %v3212_v58 = vadd.f32 %v3211_v22, %v3210_v2  ;;  %v3238_v39 = vadd.f32 %v3237_v40, %v11294_v55  ;;  %v3391_v51 = vmul.f32 %v11294_v55, %v11294_v55  ;;  %v11299_v32 = vpop.f32.mrb[81].mxu1  ;;  %v3454_v42 = vrot.slane %v3453_v9, 2  ;;  %4810 = vmatpush1.bf16.msra.mxu0 %v8773_v29  ;;  %v8771_v7 = vld [vmem:[%s14900_s4 + $0x170] ss:$12 sps:$4 sm:$0xff]  }
 0x2fc   :  { %15181 = vst [vmem:[#allocation86_spill] sm:$0xff] %v11299_v32  ;;  %v3176_v12 = vrot.slane %v3175_v25, 1  ;;  %v3275_v36 = vadd.f32 %v3274_v4, %v11299_v32  ;;  %v3392_v2 = vmul.f32 %v11299_v32, %v11299_v32  ;;  %v11307_v18 = vpop.f32.mrb[82].mxu1  ;;  %v3491_v47 = vrot.slane %v3490_v11, 2  ;;  %4811 = vmatprep.subr.bf16.mxu0 %v8778_v44 }
 0x2fd   :  { %15182 = vst [vmem:[#allocation87_spill] sm:$0xff] %v11307_v18  ;;  %v3213_v40 = vrot.slane %v3212_v58, 1  ;;  %v3518_v19 = vadd.f32 %v3517_v30, %v3391_v51  ;;  %v3239_v50 = vadd.f32 %v3238_v39, %v11307_v18  ;;  %v3395_v46 = vmul.f32 %v11307_v18, %v11307_v18  ;;  %v11315_v22 = vpop.f32.mrb[83].mxu1  ;;  %7574 = vmatpush3.bf16.msra.mxu1 %v8758_v43 }
 0x2fe   :  { %15183 = vst [vmem:[#allocation88_spill] sm:$0xff] %v11315_v22  ;;  %v3177_v4 = vadd.f32 %v3176_v12, %v3175_v25  ;;  %v3555_v6 = vadd.f32 %v3554_v8, %v3392_v2  ;;  %v3276_v30 = vadd.f32 %v3275_v36, %v11315_v22  ;;  %v3396_v29 = vmul.f32 %v11315_v22, %v11315_v22  ;;  %v8781_v8 = vld [vmem:[%s14900_s4 + $0x16c] ss:$12 sps:$4 sm:$0xff]  }
 0x2ff   :  { %v3214_v39 = vadd.f32 %v3213_v40, %v3212_v58  ;;  %v3519_v51 = vadd.f32 %v3518_v19, %v3395_v46  ;;  %v3455_v25 = vadd.f32 %v3454_v42, %v3453_v9  ;;  %v3492_v12 = vadd.f32 %v3491_v47, %v3490_v11  ;;  %v8772_v58 = vld [vmem:[%s14900_s4 + $0xb0] ss:$12 sps:$4 sm:$0xff]   ;;  %4812 = vmatpush1.bf16.msra.mxu0 %v8776_v61  ;;  %v8779_v9 = vld [vmem:[%s14900_s4 + $0x168] ss:$12 sps:$4 sm:$0xff]  }
 0x300   :  { %v11326_v18 = vmul.f32 0.00390625, %v3177_v4  ;;  %v3556_v36 = vadd.f32 %v3555_v6, %v3396_v29  ;;  %7575 = vmatprep.subr.bf16.mxu1 %v8771_v7  ;;  %4813 = vmatprep.subr.bf16.mxu0 %v8781_v8 }
 0x301   :  { %v11334_v2 = vmul.f32 0.00390625, %v3214_v39  ;;  %v3456_v11 = vrot.slane %v3455_v25, 1  ;;  %v3493_v42 = vrot.slane %v3492_v12, 1  ;;  %7576 = vmatpush3.bf16.msra.mxu1 %v8772_v58 }
 0x302   :  { %v11342_v40 = vpop.f32.mrb[84].mxu1  ;;  %v3573_v6 = vmul.f32 %v11326_v18, %v11326_v18 }
 0x303   :  { %15184 = vst [vmem:[#allocation89_spill] sm:$0xff] %v11342_v40  ;;  %v3240_v47 = vadd.f32 %v3239_v50, %v11342_v40  ;;  %v3399_v43 = vmul.f32 %v11342_v40, %v11342_v40  ;;  %v11349_v19 = vpop.f32.mrb[85].mxu1  ;;  %v3457_v46 = vadd.f32 %v3456_v11, %v3455_v25  ;;  %v3494_v4 = vadd.f32 %v3493_v42, %v3492_v12 }
 0x304   :  { %15185 = vst [vmem:[#allocation90_spill] sm:$0xff] %v11349_v19  ;;  %v3277_v61 = vadd.f32 %v3276_v30, %v11349_v19  ;;  %v3400_v44 = vmul.f32 %v11349_v19, %v11349_v19  ;;  %v11354_v29 = vpop.f32.mrb[86].mxu1  ;;  %v3574_v39 = vmul.f32 %v11334_v2, %v11334_v2  ;;  %4814 = vmatpush1.bf16.msra.mxu0 %v8779_v9  ;;  %v8782_v30 = vld [vmem:[%s14900_s4 + $0x248] ss:$12 sps:$4 sm:$0xff]  }
 0x305   :  { %15186 = vst [vmem:[#allocation91_spill] sm:$0xff] %v11354_v29  ;;  %v3520_v7 = vadd.f32 %v3519_v51, %v3399_v43  ;;  %v3241_v50 = vadd.f32 %v3240_v47, %v11354_v29  ;;  %v3403_v8 = vmul.f32 %v11354_v29, %v11354_v29  ;;  %v11361_v58 = vpop.f32.mrb[87].mxu1  ;;  %v3569_v25 = vmul.f32 0.00390625, %v3457_v46  ;;  %7673 = vmatprep.subr.bf16.mxu1 %v8782_v30  ;;  %v8786_v47 = vld [vmem:[%s14900_s4 + $0x184] ss:$12 sps:$4 sm:$0xff]  }
 0x306   :  { %15187 = vst [vmem:[#allocation92_spill] sm:$0xff] %v11361_v58  ;;  %v3557_v12 = vadd.f32 %v3556_v36, %v3400_v44  ;;  %v3278_v11 = vadd.f32 %v3277_v61, %v11361_v58  ;;  %v3404_v42 = vmul.f32 %v11361_v58, %v11361_v58  ;;  %v3570_v9 = vmul.f32 0.00390625, %v3494_v4  ;;  %4976 = vmatprep.subr.bf16.mxu0 %v8786_v47 }
 0x307   :  { %v3521_v51 = vadd.f32 %v3520_v7, %v3403_v8  ;;  %v3577_v43 = vsub.f32 %v3569_v25, %v3573_v6 }
 0x308   :  { %v3558_v29 = vadd.f32 %v3557_v12, %v3404_v42  ;;  %v3578_v46 = vsub.f32 %v3570_v9, %v3574_v39 }
 0x309   :  { %v3581_v19 = vadd.f32 1e-05, %v3577_v43 }
 0x30a   :  { %v11372_v40 = vpop.f32.mrb[88].mxu1  ;;  %v3582_v36 = vadd.f32 1e-05, %v3578_v46 }
 0x30b   :  { %15188 = vst [vmem:[#allocation93_spill] sm:$0xff] %v11372_v40  ;;  %v3242_v61 = vadd.f32 %v3241_v50, %v11372_v40  ;;  %v3407_v44 = vmul.f32 %v11372_v40, %v11372_v40  ;;  %v11377_v4 = vpop.f32.mrb[89].mxu1  ;;  %8870 = vrsqrt.f32 %v3581_v19 }
 0x30c   :  { %15189 = vst [vmem:[#allocation94_spill] sm:$0xff] %v11377_v4  ;;  %v3279_v6 = vadd.f32 %v3278_v11, %v11377_v4  ;;  %v3408_v7 = vmul.f32 %v11377_v4, %v11377_v4  ;;  %v11382_v8 = vpop.f32.mrb[90].mxu1  ;;  %8872 = vrsqrt.f32 %v3582_v36 }
 0x30d   :  { %15190 = vst [vmem:[#allocation95_spill] sm:$0xff] %v11382_v8  ;;  %v3522_v39 = vadd.f32 %v3521_v51, %v3407_v44  ;;  %v3243_v25 = vadd.f32 %v3242_v61, %v11382_v8  ;;  %v3411_v50 = vmul.f32 %v11382_v8, %v11382_v8  ;;  %v11387_v30 = vpop.f32.mrb[91].mxu1 }
 0x30e   :  { %15191 = vst [vmem:[#allocation96_spill] sm:$0xff] %v11387_v30  ;;  %v3559_v12 = vadd.f32 %v3558_v29, %v3408_v7  ;;  %v3280_v42 = vadd.f32 %v3279_v6, %v11387_v30  ;;  %v3412_v19 = vmul.f32 %v11387_v30, %v11387_v30 }
 0x30f   :  { %v3523_v11 = vadd.f32 %v3522_v39, %v3411_v50 }
 0x310   :  { %v3560_v9 = vadd.f32 %v3559_v12, %v3412_v19 }
 0x312   :  { %v11392_v43 = vpop.f32.mrb[92].mxu1 }
 0x313   :  { %15192 = vst [vmem:[#allocation97_spill] sm:$0xff] %v11392_v43  ;;  %v3244_v47 = vadd.f32 %v3243_v25, %v11392_v43  ;;  %v3415_v51 = vmul.f32 %v11392_v43, %v11392_v43  ;;  %v11397_v46 = vpop.f32.mrb[93].mxu1 }
 0x314   :  { %15193 = vst [vmem:[#allocation98_spill] sm:$0xff] %v11397_v46  ;;  %v3281_v36 = vadd.f32 %v3280_v42, %v11397_v46  ;;  %v3416_v29 = vmul.f32 %v11397_v46, %v11397_v46  ;;  %v11402_v61 = vpop.f32.mrb[94].mxu1 }
 0x315   :  { %15194 = vst [vmem:[#allocation99_spill] sm:$0xff] %v11402_v61  ;;  %v8871_v44 = vpop.eup %8870  ;;  %v3524_v6 = vadd.f32 %v3523_v11, %v3415_v51  ;;  %v3245_v7 = vadd.f32 %v3244_v47, %v11402_v61  ;;  %v3419_v39 = vmul.f32 %v11402_v61, %v11402_v61  ;;  %v11407_v25 = vpop.f32.mrb[95].mxu1 }
 0x316   :  { %v8873_v50 = vpop.eup %8872  ;;  %v3561_v12 = vadd.f32 %v3560_v9, %v3416_v29  ;;  %v3282_v19 = vadd.f32 %v3281_v36, %v11407_v25  ;;  %v3420_v42 = vmul.f32 %v11407_v25, %v11407_v25 }
 0x317   :  { %v3246_v43 = vrot.slane %v3245_v7, 4  ;;  %v3525_v46 = vadd.f32 %v3524_v6, %v3419_v39  ;;  %v3593_v30 = vcombine.low %v8871_v44, %v8873_v50 }
 0x318   :  { %v3283_v8 = vrot.slane %v3282_v19, 4  ;;  %v3562_v4 = vadd.f32 %v3561_v12, %v3420_v42 }
 0x319   :  { %v3247_v11 = vadd.f32 %v3246_v43, %v3245_v7  ;;  %v3526_v51 = vrot.slane %v3525_v46, 4 }
 0x31a   :  { %v3284_v47 = vadd.f32 %v3283_v8, %v3282_v19  ;;  %v3563_v40 = vrot.slane %v3562_v4, 4 }
 0x31b   :  { %v3248_v58 = vrot.slane %v3247_v11, 2  ;;  %v3527_v61 = vadd.f32 %v3526_v51, %v3525_v46 }
 0x31c   :  { %v3285_v22 = vrot.slane %v3284_v47, 2  ;;  %v3564_v3 = vadd.f32 %v3563_v40, %v3562_v4 }
 0x31d   :  { %v3249_v63 = vadd.f32 %v3248_v58, %v3247_v11  ;;  %v3528_v9 = vrot.slane %v3527_v61, 2 }
 0x31e   :  { %v3286_v29 = vadd.f32 %v3285_v22, %v3284_v47  ;;  %v3565_v36 = vrot.slane %v3564_v3, 2 }
 0x31f   :  { %v3250_v32 = vrot.slane %v3249_v63, 1  ;;  %v3529_v55 = vadd.f32 %v3528_v9, %v3527_v61  ;;  %v9039_v61 = vmov 1966171168  }
 0x320   :  { %v3287_v59 = vrot.slane %v3286_v29, 1  ;;  %v3566_v34 = vadd.f32 %v3565_v36, %v3564_v3  ;;  %v3596_v3 = vunpack.c.l.s4 %v9039_v61 }
 0x321   :  { %v3251_v6 = vadd.f32 %v3250_v32, %v3249_v63  ;;  %v3530_v44 = vrot.slane %v3529_v55, 1  ;;  %v15007_v63 = vlaneseq }
 0x322   :  { %v3288_v39 = vadd.f32 %v3287_v59, %v3286_v29  ;;  %v3567_v50 = vrot.slane %v3566_v34, 1  ;;  %v3597_v32 = vunpack.c.0.s8 %v3596_v3  ;;  %v15199_v3 = vld [vmem:[#allocation23_spill] sm:$0xff] }
 0x323   :  { %v3291_v43 = vmul.f32 0.00390625, %v3251_v6  ;;  %v3531_v7 = vadd.f32 %v3530_v44, %v3529_v55  ;;  %v11413_v59 = vshrl.u32 %v15007_v63, 7  ;;  %v3139_v6 = vld [vmem:[%s14898_s2] sm:$0xf]  ;;  %v15216_v63 = vld [vmem:[#allocation34_spill] sm:$0xff] }
 0x324   :  { %v3292_v8 = vmul.f32 0.00390625, %v3288_v39  ;;  %v3568_v12 = vadd.f32 %v3567_v50, %v3566_v34 }
 0x325   :  { %v3571_v19 = vmul.f32 0.00390625, %v3531_v7  ;;  %v3575_v46 = vmul.f32 %v3291_v43, %v3291_v43  ;;  %v11416_v34 = vsub.s32 %v3597_v32, %v11413_v59  ;;  %v11424_v44 = vsub.s32 0, %v11413_v59 }
 0x326   :  { %v3572_v42 = vmul.f32 0.00390625, %v3568_v12  ;;  %v3576_v40 = vmul.f32 %v3292_v8, %v3292_v8  ;;  %v11428_v50 = vsub.s32 1, %v11413_v59  ;;  %v11431_v7 = vsub.s32 2, %v11413_v59 }
 0x327   :  { %v3579_v58 = vsub.f32 %v3571_v19, %v3575_v46  ;;  %15195 = vst [vmem:[#allocation100_spill] sm:$0xff] %v11416_v34  ;;  %v3601_v9 = vrot.slane %v3593_v30, %v11416_v34  ;;  %15196 = vst [vmem:[#allocation101_spill] sm:$0xff] %v11424_v44  ;;  %v3634_v30 = vsub.s32 3, %v11413_v59  ;;  %v15200_v59 = vld [vmem:[#allocation24_spill] sm:$0xff] }
 0x328   :  { %v3580_v4 = vsub.f32 %v3572_v42, %v3576_v40  ;;  %15197 = vst [vmem:[#allocation102_spill] sm:$0xff] %v11428_v50  ;;  %15198 = vst [vmem:[#allocation103_spill] sm:$0xff] %v11431_v7 }
 0x329   :  { %v3583_v22 = vadd.f32 1e-05, %v3579_v58 }
 0x32a   :  { %v3584_v11 = vadd.f32 1e-05, %v3580_v4 }
 0x32b   :  { %8874 = vrsqrt.f32 %v3583_v22 }
 0x32c   :  { %8876 = vrsqrt.f32 %v3584_v11 }
 0x335   :  { %v8875_v55 = vpop.eup %8874 }
 0x336   :  { %v8877_v51 = vpop.eup %8876 }
 0x337   :  { %v3594_v47 = vcombine.low %v8875_v55, %v8877_v51  ;;  %v15201_v51 = vld [vmem:[#allocation27_spill] sm:$0xff] }
 0x339   :  { %v3608_v29 = vrot.slane %v3594_v47, %v11416_v34 }
 0x33b   :  { %v3609_v36 = vcombine.low %v3601_v9, %v3608_v29  ;;  %v15203_v9 = vld [vmem:[#allocation25_spill] sm:$0xff]  ;;  %v15204_v29 = vld [vmem:[#allocation26_spill] sm:$0xff] }
 0x33d   :  { %v3616_v39 = vrot.slane %v3609_v36, %v11416_v34 }
 0x33f   :  { %v3618_v12 = vmul.f32 %v3616_v39, %v3139_v6  ;;  %v15205_v6 = vld [vmem:[#allocation29_spill] sm:$0xff] }
 0x341   :  { %v11435_v19 = vrot.slane %v3618_v12, %v11424_v44  ;;  %v11438_v46 = vrot.slane %v3618_v12, %v11428_v50  ;;  %v11441_v42 = vrot.slane %v3618_v12, %v11431_v7  ;;  %v11443_v40 = vrot.slane %v3618_v12, %v3634_v30  ;;  %v15206_v12 = vld [vmem:[#allocation30_spill] sm:$0xff] }
 0x343   :  { %v3640_v58 = vmul.f32 %v11435_v19, %v11326_v18  ;;  %v3641_v4 = vmul.f32 %v11438_v46, %v11334_v2  ;;  %v3642_v22 = vmul.f32 %v11441_v42, %v3291_v43  ;;  %v3643_v11 = vmul.f32 %v11443_v40, %v3292_v8  ;;  %v15202_v43 = vld [vmem:[#allocation28_spill] sm:$0xff] }
 0x344   :  { %v3801_v61 = vmul.f32 %v11443_v40, %v11407_v25  ;;  %v11455_v32 = vmul.f32 %v11435_v19, %v15199_v3  ;;  %v11459_v55 = vmul.f32 %v11438_v46, %v15200_v59  ;;  %v11463_v18 = vmul.f32 %v11441_v42, %v15201_v51  ;;  %v15209_v59 = vld [vmem:[#allocation32_spill] sm:$0xff] }
 0x345   :  { %v3648_v2 = vcombine.low %v3640_v58, %v3641_v4  ;;  %v3649_v47 = vcombine.low %v3642_v22, %v3643_v11  ;;  %v11467_v8 = vmul.f32 %v11443_v40, %v15202_v43  ;;  %v11471_v25 = vmul.f32 %v11435_v19, %v15203_v9  ;;  %v15207_v4 = vld [vmem:[#allocation31_spill] sm:$0xff] }
 0x346   :  { %v11475_v36 = vmul.f32 %v11438_v46, %v15204_v29  ;;  %v11479_v39 = vmul.f32 %v11441_v42, %v15205_v6  ;;  %v11483_v58 = vmul.f32 %v11443_v40, %v15206_v12  ;;  %v11487_v22 = vmul.f32 %v11435_v19, %v15207_v4  ;;  %v15211_v43 = vld [vmem:[#allocation35_spill] sm:$0xff]  ;;  %v15213_v29 = vld [vmem:[#allocation36_spill] sm:$0xff]  ;;  %v15215_v12 = vld [vmem:[#allocation33_spill] sm:$0xff] }
 0x347   :  { %v3656_v11 = vrot.slane %v3648_v2, %v11416_v34  ;;  %v3663_v3 = vrot.slane %v3649_v47, %v11416_v34  ;;  %v11493_v51 = vmul.f32 %v11438_v46, %v15209_v59  ;;  %v11497_v9 = vmul.f32 %v11441_v42, %v15211_v43  ;;  %v15218_v47 = vld [vmem:[#allocation37_spill] sm:$0xff] }
 0x348   :  { %15208 = vst [vmem:[#allocation23_spill] sm:$0xff] %v11487_v22  ;;  %v11501_v6 = vmul.f32 %v11443_v40, %v15213_v29  ;;  %v11505_v4 = vmul.f32 %v11435_v19, %v15215_v12  ;;  %v11509_v2 = vmul.f32 %v11438_v46, %v15216_v63  ;;  %v11513_v59 = vmul.f32 %v11441_v42, %v15218_v47  ;;  %v15220_v22 = vld [vmem:[#allocation38_spill] sm:$0xff]  ;;  %v3140_v63 = vld [vmem:[%s14899_s3] sm:$0xf] }
 0x349   :  { %15210 = vst [vmem:[#allocation24_spill] sm:$0xff] %v11493_v51  ;;  %15212 = vst [vmem:[#allocation27_spill] sm:$0xff] %v11497_v9  ;;  %v3664_v51 = vcombine.low %v3656_v11, %v3663_v3  ;;  %v11517_v43 = vmul.f32 %v11443_v40, %v15220_v22  ;;  %v15222_v9 = vld [vmem:[#allocation39_spill] sm:$0xff]  ;;  %v15228_v11 = vld [vmem:[#allocation44_spill] sm:$0xff] }
 0x34a   :  { %15214 = vst [vmem:[#allocation28_spill] sm:$0xff] %v11501_v6  ;;  %15217 = vst [vmem:[#allocation25_spill] sm:$0xff] %v11509_v2  ;;  %v11521_v29 = vmul.f32 %v11435_v19, %v15222_v9  ;;  %v15224_v6 = vld [vmem:[#allocation40_spill] sm:$0xff]  ;;  %v15226_v2 = vld [vmem:[#allocation43_spill] sm:$0xff]  ;;  %v11536_v22 = vmul.f32 %v11443_v40, %v15228_v11 }
 0x34b   :  { %15219 = vst [vmem:[#allocation26_spill] sm:$0xff] %v11513_v59  ;;  %15221 = vst [vmem:[#allocation29_spill] sm:$0xff] %v11517_v43  ;;  %v11525_v12 = vmul.f32 %v11438_v46, %v15224_v6  ;;  %v11532_v47 = vmul.f32 %v11441_v42, %v15226_v2  ;;  %v15230_v3 = vld [vmem:[#allocation41_spill] sm:$0xff]  ;;  %v15236_v2 = vld [vmem:[#allocation46_spill] sm:$0xff] }
 0x34c   :  { %15223 = vst [vmem:[#allocation30_spill] sm:$0xff] %v11521_v29  ;;  %15229 = vst [vmem:[#allocation35_spill] sm:$0xff] %v11536_v22  ;;  %v11540_v9 = vmul.f32 %v11435_v19, %v15230_v3  ;;  %v15232_v29 = vld [vmem:[#allocation42_spill] sm:$0xff]  ;;  %v15234_v43 = vld [vmem:[#allocation45_spill] sm:$0xff] }
 0x34d   :  { %15225 = vst [vmem:[#allocation31_spill] sm:$0xff] %v11525_v12  ;;  %15227 = vst [vmem:[#allocation32_spill] sm:$0xff] %v11532_v47  ;;  %v11544_v6 = vmul.f32 %v11438_v46, %v15232_v29  ;;  %v3671_v12 = vrot.slane %v3664_v51, %v11416_v34  ;;  %v11549_v59 = vmul.f32 %v11441_v42, %v15234_v43  ;;  %v15238_v11 = vld [vmem:[#allocation47_spill] sm:$0xff]  ;;  %v15240_v3 = vld [vmem:[#allocation48_spill] sm:$0xff] }
 0x34e   :  { %15231 = vst [vmem:[#allocation36_spill] sm:$0xff] %v11540_v9  ;;  %v11553_v47 = vmul.f32 %v11443_v40, %v15236_v2  ;;  %v11557_v22 = vmul.f32 %v11435_v19, %v15238_v11  ;;  %v11561_v9 = vmul.f32 %v11438_v46, %v15240_v3  ;;  %v15242_v29 = vld [vmem:[#allocation51_spill] sm:$0xff]  ;;  %v15244_v51 = vld [vmem:[#allocation52_spill] sm:$0xff]  ;;  %v15246_v34 = vld [vmem:[#allocation49_spill] sm:$0xff] }
 0x34f   :  { %15233 = vst [vmem:[#allocation33_spill] sm:$0xff] %v11544_v6  ;;  %15235 = vst [vmem:[#allocation34_spill] sm:$0xff] %v11549_v59  ;;  %v11565_v6 = vmul.f32 %v11441_v42, %v15242_v29  ;;  %v11569_v43 = vmul.f32 %v11443_v40, %v15244_v51  ;;  %v11573_v2 = vmul.f32 %v11435_v19, %v15246_v34  ;;  %v15247_v59 = vld [vmem:[#allocation50_spill] sm:$0xff] }
 0x350   :  { %15237 = vst [vmem:[#allocation37_spill] sm:$0xff] %v11553_v47  ;;  %15239 = vst [vmem:[#allocation38_spill] sm:$0xff] %v11557_v22  ;;  %v3673_v47 = vsub.f32 %v3140_v63, %v3671_v12  ;;  %v11577_v11 = vmul.f32 %v11438_v46, %v15247_v59  ;;  %v15248_v22 = vld [vmem:[#allocation53_spill] sm:$0xff]  ;;  %v15255_v12 = vld [vmem:[#allocation59_spill] sm:$0xff] }
 0x351   :  { %15241 = vst [vmem:[#allocation39_spill] sm:$0xff] %v11561_v9  ;;  %15243 = vst [vmem:[#allocation40_spill] sm:$0xff] %v11565_v6  ;;  %v11581_v3 = vmul.f32 %v11441_v42, %v15248_v22  ;;  %v15250_v9 = vld [vmem:[#allocation54_spill] sm:$0xff]  ;;  %v15251_v6 = vld [vmem:[#allocation55_spill] sm:$0xff]  ;;  %v11597_v59 = vmul.f32 %v11441_v42, %v15255_v12 }
 0x352   :  { %15245 = vst [vmem:[#allocation43_spill] sm:$0xff] %v11569_v43  ;;  %v11585_v29 = vmul.f32 %v11443_v40, %v15250_v9  ;;  %v11589_v51 = vmul.f32 %v11435_v19, %v15251_v6  ;;  %v15253_v43 = vld [vmem:[#allocation56_spill] sm:$0xff]  ;;  %v11607_v9 = vrot.slane %v3673_v47, %v11428_v50  ;;  %v11610_v6 = vrot.slane %v3673_v47, %v11431_v7  ;;  %v15261_v12 = vld [vmem:[#allocation58_spill] sm:$0xff] }
 0x353   :  { %15249 = vst [vmem:[#allocation44_spill] sm:$0xff] %v11581_v3  ;;  %v11593_v34 = vmul.f32 %v11438_v46, %v15253_v43  ;;  %15256 = vst [vmem:[#allocation45_spill] sm:$0xff] %v11597_v59  ;;  %v15257_v63 = vld [vmem:[#allocation60_spill] sm:$0xff]  ;;  %v11604_v3 = vrot.slane %v3673_v47, %v11424_v44  ;;  %v15259_v43 = vld [vmem:[#allocation57_spill] sm:$0xff]  ;;  %v11620_v59 = vmul.f32 %v11438_v46, %v15261_v12 }
 0x354   :  { %15252 = vst [vmem:[#allocation41_spill] sm:$0xff] %v11589_v51  ;;  %v11601_v22 = vmul.f32 %v11443_v40, %v15257_v63  ;;  %v11612_v51 = vrot.slane %v3673_v47, %v3634_v30  ;;  %v15263_v63 = vld [vmem:[#allocation61_spill] sm:$0xff]  ;;  %v15267_v30 = vld [vmem:[#allocation63_spill] sm:$0xff] }
 0x355   :  { %15254 = vst [vmem:[#allocation42_spill] sm:$0xff] %v11593_v34  ;;  %v11616_v34 = vmul.f32 %v11435_v19, %v15259_v43  ;;  %15262 = vst [vmem:[#allocation48_spill] sm:$0xff] %v11620_v59  ;;  %v11624_v44 = vmul.f32 %v11441_v42, %v15263_v63  ;;  %v11635_v47 = vmul.f32 %v11435_v19, %v15267_v30  ;;  %v15269_v43 = vld [vmem:[#allocation64_spill] sm:$0xff]  ;;  %v15271_v12 = vld [vmem:[#allocation67_spill] sm:$0xff] }
 0x356   :  { %15258 = vst [vmem:[#allocation46_spill] sm:$0xff] %v11601_v22  ;;  %v15265_v22 = vld [vmem:[#allocation62_spill] sm:$0xff]  ;;  %v11631_v7 = vadd.f32 %v11612_v51, %v3801_v61  ;;  %v11643_v59 = vmul.f32 %v11441_v42, %v15271_v12  ;;  %v15273_v63 = vld [vmem:[#allocation68_spill] sm:$0xff] }
 0x357   :  { %15260 = vst [vmem:[#allocation47_spill] sm:$0xff] %v11616_v34  ;;  %15264 = vst [vmem:[#allocation51_spill] sm:$0xff] %v11624_v44  ;;  %v11628_v50 = vmul.f32 %v11443_v40, %v15265_v22  ;;  %v11639_v34 = vmul.f32 %v11438_v46, %v15269_v43  ;;  %v11647_v44 = vmul.f32 %v11443_v40, %v15273_v63  ;;  %v15275_v22 = vld [vmem:[#allocation65_spill] sm:$0xff] }
 0x358   :  { %15266 = vst [vmem:[#allocation52_spill] sm:$0xff] %v11631_v7  ;;  %15268 = vst [vmem:[#allocation49_spill] sm:$0xff] %v11635_v47  ;;  %v11651_v61 = vmul.f32 %v11435_v19, %v15275_v22  ;;  %v15277_v7 = vld [vmem:[#allocation66_spill] sm:$0xff]  ;;  %v15279_v47 = vld [vmem:[#allocation69_spill] sm:$0xff] }
 0x359   :  { %15270 = vst [vmem:[#allocation50_spill] sm:$0xff] %v11639_v34  ;;  %15272 = vst [vmem:[#allocation53_spill] sm:$0xff] %v11643_v59  ;;  %v11655_v30 = vmul.f32 %v11438_v46, %v15277_v7  ;;  %v11659_v43 = vmul.f32 %v11441_v42, %v15279_v47  ;;  %v15281_v34 = vld [vmem:[#allocation70_spill] sm:$0xff]  ;;  %v15283_v59 = vld [vmem:[#allocation71_spill] sm:$0xff] }
 0x35a   :  { %15274 = vst [vmem:[#allocation54_spill] sm:$0xff] %v11647_v44  ;;  %15276 = vst [vmem:[#allocation55_spill] sm:$0xff] %v11651_v61  ;;  %v11663_v12 = vmul.f32 %v11443_v40, %v15281_v34  ;;  %v11667_v63 = vmul.f32 %v11435_v19, %v15283_v59  ;;  %v15285_v44 = vld [vmem:[#allocation72_spill] sm:$0xff]  ;;  %v15287_v61 = vld [vmem:[#allocation75_spill] sm:$0xff] }
 0x35b   :  { %15278 = vst [vmem:[#allocation56_spill] sm:$0xff] %v11655_v30  ;;  %15280 = vst [vmem:[#allocation59_spill] sm:$0xff] %v11659_v43  ;;  %v11671_v22 = vmul.f32 %v11438_v46, %v15285_v44  ;;  %v11675_v7 = vmul.f32 %v11441_v42, %v15287_v61  ;;  %v15289_v30 = vld [vmem:[#allocation76_spill] sm:$0xff]  ;;  %v15291_v43 = vld [vmem:[#allocation73_spill] sm:$0xff] }
 0x35c   :  { %15282 = vst [vmem:[#allocation60_spill] sm:$0xff] %v11663_v12  ;;  %15284 = vst [vmem:[#allocation57_spill] sm:$0xff] %v11667_v63  ;;  %v11679_v47 = vmul.f32 %v11443_v40, %v15289_v30  ;;  %v11683_v34 = vmul.f32 %v11435_v19, %v15291_v43  ;;  %v15293_v12 = vld [vmem:[#allocation74_spill] sm:$0xff]  ;;  %v15295_v63 = vld [vmem:[#allocation77_spill] sm:$0xff] }
 0x35d   :  { %15286 = vst [vmem:[#allocation58_spill] sm:$0xff] %v11671_v22  ;;  %15288 = vst [vmem:[#allocation61_spill] sm:$0xff] %v11675_v7  ;;  %v11687_v59 = vmul.f32 %v11438_v46, %v15293_v12  ;;  %v11691_v44 = vmul.f32 %v11441_v42, %v15295_v63  ;;  %v15297_v22 = vld [vmem:[#allocation78_spill] sm:$0xff]  ;;  %v15299_v7 = vld [vmem:[#allocation79_spill] sm:$0xff] }
 0x35e   :  { %15290 = vst [vmem:[#allocation62_spill] sm:$0xff] %v11679_v47  ;;  %15292 = vst [vmem:[#allocation63_spill] sm:$0xff] %v11683_v34  ;;  %v11695_v61 = vmul.f32 %v11443_v40, %v15297_v22  ;;  %v11699_v30 = vmul.f32 %v11435_v19, %v15299_v7  ;;  %v15300_v47 = vld [vmem:[#allocation80_spill] sm:$0xff]  ;;  %v15301_v34 = vld [vmem:[#allocation83_spill] sm:$0xff] }
 0x35f   :  { %15294 = vst [vmem:[#allocation64_spill] sm:$0xff] %v11687_v59  ;;  %15296 = vst [vmem:[#allocation67_spill] sm:$0xff] %v11691_v44  ;;  %v11703_v43 = vmul.f32 %v11438_v46, %v15300_v47  ;;  %v11707_v12 = vmul.f32 %v11441_v42, %v15301_v34  ;;  %v15303_v59 = vld [vmem:[#allocation84_spill] sm:$0xff]  ;;  %v15305_v44 = vld [vmem:[#allocation81_spill] sm:$0xff]  ;;  %v11723_v47 = vmul.f32 %v11441_v42, %v11046_v53 }
 0x360   :  { %15298 = vst [vmem:[#allocation68_spill] sm:$0xff] %v11695_v61  ;;  %v11711_v63 = vmul.f32 %v11443_v40, %v15303_v59  ;;  %v11715_v22 = vmul.f32 %v11435_v19, %v15305_v44  ;;  %v15306_v61 = vld [vmem:[#allocation82_spill] sm:$0xff]  ;;  %v11727_v34 = vmul.f32 %v11443_v40, %v11054_v21  ;;  %v11743_v53 = vmul.f32 %v11443_v40, %v11100_v26 }
 0x361   :  { %15302 = vst [vmem:[#allocation65_spill] sm:$0xff] %v11707_v12  ;;  %v11719_v7 = vmul.f32 %v11438_v46, %v15306_v61  ;;  %v15307_v12 = vld [vmem:[#allocation5_spill] sm:$0xff]  ;;  %v11739_v61 = vmul.f32 %v11441_v42, %v11093_v41  ;;  %v11747_v21 = vmul.f32 %v10526_v0, %v11435_v19  ;;  %v11759_v41 = vmul.f32 %v11443_v40, %v11118_v13 }
 0x362   :  { %15304 = vst [vmem:[#allocation66_spill] sm:$0xff] %v11711_v63  ;;  %v11731_v59 = vmul.f32 %v15307_v12, %v11435_v19  ;;  %v15309_v63 = vld [vmem:[#allocation6_spill] sm:$0xff]  ;;  %v11751_v12 = vmul.f32 %v10529_v16, %v11438_v46  ;;  %v11763_v26 = vmul.f32 %v10532_v17, %v11435_v19  ;;  %v11767_v0 = vmul.f32 %v10535_v24, %v11438_v46 }
 0x363   :  { %v11735_v44 = vmul.f32 %v15309_v63, %v11438_v46  ;;  %15311 = vst [vmem:[#allocation71_spill] sm:$0xff] %v11747_v21  ;;  %v11755_v63 = vmul.f32 %v11441_v42, %v11110_v48  ;;  %v11771_v16 = vmul.f32 %v11441_v42, %v11149_v33  ;;  %v11775_v48 = vmul.f32 %v11443_v40, %v11156_v54  ;;  %v15355_v21 = vld [vmem:[#allocation17_spill] sm:$0xff] }
 0x364   :  { %15308 = vst [vmem:[#allocation69_spill] sm:$0xff] %v11731_v59  ;;  %15312 = vst [vmem:[#allocation72_spill] sm:$0xff] %v11751_v12  ;;  %v11779_v13 = vmul.f32 %v10538_v28, %v11435_v19  ;;  %v11783_v17 = vmul.f32 %v10541_v35, %v11438_v46  ;;  %v11787_v24 = vmul.f32 %v11441_v42, %v11166_v62  ;;  %v15357_v59 = vld [vmem:[#allocation18_spill] sm:$0xff]  ;;  %v15363_v12 = vld [vmem:[#allocation19_spill] sm:$0xff] }
 0x365   :  { %15310 = vst [vmem:[#allocation70_spill] sm:$0xff] %v11735_v44  ;;  %15313 = vst [vmem:[#allocation75_spill] sm:$0xff] %v11763_v26  ;;  %v11791_v33 = vmul.f32 %v11443_v40, %v11174_v20  ;;  %v11795_v54 = vmul.f32 %v10544_v37, %v11435_v19  ;;  %v11799_v28 = vmul.f32 %v10547_v45, %v11438_v46  ;;  %v15345_v26 = vld [vmem:[#allocation14_spill] sm:$0xff]  ;;  %v15365_v44 = vld [vmem:[#allocation20_spill] sm:$0xff] }
 0x366   :  { %15314 = vst [vmem:[#allocation76_spill] sm:$0xff] %v11767_v0  ;;  %15315 = vst [vmem:[#allocation73_spill] sm:$0xff] %v11779_v13  ;;  %v11803_v35 = vmul.f32 %v11441_v42, %v11204_v23  ;;  %v11807_v62 = vmul.f32 %v11443_v40, %v11210_v14  ;;  %v11811_v20 = vmul.f32 %v10550_v49, %v11435_v19  ;;  %v15343_v13 = vld [vmem:[#allocation13_spill] sm:$0xff]  ;;  %v15351_v0 = vld [vmem:[#allocation16_spill] sm:$0xff] }
 0x367   :  { %15316 = vst [vmem:[#allocation74_spill] sm:$0xff] %v11783_v17  ;;  %15317 = vst [vmem:[#allocation77_spill] sm:$0xff] %v11795_v54  ;;  %v11815_v37 = vmul.f32 %v10553_v52, %v11438_v46  ;;  %v11819_v45 = vmul.f32 %v11441_v42, %v11219_v38  ;;  %v11823_v23 = vmul.f32 %v11443_v40, %v11226_v15  ;;  %v15333_v54 = vld [vmem:[#allocation10_spill] sm:$0xff]  ;;  %v15349_v17 = vld [vmem:[#allocation15_spill] sm:$0xff] }
 0x368   :  { %15318 = vst [vmem:[#allocation78_spill] sm:$0xff] %v11799_v28  ;;  %15319 = vst [vmem:[#allocation79_spill] sm:$0xff] %v11811_v20  ;;  %v11827_v14 = vmul.f32 %v10556_v56, %v11435_v19  ;;  %v11831_v49 = vmul.f32 %v10559_v1, %v11438_v46  ;;  %v11835_v52 = vmul.f32 %v11441_v42, %v11249_v27  ;;  %v15331_v20 = vld [vmem:[#allocation9_spill] sm:$0xff]  ;;  %v15339_v28 = vld [vmem:[#allocation12_spill] sm:$0xff] }
 0x369   :  { %15320 = vst [vmem:[#allocation80_spill] sm:$0xff] %v11815_v37  ;;  %v11839_v38 = vmul.f32 %v11443_v40, %v11255_v31  ;;  %v11843_v15 = vmul.f32 %v10562_v5, %v11435_v19  ;;  %v11847_v56 = vmul.f32 %v10565_v10, %v11438_v46  ;;  %v11851_v1 = vmul.f32 %v11441_v42, %v11266_v57  ;;  %v15337_v37 = vld [vmem:[#allocation11_spill] sm:$0xff] }
 0x36a   :  { %15321 = vst [vmem:[#allocation83_spill] sm:$0xff] %v11827_v14  ;;  %15322 = vst [vmem:[#allocation84_spill] sm:$0xff] %v11831_v49  ;;  %v11855_v27 = vmul.f32 %v11443_v40, %v11277_v60  ;;  %v15325_v14 = vld [vmem:[#allocation7_spill] sm:$0xff]  ;;  %v15327_v49 = vld [vmem:[#allocation8_spill] sm:$0xff]  ;;  %v11875_v60 = vmul.f32 %v15331_v20, %v11435_v19  ;;  %v11895_v20 = vmul.f32 %v15339_v28, %v11438_v46 }
 0x36b   :  { %15323 = vst [vmem:[#allocation81_spill] sm:$0xff] %v11843_v15  ;;  %15324 = vst [vmem:[#allocation82_spill] sm:$0xff] %v11847_v56  ;;  %v11859_v31 = vmul.f32 %v15325_v14, %v11435_v19  ;;  %v11863_v5 = vmul.f32 %v15327_v49, %v11438_v46  ;;  %v15329_v15 = vld [vmem:[#allocation85_spill] sm:$0xff]  ;;  %v15330_v56 = vld [vmem:[#allocation86_spill] sm:$0xff]  ;;  %v11879_v14 = vmul.f32 %v15333_v54, %v11438_v46 }
 0x36c   :  { %v11867_v10 = vmul.f32 %v11441_v42, %v15329_v15  ;;  %v11871_v57 = vmul.f32 %v11443_v40, %v15330_v56  ;;  %15332 = vst [vmem:[#allocation7_spill] sm:$0xff] %v11875_v60  ;;  %v11891_v56 = vmul.f32 %v15337_v37, %v11435_v19  ;;  %15340 = vst [vmem:[#allocation86_spill] sm:$0xff] %v11895_v20  ;;  %v15341_v60 = vld [vmem:[#allocation89_spill] sm:$0xff]  ;;  %v15348_v20 = vld [vmem:[#allocation92_spill] sm:$0xff] }
 0x36d   :  { %15326 = vst [vmem:[#allocation5_spill] sm:$0xff] %v11859_v31  ;;  %15328 = vst [vmem:[#allocation6_spill] sm:$0xff] %v11863_v5  ;;  %v15335_v31 = vld [vmem:[#allocation87_spill] sm:$0xff]  ;;  %v15336_v5 = vld [vmem:[#allocation88_spill] sm:$0xff]  ;;  %v11899_v54 = vmul.f32 %v11441_v42, %v15341_v60  ;;  %v11911_v37 = vmul.f32 %v15345_v26, %v11438_v46  ;;  %v11919_v60 = vmul.f32 %v11443_v40, %v15348_v20 }
 0x36e   :  { %15334 = vst [vmem:[#allocation8_spill] sm:$0xff] %v11879_v14  ;;  %v11883_v49 = vmul.f32 %v11441_v42, %v15335_v31  ;;  %v11887_v15 = vmul.f32 %v11443_v40, %v15336_v5  ;;  %15338 = vst [vmem:[#allocation85_spill] sm:$0xff] %v11891_v56  ;;  %v15342_v14 = vld [vmem:[#allocation90_spill] sm:$0xff]  ;;  %v11907_v5 = vmul.f32 %v15343_v13, %v11435_v19  ;;  %v15347_v56 = vld [vmem:[#allocation91_spill] sm:$0xff] }
 0x36f   :  { %v11903_v31 = vmul.f32 %v11443_v40, %v15342_v14  ;;  %15346 = vst [vmem:[#allocation10_spill] sm:$0xff] %v11911_v37  ;;  %v11915_v28 = vmul.f32 %v11441_v42, %v15347_v56  ;;  %v11923_v14 = vmul.f32 %v15349_v17, %v11435_v19  ;;  %v11927_v13 = vmul.f32 %v15351_v0, %v11438_v46  ;;  %v15354_v37 = vld [vmem:[#allocation94_spill] sm:$0xff] }
 0x370   :  { %15344 = vst [vmem:[#allocation9_spill] sm:$0xff] %v11907_v5  ;;  %v15353_v5 = vld [vmem:[#allocation93_spill] sm:$0xff]  ;;  %v11935_v56 = vmul.f32 %v11443_v40, %v15354_v37  ;;  %v11939_v20 = vmul.f32 %v15355_v21, %v11435_v19  ;;  %v11943_v17 = vmul.f32 %v15357_v59, %v11438_v46  ;;  %v11955_v37 = vmul.f32 %v15363_v12, %v11435_v19 }
 0x371   :  { %15350 = vst [vmem:[#allocation87_spill] sm:$0xff] %v11923_v14  ;;  %15352 = vst [vmem:[#allocation88_spill] sm:$0xff] %v11927_v13  ;;  %v11931_v26 = vmul.f32 %v11441_v42, %v15353_v5  ;;  %v15359_v14 = vld [vmem:[#allocation95_spill] sm:$0xff]  ;;  %v15361_v13 = vld [vmem:[#allocation96_spill] sm:$0xff]  ;;  %v11959_v21 = vmul.f32 %v15365_v44, %v11438_v46 }
 0x372   :  { %15356 = vst [vmem:[#allocation11_spill] sm:$0xff] %v11939_v20  ;;  %15358 = vst [vmem:[#allocation12_spill] sm:$0xff] %v11943_v17  ;;  %v11947_v0 = vmul.f32 %v11441_v42, %v15359_v14  ;;  %v11951_v5 = vmul.f32 %v11443_v40, %v15361_v13  ;;  %v15367_v20 = vld [vmem:[#allocation97_spill] sm:$0xff]  ;;  %v15368_v17 = vld [vmem:[#allocation98_spill] sm:$0xff] }
 0x373   :  { %15364 = vst [vmem:[#allocation13_spill] sm:$0xff] %v11955_v37  ;;  %15366 = vst [vmem:[#allocation14_spill] sm:$0xff] %v11959_v21  ;;  %v11963_v59 = vmul.f32 %v11441_v42, %v15367_v20  ;;  %v11967_v14 = vmul.f32 %v11443_v40, %v15368_v17  ;;  %v15373_v37 = vld [vmem:[#allocation99_spill] sm:$0xff]  ;;  %v11983_v20 = vadd.f32 %v11604_v3, %v11455_v32  ;;  %v15391_v21 = vld [vmem:[#allocation32_spill] sm:$0xff] }
 0x374   :  { %15360 = vst [vmem:[#allocation89_spill] sm:$0xff] %v11947_v0  ;;  %15362 = vst [vmem:[#allocation90_spill] sm:$0xff] %v11951_v5  ;;  %v15369_v0 = vld [vmem:[#allocation21_spill] sm:$0xff]  ;;  %v15371_v5 = vld [vmem:[#allocation22_spill] sm:$0xff]  ;;  %v11979_v44 = vmul.f32 %v11441_v42, %v15373_v37  ;;  %v11987_v40 = vadd.f32 %v11607_v9, %v11459_v55  ;;  %v11999_v42 = vadd.f32 %v11604_v3, %v11471_v25 }
 0x375   :  { %v11971_v13 = vmul.f32 %v15369_v0, %v11435_v19  ;;  %v11975_v12 = vmul.f32 %v15371_v5, %v11438_v46  ;;  %v11991_v19 = vadd.f32 %v11610_v6, %v11463_v18  ;;  %v11995_v46 = vadd.f32 %v11612_v51, %v11467_v8  ;;  %v15376_v17 = vld [vmem:[#allocation23_spill] sm:$0xff]  ;;  %v15377_v0 = vld [vmem:[#allocation24_spill] sm:$0xff] }
 0x376   :  { %v12003_v32 = vadd.f32 %v11607_v9, %v11475_v36  ;;  %v12007_v55 = vadd.f32 %v11610_v6, %v11479_v39  ;;  %v12011_v18 = vadd.f32 %v11612_v51, %v11483_v58  ;;  %v12015_v8 = vadd.f32 %v11604_v3, %v15376_v17  ;;  %v15378_v5 = vld [vmem:[#allocation27_spill] sm:$0xff]  ;;  %v15380_v37 = vld [vmem:[#allocation28_spill] sm:$0xff] }
 0x377   :  { %15370 = vst [vmem:[#allocation91_spill] sm:$0xff] %v11971_v13  ;;  %15372 = vst [vmem:[#allocation92_spill] sm:$0xff] %v11975_v12  ;;  %v12019_v25 = vadd.f32 %v11607_v9, %v15377_v0  ;;  %v12023_v36 = vadd.f32 %v11610_v6, %v15378_v5  ;;  %v12027_v39 = vadd.f32 %v11612_v51, %v15380_v37  ;;  %v15383_v13 = vld [vmem:[#allocation26_spill] sm:$0xff]  ;;  %v15385_v12 = vld [vmem:[#allocation29_spill] sm:$0xff] }
 0x378   :  { %15374 = vst [vmem:[#allocation15_spill] sm:$0xff] %v11995_v46  ;;  %15375 = vst [vmem:[#allocation16_spill] sm:$0xff] %v12011_v18  ;;  %v12031_v58 = vadd.f32 %v11604_v3, %v11505_v4  ;;  %v15382_v18 = vld [vmem:[#allocation25_spill] sm:$0xff]  ;;  %v12039_v0 = vadd.f32 %v11610_v6, %v15383_v13  ;;  %v12043_v5 = vadd.f32 %v11612_v51, %v15385_v12  ;;  %v15393_v46 = vld [vmem:[#allocation35_spill] sm:$0xff] }
 0x379   :  { %15379 = vst [vmem:[#allocation93_spill] sm:$0xff] %v12023_v36  ;;  %15381 = vst [vmem:[#allocation94_spill] sm:$0xff] %v12027_v39  ;;  %v12035_v17 = vadd.f32 %v11607_v9, %v15382_v18  ;;  %v15387_v36 = vld [vmem:[#allocation30_spill] sm:$0xff]  ;;  %v15389_v39 = vld [vmem:[#allocation31_spill] sm:$0xff]  ;;  %v12055_v18 = vadd.f32 %v11610_v6, %v15391_v21  ;;  %v12059_v13 = vadd.f32 %v11612_v51, %v15393_v46 }
 0x37a   :  { %15384 = vst [vmem:[#allocation17_spill] sm:$0xff] %v12039_v0  ;;  %15386 = vst [vmem:[#allocation18_spill] sm:$0xff] %v12043_v5  ;;  %v12047_v37 = vadd.f32 %v11604_v3, %v15387_v36  ;;  %v12051_v4 = vadd.f32 %v11607_v9, %v15389_v39  ;;  %v15395_v0 = vld [vmem:[#allocation36_spill] sm:$0xff]  ;;  %v15397_v5 = vld [vmem:[#allocation33_spill] sm:$0xff] }
 0x37b   :  { %15392 = vst [vmem:[#allocation19_spill] sm:$0xff] %v12055_v18  ;;  %15394 = vst [vmem:[#allocation20_spill] sm:$0xff] %v12059_v13  ;;  %v12063_v12 = vadd.f32 %v11604_v3, %v15395_v0  ;;  %v12067_v36 = vadd.f32 %v11607_v9, %v15397_v5  ;;  %v15403_v18 = vld [vmem:[#allocation38_spill] sm:$0xff]  ;;  %v15404_v13 = vld [vmem:[#allocation39_spill] sm:$0xff] }
 0x37c   :  { %15388 = vst [vmem:[#allocation95_spill] sm:$0xff] %v12047_v37  ;;  %15390 = vst [vmem:[#allocation96_spill] sm:$0xff] %v12051_v4  ;;  %v15399_v37 = vld [vmem:[#allocation34_spill] sm:$0xff]  ;;  %v15401_v4 = vld [vmem:[#allocation37_spill] sm:$0xff]  ;;  %v12079_v46 = vadd.f32 %v11604_v3, %v15403_v18  ;;  %v12083_v0 = vadd.f32 %v11607_v9, %v15404_v13  ;;  %v12099_v18 = vadd.f32 %v11607_v9, %v11577_v11 }
 0x37d   :  { %15396 = vst [vmem:[#allocation97_spill] sm:$0xff] %v12063_v12  ;;  %15398 = vst [vmem:[#allocation98_spill] sm:$0xff] %v12067_v36  ;;  %v12071_v39 = vadd.f32 %v11610_v6, %v15399_v37  ;;  %v12075_v21 = vadd.f32 %v11612_v51, %v15401_v4  ;;  %v15405_v12 = vld [vmem:[#allocation40_spill] sm:$0xff]  ;;  %v15407_v36 = vld [vmem:[#allocation43_spill] sm:$0xff]  ;;  %v12095_v4 = vadd.f32 %v11604_v3, %v11573_v2 }
 0x37e   :  { %v12087_v5 = vadd.f32 %v11610_v6, %v15405_v12  ;;  %v12091_v37 = vadd.f32 %v11612_v51, %v15407_v36  ;;  %v12107_v12 = vadd.f32 %v11612_v51, %v11585_v29 }
 0x37f   :  { %15400 = vst [vmem:[#allocation21_spill] sm:$0xff] %v12071_v39  ;;  %15402 = vst [vmem:[#allocation22_spill] sm:$0xff] %v12075_v21  ;;  %v15410_v39 = vld [vmem:[#allocation44_spill] sm:$0xff]  ;;  %v15416_v21 = vld [vmem:[#allocation45_spill] sm:$0xff] }
 0x380   :  { %15406 = vst [vmem:[#allocation99_spill] sm:$0xff] %v12087_v5  ;;  %15408 = vst [vmem:[#allocation23_spill] sm:$0xff] %v12091_v37  ;;  %v12103_v13 = vadd.f32 %v11610_v6, %v15410_v39  ;;  %v15413_v5 = vld [vmem:[#allocation41_spill] sm:$0xff]  ;;  %v15415_v37 = vld [vmem:[#allocation42_spill] sm:$0xff]  ;;  %v12119_v11 = vadd.f32 %v11610_v6, %v15416_v21  ;;  %v12139_v21 = vadd.f32 %v11612_v51, %v11628_v50 }
 0x381   :  { %15409 = vst [vmem:[#allocation24_spill] sm:$0xff] %v12095_v4  ;;  %15412 = vst [vmem:[#allocation28_spill] sm:$0xff] %v12107_v12  ;;  %v12111_v36 = vadd.f32 %v11604_v3, %v15413_v5  ;;  %v12115_v2 = vadd.f32 %v11607_v9, %v15415_v37  ;;  %v15418_v4 = vld [vmem:[#allocation46_spill] sm:$0xff]  ;;  %v15422_v12 = vld [vmem:[#allocation48_spill] sm:$0xff] }
 0x382   :  { %15411 = vst [vmem:[#allocation27_spill] sm:$0xff] %v12103_v13  ;;  %15417 = vst [vmem:[#allocation26_spill] sm:$0xff] %v12119_v11  ;;  %v12123_v39 = vadd.f32 %v11612_v51, %v15418_v4  ;;  %v15420_v13 = vld [vmem:[#allocation47_spill] sm:$0xff]  ;;  %v12131_v5 = vadd.f32 %v11607_v9, %v15422_v12  ;;  %v15427_v11 = vld [vmem:[#allocation49_spill] sm:$0xff] }
 0x383   :  { %15414 = vst [vmem:[#allocation25_spill] sm:$0xff] %v12111_v36  ;;  %v12127_v29 = vadd.f32 %v11604_v3, %v15420_v13  ;;  %v15424_v36 = vld [vmem:[#allocation51_spill] sm:$0xff]  ;;  %15426 = vst [vmem:[#allocation35_spill] sm:$0xff] %v12139_v21  ;;  %v12143_v4 = vadd.f32 %v11604_v3, %v15427_v11  ;;  %v15437_v21 = vld [vmem:[#allocation56_spill] sm:$0xff] }
 0x384   :  { %15419 = vst [vmem:[#allocation29_spill] sm:$0xff] %v12123_v39  ;;  %15423 = vst [vmem:[#allocation31_spill] sm:$0xff] %v12131_v5  ;;  %v12135_v37 = vadd.f32 %v11610_v6, %v15424_v36  ;;  %v15429_v39 = vld [vmem:[#allocation50_spill] sm:$0xff]  ;;  %v12163_v11 = vadd.f32 %v11607_v9, %v15437_v21 }
 0x385   :  { %15421 = vst [vmem:[#allocation30_spill] sm:$0xff] %v12127_v29  ;;  %15428 = vst [vmem:[#allocation36_spill] sm:$0xff] %v12143_v4  ;;  %v12147_v13 = vadd.f32 %v11607_v9, %v15429_v39  ;;  %v15431_v29 = vld [vmem:[#allocation53_spill] sm:$0xff]  ;;  %v15433_v5 = vld [vmem:[#allocation54_spill] sm:$0xff] }
 0x386   :  { %15425 = vst [vmem:[#allocation32_spill] sm:$0xff] %v12135_v37  ;;  %v12151_v12 = vadd.f32 %v11610_v6, %v15431_v29  ;;  %v12155_v36 = vadd.f32 %v11612_v51, %v15433_v5  ;;  %v15435_v37 = vld [vmem:[#allocation55_spill] sm:$0xff]  ;;  %15438 = vst [vmem:[#allocation39_spill] sm:$0xff] %v12163_v11  ;;  %v15449_v11 = vld [vmem:[#allocation62_spill] sm:$0xff] }
 0x387   :  { %15430 = vst [vmem:[#allocation33_spill] sm:$0xff] %v12147_v13  ;;  %v12159_v50 = vadd.f32 %v11604_v3, %v15435_v37  ;;  %v15439_v4 = vld [vmem:[#allocation59_spill] sm:$0xff]  ;;  %v15441_v13 = vld [vmem:[#allocation60_spill] sm:$0xff] }
 0x388   :  { %15432 = vst [vmem:[#allocation34_spill] sm:$0xff] %v12151_v12  ;;  %15434 = vst [vmem:[#allocation37_spill] sm:$0xff] %v12155_v36  ;;  %v12167_v39 = vadd.f32 %v11610_v6, %v15439_v4  ;;  %v12171_v29 = vadd.f32 %v11612_v51, %v15441_v13  ;;  %v15443_v12 = vld [vmem:[#allocation57_spill] sm:$0xff]  ;;  %v15445_v36 = vld [vmem:[#allocation58_spill] sm:$0xff]  ;;  %v12187_v4 = vadd.f32 %v11612_v51, %v15449_v11 }
 0x389   :  { %15436 = vst [vmem:[#allocation38_spill] sm:$0xff] %v12159_v50  ;;  %v12175_v5 = vadd.f32 %v11604_v3, %v15443_v12  ;;  %v12179_v37 = vadd.f32 %v11607_v9, %v15445_v36  ;;  %v15447_v50 = vld [vmem:[#allocation61_spill] sm:$0xff]  ;;  %v12207_v11 = vadd.f32 %v11604_v3, %v11699_v30  ;;  %v12227_v30 = vadd.f32 %v11607_v9, %v11719_v7 }
 0x38a   :  { %15440 = vst [vmem:[#allocation40_spill] sm:$0xff] %v12167_v39  ;;  %15442 = vst [vmem:[#allocation43_spill] sm:$0xff] %v12171_v29  ;;  %v12183_v21 = vadd.f32 %v11610_v6, %v15447_v50  ;;  %v15451_v39 = vld [vmem:[#allocation63_spill] sm:$0xff]  ;;  %v15452_v29 = vld [vmem:[#allocation64_spill] sm:$0xff]  ;;  %v12247_v7 = vadd.f32 %v11610_v6, %v11755_v63  ;;  %v12267_v63 = vadd.f32 %v11612_v51, %v11791_v33 }
 0x38b   :  { %15444 = vst [vmem:[#allocation44_spill] sm:$0xff] %v12175_v5  ;;  %15446 = vst [vmem:[#allocation41_spill] sm:$0xff] %v12179_v37  ;;  %v12191_v13 = vadd.f32 %v11604_v3, %v15451_v39  ;;  %v12195_v12 = vadd.f32 %v11607_v9, %v15452_v29  ;;  %v15453_v5 = vld [vmem:[#allocation67_spill] sm:$0xff]  ;;  %v15454_v37 = vld [vmem:[#allocation68_spill] sm:$0xff]  ;;  %v12211_v39 = vadd.f32 %v11607_v9, %v11703_v43 }
 0x38c   :  { %15448 = vst [vmem:[#allocation42_spill] sm:$0xff] %v12183_v21  ;;  %15450 = vst [vmem:[#allocation45_spill] sm:$0xff] %v12187_v4  ;;  %v12199_v36 = vadd.f32 %v11610_v6, %v15453_v5  ;;  %v12203_v50 = vadd.f32 %v11612_v51, %v15454_v37  ;;  %v15455_v21 = vld [vmem:[#allocation65_spill] sm:$0xff]  ;;  %v15456_v4 = vld [vmem:[#allocation66_spill] sm:$0xff]  ;;  %v12223_v37 = vadd.f32 %v11604_v3, %v11715_v22 }
 0x38d   :  { %v12215_v29 = vadd.f32 %v11610_v6, %v15455_v21  ;;  %v12219_v5 = vadd.f32 %v11612_v51, %v15456_v4  ;;  %v12231_v43 = vadd.f32 %v11610_v6, %v11723_v47  ;;  %v12235_v21 = vadd.f32 %v11612_v51, %v11727_v34 }
 0x38e   :  { %v12239_v4 = vadd.f32 %v11610_v6, %v11739_v61  ;;  %v12243_v22 = vadd.f32 %v11612_v51, %v11743_v53  ;;  %v12251_v47 = vadd.f32 %v11612_v51, %v11759_v41  ;;  %v12255_v34 = vadd.f32 %v11610_v6, %v11771_v16 }
 0x38f   :  { %v12259_v61 = vadd.f32 %v11612_v51, %v11775_v48  ;;  %v12263_v53 = vadd.f32 %v11610_v6, %v11787_v24  ;;  %v12271_v41 = vadd.f32 %v11610_v6, %v11803_v35  ;;  %v12275_v16 = vadd.f32 %v11612_v51, %v11807_v62 }
 0x390   :  { %v12279_v48 = vadd.f32 %v11610_v6, %v11819_v45  ;;  %v12283_v24 = vadd.f32 %v11612_v51, %v11823_v23  ;;  %v12287_v33 = vadd.f32 %v11610_v6, %v11835_v52  ;;  %v12291_v35 = vadd.f32 %v11612_v51, %v11839_v38 }
 0x391   :  { %v12295_v62 = vadd.f32 %v11610_v6, %v11851_v1  ;;  %v12299_v45 = vadd.f32 %v11612_v51, %v11855_v27  ;;  %v12303_v23 = vadd.f32 %v11610_v6, %v11867_v10  ;;  %v12307_v52 = vadd.f32 %v11612_v51, %v11871_v57 }
 0x392   :  { %v12311_v38 = vadd.f32 %v11610_v6, %v11883_v49  ;;  %v12315_v1 = vadd.f32 %v11612_v51, %v11887_v15  ;;  %v12319_v27 = vadd.f32 %v11610_v6, %v11899_v54  ;;  %v12323_v10 = vadd.f32 %v11612_v51, %v11903_v31 }
 0x393   :  { %v12327_v57 = vadd.f32 %v11610_v6, %v11915_v28  ;;  %v12331_v49 = vadd.f32 %v11612_v51, %v11919_v60  ;;  %v12335_v15 = vadd.f32 %v11610_v6, %v11931_v26  ;;  %v12339_v54 = vadd.f32 %v11612_v51, %v11935_v56 }
 0x394   :  { %15457 = vst [vmem:[#allocation46_spill] sm:$0xff] %v12319_v27  ;;  %15458 = vst [vmem:[#allocation47_spill] sm:$0xff] %v12323_v10  ;;  %v15460_v27 = vld [vmem:[#allocation89_spill] sm:$0xff]  ;;  %v15462_v10 = vld [vmem:[#allocation90_spill] sm:$0xff]  ;;  %v12351_v60 = vadd.f32 %v11610_v6, %v11963_v59  ;;  %v12355_v26 = vadd.f32 %v11612_v51, %v11967_v14  ;;  %v12359_v56 = vadd.f32 %v11610_v6, %v11979_v44  ;;  %v3956_v59 = vmax.f32 %v12003_v32, 0.0 }
 0x395   :  { %15459 = vst [vmem:[#allocation48_spill] sm:$0xff] %v12335_v15  ;;  %v12343_v31 = vadd.f32 %v11610_v6, %v15460_v27  ;;  %v12347_v28 = vadd.f32 %v11612_v51, %v15462_v10  ;;  %v3951_v15 = vmax.f32 %v11983_v20, 0.0  ;;  %v3953_v27 = vmax.f32 %v11991_v19, 0.0  ;;  %v15468_v19 = vld [vmem:[#allocation96_spill] sm:$0xff]  ;;  %v8784_v32 = vld [vmem:[%s14900_s4 + $0x180] ss:$12 sps:$4 sm:$0xff]  }
 0x396   :  { %15464 = vst [vmem:[#allocation50_spill] sm:$0xff] %v12351_v60  ;;  %15465 = vst [vmem:[#allocation53_spill] sm:$0xff] %v12355_v26  ;;  %v3957_v10 = vmax.f32 %v12007_v55, 0.0  ;;  %v3960_v60 = vmax.f32 %v12019_v25, 0.0  ;;  %v3964_v51 = vmax.f32 %v12035_v17, 0.0  ;;  %v3959_v14 = vmax.f32 %v12015_v8, 0.0 }
 0x397   :  { %15461 = vst [vmem:[#allocation51_spill] sm:$0xff] %v12343_v31  ;;  %15463 = vst [vmem:[#allocation49_spill] sm:$0xff] %v12347_v28  ;;  %v3955_v31 = vmax.f32 %v11999_v42, 0.0  ;;  %v3952_v28 = vmax.f32 %v11987_v40, 0.0  ;;  %v3963_v20 = vmax.f32 %v12031_v58, 0.0  ;;  %v15469_v55 = vld [vmem:[#allocation98_spill] sm:$0xff] }
 0x398   :  { %15466 = vst [vmem:[#allocation54_spill] sm:$0xff] %v12359_v56  ;;  %v12370_v44 = vpack.c.bf16 %v3957_v10, %v3953_v27  ;;  %v3968_v56 = vmax.f32 %v15468_v19, 0.0  ;;  %v4084_v26 = vpack.c.bf16 %v3964_v51, %v3960_v60  ;;  %v8783_v40 = vld [vmem:[%s14900_s4 + $0x188] ss:$12 sps:$4 sm:$0xff]   ;;  %v3972_v25 = vmax.f32 %v15469_v55, 0.0 }
 0x399   :  { %v4079_v6 = vpack.c.bf16 %v3955_v31, %v3951_v15  ;;  %v4080_v42 = vpack.c.bf16 %v3956_v59, %v3952_v28  ;;  %v15470_v8 = vld [vmem:[#allocation95_spill] sm:$0xff]  ;;  %v12382_v15 = vpack.c.bf16 %v3963_v20, %v3959_v14  ;;  %v8789_v58 = vld [vmem:[%s14900_s4 + $0x19c] ss:$12 sps:$4 sm:$0xff]   ;;  %v15471_v31 = vld [vmem:[#allocation97_spill] sm:$0xff]  ;;  %v3976_v60 = vmax.f32 %v12083_v0, 0.0 }
 0x39a   :  { %15467 = vst [vmem:[#allocation55_spill] sm:$0xff] %v12370_v44  ;;  %v3967_v17 = vmax.f32 %v15470_v8, 0.0  ;;  %v3971_v28 = vmax.f32 %v15471_v31, 0.0  ;;  %v3980_v27 = vmax.f32 %v12099_v18, 0.0  ;;  %v12390_v10 = vpack.c.bf16 %v3972_v25, %v3968_v56  ;;  %v8790_v59 = vld [vmem:[%s14900_s4 + $0x260] ss:$12 sps:$4 sm:$0xff]  }
 0x39b   :  { %4815 = vmatprep.mubr.bf16.mxu0 %v4080_v42  ;;  %5201 = vmatprep.mubr.bf16.mxu1 %v4080_v42  ;;  %v3975_v51 = vmax.f32 %v12079_v46, 0.0  ;;  %v15472_v14 = vld [vmem:[#allocation24_spill] sm:$0xff]  ;;  %v3984_v19 = vmax.f32 %v12115_v2, 0.0  ;;  %v15473_v18 = vld [vmem:[#allocation31_spill] sm:$0xff]  ;;  %v15474_v56 = vld [vmem:[#allocation25_spill] sm:$0xff] }
 0x39c   :  { %v3979_v20 = vmax.f32 %v15472_v14, 0.0  ;;  %4816 = vmatmul.mubr.bf16.vlgmr.msra.gmra.mrb[64].mxu0 %v4079_v6  ;;  %5202 = vmatmul.mubr.bf16.vlgmr.msra.gmra.mrb[96].mxu1 %v4079_v6  ;;  %v12398_v55 = vpack.c.bf16 %v3971_v28, %v3967_v17  ;;  %v12400_v0 = vpack.c.bf16 %v3980_v27, %v3976_v60  ;;  %v3988_v42 = vmax.f32 %v15473_v18, 0.0  ;;  %v8787_v46 = vld [vmem:[%s14900_s4 + $0x198] ss:$12 sps:$4 sm:$0xff]   ;;  %v15475_v31 = vld [vmem:[#allocation30_spill] sm:$0xff]  ;;  %v15477_v17 = vld [vmem:[#allocation39_spill] sm:$0xff] }
 0x39d   :  { %v3983_v25 = vmax.f32 %v15474_v56, 0.0  ;;  %4825 = vmatprep.mubr.bf16.mxu0 %v4084_v26  ;;  %5209 = vmatprep.mubr.bf16.mxu1 %v4084_v26  ;;  %v3987_v2 = vmax.f32 %v15475_v31, 0.0  ;;  %v15476_v14 = vld [vmem:[#allocation33_spill] sm:$0xff]  ;;  %v3996_v28 = vmax.f32 %v15477_v17, 0.0  ;;  %v15478_v26 = vld [vmem:[#allocation36_spill] sm:$0xff]  ;;  %v15479_v56 = vld [vmem:[#allocation38_spill] sm:$0xff] }
 0x39e   :  { %v12407_v8 = vpack.c.bf16 %v3979_v20, %v3975_v51  ;;  %v3992_v6 = vmax.f32 %v15476_v14, 0.0  ;;  %7674 = vmatpush3.bf16.msra.mxu1 %v8783_v40  ;;  %4977 = vmatpush1.bf16.msra.mxu0 %v8784_v32  ;;  %v8791_v60 = vld [vmem:[%s14900_s4 + $0x1a0] ss:$12 sps:$4 sm:$0xff]   ;;  %v12415_v27 = vpack.c.bf16 %v3988_v42, %v3984_v19  ;;  %v3991_v18 = vmax.f32 %v15478_v26, 0.0  ;;  %v8798_v32 = vld [vmem:[%s14900_s4 + $0x278] ss:$12 sps:$4 sm:$0xff]  }
 0x39f   :  { %v3995_v44 = vmax.f32 %v15479_v56, 0.0  ;;  %v15480_v51 = vld [vmem:[#allocation41_spill] sm:$0xff]  ;;  %4978 = vmatprep.subr.bf16.mxu0 %v8789_v58  ;;  %7675 = vmatprep.subr.bf16.mxu1 %v8790_v59  ;;  %v12423_v40 = vpack.c.bf16 %v3987_v2, %v3983_v25  ;;  %v4004_v42 = vmax.f32 %v12195_v12, 0.0  ;;  %v15481_v14 = vld [vmem:[#allocation44_spill] sm:$0xff]  ;;  %v4003_v58 = vmax.f32 %v12191_v13, 0.0 }
 0x3a0   :  { %v4000_v20 = vmax.f32 %v15480_v51, 0.0  ;;  %v8794_v31 = vld [vmem:[%s14900_s4 + $0x1b4] ss:$12 sps:$4 sm:$0xff]   ;;  %v12428_v19 = vpack.c.bf16 %v3996_v28, %v3992_v6  ;;  %v3999_v17 = vmax.f32 %v15481_v14, 0.0  ;;  %v4008_v59 = vmax.f32 %v12211_v39, 0.0  ;;  %v15482_v6 = vld [vmem:[#allocation70_spill] sm:$0xff] }
 0x3a1   :  { %v12432_v26 = vpack.c.bf16 %v3995_v44, %v3991_v18  ;;  %v4012_v56 = vmax.f32 %v12227_v30, 0.0  ;;  %v4007_v2 = vmax.f32 %v12207_v11, 0.0  ;;  %v4011_v51 = vmax.f32 %v12223_v37, 0.0  ;;  %v8792_v12 = vld [vmem:[%s14900_s4 + $0x1b0] ss:$12 sps:$4 sm:$0xff]   ;;  %v15487_v14 = vld [vmem:[#allocation69_spill] sm:$0xff] }
 0x3a2   :  { %v12437_v25 = vpack.c.bf16 %v4004_v42, %v4000_v20  ;;  %v3888_v28 = vadd.f32 %v11607_v9, %v15482_v6  ;;  %4979 = vmatpush1.bf16.msra.mxu0 %v8787_v46  ;;  %7676 = vmatpush3.bf16.msra.mxu1 %v8791_v60  ;;  %v8799_v13 = vld [vmem:[%s14900_s4 + $0x1b8] ss:$12 sps:$4 sm:$0xff]   ;;  %v12449_v39 = vpack.c.bf16 %v4003_v58, %v3999_v17  ;;  %v15485_v44 = vld [vmem:[#allocation15_spill] sm:$0xff]  ;;  %v15490_v6 = vld [vmem:[#allocation74_spill] sm:$0xff] }
 0x3a3   :  { %v12451_v30 = vpack.c.bf16 %v4012_v56, %v4008_v59  ;;  %v15484_v11 = vld [vmem:[#allocation72_spill] sm:$0xff]  ;;  %4980 = vmatprep.subr.bf16.mxu0 %v8794_v31  ;;  %7677 = vmatprep.subr.bf16.mxu1 %v8798_v32  ;;  %v12462_v20 = vpack.c.bf16 %v4011_v51, %v4007_v2  ;;  %v3887_v17 = vadd.f32 %v11604_v3, %v15487_v14  ;;  %v15488_v58 = vld [vmem:[#allocation71_spill] sm:$0xff] }
 0x3a4   :  { %v3892_v37 = vadd.f32 %v11607_v9, %v15484_v11  ;;  %v8797_v46 = vld [vmem:[%s14900_s4 + $0x1cc] ss:$12 sps:$4 sm:$0xff]   ;;  %v8806_v60 = vld [vmem:[%s14900_s4 + $0x290] ss:$12 sps:$4 sm:$0xff]   ;;  %v4016_v42 = vmax.f32 %v3888_v28, 0.0  ;;  %v3891_v59 = vadd.f32 %v11604_v3, %v15488_v58  ;;  %4826 = vmatmul.mubr.bf16.gmra.mrb[68].mxu0 %v12382_v15  ;;  %5210 = vmatmul.mubr.bf16.gmra.mrb[100].mxu1 %v12382_v15  ;;  %v3900_v11 = vadd.f32 %v11607_v9, %v15490_v6 }
 0x3a5   :  { %15483 = vst [vmem:[#allocation56_spill] sm:$0xff] %v12451_v30  ;;  %15486 = vst [vmem:[#allocation59_spill] sm:$0xff] %v12462_v20  ;;  %v15489_v56 = vld [vmem:[#allocation76_spill] sm:$0xff]  ;;  %v15491_v2 = vld [vmem:[#allocation75_spill] sm:$0xff]  ;;  %4835 = vmatprep.mubr.bf16.mxu0 %v12390_v10  ;;  %5217 = vmatprep.mubr.bf16.mxu1 %v12390_v10  ;;  %v4015_v14 = vmax.f32 %v3887_v17, 0.0 }
 0x3a6   :  { %v4020_v31 = vmax.f32 %v3892_v37, 0.0  ;;  %v3896_v32 = vadd.f32 %v11607_v9, %v15489_v56  ;;  %v3895_v51 = vadd.f32 %v11604_v3, %v15491_v2  ;;  %v8795_v28 = vld [vmem:[%s14900_s4 + $0x1c8] ss:$12 sps:$4 sm:$0xff]   ;;  %v4019_v15 = vmax.f32 %v3891_v59, 0.0  ;;  %v15492_v37 = vld [vmem:[#allocation73_spill] sm:$0xff]  ;;  %4981 = vmatpush1.bf16.msra.mxu0 %v8792_v12  ;;  %7678 = vmatpush3.bf16.msra.mxu1 %v8799_v13 }
 0x3a7   :  { %v3899_v58 = vadd.f32 %v11604_v3, %v15492_v37  ;;  %v15493_v56 = vld [vmem:[#allocation78_spill] sm:$0xff]  ;;  %v8807_v6 = vld [vmem:[%s14900_s4 + $0x1d0] ss:$12 sps:$4 sm:$0xff]   ;;  %v4028_v20 = vmax.f32 %v3900_v11, 0.0  ;;  %4982 = vmatprep.subr.bf16.mxu0 %v8797_v46  ;;  %7679 = vmatprep.subr.bf16.mxu1 %v8806_v60  ;;  %v15498_v11 = vld [vmem:[#allocation77_spill] sm:$0xff] }
 0x3a8   :  { %v3904_v18 = vadd.f32 %v11607_v9, %v15493_v56  ;;  %v12488_v2 = vpack.c.bf16 %v4020_v31, %v4016_v42  ;;  %v4024_v10 = vmax.f32 %v3896_v32, 0.0  ;;  %v4023_v30 = vmax.f32 %v3895_v51, 0.0  ;;  %v8802_v17 = vld [vmem:[%s14900_s4 + $0x1e4] ss:$12 sps:$4 sm:$0xff]   ;;  %v8814_v12 = vld [vmem:[%s14900_s4 + $0x2a8] ss:$12 sps:$4 sm:$0xff]  }
 0x3a9   :  { %v12493_v59 = vpack.c.bf16 %v4019_v15, %v4015_v14  ;;  %v4027_v13 = vmax.f32 %v3899_v58, 0.0  ;;  %v15496_v37 = vld [vmem:[#allocation80_spill] sm:$0xff]  ;;  %v3903_v46 = vadd.f32 %v11604_v3, %v15498_v11  ;;  %v15499_v51 = vld [vmem:[#allocation79_spill] sm:$0xff]  ;;  %v8800_v15 = vld [vmem:[%s14900_s4 + $0x1e0] ss:$12 sps:$4 sm:$0xff]  }
 0x3aa   :  { %15494 = vst [vmem:[#allocation60_spill] sm:$0xff] %v12488_v2  ;;  %v3908_v42 = vadd.f32 %v11607_v9, %v15496_v37  ;;  %v4032_v31 = vmax.f32 %v3904_v18, 0.0  ;;  %v12500_v32 = vpack.c.bf16 %v4028_v20, %v4024_v10  ;;  %v3907_v56 = vadd.f32 %v11604_v3, %v15499_v51  ;;  %v15500_v60 = vld [vmem:[#allocation84_spill] sm:$0xff]  ;;  %v15502_v37 = vld [vmem:[#allocation82_spill] sm:$0xff]  ;;  %v15503_v20 = vld [vmem:[#allocation83_spill] sm:$0xff]  ;;  %4983 = vmatpush1.bf16.msra.mxu0 %v8795_v28 }
 0x3ab   :  { %15495 = vst [vmem:[#allocation57_spill] sm:$0xff] %v12493_v59  ;;  %v3912_v14 = vadd.f32 %v11607_v9, %v15500_v60  ;;  %v12511_v58 = vpack.c.bf16 %v4027_v13, %v4023_v30  ;;  %v3916_v18 = vadd.f32 %v11607_v9, %v15502_v37  ;;  %v3911_v10 = vadd.f32 %v11604_v3, %v15503_v20  ;;  %v8815_v11 = vld [vmem:[%s14900_s4 + $0x1e8] ss:$12 sps:$4 sm:$0xff]   ;;  %v15504_v2 = vld [vmem:[#allocation81_spill] sm:$0xff] }
 0x3ac   :  { %15497 = vst [vmem:[#allocation58_spill] sm:$0xff] %v12500_v32  ;;  %v4036_v59 = vmax.f32 %v3908_v42, 0.0  ;;  %7680 = vmatpush3.bf16.msra.mxu1 %v8807_v6  ;;  %v4031_v51 = vmax.f32 %v3903_v46, 0.0  ;;  %v4035_v60 = vmax.f32 %v3907_v56, 0.0  ;;  %v3915_v30 = vadd.f32 %v11604_v3, %v15504_v2  ;;  %4984 = vmatprep.subr.bf16.mxu0 %v8802_v17  ;;  %v8805_v13 = vld [vmem:[%s14900_s4 + $0x1fc] ss:$12 sps:$4 sm:$0xff]  }
 0x3ad   :  { %15501 = vst [vmem:[#allocation61_spill] sm:$0xff] %v12511_v58  ;;  %v4040_v32 = vmax.f32 %v3912_v14, 0.0  ;;  %7681 = vmatprep.subr.bf16.mxu1 %v8814_v12  ;;  %v8822_v28 = vld [vmem:[%s14900_s4 + $0x2c0] ss:$12 sps:$4 sm:$0xff]   ;;  %v4044_v6 = vmax.f32 %v3916_v18, 0.0  ;;  %v4039_v37 = vmax.f32 %v3911_v10, 0.0  ;;  %4836 = vmatmul.mubr.bf16.gmra.mrb[72].mxu0 %v12398_v55 }
 0x3ae   :  { %v12525_v42 = vpack.c.bf16 %v4036_v59, %v4032_v31  ;;  %v15506_v46 = vld [vmem:[#allocation6_spill] sm:$0xff]  ;;  %5218 = vmatmul.mubr.bf16.gmra.mrb[104].mxu1 %v12398_v55  ;;  %v12534_v2 = vpack.c.bf16 %v4035_v60, %v4031_v51  ;;  %v4043_v17 = vmax.f32 %v3915_v30, 0.0  ;;  %v15508_v14 = vld [vmem:[#allocation8_spill] sm:$0xff]  ;;  %v15509_v12 = vld [vmem:[#allocation5_spill] sm:$0xff]  ;;  %4845 = vmatprep.mubr.bf16.mxu0 %v12400_v0 }
 0x3af   :  { %v3920_v56 = vadd.f32 %v11607_v9, %v15506_v46  ;;  %v3924_v59 = vadd.f32 %v11607_v9, %v15508_v14  ;;  %v3919_v31 = vadd.f32 %v11604_v3, %v15509_v12  ;;  %5225 = vmatprep.mubr.bf16.mxu1 %v12400_v0  ;;  %v12542_v18 = vpack.c.bf16 %v4044_v6, %v4040_v32  ;;  %v15511_v10 = vld [vmem:[#allocation7_spill] sm:$0xff]  ;;  %v15512_v55 = vld [vmem:[#allocation86_spill] sm:$0xff]  ;;  %v8803_v60 = vld [vmem:[%s14900_s4 + $0x1f8] ss:$12 sps:$4 sm:$0xff]  }
 0x3b0   :  { %15505 = vst [vmem:[#allocation62_spill] sm:$0xff] %v12525_v42  ;;  %15507 = vst [vmem:[#allocation63_spill] sm:$0xff] %v12534_v2  ;;  %v3923_v46 = vadd.f32 %v11604_v3, %v15511_v10  ;;  %v3928_v51 = vadd.f32 %v11607_v9, %v15512_v55  ;;  %4985 = vmatpush1.bf16.msra.mxu0 %v8800_v15  ;;  %7682 = vmatpush3.bf16.msra.mxu1 %v8815_v11  ;;  %v8823_v30 = vld [vmem:[%s14900_s4 + $0x200] ss:$12 sps:$4 sm:$0xff]   ;;  %v8830_v11 = vld [vmem:[%s14900_s4 + $0x2d8] ss:$12 sps:$4 sm:$0xff]  }
 0x3b1   :  { %15510 = vst [vmem:[#allocation64_spill] sm:$0xff] %v12542_v18  ;;  %v4048_v20 = vmax.f32 %v3920_v56, 0.0  ;;  %v12554_v0 = vpack.c.bf16 %v4043_v17, %v4039_v37  ;;  %v4052_v32 = vmax.f32 %v3924_v59, 0.0  ;;  %v4047_v6 = vmax.f32 %v3919_v31, 0.0  ;;  %v15514_v56 = vld [vmem:[#allocation10_spill] sm:$0xff]  ;;  %4986 = vmatprep.subr.bf16.mxu0 %v8805_v13  ;;  %7683 = vmatprep.subr.bf16.mxu1 %v8822_v28  ;;  %v15515_v55 = vld [vmem:[#allocation85_spill] sm:$0xff] }
 0x3b2   :  { %v3932_v14 = vadd.f32 %v11607_v9, %v15514_v56  ;;  %v8810_v15 = vld [vmem:[%s14900_s4 + $0x214] ss:$12 sps:$4 sm:$0xff]   ;;  %v4051_v12 = vmax.f32 %v3923_v46, 0.0  ;;  %v4056_v10 = vmax.f32 %v3928_v51, 0.0  ;;  %v3927_v37 = vadd.f32 %v11604_v3, %v15515_v55  ;;  %v15517_v56 = vld [vmem:[#allocation88_spill] sm:$0xff] }
 0x3b3   :  { %15513 = vst [vmem:[#allocation67_spill] sm:$0xff] %v12554_v0  ;;  %v15516_v17 = vld [vmem:[#allocation9_spill] sm:$0xff]  ;;  %v12568_v31 = vpack.c.bf16 %v4052_v32, %v4048_v20  ;;  %v3936_v0 = vadd.f32 %v11607_v9, %v15517_v56  ;;  %v15518_v18 = vld [vmem:[#allocation12_spill] sm:$0xff]  ;;  %v15519_v51 = vld [vmem:[#allocation87_spill] sm:$0xff] }
 0x3b4   :  { %v3931_v59 = vadd.f32 %v11604_v3, %v15516_v17  ;;  %v4060_v13 = vmax.f32 %v3932_v14, 0.0  ;;  %v3940_v28 = vadd.f32 %v11607_v9, %v15518_v18  ;;  %v12574_v46 = vpack.c.bf16 %v4051_v12, %v4047_v6  ;;  %4987 = vmatpush1.bf16.msra.mxu0 %v8803_v60  ;;  %v8808_v20 = vld [vmem:[%s14900_s4 + $0x210] ss:$12 sps:$4 sm:$0xff]   ;;  %7684 = vmatpush3.bf16.msra.mxu1 %v8823_v30  ;;  %v8831_v14 = vld [vmem:[%s14900_s4 + $0x218] ss:$12 sps:$4 sm:$0xff]   ;;  %v15521_v17 = vld [vmem:[#allocation14_spill] sm:$0xff] }
 0x3b5   :  { %v4055_v2 = vmax.f32 %v3927_v37, 0.0  ;;  %v3935_v58 = vadd.f32 %v11604_v3, %v15519_v51  ;;  %v4064_v18 = vmax.f32 %v3936_v0, 0.0  ;;  %v15520_v12 = vld [vmem:[#allocation11_spill] sm:$0xff]  ;;  %4988 = vmatprep.subr.bf16.mxu0 %v8810_v15  ;;  %v8813_v60 = vld [vmem:[%s14900_s4 + $0x22c] ss:$12 sps:$4 sm:$0xff]   ;;  %7685 = vmatprep.subr.bf16.mxu1 %v8830_v11  ;;  %v3944_v0 = vadd.f32 %v11607_v9, %v15521_v17 }
 0x3b6   :  { %v4059_v42 = vmax.f32 %v3931_v59, 0.0  ;;  %v12581_v32 = vpack.c.bf16 %v4060_v13, %v4056_v10  ;;  %v4068_v6 = vmax.f32 %v3940_v28, 0.0  ;;  %v3939_v55 = vadd.f32 %v11604_v3, %v15520_v12  ;;  %v8838_v10 = vld [vmem:[%s14900_s4 + $0x2f0] ss:$12 sps:$4 sm:$0xff]   ;;  %4846 = vmatmul.mubr.bf16.gmra.mrb[76].mxu0 %v12407_v8  ;;  %5226 = vmatmul.mubr.bf16.gmra.mrb[108].mxu1 %v12407_v8 }
 0x3b7   :  { %v4063_v30 = vmax.f32 %v3935_v58, 0.0  ;;  %v15522_v59 = vld [vmem:[#allocation92_spill] sm:$0xff]  ;;  %4855 = vmatprep.mubr.bf16.mxu0 %v12415_v27  ;;  %5233 = vmatprep.mubr.bf16.mxu1 %v12415_v27  ;;  %v4072_v28 = vmax.f32 %v3944_v0, 0.0  ;;  %v8818_v0 = vld [vmem:[%s14900_s4 + $0x244] ss:$12 sps:$4 sm:$0xff]  }
 0x3b8   :  { %v12591_v37 = vpack.c.bf16 %v4059_v42, %v4055_v2  ;;  %v3948_v13 = vadd.f32 %v11607_v9, %v15522_v59  ;;  %v12602_v15 = vpack.c.bf16 %v4068_v6, %v4064_v18  ;;  %v4067_v11 = vmax.f32 %v3939_v55, 0.0  ;;  %v15524_v42 = vld [vmem:[#allocation13_spill] sm:$0xff]  ;;  %v15525_v2 = vld [vmem:[#allocation91_spill] sm:$0xff]  ;;  %v15526_v8 = vld [vmem:[#allocation16_spill] sm:$0xff]  ;;  %4989 = vmatpush1.bf16.msra.mxu0 %v8808_v20  ;;  %7686 = vmatpush3.bf16.msra.mxu1 %v8831_v14 }
 0x3b9   :  { %v3943_v58 = vadd.f32 %v11604_v3, %v15524_v42  ;;  %v3947_v56 = vadd.f32 %v11604_v3, %v15525_v2  ;;  %v8811_v9 = vld [vmem:[%s14900_s4 + $0x228] ss:$12 sps:$4 sm:$0xff]   ;;  %v3958_v18 = vmax.f32 %v15526_v8, 0.0  ;;  %v8839_v3 = vld [vmem:[%s14900_s4 + $0x230] ss:$12 sps:$4 sm:$0xff]   ;;  %4990 = vmatprep.subr.bf16.mxu0 %v8813_v60  ;;  %7687 = vmatprep.subr.bf16.mxu1 %v8838_v10  ;;  %v15530_v20 = vmax.f32 %v15485_v44, 0.0 }
 0x3ba   :  { %15523 = vst [vmem:[#allocation68_spill] sm:$0xff] %v12602_v15  ;;  %v4076_v51 = vmax.f32 %v3948_v13, 0.0  ;;  %v15527_v6 = vld [vmem:[#allocation94_spill] sm:$0xff]  ;;  %v12615_v55 = vpack.c.bf16 %v4067_v11, %v4063_v30  ;;  %v15531_v30 = vld [vmem:[#allocation93_spill] sm:$0xff]  ;;  %v15533_v60 = vld [vmem:[#allocation20_spill] sm:$0xff] }
 0x3bb   :  { %v3962_v12 = vmax.f32 %v15527_v6, 0.0  ;;  %v4071_v17 = vmax.f32 %v3943_v58, 0.0  ;;  %v4075_v27 = vmax.f32 %v3947_v56, 0.0  ;;  %v15529_v59 = vld [vmem:[#allocation18_spill] sm:$0xff]  ;;  %v12628_v14 = vpack.c.bf16 %v3958_v18, %v15530_v20  ;;  %v15532_v2 = vld [vmem:[#allocation17_spill] sm:$0xff]  ;;  %v15535_v10 = vld [vmem:[#allocation19_spill] sm:$0xff] }
 0x3bc   :  { %15528 = vst [vmem:[#allocation65_spill] sm:$0xff] %v12615_v55  ;;  %v3966_v42 = vmax.f32 %v15529_v59, 0.0  ;;  %v12624_v13 = vpack.c.bf16 %v4076_v51, %v4072_v28  ;;  %v3961_v11 = vmax.f32 %v15531_v30, 0.0  ;;  %v3965_v8 = vmax.f32 %v15532_v2, 0.0  ;;  %v15534_v59 = vld [vmem:[#allocation22_spill] sm:$0xff]  ;;  %v15536_v51 = vld [vmem:[#allocation21_spill] sm:$0xff]  ;;  %4991 = vmatpush1.bf16.msra.mxu0 %v8811_v9  ;;  %7688 = vmatpush3.bf16.msra.mxu1 %v8839_v3 }
 0x3bd   :  { %v12632_v58 = vpack.c.bf16 %v4075_v27, %v4071_v17  ;;  %v3970_v6 = vmax.f32 %v15533_v60, 0.0  ;;  %v3974_v55 = vmax.f32 %v15534_v59, 0.0  ;;  %v3969_v28 = vmax.f32 %v15535_v10, 0.0  ;;  %v15537_v18 = vld [vmem:[#allocation23_spill] sm:$0xff]  ;;  %v8816_v17 = vld [vmem:[%s14900_s4 + $0x240] ss:$12 sps:$4 sm:$0xff]   ;;  %4992 = vmatprep.subr.bf16.mxu0 %v8818_v0 }
 0x3be   :  { %v12634_v56 = vpack.c.bf16 %v3966_v42, %v3962_v12  ;;  %v12638_v15 = vpack.c.bf16 %v3965_v8, %v3961_v11  ;;  %v3973_v44 = vmax.f32 %v15536_v51, 0.0  ;;  %v3978_v20 = vmax.f32 %v15537_v18, 0.0  ;;  %v15539_v27 = vld [vmem:[#allocation28_spill] sm:$0xff]  ;;  %v15540_v30 = vld [vmem:[#allocation99_spill] sm:$0xff]  ;;  %v15543_v9 = vld [vmem:[#allocation29_spill] sm:$0xff]  ;;  %4856 = vmatmul.mubr.bf16.gmra.mrb[80].mxu0 %v12423_v40  ;;  %5234 = vmatmul.mubr.bf16.gmra.mrb[112].mxu1 %v12423_v40 }
 0x3bf   :  { %v12646_v12 = vpack.c.bf16 %v3974_v55, %v3970_v6  ;;  %v3982_v42 = vmax.f32 %v15539_v27, 0.0  ;;  %v3977_v2 = vmax.f32 %v15540_v30, 0.0  ;;  %v15541_v11 = vld [vmem:[#allocation27_spill] sm:$0xff]  ;;  %v8821_v60 = vld [vmem:[%s14900_s4 + $0x25c] ss:$12 sps:$4 sm:$0xff]   ;;  %v3986_v10 = vmax.f32 %v15543_v9, 0.0  ;;  %4865 = vmatprep.mubr.bf16.mxu0 %v12428_v19  ;;  %5241 = vmatprep.mubr.bf16.mxu1 %v12428_v19 }
 0x3c0   :  { %v3981_v8 = vmax.f32 %v15541_v11, 0.0  ;;  %v12654_v59 = vpack.c.bf16 %v3973_v44, %v3969_v28  ;;  %v15544_v51 = vld [vmem:[#allocation35_spill] sm:$0xff]  ;;  %v15545_v3 = vld [vmem:[#allocation26_spill] sm:$0xff]  ;;  %v15546_v0 = vld [vmem:[#allocation32_spill] sm:$0xff]  ;;  %4993 = vmatpush1.bf16.msra.mxu0 %v8816_v17 }
 0x3c1   :  { %15538 = vst [vmem:[#allocation66_spill] sm:$0xff] %v12646_v12  ;;  %v3990_v18 = vmax.f32 %v15544_v51, 0.0  ;;  %v3985_v55 = vmax.f32 %v15545_v3, 0.0  ;;  %v12661_v6 = vpack.c.bf16 %v3982_v42, %v3978_v20  ;;  %v3989_v30 = vmax.f32 %v15546_v0, 0.0  ;;  %v15547_v11 = vld [vmem:[#allocation37_spill] sm:$0xff]  ;;  %v15548_v44 = vld [vmem:[#allocation43_spill] sm:$0xff]  ;;  %4994 = vmatprep.subr.bf16.mxu0 %v8821_v60 }
 0x3c2   :  { %15542 = vst [vmem:[#allocation89_spill] sm:$0xff] %v12654_v59  ;;  %v12663_v27 = vpack.c.bf16 %v3981_v8, %v3977_v2  ;;  %v3994_v12 = vmax.f32 %v15547_v11, 0.0  ;;  %v3998_v9 = vmax.f32 %v15548_v44, 0.0  ;;  %v15549_v51 = vld [vmem:[#allocation34_spill] sm:$0xff]  ;;  %v15550_v59 = vld [vmem:[#allocation40_spill] sm:$0xff]  ;;  %v15551_v2 = vld [vmem:[#allocation45_spill] sm:$0xff] }
 0x3c3   :  { %v12669_v28 = vpack.c.bf16 %v3990_v18, %v3986_v10  ;;  %v3993_v3 = vmax.f32 %v15549_v51, 0.0  ;;  %v3997_v40 = vmax.f32 %v15550_v59, 0.0  ;;  %v8819_v20 = vld [vmem:[%s14900_s4 + $0x258] ss:$12 sps:$4 sm:$0xff]   ;;  %v12677_v42 = vpack.c.bf16 %v3989_v30, %v3985_v55  ;;  %v15552_v19 = vld [vmem:[#allocation42_spill] sm:$0xff] }
 0x3c4   :  { %v4002_v8 = vmax.f32 %v15551_v2, 0.0  ;;  %v4006_v0 = vmax.f32 %v12203_v50, 0.0  ;;  %v4001_v10 = vmax.f32 %v15552_v19, 0.0  ;;  %v8826_v18 = vld [vmem:[%s14900_s4 + $0x274] ss:$12 sps:$4 sm:$0xff]   ;;  %v12685_v11 = vpack.c.bf16 %v3998_v9, %v3994_v12  ;;  %4995 = vmatpush1.bf16.msra.mxu0 %v8819_v20 }
 0x3c5   :  { %v12687_v17 = vpack.c.bf16 %v3997_v40, %v3993_v3  ;;  %v4005_v59 = vmax.f32 %v12199_v36, 0.0  ;;  %v4010_v55 = vmax.f32 %v12219_v5, 0.0  ;;  %v4014_v44 = vmax.f32 %v12235_v21, 0.0  ;;  %v8824_v36 = vld [vmem:[%s14900_s4 + $0x270] ss:$12 sps:$4 sm:$0xff]   ;;  %4996 = vmatprep.subr.bf16.mxu0 %v8826_v18 }
 0x3c6   :  { %v12691_v30 = vpack.c.bf16 %v4006_v0, %v4002_v8  ;;  %v4009_v50 = vmax.f32 %v12215_v29, 0.0  ;;  %v4013_v60 = vmax.f32 %v12231_v43, 0.0  ;;  %v4018_v2 = vmax.f32 %v12243_v22, 0.0  ;;  %v8829_v22 = vld [vmem:[%s14900_s4 + $0x28c] ss:$12 sps:$4 sm:$0xff]   ;;  %4866 = vmatmul.mubr.bf16.gmra.mrb[84].mxu0 %v12432_v26  ;;  %5242 = vmatmul.mubr.bf16.gmra.mrb[116].mxu1 %v12432_v26 }
 0x3c7   :  { %v12696_v51 = vpack.c.bf16 %v4005_v59, %v4001_v10  ;;  %v4022_v12 = vmax.f32 %v12251_v47, 0.0  ;;  %v4017_v9 = vmax.f32 %v12239_v4, 0.0  ;;  %v12704_v5 = vpack.c.bf16 %v4014_v44, %v4010_v55  ;;  %4875 = vmatprep.mubr.bf16.mxu0 %v12437_v25  ;;  %5249 = vmatprep.mubr.bf16.mxu1 %v12437_v25 }
 0x3c8   :  { %v12706_v21 = vpack.c.bf16 %v4013_v60, %v4009_v50  ;;  %v4021_v29 = vmax.f32 %v12247_v7, 0.0  ;;  %v4026_v43 = vmax.f32 %v12259_v61, 0.0  ;;  %v4030_v4 = vmax.f32 %v12267_v63, 0.0  ;;  %4997 = vmatpush1.bf16.msra.mxu0 %v8824_v36  ;;  %v15554_v60 = vld [vmem:[#allocation46_spill] sm:$0xff]  ;;  %v15556_v36 = vld [vmem:[#allocation48_spill] sm:$0xff] }
 0x3c9   :  { %v12713_v47 = vpack.c.bf16 %v4022_v12, %v4018_v2  ;;  %v4025_v3 = vmax.f32 %v12255_v34, 0.0  ;;  %v4029_v40 = vmax.f32 %v12263_v53, 0.0  ;;  %v4034_v61 = vmax.f32 %v12275_v16, 0.0  ;;  %v8827_v16 = vld [vmem:[%s14900_s4 + $0x288] ss:$12 sps:$4 sm:$0xff]   ;;  %4998 = vmatprep.subr.bf16.mxu0 %v8829_v22 }
 0x3ca   :  { %v12720_v7 = vpack.c.bf16 %v4021_v29, %v4017_v9  ;;  %v4038_v20 = vmax.f32 %v12283_v24, 0.0  ;;  %v4033_v8 = vmax.f32 %v12271_v41, 0.0  ;;  %v12727_v63 = vpack.c.bf16 %v4030_v4, %v4026_v43  ;;  %v15557_v22 = vld [vmem:[#allocation51_spill] sm:$0xff] }
 0x3cb   :  { %v12729_v34 = vpack.c.bf16 %v4029_v40, %v4025_v3  ;;  %v4037_v53 = vmax.f32 %v12279_v48, 0.0  ;;  %v4042_v26 = vmax.f32 %v12291_v35, 0.0  ;;  %v4046_v41 = vmax.f32 %v12299_v45, 0.0  ;;  %v8834_v48 = vld [vmem:[%s14900_s4 + $0x2a4] ss:$12 sps:$4 sm:$0xff]  }
 0x3cc   :  { %v12736_v24 = vpack.c.bf16 %v4038_v20, %v4034_v61  ;;  %v4041_v0 = vmax.f32 %v12287_v33, 0.0  ;;  %v4045_v25 = vmax.f32 %v12295_v62, 0.0  ;;  %v4050_v35 = vmax.f32 %v12307_v52, 0.0  ;;  %v15553_v62 = vld [vmem:[#allocation47_spill] sm:$0xff]  ;;  %4999 = vmatpush1.bf16.msra.mxu0 %v8827_v16  ;;  %v15558_v3 = vld [vmem:[#allocation53_spill] sm:$0xff]  ;;  %v15559_v61 = vld [vmem:[#allocation52_spill] sm:$0xff] }
 0x3cd   :  { %v12744_v19 = vpack.c.bf16 %v4037_v53, %v4033_v8  ;;  %v4054_v10 = vmax.f32 %v12315_v1, 0.0  ;;  %v4049_v18 = vmax.f32 %v12303_v23, 0.0  ;;  %v12749_v59 = vpack.c.bf16 %v4046_v41, %v4042_v26  ;;  %v8832_v23 = vld [vmem:[%s14900_s4 + $0x2a0] ss:$12 sps:$4 sm:$0xff]   ;;  %5000 = vmatprep.subr.bf16.mxu0 %v8834_v48  ;;  %v15562_v41 = vld [vmem:[#allocation56_spill] sm:$0xff] }
 0x3ce   :  { %v12751_v45 = vpack.c.bf16 %v4045_v25, %v4041_v0  ;;  %v4053_v33 = vmax.f32 %v12311_v38, 0.0  ;;  %v4058_v55 = vmax.f32 %v15553_v62, 0.0  ;;  %v4062_v50 = vmax.f32 %v12331_v49, 0.0  ;;  %v15555_v38 = vld [vmem:[#allocation49_spill] sm:$0xff]  ;;  %v8837_v49 = vld [vmem:[%s14900_s4 + $0x2bc] ss:$12 sps:$4 sm:$0xff]   ;;  %4876 = vmatmul.mubr.bf16.gmra.mrb[88].mxu0 %v12449_v39  ;;  %5250 = vmatmul.mubr.bf16.gmra.mrb[120].mxu1 %v12449_v39 }
 0x3cf   :  { %v12755_v44 = vpack.c.bf16 %v4054_v10, %v4050_v35  ;;  %v4057_v2 = vmax.f32 %v15554_v60, 0.0  ;;  %v4061_v52 = vmax.f32 %v12327_v57, 0.0  ;;  %v4066_v12 = vmax.f32 %v12339_v54, 0.0  ;;  %v15560_v8 = vld [vmem:[#allocation50_spill] sm:$0xff]  ;;  %4885 = vmatprep.mubr.bf16.mxu0 %v15562_v41  ;;  %5257 = vmatprep.mubr.bf16.mxu1 %v15562_v41  ;;  %v8835_v25 = vld [vmem:[%s14900_s4 + $0x2b8] ss:$12 sps:$4 sm:$0xff]  }
 0x3d0   :  { %v12763_v1 = vpack.c.bf16 %v4053_v33, %v4049_v18  ;;  %v4070_v9 = vmax.f32 %v15555_v38, 0.0  ;;  %v4065_v29 = vmax.f32 %v15556_v36, 0.0  ;;  %v12771_v43 = vpack.c.bf16 %v4062_v50, %v4058_v55  ;;  %v15561_v26 = vld [vmem:[#allocation54_spill] sm:$0xff]  ;;  %5001 = vmatpush1.bf16.msra.mxu0 %v8832_v23  ;;  %v8842_v35 = vld [vmem:[%s14900_s4 + $0x2d4] ss:$12 sps:$4 sm:$0xff]   ;;  %v15564_v62 = vld [vmem:[#allocation60_spill] sm:$0xff] }
 0x3d1   :  { %v12773_v57 = vpack.c.bf16 %v4061_v52, %v4057_v2  ;;  %v4069_v4 = vmax.f32 %v15557_v22, 0.0  ;;  %v4074_v40 = vmax.f32 %v15558_v3, 0.0  ;;  %v4078_v20 = vmax.f32 %v15559_v61, 0.0  ;;  %5002 = vmatprep.subr.bf16.mxu0 %v8837_v49  ;;  %v8840_v10 = vld [vmem:[%s14900_s4 + $0x2d0] ss:$12 sps:$4 sm:$0xff]   ;;  %v15565_v50 = vld [vmem:[#allocation57_spill] sm:$0xff] }
 0x3d2   :  { %v12779_v54 = vpack.c.bf16 %v4070_v9, %v4066_v12  ;;  %v4073_v53 = vmax.f32 %v15560_v8, 0.0  ;;  %v4077_v16 = vmax.f32 %v15561_v26, 0.0  ;;  %v8845_v18 = vld [vmem:[%s14900_s4 + $0x2ec] ss:$12 sps:$4 sm:$0xff]   ;;  %v15563_v33 = vld [vmem:[#allocation59_spill] sm:$0xff]  ;;  %v15567_v2 = vld [vmem:[#allocation61_spill] sm:$0xff] }
 0x3d3   :  { %v12786_v0 = vpack.c.bf16 %v4069_v4, %v4065_v29  ;;  %v12791_v39 = vpack.c.bf16 %v4078_v20, %v4074_v40  ;;  %v8843_v55 = vld [vmem:[%s14900_s4 + $0x2e8] ss:$12 sps:$4 sm:$0xff]   ;;  %v15570_v12 = vld [vmem:[#allocation64_spill] sm:$0xff]  ;;  %v15573_v36 = vld [vmem:[#allocation65_spill] sm:$0xff] }
 0x3d4   :  { %v12793_v48 = vpack.c.bf16 %v4077_v16, %v4073_v53  ;;  %5003 = vmatpush1.bf16.msra.mxu0 %v8835_v25  ;;  %v15566_v60 = vld [vmem:[#allocation58_spill] sm:$0xff]  ;;  %v15569_v23 = vld [vmem:[#allocation63_spill] sm:$0xff]  ;;  %v15572_v9 = vld [vmem:[#allocation68_spill] sm:$0xff] }
 0x3d5   :  { %5004 = vmatprep.subr.bf16.mxu0 %v8842_v35  ;;  %v15568_v52 = vld [vmem:[#allocation62_spill] sm:$0xff]  ;;  %v15571_v38 = vld [vmem:[#allocation67_spill] sm:$0xff] }
 0x3d6   :  { %4886 = vmatmul.mubr.bf16.gmra.mrb[92].mxu0 %v15563_v33  ;;  %5258 = vmatmul.mubr.bf16.gmra.mrb[124].mxu1 %v15563_v33 }
 0x3d7   :  { %4895 = vmatprep.mubr.bf16.mxu0 %v15564_v62  ;;  %5265 = vmatprep.mubr.bf16.mxu1 %v15564_v62 }
 0x3d8   :  { %5005 = vmatpush1.bf16.msra.mxu0 %v8840_v10 }
 0x3d9   :  { %5006 = vmatprep.subr.bf16.mxu0 %v8845_v18 }
 0x3dc   :  { %5007 = vmatpush1.bf16.msra.mxu0 %v8843_v55 }
 0x3de   :  { %4896 = vmatmul.mubr.bf16.gmra.mrb[96].mxu0 %v15565_v50  ;;  %5266 = vmatmul.mubr.bf16.gmra.mrb[128].mxu1 %v15565_v50 }
 0x3df   :  { %4905 = vmatprep.mubr.bf16.mxu0 %v15566_v60  ;;  %5273 = vmatprep.mubr.bf16.mxu1 %v15566_v60  ;;  %v8846_v60 = vld [vmem:[%s14903_s7 + $0x40] sm:$0xff]  }
 0x3e0   :  { %7785 = vmatprep.subr.bf16.mxu0 %v8846_v60 }
 0x3e6   :  { %4906 = vmatmul.mubr.bf16.gmra.mrb[100].mxu0 %v15567_v2  ;;  %5274 = vmatmul.mubr.bf16.gmra.mrb[132].mxu1 %v15567_v2 }
 0x3e7   :  { %4915 = vmatprep.mubr.bf16.mxu0 %v15568_v52  ;;  %5281 = vmatprep.mubr.bf16.mxu1 %v15568_v52 }
 0x3ee   :  { %4916 = vmatmul.mubr.bf16.gmra.mrb[104].mxu0 %v15569_v23  ;;  %5282 = vmatmul.mubr.bf16.gmra.mrb[136].mxu1 %v15569_v23  ;;  %v8847_v23 = vld [vmem:[%s14903_s7] sm:$0xff]  }
 0x3ef   :  { %4925 = vmatprep.mubr.bf16.mxu0 %v15570_v12  ;;  %5289 = vmatprep.mubr.bf16.mxu1 %v15570_v12 }
 0x3f6   :  { %4926 = vmatmul.mubr.bf16.gmra.mrb[108].mxu0 %v15571_v38  ;;  %5290 = vmatmul.mubr.bf16.gmra.mrb[140].mxu1 %v15571_v38 }
 0x3f7   :  { %4935 = vmatprep.mubr.bf16.mxu0 %v12568_v31  ;;  %5297 = vmatprep.mubr.bf16.mxu1 %v12568_v31  ;;  %v15574_v31 = vld [vmem:[#allocation55_spill] sm:$0xff] }
 0x3fe   :  { %4936 = vmatmul.mubr.bf16.gmra.mrb[112].mxu0 %v12574_v46  ;;  %5298 = vmatmul.mubr.bf16.gmra.mrb[144].mxu1 %v12574_v46  ;;  %v15575_v46 = vld [vmem:[#allocation66_spill] sm:$0xff] }
 0x3ff   :  { %4945 = vmatprep.mubr.bf16.mxu0 %v12581_v32  ;;  %5305 = vmatprep.mubr.bf16.mxu1 %v12581_v32  ;;  %v15576_v32 = vld [vmem:[#allocation89_spill] sm:$0xff] }
 0x406   :  { %4946 = vmatmul.mubr.bf16.gmra.mrb[116].mxu0 %v12591_v37  ;;  %5306 = vmatmul.mubr.bf16.gmra.mrb[148].mxu1 %v12591_v37 }
 0x407   :  { %4955 = vmatprep.mubr.bf16.mxu0 %v15572_v9  ;;  %5313 = vmatprep.mubr.bf16.mxu1 %v15572_v9 }
 0x40e   :  { %4956 = vmatmul.mubr.bf16.gmra.mrb[120].mxu0 %v15573_v36  ;;  %5314 = vmatmul.mubr.bf16.gmra.mrb[152].mxu1 %v15573_v36 }
 0x40f   :  { %4965 = vmatprep.mubr.bf16.mxu0 %v12624_v13  ;;  %5321 = vmatprep.mubr.bf16.mxu1 %v12624_v13 }
 0x416   :  { %4966 = vmatmul.mubr.bf16.gmra.mrb[124].mxu0 %v12632_v58  ;;  %5322 = vmatmul.mubr.bf16.gmra.mrb[156].mxu1 %v12632_v58 }
 0x417   :  { %5008 = vmatprep.mubr.bf16.mxu0 %v12628_v14  ;;  %5362 = vmatprep.mubr.bf16.mxu1 %v12628_v14 }
 0x41e   :  { %5009 = vmatmul.mubr.bf16.vlgmr.msra.gmra.mrb[64].mxu0 %v15574_v31  ;;  %5363 = vmatmul.mubr.bf16.vlgmr.msra.gmra.mrb[160].mxu1 %v15574_v31 }
 0x41f   :  { %5018 = vmatprep.mubr.bf16.mxu0 %v12634_v56  ;;  %5370 = vmatprep.mubr.bf16.mxu1 %v12634_v56 }
 0x420   :  { %7786 = vmatpush3.bf16.msra.mxu0 %v8847_v23 }
 0x426   :  { %5019 = vmatmul.mubr.bf16.gmra.mrb[68].mxu0 %v12638_v15  ;;  %5371 = vmatmul.mubr.bf16.gmra.mrb[164].mxu1 %v12638_v15 }
 0x427   :  { %5028 = vmatprep.mubr.bf16.mxu0 %v15575_v46  ;;  %5378 = vmatprep.mubr.bf16.mxu1 %v15575_v46 }
 0x42e   :  { %5029 = vmatmul.mubr.bf16.gmra.mrb[72].mxu0 %v15576_v32  ;;  %5379 = vmatmul.mubr.bf16.gmra.mrb[168].mxu1 %v15576_v32 }
 0x42f   :  { %5038 = vmatprep.mubr.bf16.mxu0 %v12661_v6  ;;  %5386 = vmatprep.mubr.bf16.mxu1 %v12661_v6 }
 0x436   :  { %5039 = vmatmul.mubr.bf16.gmra.mrb[76].mxu0 %v12663_v27  ;;  %5387 = vmatmul.mubr.bf16.gmra.mrb[172].mxu1 %v12663_v27 }
 0x437   :  { %5048 = vmatprep.mubr.bf16.mxu0 %v12669_v28  ;;  %5394 = vmatprep.mubr.bf16.mxu1 %v12669_v28 }
 0x43e   :  { %5049 = vmatmul.mubr.bf16.gmra.mrb[80].mxu0 %v12677_v42  ;;  %5395 = vmatmul.mubr.bf16.gmra.mrb[176].mxu1 %v12677_v42 }
 0x43f   :  { %5058 = vmatprep.mubr.bf16.mxu0 %v12685_v11  ;;  %5402 = vmatprep.mubr.bf16.mxu1 %v12685_v11 }
 0x446   :  { %5059 = vmatmul.mubr.bf16.gmra.mrb[84].mxu0 %v12687_v17  ;;  %5403 = vmatmul.mubr.bf16.gmra.mrb[180].mxu1 %v12687_v17 }
 0x447   :  { %5068 = vmatprep.mubr.bf16.mxu0 %v12691_v30  ;;  %5410 = vmatprep.mubr.bf16.mxu1 %v12691_v30 }
 0x44e   :  { %5069 = vmatmul.mubr.bf16.gmra.mrb[88].mxu0 %v12696_v51  ;;  %5411 = vmatmul.mubr.bf16.gmra.mrb[184].mxu1 %v12696_v51 }
 0x44f   :  { %5078 = vmatprep.mubr.bf16.mxu0 %v12704_v5  ;;  %5418 = vmatprep.mubr.bf16.mxu1 %v12704_v5 }
 0x456   :  { %5079 = vmatmul.mubr.bf16.gmra.mrb[92].mxu0 %v12706_v21  ;;  %5419 = vmatmul.mubr.bf16.gmra.mrb[188].mxu1 %v12706_v21 }
 0x457   :  { %5088 = vmatprep.mubr.bf16.mxu0 %v12713_v47  ;;  %5426 = vmatprep.mubr.bf16.mxu1 %v12713_v47 }
 0x45e   :  { %5089 = vmatmul.mubr.bf16.gmra.mrb[96].mxu0 %v12720_v7  ;;  %5427 = vmatmul.mubr.bf16.gmra.mrb[192].mxu1 %v12720_v7 }
 0x45f   :  { %5098 = vmatprep.mubr.bf16.mxu0 %v12727_v63  ;;  %5434 = vmatprep.mubr.bf16.mxu1 %v12727_v63 }
 0x466   :  { %5099 = vmatmul.mubr.bf16.gmra.mrb[100].mxu0 %v12729_v34  ;;  %5435 = vmatmul.mubr.bf16.gmra.mrb[196].mxu1 %v12729_v34 }
 0x467   :  { %5108 = vmatprep.mubr.bf16.mxu0 %v12736_v24  ;;  %5442 = vmatprep.mubr.bf16.mxu1 %v12736_v24 }
 0x46e   :  { %5109 = vmatmul.mubr.bf16.gmra.mrb[104].mxu0 %v12744_v19  ;;  %5443 = vmatmul.mubr.bf16.gmra.mrb[200].mxu1 %v12744_v19 }
 0x46f   :  { %5118 = vmatprep.mubr.bf16.mxu0 %v12749_v59  ;;  %5450 = vmatprep.mubr.bf16.mxu1 %v12749_v59  ;;  %v7577_v37 = vpop.f32.mrb[96].mxu1 }
 0x470   :  { %v7578_v15 = vpop.f32.mrb[97].mxu1 }
 0x471   :  { %v12887_v13 = vadd.f32 %v7578_v15, %v7577_v37  ;;  %v7580_v14 = vpop.f32.mrb[98].mxu1 }
 0x472   :  { %v7581_v58 = vpop.f32.mrb[99].mxu1 }
 0x473   :  { %v12889_v56 = vadd.f32 %v7581_v58, %v7580_v14  ;;  %v8848_v58 = vld [vmem:[%s14903_s7 + $0x48] sm:$0xff]  }
 0x474   :  { %7787 = vmatprep.subr.bf16.mxu0 %v8848_v58 }
 0x476   :  { %5119 = vmatmul.mubr.bf16.gmra.mrb[108].mxu0 %v12751_v45  ;;  %5451 = vmatmul.mubr.bf16.gmra.mrb[204].mxu1 %v12751_v45 }
 0x477   :  { %5128 = vmatprep.mubr.bf16.mxu0 %v12755_v44  ;;  %5458 = vmatprep.mubr.bf16.mxu1 %v12755_v44  ;;  %v7583_v6 = vpop.f32.mrb[100].mxu1 }
 0x478   :  { %v7584_v27 = vpop.f32.mrb[101].mxu1 }
 0x479   :  { %v12895_v28 = vadd.f32 %v7584_v27, %v7583_v6  ;;  %v7586_v42 = vpop.f32.mrb[102].mxu1 }
 0x47a   :  { %v7587_v11 = vpop.f32.mrb[103].mxu1 }
 0x47b   :  { %v12897_v17 = vadd.f32 %v7587_v11, %v7586_v42  ;;  %v8849_v42 = vld [vmem:[%s14903_s7 + $0x8] sm:$0xff]  }
 0x47c   :  { %7788 = vmatpush3.bf16.msra.mxu0 %v8849_v42 }
 0x47e   :  { %5129 = vmatmul.mubr.bf16.gmra.mrb[112].mxu0 %v12763_v1  ;;  %5459 = vmatmul.mubr.bf16.gmra.mrb[208].mxu1 %v12763_v1 }
 0x47f   :  { %5138 = vmatprep.mubr.bf16.mxu0 %v12771_v43  ;;  %5466 = vmatprep.mubr.bf16.mxu1 %v12771_v43 }
 0x481   :  { %v7589_v30 = vpop.f32.mrb[104].mxu1 }
 0x482   :  { %v7590_v51 = vpop.f32.mrb[105].mxu1 }
 0x483   :  { %v12903_v5 = vadd.f32 %v7590_v51, %v7589_v30  ;;  %v7592_v21 = vpop.f32.mrb[106].mxu1 }
 0x484   :  { %v7593_v47 = vpop.f32.mrb[107].mxu1 }
 0x485   :  { %v12905_v7 = vadd.f32 %v7593_v47, %v7592_v21 }
 0x486   :  { %5139 = vmatmul.mubr.bf16.gmra.mrb[116].mxu0 %v12773_v57  ;;  %5467 = vmatmul.mubr.bf16.gmra.mrb[212].mxu1 %v12773_v57 }
 0x487   :  { %5148 = vmatprep.mubr.bf16.mxu0 %v12779_v54  ;;  %5474 = vmatprep.mubr.bf16.mxu1 %v12779_v54 }
 0x489   :  { %v7595_v63 = vpop.f32.mrb[108].mxu1 }
 0x48a   :  { %v7596_v34 = vpop.f32.mrb[109].mxu1 }
 0x48b   :  { %v12911_v24 = vadd.f32 %v7596_v34, %v7595_v63  ;;  %v7598_v19 = vpop.f32.mrb[110].mxu1 }
 0x48c   :  { %v7599_v59 = vpop.f32.mrb[111].mxu1 }
 0x48d   :  { %v12913_v45 = vadd.f32 %v7599_v59, %v7598_v19 }
 0x48e   :  { %5149 = vmatmul.mubr.bf16.gmra.mrb[120].mxu0 %v12786_v0  ;;  %5475 = vmatmul.mubr.bf16.gmra.mrb[216].mxu1 %v12786_v0 }
 0x48f   :  { %5158 = vmatprep.mubr.bf16.mxu0 %v12791_v39  ;;  %5482 = vmatprep.mubr.bf16.mxu1 %v12791_v39 }
 0x491   :  { %v7601_v44 = vpop.f32.mrb[112].mxu1 }
 0x492   :  { %v7602_v1 = vpop.f32.mrb[113].mxu1 }
 0x493   :  { %v12919_v29 = vadd.f32 %v7602_v1, %v7601_v44  ;;  %v7604_v49 = vpop.f32.mrb[114].mxu1  ;;  %v8850_v1 = vld [vmem:[%s14903_s7 + $0x50] sm:$0xff]  }
 0x494   :  { %v7605_v43 = vpop.f32.mrb[115].mxu1  ;;  %7789 = vmatprep.subr.bf16.mxu0 %v8850_v1 }
 0x495   :  { %v12921_v57 = vadd.f32 %v7605_v43, %v7604_v49 }
 0x496   :  { %5159 = vmatmul.mubr.bf16.gmra.mrb[124].mxu0 %v12793_v48  ;;  %5483 = vmatmul.mubr.bf16.gmra.mrb[220].mxu1 %v12793_v48 }
 0x499   :  { %v7607_v22 = vpop.f32.mrb[116].mxu1 }
 0x49a   :  { %v7608_v4 = vpop.f32.mrb[117].mxu1 }
 0x49b   :  { %v12925_v3 = vadd.f32 %v7608_v4, %v7607_v22  ;;  %v7610_v40 = vpop.f32.mrb[118].mxu1  ;;  %v8851_v22 = vld [vmem:[%s14903_s7 + $0x10] sm:$0xff]  }
 0x49c   :  { %v7611_v54 = vpop.f32.mrb[119].mxu1  ;;  %7790 = vmatpush3.bf16.msra.mxu0 %v8851_v22 }
 0x49d   :  { %v12927_v61 = vadd.f32 %v7611_v54, %v7610_v40 }
 0x4a1   :  { %v7613_v20 = vpop.f32.mrb[120].mxu1 }
 0x4a2   :  { %v7614_v8 = vpop.f32.mrb[121].mxu1 }
 0x4a3   :  { %v12929_v53 = vadd.f32 %v7614_v8, %v7613_v20  ;;  %v7616_v26 = vpop.f32.mrb[122].mxu1 }
 0x4a4   :  { %v7617_v16 = vpop.f32.mrb[123].mxu1 }
 0x4a5   :  { %v12931_v41 = vadd.f32 %v7617_v16, %v7616_v26 }
 0x4a9   :  { %v7619_v0 = vpop.f32.mrb[124].mxu1 }
 0x4aa   :  { %v7620_v25 = vpop.f32.mrb[125].mxu1 }
 0x4ab   :  { %v12933_v39 = vadd.f32 %v7620_v25, %v7619_v0  ;;  %v7622_v48 = vpop.f32.mrb[126].mxu1 }
 0x4ac   :  { %v7623_v35 = vpop.f32.mrb[127].mxu1 }
 0x4ad   :  { %v12935_v10 = vadd.f32 %v7623_v35, %v7622_v48  ;;  %v8852_v35 = vld [vmem:[%s14903_s7 + $0x58] sm:$0xff]  }
 0x4ae   :  { %7791 = vmatprep.subr.bf16.mxu0 %v8852_v35 }
 0x4b1   :  { %v7625_v18 = vpop.f32.mrb[128].mxu1 }
 0x4b2   :  { %v7626_v33 = vpop.f32.mrb[129].mxu1 }
 0x4b3   :  { %v12937_v62 = vadd.f32 %v7626_v33, %v7625_v18  ;;  %v7628_v55 = vpop.f32.mrb[130].mxu1 }
 0x4b4   :  { %v7629_v50 = vpop.f32.mrb[131].mxu1 }
 0x4b5   :  { %v12942_v2 = vadd.f32 %v7629_v50, %v7628_v55  ;;  %v8853_v55 = vld [vmem:[%s14903_s7 + $0x18] sm:$0xff]  }
 0x4b6   :  { %7792 = vmatpush3.bf16.msra.mxu0 %v8853_v55 }
 0x4b9   :  { %v7631_v52 = vpop.f32.mrb[132].mxu1 }
 0x4ba   :  { %v7632_v12 = vpop.f32.mrb[133].mxu1 }
 0x4bb   :  { %v12947_v38 = vadd.f32 %v7632_v12, %v7631_v52  ;;  %v7634_v9 = vpop.f32.mrb[134].mxu1 }
 0x4bc   :  { %v7635_v36 = vpop.f32.mrb[135].mxu1 }
 0x4bd   :  { %v12949_v31 = vadd.f32 %v7635_v36, %v7634_v9 }
 0x4c1   :  { %v7637_v46 = vpop.f32.mrb[136].mxu1 }
 0x4c2   :  { %v7638_v32 = vpop.f32.mrb[137].mxu1 }
 0x4c3   :  { %v12951_v37 = vadd.f32 %v7638_v32, %v7637_v46  ;;  %v7640_v15 = vpop.f32.mrb[138].mxu1 }
 0x4c4   :  { %v7641_v14 = vpop.f32.mrb[139].mxu1 }
 0x4c5   :  { %v12956_v6 = vadd.f32 %v7641_v14, %v7640_v15 }
 0x4c9   :  { %v7643_v27 = vpop.f32.mrb[140].mxu1 }
 0x4ca   :  { %v7644_v11 = vpop.f32.mrb[141].mxu1 }
 0x4cb   :  { %v12961_v30 = vadd.f32 %v7644_v11, %v7643_v27  ;;  %v7646_v51 = vpop.f32.mrb[142].mxu1 }
 0x4cc   :  { %v7647_v21 = vpop.f32.mrb[143].mxu1 }
 0x4cd   :  { %v12963_v47 = vadd.f32 %v7647_v21, %v7646_v51 }
 0x4d1   :  { %v7649_v63 = vpop.f32.mrb[144].mxu1 }
 0x4d2   :  { %v7650_v34 = vpop.f32.mrb[145].mxu1 }
 0x4d3   :  { %v12965_v19 = vadd.f32 %v7650_v34, %v7649_v63  ;;  %v7652_v59 = vpop.f32.mrb[146].mxu1 }
 0x4d4   :  { %v7653_v44 = vpop.f32.mrb[147].mxu1 }
 0x4d5   :  { %v12970_v49 = vadd.f32 %v7653_v44, %v7652_v59 }
 0x4d9   :  { %v7655_v43 = vpop.f32.mrb[148].mxu1 }
 0x4da   :  { %v7656_v4 = vpop.f32.mrb[149].mxu1 }
 0x4db   :  { %v12975_v40 = vadd.f32 %v7656_v4, %v7655_v43  ;;  %v7658_v54 = vpop.f32.mrb[150].mxu1 }
 0x4dc   :  { %v7659_v20 = vpop.f32.mrb[151].mxu1 }
 0x4dd   :  { %v12977_v8 = vadd.f32 %v7659_v20, %v7658_v54 }
 0x4e1   :  { %v7661_v26 = vpop.f32.mrb[152].mxu1 }
 0x4e2   :  { %v7662_v16 = vpop.f32.mrb[153].mxu1 }
 0x4e3   :  { %v12979_v0 = vadd.f32 %v7662_v16, %v7661_v26  ;;  %v7664_v25 = vpop.f32.mrb[154].mxu1 }
 0x4e4   :  { %v7665_v48 = vpop.f32.mrb[155].mxu1 }
 0x4e5   :  { %v12984_v18 = vadd.f32 %v7665_v48, %v7664_v25 }
 0x4e9   :  { %v7667_v33 = vpop.f32.mrb[156].mxu1 }
 0x4ea   :  { %v7668_v50 = vpop.f32.mrb[157].mxu1 }
 0x4eb   :  { %v12989_v60 = vadd.f32 %v7668_v50, %v7667_v33  ;;  %v7670_v52 = vpop.f32.mrb[158].mxu1 }
 0x4ec   :  { %v7671_v23 = vpop.f32.mrb[159].mxu1 }
 0x4ed   :  { %v12991_v12 = vadd.f32 %v7671_v23, %v7670_v52 }
 0x4f1   :  { %v12993_v9 = vpop.f32.mrb[64].mxu0  ;;  %v7689_v36 = vpop.f32.mrb[160].mxu1 }
 0x4f2   :  { %v12995_v46 = vpop.f32.mrb[65].mxu0  ;;  %v7690_v32 = vpop.f32.mrb[161].mxu1  ;;  %v5607_v27 = vmul.f32 %v12993_v9, %v12993_v9 }
 0x4f3   :  { %v7691_v15 = vadd.f32 %v7690_v32, %v7689_v36  ;;  %v12997_v14 = vpop.f32.mrb[66].mxu0  ;;  %v7692_v58 = vpop.f32.mrb[162].mxu1  ;;  %v5608_v42 = vmul.f32 %v12995_v46, %v12995_v46 }
 0x4f4   :  { %v5493_v11 = vadd.f32 %v12997_v14, %v12993_v9  ;;  %v5610_v51 = vmul.f32 %v12997_v14, %v12997_v14  ;;  %v13007_v21 = vpop.f32.mrb[67].mxu0  ;;  %v7693_v63 = vpop.f32.mrb[163].mxu1 }
 0x4f5   :  { %v13010_v34 = vadd.f32 %v7691_v15, %v12887_v13  ;;  %v5530_v59 = vadd.f32 %v13007_v21, %v12995_v46  ;;  %v5611_v44 = vmul.f32 %v13007_v21, %v13007_v21  ;;  %v7694_v1 = vadd.f32 %v7693_v63, %v7692_v58 }
 0x4f6   :  { %v5703_v43 = vadd.f32 %v5610_v51, %v5607_v27 }
 0x4f7   :  { %v5740_v22 = vadd.f32 %v5611_v44, %v5608_v42  ;;  %v13017_v4 = vadd.f32 %v7694_v1, %v12889_v56 }
 0x4f9   :  { %v13019_v54 = vpop.f32.mrb[68].mxu0  ;;  %v7695_v20 = vpop.f32.mrb[164].mxu1  ;;  %v5612_v50 = vmul.f32 %v13017_v4, %v13017_v4 }
 0x4fa   :  { %v5494_v26 = vadd.f32 %v5493_v11, %v13019_v54  ;;  %v5613_v13 = vmul.f32 %v13019_v54, %v13019_v54  ;;  %v13024_v16 = vpop.f32.mrb[69].mxu0  ;;  %v7696_v25 = vpop.f32.mrb[165].mxu1 }
 0x4fb   :  { %v5531_v48 = vadd.f32 %v5530_v59, %v13024_v16  ;;  %v5614_v35 = vmul.f32 %v13024_v16, %v13024_v16  ;;  %v7697_v33 = vadd.f32 %v7696_v25, %v7695_v20  ;;  %v13029_v55 = vpop.f32.mrb[70].mxu0  ;;  %v7698_v56 = vpop.f32.mrb[166].mxu1  ;;  %v5609_v59 = vmul.f32 %v13010_v34, %v13010_v34 }
 0x4fc   :  { %v5704_v52 = vadd.f32 %v5703_v43, %v5613_v13  ;;  %v5495_v23 = vadd.f32 %v5494_v26, %v13029_v55  ;;  %v5616_v36 = vmul.f32 %v13029_v55, %v13029_v55  ;;  %v13036_v32 = vpop.f32.mrb[71].mxu0  ;;  %v7699_v15 = vpop.f32.mrb[167].mxu1  ;;  %v5567_v43 = vadd.f32 %v13017_v4, %v13010_v34 }
 0x4fd   :  { %v5741_v58 = vadd.f32 %v5740_v22, %v5614_v35  ;;  %v13039_v27 = vadd.f32 %v7697_v33, %v12895_v28  ;;  %v5532_v42 = vadd.f32 %v5531_v48, %v13036_v32  ;;  %v5617_v11 = vmul.f32 %v13036_v32, %v13036_v32 }
 0x4fe   :  { %v5705_v51 = vadd.f32 %v5704_v52, %v5616_v36  ;;  %v7700_v63 = vadd.f32 %v7699_v15, %v7698_v56  ;;  %v5777_v22 = vadd.f32 %v5612_v50, %v5609_v59 }
 0x4ff   :  { %v5615_v44 = vmul.f32 %v13039_v27, %v13039_v27  ;;  %v5742_v1 = vadd.f32 %v5741_v58, %v5617_v11  ;;  %v5568_v13 = vadd.f32 %v5567_v43, %v13039_v27 }
 0x500   :  { %v13051_v28 = vadd.f32 %v7700_v63, %v12897_v17 }
 0x501   :  { %v13053_v20 = vpop.f32.mrb[72].mxu0  ;;  %v7701_v26 = vpop.f32.mrb[168].mxu1  ;;  %v5778_v56 = vadd.f32 %v5777_v22, %v5615_v44 }
 0x502   :  { %v5496_v25 = vadd.f32 %v5495_v23, %v13053_v20  ;;  %v5619_v48 = vmul.f32 %v13053_v20, %v13053_v20  ;;  %v13059_v35 = vpop.f32.mrb[73].mxu0  ;;  %v7702_v33 = vpop.f32.mrb[169].mxu1  ;;  %v5618_v58 = vmul.f32 %v13051_v28, %v13051_v28 }
 0x503   :  { %15577 = vst [vmem:[#allocation90_spill] sm:$0xff] %v13059_v35  ;;  %v5533_v52 = vadd.f32 %v5532_v42, %v13059_v35  ;;  %v5620_v17 = vmul.f32 %v13059_v35, %v13059_v35  ;;  %v7703_v50 = vadd.f32 %v7702_v33, %v7701_v26  ;;  %v13064_v36 = vpop.f32.mrb[74].mxu0  ;;  %v7704_v15 = vpop.f32.mrb[170].mxu1 }
 0x504   :  { %15578 = vst [vmem:[#allocation96_spill] sm:$0xff] %v13064_v36  ;;  %v5706_v23 = vadd.f32 %v5705_v51, %v5619_v48  ;;  %v5497_v11 = vadd.f32 %v5496_v25, %v13064_v36  ;;  %v5622_v63 = vmul.f32 %v13064_v36, %v13064_v36  ;;  %v13071_v59 = vpop.f32.mrb[75].mxu0  ;;  %v7705_v44 = vpop.f32.mrb[171].mxu1  ;;  %v5569_v48 = vadd.f32 %v5568_v13, %v13051_v28 }
 0x505   :  { %15579 = vst [vmem:[#allocation98_spill] sm:$0xff] %v13071_v59  ;;  %v5743_v42 = vadd.f32 %v5742_v1, %v5620_v17  ;;  %v13074_v43 = vadd.f32 %v7703_v50, %v12903_v5  ;;  %v5534_v22 = vadd.f32 %v5533_v52, %v13071_v59  ;;  %v5623_v26 = vmul.f32 %v13071_v59, %v13071_v59 }
 0x506   :  { %v5707_v33 = vadd.f32 %v5706_v23, %v5622_v63  ;;  %v7706_v35 = vadd.f32 %v7705_v44, %v7704_v15  ;;  %v5779_v1 = vadd.f32 %v5778_v56, %v5618_v58 }
 0x507   :  { %v5621_v51 = vmul.f32 %v13074_v43, %v13074_v43  ;;  %v5744_v25 = vadd.f32 %v5743_v42, %v5623_v26  ;;  %v5570_v52 = vadd.f32 %v5569_v48, %v13074_v43 }
 0x508   :  { %v13083_v36 = vadd.f32 %v7706_v35, %v12905_v7 }
 0x509   :  { %v13085_v17 = vpop.f32.mrb[76].mxu0  ;;  %v7707_v5 = vpop.f32.mrb[172].mxu1  ;;  %v5780_v44 = vadd.f32 %v5779_v1, %v5621_v51 }
 0x50a   :  { %15580 = vst [vmem:[#allocation95_spill] sm:$0xff] %v13085_v17  ;;  %v5498_v50 = vadd.f32 %v5497_v11, %v13085_v17  ;;  %v5625_v15 = vmul.f32 %v13085_v17, %v13085_v17  ;;  %v13091_v23 = vpop.f32.mrb[77].mxu0  ;;  %v7708_v63 = vpop.f32.mrb[173].mxu1  ;;  %v5624_v42 = vmul.f32 %v13083_v36, %v13083_v36 }
 0x50b   :  { %15581 = vst [vmem:[#allocation97_spill] sm:$0xff] %v13091_v23  ;;  %v5535_v13 = vadd.f32 %v5534_v22, %v13091_v23  ;;  %v5626_v7 = vmul.f32 %v13091_v23, %v13091_v23  ;;  %v7709_v35 = vadd.f32 %v7708_v63, %v7707_v5  ;;  %v13096_v56 = vpop.f32.mrb[78].mxu0  ;;  %v7710_v58 = vpop.f32.mrb[174].mxu1 }
 0x50c   :  { %15582 = vst [vmem:[#allocation24_spill] sm:$0xff] %v13096_v56  ;;  %v5708_v11 = vadd.f32 %v5707_v33, %v5625_v15  ;;  %v5499_v26 = vadd.f32 %v5498_v50, %v13096_v56  ;;  %v5628_v48 = vmul.f32 %v13096_v56, %v13096_v56  ;;  %v13103_v17 = vpop.f32.mrb[79].mxu0  ;;  %v7711_v51 = vpop.f32.mrb[175].mxu1  ;;  %v5571_v15 = vadd.f32 %v5570_v52, %v13083_v36 }
 0x50d   :  { %15583 = vst [vmem:[#allocation31_spill] sm:$0xff] %v13103_v17  ;;  %v5745_v22 = vadd.f32 %v5744_v25, %v5626_v7  ;;  %v13106_v1 = vadd.f32 %v7709_v35, %v12911_v24  ;;  %v5536_v5 = vadd.f32 %v5535_v13, %v13103_v17  ;;  %v5629_v63 = vmul.f32 %v13103_v17, %v13103_v17 }
 0x50e   :  { %v5709_v23 = vadd.f32 %v5708_v11, %v5628_v48  ;;  %v7712_v59 = vadd.f32 %v7711_v51, %v7710_v58  ;;  %v5781_v25 = vadd.f32 %v5780_v44, %v5624_v42 }
 0x50f   :  { %v5627_v33 = vmul.f32 %v13106_v1, %v13106_v1  ;;  %v5746_v50 = vadd.f32 %v5745_v22, %v5629_v63  ;;  %v5572_v13 = vadd.f32 %v5571_v15, %v13106_v1 }
 0x510   :  { %v13115_v56 = vadd.f32 %v7712_v59, %v12913_v45 }
 0x511   :  { %v13117_v7 = vpop.f32.mrb[80].mxu0  ;;  %v7713_v24 = vpop.f32.mrb[176].mxu1  ;;  %v5782_v51 = vadd.f32 %v5781_v25, %v5627_v33 }
 0x512   :  { %15584 = vst [vmem:[#allocation25_spill] sm:$0xff] %v13117_v7  ;;  %v5500_v35 = vadd.f32 %v5499_v26, %v13117_v7  ;;  %v5631_v58 = vmul.f32 %v13117_v7, %v13117_v7  ;;  %v13123_v11 = vpop.f32.mrb[81].mxu0  ;;  %v7714_v48 = vpop.f32.mrb[177].mxu1  ;;  %v5630_v22 = vmul.f32 %v13115_v56, %v13115_v56 }
 0x513   :  { %15585 = vst [vmem:[#allocation30_spill] sm:$0xff] %v13123_v11  ;;  %v5537_v52 = vadd.f32 %v5536_v5, %v13123_v11  ;;  %v5632_v45 = vmul.f32 %v13123_v11, %v13123_v11  ;;  %v7715_v59 = vadd.f32 %v7714_v48, %v7713_v24  ;;  %v13128_v44 = vpop.f32.mrb[82].mxu0  ;;  %v7716_v42 = vpop.f32.mrb[178].mxu1 }
 0x514   :  { %15586 = vst [vmem:[#allocation33_spill] sm:$0xff] %v13128_v44  ;;  %v5710_v26 = vadd.f32 %v5709_v23, %v5631_v58  ;;  %v5501_v63 = vadd.f32 %v5500_v35, %v13128_v44  ;;  %v5634_v15 = vmul.f32 %v13128_v44, %v13128_v44  ;;  %v13135_v7 = vpop.f32.mrb[83].mxu0  ;;  %v7717_v33 = vpop.f32.mrb[179].mxu1  ;;  %v5573_v58 = vadd.f32 %v5572_v13, %v13115_v56 }
 0x515   :  { %15587 = vst [vmem:[#allocation39_spill] sm:$0xff] %v13135_v7  ;;  %v5747_v5 = vadd.f32 %v5746_v50, %v5632_v45  ;;  %v13138_v25 = vadd.f32 %v7715_v59, %v12919_v29  ;;  %v5538_v24 = vadd.f32 %v5537_v52, %v13135_v7  ;;  %v5635_v48 = vmul.f32 %v13135_v7, %v13135_v7 }
 0x516   :  { %v5711_v11 = vadd.f32 %v5710_v26, %v5634_v15  ;;  %v7718_v17 = vadd.f32 %v7717_v33, %v7716_v42  ;;  %v5783_v50 = vadd.f32 %v5782_v51, %v5630_v22 }
 0x517   :  { %v5633_v23 = vmul.f32 %v13138_v25, %v13138_v25  ;;  %v5748_v35 = vadd.f32 %v5747_v5, %v5635_v48  ;;  %v5574_v52 = vadd.f32 %v5573_v58, %v13138_v25 }
 0x518   :  { %v13147_v44 = vadd.f32 %v7718_v17, %v12921_v57 }
 0x519   :  { %v13149_v45 = vpop.f32.mrb[84].mxu0  ;;  %v7719_v29 = vpop.f32.mrb[180].mxu1  ;;  %v5784_v33 = vadd.f32 %v5783_v50, %v5633_v23 }
 0x51a   :  { %15588 = vst [vmem:[#allocation36_spill] sm:$0xff] %v13149_v45  ;;  %v5502_v59 = vadd.f32 %v5501_v63, %v13149_v45  ;;  %v5637_v42 = vmul.f32 %v13149_v45, %v13149_v45  ;;  %v13155_v26 = vpop.f32.mrb[85].mxu0  ;;  %v7720_v15 = vpop.f32.mrb[181].mxu1  ;;  %v5636_v5 = vmul.f32 %v13147_v44, %v13147_v44 }
 0x51b   :  { %15589 = vst [vmem:[#allocation38_spill] sm:$0xff] %v13155_v26  ;;  %v5539_v13 = vadd.f32 %v5538_v24, %v13155_v26  ;;  %v5638_v57 = vmul.f32 %v13155_v26, %v13155_v26  ;;  %v7721_v17 = vadd.f32 %v7720_v15, %v7719_v29  ;;  %v13160_v51 = vpop.f32.mrb[86].mxu0  ;;  %v7722_v22 = vpop.f32.mrb[182].mxu1 }
 0x51c   :  { %15590 = vst [vmem:[#allocation41_spill] sm:$0xff] %v13160_v51  ;;  %v5712_v63 = vadd.f32 %v5711_v11, %v5637_v42  ;;  %v5503_v48 = vadd.f32 %v5502_v59, %v13160_v51  ;;  %v5640_v58 = vmul.f32 %v13160_v51, %v13160_v51  ;;  %v13167_v45 = vpop.f32.mrb[87].mxu0  ;;  %v7723_v23 = vpop.f32.mrb[183].mxu1  ;;  %v5575_v42 = vadd.f32 %v5574_v52, %v13147_v44 }
 0x51d   :  { %15591 = vst [vmem:[#allocation44_spill] sm:$0xff] %v13167_v45  ;;  %v5749_v24 = vadd.f32 %v5748_v35, %v5638_v57  ;;  %v13170_v50 = vadd.f32 %v7721_v17, %v12925_v3  ;;  %v5540_v29 = vadd.f32 %v5539_v13, %v13167_v45  ;;  %v5641_v15 = vmul.f32 %v13167_v45, %v13167_v45 }
 0x51e   :  { %v5713_v26 = vadd.f32 %v5712_v63, %v5640_v58  ;;  %v7724_v7 = vadd.f32 %v7723_v23, %v7722_v22  ;;  %v5785_v35 = vadd.f32 %v5784_v33, %v5636_v5 }
 0x51f   :  { %v5639_v11 = vmul.f32 %v13170_v50, %v13170_v50  ;;  %v5750_v59 = vadd.f32 %v5749_v24, %v5641_v15  ;;  %v5576_v13 = vadd.f32 %v5575_v42, %v13170_v50 }
 0x520   :  { %v13179_v51 = vadd.f32 %v7724_v7, %v12927_v61 }
 0x521   :  { %v13181_v57 = vpop.f32.mrb[88].mxu0  ;;  %v7725_v3 = vpop.f32.mrb[184].mxu1  ;;  %v5786_v23 = vadd.f32 %v5785_v35, %v5639_v11 }
 0x522   :  { %15592 = vst [vmem:[#allocation70_spill] sm:$0xff] %v13181_v57  ;;  %v5504_v17 = vadd.f32 %v5503_v48, %v13181_v57  ;;  %v5643_v22 = vmul.f32 %v13181_v57, %v13181_v57  ;;  %v13187_v63 = vpop.f32.mrb[89].mxu0  ;;  %v7726_v58 = vpop.f32.mrb[185].mxu1  ;;  %v5642_v24 = vmul.f32 %v13179_v51, %v13179_v51 }
 0x523   :  { %15593 = vst [vmem:[#allocation72_spill] sm:$0xff] %v13187_v63  ;;  %v5541_v52 = vadd.f32 %v5540_v29, %v13187_v63  ;;  %v5644_v61 = vmul.f32 %v13187_v63, %v13187_v63  ;;  %v7727_v7 = vadd.f32 %v7726_v58, %v7725_v3  ;;  %v13192_v33 = vpop.f32.mrb[90].mxu0  ;;  %v7728_v5 = vpop.f32.mrb[186].mxu1 }
 0x524   :  { %15594 = vst [vmem:[#allocation15_spill] sm:$0xff] %v13192_v33  ;;  %v5714_v48 = vadd.f32 %v5713_v26, %v5643_v22  ;;  %v5505_v15 = vadd.f32 %v5504_v17, %v13192_v33  ;;  %v5646_v42 = vmul.f32 %v13192_v33, %v13192_v33  ;;  %v13199_v57 = vpop.f32.mrb[91].mxu0  ;;  %v7729_v11 = vpop.f32.mrb[187].mxu1  ;;  %v5577_v22 = vadd.f32 %v5576_v13, %v13179_v51 }
 0x525   :  { %15595 = vst [vmem:[#allocation69_spill] sm:$0xff] %v13199_v57  ;;  %v5751_v29 = vadd.f32 %v5750_v59, %v5644_v61  ;;  %v13202_v35 = vadd.f32 %v7727_v7, %v12929_v53  ;;  %v5542_v3 = vadd.f32 %v5541_v52, %v13199_v57  ;;  %v5647_v58 = vmul.f32 %v13199_v57, %v13199_v57 }
 0x526   :  { %v5715_v63 = vadd.f32 %v5714_v48, %v5646_v42  ;;  %v7730_v45 = vadd.f32 %v7729_v11, %v7728_v5  ;;  %v5787_v59 = vadd.f32 %v5786_v23, %v5642_v24 }
 0x527   :  { %v5645_v26 = vmul.f32 %v13202_v35, %v13202_v35  ;;  %v5752_v17 = vadd.f32 %v5751_v29, %v5647_v58  ;;  %v5578_v52 = vadd.f32 %v5577_v22, %v13202_v35 }
 0x528   :  { %v13211_v33 = vadd.f32 %v7730_v45, %v12931_v41 }
 0x529   :  { %v13213_v61 = vpop.f32.mrb[92].mxu0  ;;  %v7731_v53 = vpop.f32.mrb[188].mxu1  ;;  %v5788_v11 = vadd.f32 %v5787_v59, %v5645_v26 }
 0x52a   :  { %15596 = vst [vmem:[#allocation71_spill] sm:$0xff] %v13213_v61  ;;  %v5506_v7 = vadd.f32 %v5505_v15, %v13213_v61  ;;  %v5649_v5 = vmul.f32 %v13213_v61, %v13213_v61  ;;  %v13219_v48 = vpop.f32.mrb[93].mxu0  ;;  %v7732_v42 = vpop.f32.mrb[189].mxu1  ;;  %v5648_v29 = vmul.f32 %v13211_v33, %v13211_v33 }
 0x52b   :  { %15597 = vst [vmem:[#allocation76_spill] sm:$0xff] %v13219_v48  ;;  %v5543_v13 = vadd.f32 %v5542_v3, %v13219_v48  ;;  %v5650_v41 = vmul.f32 %v13219_v48, %v13219_v48  ;;  %v7733_v45 = vadd.f32 %v7732_v42, %v7731_v53  ;;  %v13224_v23 = vpop.f32.mrb[94].mxu0  ;;  %v7734_v24 = vpop.f32.mrb[190].mxu1 }
 0x52c   :  { %15598 = vst [vmem:[#allocation74_spill] sm:$0xff] %v13224_v23  ;;  %v5716_v15 = vadd.f32 %v5715_v63, %v5649_v5  ;;  %v5507_v58 = vadd.f32 %v5506_v7, %v13224_v23  ;;  %v5652_v22 = vmul.f32 %v13224_v23, %v13224_v23  ;;  %v13231_v61 = vpop.f32.mrb[95].mxu0  ;;  %v7735_v26 = vpop.f32.mrb[191].mxu1  ;;  %v5579_v5 = vadd.f32 %v5578_v52, %v13211_v33 }
 0x52d   :  { %15599 = vst [vmem:[#allocation75_spill] sm:$0xff] %v13231_v61  ;;  %v5753_v3 = vadd.f32 %v5752_v17, %v5650_v41  ;;  %v13234_v59 = vadd.f32 %v7733_v45, %v12933_v39  ;;  %v5544_v53 = vadd.f32 %v5543_v13, %v13231_v61  ;;  %v5653_v42 = vmul.f32 %v13231_v61, %v13231_v61 }
 0x52e   :  { %v5717_v48 = vadd.f32 %v5716_v15, %v5652_v22  ;;  %v7736_v57 = vadd.f32 %v7735_v26, %v7734_v24  ;;  %v5789_v17 = vadd.f32 %v5788_v11, %v5648_v29 }
 0x52f   :  { %v5651_v63 = vmul.f32 %v13234_v59, %v13234_v59  ;;  %v5754_v7 = vadd.f32 %v5753_v3, %v5653_v42  ;;  %v5580_v13 = vadd.f32 %v5579_v5, %v13234_v59 }
 0x530   :  { %v13243_v23 = vadd.f32 %v7736_v57, %v12935_v10 }
 0x531   :  { %v13245_v41 = vpop.f32.mrb[96].mxu0  ;;  %v7737_v39 = vpop.f32.mrb[192].mxu1  ;;  %v5790_v26 = vadd.f32 %v5789_v17, %v5651_v63 }
 0x532   :  { %15600 = vst [vmem:[#allocation73_spill] sm:$0xff] %v13245_v41  ;;  %v5508_v45 = vadd.f32 %v5507_v58, %v13245_v41  ;;  %v5655_v24 = vmul.f32 %v13245_v41, %v13245_v41  ;;  %v13251_v15 = vpop.f32.mrb[97].mxu0  ;;  %v7738_v22 = vpop.f32.mrb[193].mxu1  ;;  %v5654_v3 = vmul.f32 %v13243_v23, %v13243_v23 }
 0x533   :  { %15601 = vst [vmem:[#allocation78_spill] sm:$0xff] %v13251_v15  ;;  %v5545_v52 = vadd.f32 %v5544_v53, %v13251_v15  ;;  %v5656_v10 = vmul.f32 %v13251_v15, %v13251_v15  ;;  %v7739_v57 = vadd.f32 %v7738_v22, %v7737_v39  ;;  %v13256_v11 = vpop.f32.mrb[98].mxu0  ;;  %v7740_v29 = vpop.f32.mrb[194].mxu1 }
 0x534   :  { %15602 = vst [vmem:[#allocation80_spill] sm:$0xff] %v13256_v11  ;;  %v5718_v58 = vadd.f32 %v5717_v48, %v5655_v24  ;;  %v5509_v42 = vadd.f32 %v5508_v45, %v13256_v11  ;;  %v5658_v5 = vmul.f32 %v13256_v11, %v13256_v11  ;;  %v13263_v41 = vpop.f32.mrb[99].mxu0  ;;  %v7741_v63 = vpop.f32.mrb[195].mxu1  ;;  %v8854_v24 = vld [vmem:[%s14903_s7 + $0x80] sm:$0xff]  }
 0x535   :  { %15603 = vst [vmem:[#allocation77_spill] sm:$0xff] %v13263_v41  ;;  %v5755_v53 = vadd.f32 %v5754_v7, %v5656_v10  ;;  %v13266_v17 = vadd.f32 %v7739_v57, %v12937_v62  ;;  %v5546_v39 = vadd.f32 %v5545_v52, %v13263_v41  ;;  %v5659_v22 = vmul.f32 %v13263_v41, %v13263_v41 }
 0x536   :  { %v5719_v15 = vadd.f32 %v5718_v58, %v5658_v5  ;;  %v7742_v61 = vadd.f32 %v7741_v63, %v7740_v29  ;;  %v5581_v7 = vadd.f32 %v5580_v13, %v13243_v23  ;;  %v5791_v10 = vadd.f32 %v5790_v26, %v5654_v3  ;;  %7921 = vmatprep.subr.bf16.mxu1 %v8854_v24 }
 0x537   :  { %v5657_v48 = vmul.f32 %v13266_v17, %v13266_v17  ;;  %v5756_v45 = vadd.f32 %v5755_v53, %v5659_v22  ;;  %7922 = vmatpush3.bf16.msra.mxu1 %v8854_v24 }
 0x538   :  { %v13278_v62 = vadd.f32 %v7742_v61, %v12942_v2  ;;  %v5582_v29 = vadd.f32 %v5581_v7, %v13266_v17 }
 0x539   :  { %v13280_v52 = vpop.f32.mrb[100].mxu0  ;;  %v7743_v57 = vpop.f32.mrb[196].mxu1  ;;  %v5792_v13 = vadd.f32 %v5791_v10, %v5657_v48 }
 0x53a   :  { %15604 = vst [vmem:[#allocation79_spill] sm:$0xff] %v13280_v52  ;;  %v5510_v58 = vadd.f32 %v5509_v42, %v13280_v52  ;;  %v5661_v5 = vmul.f32 %v13280_v52, %v13280_v52  ;;  %v13286_v63 = vpop.f32.mrb[101].mxu0  ;;  %v7744_v53 = vpop.f32.mrb[197].mxu1  ;;  %v5660_v42 = vmul.f32 %v13278_v62, %v13278_v62 }
 0x53b   :  { %15605 = vst [vmem:[#allocation84_spill] sm:$0xff] %v13286_v63  ;;  %v5547_v2 = vadd.f32 %v5546_v39, %v13286_v63  ;;  %v5662_v61 = vmul.f32 %v13286_v63, %v13286_v63  ;;  %v7745_v26 = vadd.f32 %v7744_v53, %v7743_v57  ;;  %v13291_v3 = vpop.f32.mrb[102].mxu0  ;;  %v7746_v22 = vpop.f32.mrb[198].mxu1 }
 0x53c   :  { %15606 = vst [vmem:[#allocation82_spill] sm:$0xff] %v13291_v3  ;;  %v5720_v7 = vadd.f32 %v5719_v15, %v5661_v5  ;;  %v5511_v52 = vadd.f32 %v5510_v58, %v13291_v3  ;;  %v5664_v41 = vmul.f32 %v13291_v3, %v13291_v3  ;;  %v13298_v24 = vpop.f32.mrb[103].mxu0  ;;  %v7747_v48 = vpop.f32.mrb[199].mxu1  ;;  %v5583_v5 = vadd.f32 %v5582_v29, %v13278_v62 }
 0x53d   :  { %15607 = vst [vmem:[#allocation83_spill] sm:$0xff] %v13298_v24  ;;  %v5757_v39 = vadd.f32 %v5756_v45, %v5662_v61  ;;  %v13301_v10 = vadd.f32 %v7745_v26, %v12947_v38  ;;  %v5548_v57 = vadd.f32 %v5547_v2, %v13298_v24  ;;  %v5665_v53 = vmul.f32 %v13298_v24, %v13298_v24 }
 0x53e   :  { %v5721_v63 = vadd.f32 %v5720_v7, %v5664_v41  ;;  %v7748_v11 = vadd.f32 %v7747_v48, %v7746_v22  ;;  %v5793_v45 = vadd.f32 %v5792_v13, %v5660_v42 }
 0x53f   :  { %v5663_v15 = vmul.f32 %v13301_v10, %v13301_v10  ;;  %v5758_v58 = vadd.f32 %v5757_v39, %v5665_v53  ;;  %v5584_v2 = vadd.f32 %v5583_v5, %v13301_v10 }
 0x540   :  { %v13310_v3 = vadd.f32 %v7748_v11, %v12949_v31 }
 0x541   :  { %v13312_v61 = vpop.f32.mrb[104].mxu0  ;;  %v7749_v38 = vpop.f32.mrb[200].mxu1  ;;  %v5794_v48 = vadd.f32 %v5793_v45, %v5663_v15 }
 0x542   :  { %15608 = vst [vmem:[#allocation81_spill] sm:$0xff] %v13312_v61  ;;  %v5512_v26 = vadd.f32 %v5511_v52, %v13312_v61  ;;  %v5667_v41 = vmul.f32 %v13312_v61, %v13312_v61  ;;  %v13318_v22 = vpop.f32.mrb[105].mxu0  ;;  %v7750_v7 = vpop.f32.mrb[201].mxu1  ;;  %v5666_v39 = vmul.f32 %v13310_v3, %v13310_v3 }
 0x543   :  { %15609 = vst [vmem:[#allocation6_spill] sm:$0xff] %v13318_v22  ;;  %v5549_v29 = vadd.f32 %v5548_v57, %v13318_v22  ;;  %v5668_v31 = vmul.f32 %v13318_v22, %v13318_v22  ;;  %v7751_v11 = vadd.f32 %v7750_v7, %v7749_v38  ;;  %v13323_v13 = vpop.f32.mrb[106].mxu0  ;;  %v7752_v42 = vpop.f32.mrb[202].mxu1 }
 0x544   :  { %15610 = vst [vmem:[#allocation8_spill] sm:$0xff] %v13323_v13  ;;  %v5722_v52 = vadd.f32 %v5721_v63, %v5667_v41  ;;  %v5513_v53 = vadd.f32 %v5512_v26, %v13323_v13  ;;  %v5670_v5 = vmul.f32 %v13323_v13, %v13323_v13  ;;  %v13330_v61 = vpop.f32.mrb[107].mxu0  ;;  %v7753_v15 = vpop.f32.mrb[203].mxu1  ;;  %v5585_v41 = vadd.f32 %v5584_v2, %v13310_v3 }
 0x545   :  { %15611 = vst [vmem:[#allocation5_spill] sm:$0xff] %v13330_v61  ;;  %v5759_v57 = vadd.f32 %v5758_v58, %v5668_v31  ;;  %v13333_v45 = vadd.f32 %v7751_v11, %v12951_v37  ;;  %v5550_v38 = vadd.f32 %v5549_v29, %v13330_v61  ;;  %v5671_v7 = vmul.f32 %v13330_v61, %v13330_v61  ;;  %v8857_v37 = vld [vmem:[%s14903_s7 + $0x88] sm:$0xff]  }
 0x546   :  { %v5723_v22 = vadd.f32 %v5722_v52, %v5670_v5  ;;  %v7754_v24 = vadd.f32 %v7753_v15, %v7752_v42  ;;  %v5795_v58 = vadd.f32 %v5794_v48, %v5666_v39  ;;  %7923 = vmatprep.subr.bf16.mxu1 %v8857_v37 }
 0x547   :  { %15612 = vst [vmem:[#allocation7_spill] sm:$0xff] %v13333_v45  ;;  %v5669_v63 = vmul.f32 %v13333_v45, %v13333_v45  ;;  %v5760_v26 = vadd.f32 %v5759_v57, %v5671_v7  ;;  %v5586_v11 = vadd.f32 %v5585_v41, %v13333_v45  ;;  %v8856_v7 = vld [vmem:[%s14903_s7 + $0x20] sm:$0xff]   ;;  %7924 = vmatpush3.bf16.msra.mxu1 %v8857_v37  ;;  %v8860_v37 = vld [vmem:[%s14903_s7 + $0x90] sm:$0xff]  }
 0x548   :  { %v13342_v13 = vadd.f32 %v7754_v24, %v12956_v6  ;;  %7925 = vmatprep.subr.bf16.mxu1 %v8860_v37 }
 0x549   :  { %v13347_v29 = vpop.f32.mrb[108].mxu0  ;;  %v7755_v31 = vpop.f32.mrb[204].mxu1  ;;  %v5796_v6 = vadd.f32 %v5795_v58, %v5669_v63 }
 0x54a   :  { %15613 = vst [vmem:[#allocation86_spill] sm:$0xff] %v13342_v13  ;;  %15614 = vst [vmem:[#allocation10_spill] sm:$0xff] %v13347_v29  ;;  %v5514_v42 = vadd.f32 %v5513_v53, %v13347_v29  ;;  %v5673_v52 = vmul.f32 %v13347_v29, %v13347_v29  ;;  %v13353_v5 = vpop.f32.mrb[109].mxu0  ;;  %v7756_v2 = vpop.f32.mrb[205].mxu1  ;;  %v8855_v53 = vld [vmem:[%s14903_s7 + $0x60] sm:$0xff]   ;;  %v5672_v63 = vmul.f32 %v13342_v13, %v13342_v13 }
 0x54b   :  { %15615 = vst [vmem:[#allocation85_spill] sm:$0xff] %v13353_v5  ;;  %v5551_v24 = vadd.f32 %v5550_v38, %v13353_v5  ;;  %v5674_v48 = vmul.f32 %v13353_v5, %v13353_v5  ;;  %v7757_v39 = vadd.f32 %v7756_v2, %v7755_v31  ;;  %v13358_v15 = vpop.f32.mrb[110].mxu0  ;;  %v7758_v57 = vpop.f32.mrb[206].mxu1  ;;  %v8858_v38 = vld [vmem:[%s14903_s7 + $0x68] sm:$0xff]   ;;  %7793 = vmatprep.subr.bf16.mxu0 %v8855_v53 }
 0x54c   :  { %15616 = vst [vmem:[#allocation9_spill] sm:$0xff] %v13358_v15  ;;  %v5724_v41 = vadd.f32 %v5723_v22, %v5673_v52  ;;  %v5515_v58 = vadd.f32 %v5514_v42, %v13358_v15  ;;  %v5676_v31 = vmul.f32 %v13358_v15, %v13358_v15  ;;  %v13374_v2 = vpop.f32.mrb[111].mxu0  ;;  %v7759_v5 = vpop.f32.mrb[207].mxu1  ;;  %v8863_v42 = vld [vmem:[%s14903_s7 + $0x98] sm:$0xff]   ;;  %7794 = vmatpush3.bf16.msra.mxu0 %v8856_v7 }
 0x54d   :  { %15617 = vst [vmem:[#allocation88_spill] sm:$0xff] %v13374_v2  ;;  %v5761_v29 = vadd.f32 %v5760_v26, %v5674_v48  ;;  %v13380_v61 = vadd.f32 %v7757_v39, %v12961_v30  ;;  %v5552_v45 = vadd.f32 %v5551_v24, %v13374_v2  ;;  %v5677_v22 = vmul.f32 %v13374_v2, %v13374_v2  ;;  %v8859_v26 = vld [vmem:[%s14903_s7 + $0x28] sm:$0xff]   ;;  %v8861_v48 = vld [vmem:[%s14903_s7 + $0x70] sm:$0xff]  }
 0x54e   :  { %v5725_v52 = vadd.f32 %v5724_v41, %v5676_v31  ;;  %v7760_v15 = vadd.f32 %v7759_v5, %v7758_v57  ;;  %7795 = vmatprep.subr.bf16.mxu0 %v8858_v38  ;;  %7926 = vmatpush3.bf16.msra.mxu1 %v8860_v37  ;;  %v5587_v39 = vadd.f32 %v5586_v11, %v13342_v13  ;;  %v8865_v57 = vld [vmem:[%s14903_s7 + $0xa0] sm:$0xff]  }
 0x54f   :  { %15618 = vst [vmem:[#allocation12_spill] sm:$0xff] %v13380_v61  ;;  %v5675_v30 = vmul.f32 %v13380_v61, %v13380_v61  ;;  %v5762_v24 = vadd.f32 %v5761_v29, %v5677_v22  ;;  %v5797_v53 = vadd.f32 %v5796_v6, %v5672_v63  ;;  %7927 = vmatprep.subr.bf16.mxu1 %v8863_v42 }
 0x550   :  { %v13398_v5 = vadd.f32 %v7760_v15, %v12963_v47  ;;  %v5588_v38 = vadd.f32 %v5587_v39, %v13380_v61  ;;  %7796 = vmatpush3.bf16.msra.mxu0 %v8859_v26  ;;  %v8862_v15 = vld [vmem:[%s14903_s7 + $0x30] sm:$0xff]   ;;  %v8864_v39 = vld [vmem:[%s14903_s7 + $0x78] sm:$0xff]  }
 0x551   :  { %v13403_v7 = vpop.f32.mrb[112].mxu0  ;;  %v7761_v29 = vpop.f32.mrb[208].mxu1  ;;  %v5798_v41 = vadd.f32 %v5797_v53, %v5675_v30  ;;  %7797 = vmatprep.subr.bf16.mxu0 %v8861_v48 }
 0x552   :  { %15619 = vst [vmem:[#allocation87_spill] sm:$0xff] %v13403_v7  ;;  %v5516_v31 = vadd.f32 %v5515_v58, %v13403_v7  ;;  %v5679_v11 = vmul.f32 %v13403_v7, %v13403_v7  ;;  %v13409_v6 = vpop.f32.mrb[113].mxu0  ;;  %v7762_v47 = vpop.f32.mrb[209].mxu1  ;;  %7928 = vmatpush3.bf16.msra.mxu1 %v8863_v42  ;;  %v5678_v26 = vmul.f32 %v13398_v5, %v13398_v5  ;;  %v8867_v42 = vld [vmem:[%s14903_s7 + $0xa8] sm:$0xff]  }
 0x553   :  { %15620 = vst [vmem:[#allocation11_spill] sm:$0xff] %v13409_v6  ;;  %v5553_v63 = vadd.f32 %v5552_v45, %v13409_v6  ;;  %v5680_v37 = vmul.f32 %v13409_v6, %v13409_v6  ;;  %v7763_v22 = vadd.f32 %v7762_v47, %v7761_v29  ;;  %v13417_v30 = vpop.f32.mrb[114].mxu0  ;;  %v7764_v58 = vpop.f32.mrb[210].mxu1  ;;  %7929 = vmatprep.subr.bf16.mxu1 %v8865_v57 }
 0x554   :  { %15621 = vst [vmem:[#allocation14_spill] sm:$0xff] %v13417_v30  ;;  %v5726_v53 = vadd.f32 %v5725_v52, %v5679_v11  ;;  %v5517_v7 = vadd.f32 %v5516_v31, %v13417_v30  ;;  %v5682_v45 = vmul.f32 %v13417_v30, %v13417_v30  ;;  %v13427_v6 = vpop.f32.mrb[115].mxu0  ;;  %v7765_v29 = vpop.f32.mrb[211].mxu1  ;;  %7798 = vmatpush3.bf16.msra.mxu0 %v8862_v15  ;;  %v8866_v30 = vld [vmem:[%s14903_s7 + $0x38] sm:$0xff]   ;;  %v8868_v15 = vld [vmem:[%s14903_s7 + $0xb0] sm:$0xff]  }
 0x555   :  { %v5763_v48 = vadd.f32 %v5762_v24, %v5680_v37  ;;  %v13433_v47 = vadd.f32 %v7763_v22, %v12965_v19  ;;  %v5554_v2 = vadd.f32 %v5553_v63, %v13427_v6  ;;  %v5683_v52 = vmul.f32 %v13427_v6, %v13427_v6  ;;  %7799 = vmatprep.subr.bf16.mxu0 %v8864_v39 }
 0x556   :  { %v5727_v31 = vadd.f32 %v5726_v53, %v5682_v45  ;;  %v7766_v11 = vadd.f32 %v7765_v29, %v7764_v58  ;;  %7930 = vmatpush3.bf16.msra.mxu1 %v8865_v57  ;;  %v5589_v19 = vadd.f32 %v5588_v38, %v13398_v5  ;;  %v5799_v63 = vadd.f32 %v5798_v41, %v5678_v26 }
 0x557   :  { %v5681_v61 = vmul.f32 %v13433_v47, %v13433_v47  ;;  %v5764_v13 = vadd.f32 %v5763_v48, %v5683_v52  ;;  %7931 = vmatprep.subr.bf16.mxu1 %v8867_v42 }
 0x558   :  { %v13445_v24 = vadd.f32 %v7766_v11, %v12970_v49  ;;  %v5590_v58 = vadd.f32 %v5589_v19, %v13433_v47  ;;  %7800 = vmatpush3.bf16.msra.mxu0 %v8866_v30  ;;  %v8869_v19 = vld [vmem:[%s14903_s7 + $0xb8] sm:$0xff]  }
 0x559   :  { %v13450_v37 = vpop.f32.mrb[116].mxu0  ;;  %v7767_v22 = vpop.f32.mrb[212].mxu1  ;;  %v5800_v39 = vadd.f32 %v5799_v63, %v5681_v61 }
 0x55a   :  { %15622 = vst [vmem:[#allocation92_spill] sm:$0xff] %v13450_v37  ;;  %v5518_v53 = vadd.f32 %v5517_v7, %v13450_v37  ;;  %v5685_v57 = vmul.f32 %v13450_v37, %v13450_v37  ;;  %v13456_v38 = vpop.f32.mrb[117].mxu0  ;;  %v7768_v49 = vpop.f32.mrb[213].mxu1  ;;  %7932 = vmatpush3.bf16.msra.mxu1 %v8867_v42  ;;  %v5684_v7 = vmul.f32 %v13445_v24, %v13445_v24 }
 0x55b   :  { %15623 = vst [vmem:[#allocation13_spill] sm:$0xff] %v13456_v38  ;;  %v5555_v45 = vadd.f32 %v5554_v2, %v13456_v38  ;;  %v5686_v41 = vmul.f32 %v13456_v38, %v13456_v38  ;;  %v7769_v26 = vadd.f32 %v7768_v49, %v7767_v22  ;;  %v13461_v29 = vpop.f32.mrb[118].mxu0  ;;  %v7770_v48 = vpop.f32.mrb[214].mxu1  ;;  %7933 = vmatprep.subr.bf16.mxu1 %v8868_v15 }
 0x55c   :  { %15624 = vst [vmem:[#allocation91_spill] sm:$0xff] %v13461_v29  ;;  %v5728_v52 = vadd.f32 %v5727_v31, %v5685_v57  ;;  %v5519_v11 = vadd.f32 %v5518_v53, %v13461_v29  ;;  %v5688_v30 = vmul.f32 %v13461_v29, %v13461_v29  ;;  %v13468_v61 = vpop.f32.mrb[119].mxu0  ;;  %v7771_v2 = vpop.f32.mrb[215].mxu1  ;;  %v5591_v38 = vadd.f32 %v5590_v58, %v13445_v24 }
 0x55d   :  { %15625 = vst [vmem:[#allocation16_spill] sm:$0xff] %v13468_v61  ;;  %v5765_v63 = vadd.f32 %v5764_v13, %v5686_v41  ;;  %v13474_v42 = vadd.f32 %v7769_v26, %v12975_v40  ;;  %v5556_v22 = vadd.f32 %v5555_v45, %v13468_v61  ;;  %v5689_v31 = vmul.f32 %v13468_v61, %v13468_v61 }
 0x55e   :  { %v5729_v53 = vadd.f32 %v5728_v52, %v5688_v30  ;;  %v7772_v57 = vadd.f32 %v7771_v2, %v7770_v48  ;;  %7934 = vmatpush3.bf16.msra.mxu1 %v8868_v15  ;;  %v5801_v40 = vadd.f32 %v5800_v39, %v5684_v7 }
 0x55f   :  { %15626 = vst [vmem:[#allocation94_spill] sm:$0xff] %v13474_v42  ;;  %v5687_v49 = vmul.f32 %v13474_v42, %v13474_v42  ;;  %v5766_v29 = vadd.f32 %v5765_v63, %v5689_v31  ;;  %7935 = vmatprep.subr.bf16.mxu1 %v8869_v19  ;;  %v5592_v41 = vadd.f32 %v5591_v38, %v13474_v42 }
 0x560   :  { %v13483_v37 = vadd.f32 %v7772_v57, %v12977_v8 }
 0x561   :  { %v13485_v13 = vpop.f32.mrb[120].mxu0  ;;  %v7773_v45 = vpop.f32.mrb[216].mxu1  ;;  %v5802_v30 = vadd.f32 %v5801_v40, %v5687_v49 }
 0x562   :  { %15627 = vst [vmem:[#allocation18_spill] sm:$0xff] %v13483_v37  ;;  %15628 = vst [vmem:[#allocation93_spill] sm:$0xff] %v13485_v13  ;;  %v5520_v26 = vadd.f32 %v5519_v11, %v13485_v13  ;;  %v5691_v48 = vmul.f32 %v13485_v13, %v13485_v13  ;;  %v13491_v52 = vpop.f32.mrb[121].mxu0  ;;  %v7774_v15 = vpop.f32.mrb[217].mxu1  ;;  %7936 = vmatpush3.bf16.msra.mxu1 %v8869_v19  ;;  %v5690_v38 = vmul.f32 %v13483_v37, %v13483_v37 }
 0x563   :  { %15629 = vst [vmem:[#allocation17_spill] sm:$0xff] %v13491_v52  ;;  %v5557_v58 = vadd.f32 %v5556_v22, %v13491_v52  ;;  %v5692_v8 = vmul.f32 %v13491_v52, %v13491_v52  ;;  %v7775_v39 = vadd.f32 %v7774_v15, %v7773_v45  ;;  %v13496_v7 = vpop.f32.mrb[122].mxu0  ;;  %v7776_v2 = vpop.f32.mrb[218].mxu1  ;;  %v5593_v15 = vadd.f32 %v5592_v41, %v13483_v37 }
 0x564   :  { %15630 = vst [vmem:[#allocation20_spill] sm:$0xff] %v13496_v7  ;;  %v5730_v11 = vadd.f32 %v5729_v53, %v5691_v48  ;;  %v5521_v63 = vadd.f32 %v5520_v26, %v13496_v7  ;;  %v5694_v31 = vmul.f32 %v13496_v7, %v13496_v7  ;;  %v13503_v57 = vpop.f32.mrb[123].mxu0  ;;  %v7777_v22 = vpop.f32.mrb[219].mxu1  ;;  %v5803_v52 = vadd.f32 %v5802_v30, %v5690_v38 }
 0x565   :  { %15631 = vst [vmem:[#allocation22_spill] sm:$0xff] %v13503_v57  ;;  %v5767_v49 = vadd.f32 %v5766_v29, %v5692_v8  ;;  %v13506_v40 = vadd.f32 %v7775_v39, %v12979_v0  ;;  %v5558_v45 = vadd.f32 %v5557_v58, %v13503_v57  ;;  %v5695_v19 = vmul.f32 %v13503_v57, %v13503_v57 }
 0x566   :  { %v5731_v53 = vadd.f32 %v5730_v11, %v5694_v31  ;;  %v7778_v48 = vadd.f32 %v7777_v22, %v7776_v2 }
 0x567   :  { %15632 = vst [vmem:[#allocation19_spill] sm:$0xff] %v13506_v40  ;;  %v5693_v26 = vmul.f32 %v13506_v40, %v13506_v40  ;;  %v5768_v7 = vadd.f32 %v5767_v49, %v5695_v19  ;;  %v5594_v13 = vadd.f32 %v5593_v15, %v13506_v40 }
 0x568   :  { %v13516_v29 = vadd.f32 %v7778_v48, %v12984_v18 }
 0x569   :  { %v13518_v0 = vpop.f32.mrb[124].mxu0  ;;  %v7779_v58 = vpop.f32.mrb[220].mxu1  ;;  %v5804_v8 = vadd.f32 %v5803_v52, %v5693_v26 }
 0x56a   :  { %15633 = vst [vmem:[#allocation21_spill] sm:$0xff] %v13516_v29  ;;  %15634 = vst [vmem:[#allocation23_spill] sm:$0xff] %v13518_v0  ;;  %v5696_v39 = vmul.f32 %v13516_v29, %v13516_v29  ;;  %v5522_v41 = vadd.f32 %v5521_v63, %v13518_v0  ;;  %v5697_v2 = vmul.f32 %v13518_v0, %v13518_v0  ;;  %v13525_v11 = vpop.f32.mrb[125].mxu0  ;;  %v7780_v30 = vpop.f32.mrb[221].mxu1 }
 0x56b   :  { %15635 = vst [vmem:[#allocation28_spill] sm:$0xff] %v13525_v11  ;;  %v5559_v38 = vadd.f32 %v5558_v45, %v13525_v11  ;;  %v5698_v18 = vmul.f32 %v13525_v11, %v13525_v11  ;;  %v7781_v31 = vadd.f32 %v7780_v30, %v7779_v58  ;;  %v13530_v22 = vpop.f32.mrb[126].mxu0  ;;  %v7782_v52 = vpop.f32.mrb[222].mxu1  ;;  %v5595_v49 = vadd.f32 %v5594_v13, %v13516_v29 }
 0x56c   :  { %15636 = vst [vmem:[#allocation99_spill] sm:$0xff] %v13530_v22  ;;  %v5732_v19 = vadd.f32 %v5731_v53, %v5697_v2  ;;  %v5523_v63 = vadd.f32 %v5522_v41, %v13530_v22  ;;  %v5700_v15 = vmul.f32 %v13530_v22, %v13530_v22  ;;  %v13536_v48 = vpop.f32.mrb[127].mxu0  ;;  %v7783_v26 = vpop.f32.mrb[223].mxu1  ;;  %v5805_v11 = vadd.f32 %v5804_v8, %v5696_v39 }
 0x56d   :  { %15637 = vst [vmem:[#allocation27_spill] sm:$0xff] %v13536_v48  ;;  %v5769_v0 = vadd.f32 %v5768_v7, %v5698_v18  ;;  %v13539_v45 = vadd.f32 %v7781_v31, %v12989_v60  ;;  %v5560_v58 = vadd.f32 %v5559_v38, %v13536_v48  ;;  %v5701_v30 = vmul.f32 %v13536_v48, %v13536_v48 }
 0x56e   :  { %v5524_v13 = vrot.slane %v5523_v63, 4  ;;  %v5733_v53 = vadd.f32 %v5732_v19, %v5700_v15  ;;  %v7784_v2 = vadd.f32 %v7783_v26, %v7782_v52 }
 0x56f   :  { %15638 = vst [vmem:[#allocation29_spill] sm:$0xff] %v13539_v45  ;;  %v5596_v41 = vadd.f32 %v5595_v49, %v13539_v45  ;;  %v5699_v22 = vmul.f32 %v13539_v45, %v13539_v45  ;;  %v5561_v29 = vrot.slane %v5560_v58, 4  ;;  %v5770_v57 = vadd.f32 %v5769_v0, %v5701_v30 }
 0x570   :  { %v5525_v7 = vadd.f32 %v5524_v13, %v5523_v63  ;;  %v5734_v18 = vrot.slane %v5733_v53, 4  ;;  %v13548_v60 = vadd.f32 %v7784_v2, %v12991_v12 }
 0x571   :  { %v5806_v38 = vadd.f32 %v5805_v11, %v5699_v22  ;;  %v5562_v31 = vadd.f32 %v5561_v29, %v5560_v58  ;;  %v5771_v40 = vrot.slane %v5770_v57, 4 }
 0x572   :  { %v5526_v48 = vrot.slane %v5525_v7, 2  ;;  %v5735_v8 = vadd.f32 %v5734_v18, %v5733_v53  ;;  %v5597_v39 = vadd.f32 %v5596_v41, %v13548_v60  ;;  %v5702_v52 = vmul.f32 %v13548_v60, %v13548_v60 }
 0x573   :  { %v5563_v49 = vrot.slane %v5562_v31, 2  ;;  %v5772_v19 = vadd.f32 %v5771_v40, %v5770_v57 }
 0x574   :  { %v5527_v15 = vadd.f32 %v5526_v48, %v5525_v7  ;;  %v5736_v26 = vrot.slane %v5735_v8, 2  ;;  %v5598_v0 = vrot.slane %v5597_v39, 4  ;;  %v5807_v63 = vadd.f32 %v5806_v38, %v5702_v52 }
 0x575   :  { %v5564_v30 = vadd.f32 %v5563_v49, %v5562_v31  ;;  %v5773_v13 = vrot.slane %v5772_v19, 2 }
 0x576   :  { %v5528_v12 = vrot.slane %v5527_v15, 1  ;;  %v5737_v2 = vadd.f32 %v5736_v26, %v5735_v8  ;;  %v5599_v11 = vadd.f32 %v5598_v0, %v5597_v39  ;;  %v5808_v29 = vrot.slane %v5807_v63, 4 }
 0x577   :  { %v5565_v22 = vrot.slane %v5564_v30, 1  ;;  %v5774_v58 = vadd.f32 %v5773_v13, %v5772_v19 }
 0x578   :  { %v5529_v53 = vadd.f32 %v5528_v12, %v5527_v15  ;;  %v5738_v18 = vrot.slane %v5737_v2, 1  ;;  %v5600_v41 = vrot.slane %v5599_v11, 2  ;;  %v5809_v45 = vadd.f32 %v5808_v29, %v5807_v63 }
 0x579   :  { %v5566_v37 = vadd.f32 %v5565_v22, %v5564_v30  ;;  %v5775_v61 = vrot.slane %v5774_v58, 1 }
 0x57a   :  { %v5604_v42 = vmul.f32 0.00390625, %v5529_v53  ;;  %v5739_v57 = vadd.f32 %v5738_v18, %v5737_v2  ;;  %v5601_v40 = vadd.f32 %v5600_v41, %v5599_v11  ;;  %v5810_v48 = vrot.slane %v5809_v45, 2  ;;  %v15639_v18 = vld [vmem:[#allocation100_spill] sm:$0xff] }
 0x57b   :  { %v5605_v7 = vmul.f32 0.00390625, %v5566_v37  ;;  %v5776_v38 = vadd.f32 %v5775_v61, %v5774_v58 }
 0x57c   :  { %v5814_v31 = vmul.f32 0.00390625, %v5739_v57  ;;  %v5817_v52 = vmul.f32 %v5604_v42, %v5604_v42  ;;  %v5602_v49 = vrot.slane %v5601_v40, 1  ;;  %v5811_v8 = vadd.f32 %v5810_v48, %v5809_v45  ;;  %v5491_v48 = vld [vmem:[%s14901_s5] sm:$0x7] }
 0x57d   :  { %v5815_v39 = vmul.f32 0.00390625, %v5776_v38  ;;  %v5818_v26 = vmul.f32 %v5605_v7, %v5605_v7 }
 0x57e   :  { %v5820_v0 = vsub.f32 %v5814_v31, %v5817_v52  ;;  %v5603_v19 = vadd.f32 %v5602_v49, %v5601_v40  ;;  %v5812_v15 = vrot.slane %v5811_v8, 1  ;;  %v15640_v52 = vld [vmem:[#allocation101_spill] sm:$0xff] }
 0x57f   :  { %v5821_v13 = vsub.f32 %v5815_v39, %v5818_v26  ;;  %v15642_v26 = vld [vmem:[#allocation103_spill] sm:$0xff] }
 0x580   :  { %v5823_v12 = vadd.f32 1e-05, %v5820_v0  ;;  %v5606_v63 = vmul.f32 0.00390625, %v5603_v19  ;;  %v5813_v30 = vadd.f32 %v5812_v15, %v5811_v8  ;;  %v15641_v8 = vld [vmem:[#allocation102_spill] sm:$0xff] }
 0x581   :  { %v5824_v29 = vadd.f32 1e-05, %v5821_v13 }
 0x582   :  { %8878 = vrsqrt.f32 %v5823_v12  ;;  %v5816_v2 = vmul.f32 0.00390625, %v5813_v30  ;;  %v5819_v11 = vmul.f32 %v5606_v63, %v5606_v63 }
 0x583   :  { %8880 = vrsqrt.f32 %v5824_v29 }
 0x584   :  { %v5822_v37 = vsub.f32 %v5816_v2, %v5819_v11 }
 0x586   :  { %v5825_v61 = vadd.f32 1e-05, %v5822_v37 }
 0x588   :  { %8882 = vrsqrt.f32 %v5825_v61  ;;  %v15648_v61 = vld [vmem:[#allocation96_spill] sm:$0xff] }
 0x58c   :  { %v8879_v22 = vpop.eup %8878 }
 0x58d   :  { %v8881_v58 = vpop.eup %8880 }
 0x58e   :  { %v5832_v45 = vcombine.low %v8879_v22, %v8881_v58  ;;  %v15649_v22 = vld [vmem:[#allocation98_spill] sm:$0xff] }
 0x590   :  { %v5839_v41 = vrot.slane %v5832_v45, %v15639_v18  ;;  %v15651_v45 = vld [vmem:[#allocation95_spill] sm:$0xff] }
 0x592   :  { %v8883_v53 = vpop.eup %8882 }
 0x593   :  { %v5846_v57 = vrot.slane %v8883_v53, %v15639_v18 }
 0x595   :  { %v5847_v40 = vcombine.low %v5839_v41, %v5846_v57  ;;  %v15652_v41 = vld [vmem:[#allocation97_spill] sm:$0xff] }
 0x596   :  { %v5492_v57 = vld [vmem:[%s14902_s6] sm:$0x7] }
 0x597   :  { %v5854_v38 = vrot.slane %v5847_v40, %v15639_v18 }
 0x599   :  { %v5856_v31 = vmul.f32 %v5854_v38, %v5491_v48  ;;  %v15654_v48 = vld [vmem:[#allocation24_spill] sm:$0xff]  ;;  %v15655_v38 = vld [vmem:[#allocation31_spill] sm:$0xff] }
 0x59b   :  { %v13560_v49 = vrot.slane %v5856_v31, %v15640_v52  ;;  %v13563_v39 = vrot.slane %v5856_v31, %v15641_v8  ;;  %v13566_v0 = vrot.slane %v5856_v31, %v15642_v26 }
 0x59d   :  { %v5873_v19 = vmul.f32 %v13560_v49, %v5604_v42  ;;  %v5874_v15 = vmul.f32 %v13563_v39, %v5605_v7  ;;  %v5875_v13 = vmul.f32 %v13566_v0, %v5606_v63  ;;  %v13573_v12 = vmul.f32 %v13566_v0, %v13548_v60 }
 0x59e   :  { %v13577_v30 = vmul.f32 %v13560_v49, %v12993_v9  ;;  %v13581_v29 = vmul.f32 %v13563_v39, %v12995_v46  ;;  %v13585_v2 = vmul.f32 %v13566_v0, %v13010_v34  ;;  %v13589_v42 = vmul.f32 %v13560_v49, %v12997_v14 }
 0x59f   :  { %15643 = vst [vmem:[#allocation35_spill] sm:$0xff] %v13573_v12  ;;  %v5879_v7 = vcombine.low %v5873_v19, %v5874_v15  ;;  %v5893_v60 = vrot.slane %v5875_v13, %v15639_v18  ;;  %v13594_v63 = vmul.f32 %v13563_v39, %v13007_v21  ;;  %v13598_v9 = vmul.f32 %v13566_v0, %v13017_v4  ;;  %v15657_v13 = vld [vmem:[#allocation25_spill] sm:$0xff]  ;;  %v15672_v12 = vld [vmem:[#allocation15_spill] sm:$0xff] }
 0x5a0   :  { %15644 = vst [vmem:[#allocation26_spill] sm:$0xff] %v13585_v2  ;;  %v13602_v46 = vmul.f32 %v13560_v49, %v13019_v54  ;;  %v13606_v34 = vmul.f32 %v13563_v39, %v13024_v16  ;;  %v13610_v14 = vmul.f32 %v13566_v0, %v13039_v27  ;;  %v13614_v21 = vmul.f32 %v13560_v49, %v13029_v55  ;;  %v15646_v27 = vld [vmem:[#allocation90_spill] sm:$0xff] }
 0x5a1   :  { %15645 = vst [vmem:[#allocation32_spill] sm:$0xff] %v13598_v9  ;;  %v5886_v11 = vrot.slane %v5879_v7, %v15639_v18  ;;  %v13619_v4 = vmul.f32 %v13563_v39, %v13036_v32  ;;  %v13623_v54 = vmul.f32 %v13566_v0, %v13051_v28  ;;  %v13627_v16 = vmul.f32 %v13560_v49, %v13053_v20  ;;  %v15700_v9 = vld [vmem:[#allocation5_spill] sm:$0xff]  ;;  %v15704_v2 = vld [vmem:[#allocation10_spill] sm:$0xff] }
 0x5a2   :  { %v13631_v37 = vmul.f32 %v13563_v39, %v15646_v27  ;;  %v13635_v55 = vmul.f32 %v13566_v0, %v13074_v43  ;;  %v13639_v32 = vmul.f32 %v13560_v49, %v15648_v61  ;;  %v13643_v28 = vmul.f32 %v13563_v39, %v15649_v22  ;;  %v15660_v27 = vld [vmem:[#allocation33_spill] sm:$0xff] }
 0x5a3   :  { %v5894_v58 = vcombine.low %v5886_v11, %v5893_v60  ;;  %v13647_v20 = vmul.f32 %v13566_v0, %v13083_v36  ;;  %v13651_v53 = vmul.f32 %v13560_v49, %v15651_v45  ;;  %v13655_v43 = vmul.f32 %v13563_v39, %v15652_v41 }
 0x5a4   :  { %15647 = vst [vmem:[#allocation37_spill] sm:$0xff] %v13635_v55  ;;  %v13662_v40 = vmul.f32 %v13566_v0, %v13106_v1  ;;  %v13666_v36 = vmul.f32 %v13560_v49, %v15654_v48  ;;  %v13670_v31 = vmul.f32 %v13563_v39, %v15655_v38  ;;  %v13674_v19 = vmul.f32 %v13566_v0, %v13115_v56  ;;  %v15658_v1 = vld [vmem:[#allocation30_spill] sm:$0xff]  ;;  %v15661_v56 = vld [vmem:[#allocation39_spill] sm:$0xff]  ;;  %v15698_v55 = vld [vmem:[#allocation8_spill] sm:$0xff] }
 0x5a5   :  { %15650 = vst [vmem:[#allocation43_spill] sm:$0xff] %v13647_v20  ;;  %v5901_v15 = vrot.slane %v5894_v58, %v15639_v18  ;;  %v13679_v7 = vmul.f32 %v13560_v49, %v15657_v13  ;;  %v13683_v60 = vmul.f32 %v13563_v39, %v15658_v1  ;;  %v13687_v11 = vmul.f32 %v13566_v0, %v13138_v25  ;;  %v15663_v58 = vld [vmem:[#allocation36_spill] sm:$0xff]  ;;  %v15664_v48 = vld [vmem:[#allocation38_spill] sm:$0xff]  ;;  %v15666_v13 = vld [vmem:[#allocation41_spill] sm:$0xff] }
 0x5a6   :  { %15653 = vst [vmem:[#allocation34_spill] sm:$0xff] %v13662_v40  ;;  %15656 = vst [vmem:[#allocation40_spill] sm:$0xff] %v13674_v19  ;;  %v13691_v61 = vmul.f32 %v13560_v49, %v15660_v27  ;;  %v13695_v22 = vmul.f32 %v13563_v39, %v15661_v56  ;;  %v13699_v18 = vmul.f32 %v13566_v0, %v13147_v44  ;;  %v15667_v27 = vld [vmem:[#allocation44_spill] sm:$0xff]  ;;  %v15691_v40 = vld [vmem:[#allocation83_spill] sm:$0xff] }
 0x5a7   :  { %15659 = vst [vmem:[#allocation45_spill] sm:$0xff] %v13687_v11  ;;  %v13703_v45 = vmul.f32 %v13560_v49, %v15663_v58  ;;  %v5903_v41 = vsub.f32 %v5492_v57, %v5901_v15  ;;  %v13707_v25 = vmul.f32 %v13563_v39, %v15664_v48  ;;  %v13711_v38 = vmul.f32 %v13566_v0, %v13170_v50  ;;  %v15669_v57 = vld [vmem:[#allocation70_spill] sm:$0xff]  ;;  %v15670_v58 = vld [vmem:[#allocation72_spill] sm:$0xff]  ;;  %v15685_v11 = vld [vmem:[#allocation77_spill] sm:$0xff] }
 0x5a8   :  { %15662 = vst [vmem:[#allocation42_spill] sm:$0xff] %v13699_v18  ;;  %v13715_v1 = vmul.f32 %v13560_v49, %v15666_v13  ;;  %v13719_v44 = vmul.f32 %v13563_v39, %v15667_v27  ;;  %v13723_v56 = vmul.f32 %v13566_v0, %v13179_v51  ;;  %v13727_v15 = vmul.f32 %v13560_v49, %v15669_v57  ;;  %v15682_v18 = vld [vmem:[#allocation78_spill] sm:$0xff]  ;;  %v15688_v19 = vld [vmem:[#allocation84_spill] sm:$0xff] }
 0x5a9   :  { %15665 = vst [vmem:[#allocation47_spill] sm:$0xff] %v13711_v38  ;;  %v13731_v50 = vmul.f32 %v13563_v39, %v15670_v58  ;;  %v13734_v48 = vrot.slane %v5903_v41, %v15640_v52  ;;  %v13737_v13 = vrot.slane %v5903_v41, %v15641_v8  ;;  %v13740_v27 = vrot.slane %v5903_v41, %v15642_v26  ;;  %v15675_v8 = vld [vmem:[#allocation71_spill] sm:$0xff]  ;;  %v15676_v41 = vld [vmem:[#allocation76_spill] sm:$0xff]  ;;  %v15694_v20 = vld [vmem:[#allocation6_spill] sm:$0xff] }
 0x5aa   :  { %15668 = vst [vmem:[#allocation46_spill] sm:$0xff] %v13723_v56  ;;  %v13744_v51 = vmul.f32 %v13566_v0, %v13202_v35  ;;  %v13748_v57 = vmul.f32 %v13560_v49, %v15672_v12  ;;  %v15673_v56 = vld [vmem:[#allocation69_spill] sm:$0xff]  ;;  %v13756_v52 = vmul.f32 %v13566_v0, %v13211_v33  ;;  %v13760_v26 = vmul.f32 %v13560_v49, %v15675_v8  ;;  %v15679_v38 = vld [vmem:[#allocation75_spill] sm:$0xff] }
 0x5ab   :  { %v13752_v58 = vmul.f32 %v13563_v39, %v15673_v56  ;;  %v13764_v35 = vmul.f32 %v13563_v39, %v15676_v41  ;;  %v13768_v12 = vmul.f32 %v13566_v0, %v13234_v59  ;;  %v13776_v33 = vmul.f32 %v13563_v39, %v15679_v38 }
 0x5ac   :  { %15671 = vst [vmem:[#allocation49_spill] sm:$0xff] %v13744_v51  ;;  %15674 = vst [vmem:[#allocation48_spill] sm:$0xff] %v13756_v52  ;;  %v15678_v51 = vld [vmem:[#allocation74_spill] sm:$0xff]  ;;  %v13780_v8 = vmul.f32 %v13566_v0, %v13243_v23  ;;  %v15681_v52 = vld [vmem:[#allocation73_spill] sm:$0xff]  ;;  %v13788_v59 = vmul.f32 %v13563_v39, %v15682_v18  ;;  %v13800_v23 = vmul.f32 %v13563_v39, %v15685_v11 }
 0x5ad   :  { %15677 = vst [vmem:[#allocation51_spill] sm:$0xff] %v13768_v12  ;;  %v13772_v56 = vmul.f32 %v13560_v49, %v15678_v51  ;;  %v13784_v41 = vmul.f32 %v13560_v49, %v15681_v52  ;;  %v13792_v51 = vmul.f32 %v13566_v0, %v13266_v17  ;;  %v15684_v12 = vld [vmem:[#allocation80_spill] sm:$0xff]  ;;  %v13804_v52 = vmul.f32 %v13566_v0, %v13278_v62 }
 0x5ae   :  { %15680 = vst [vmem:[#allocation53_spill] sm:$0xff] %v13780_v8  ;;  %v13796_v38 = vmul.f32 %v13560_v49, %v15684_v12  ;;  %v15687_v8 = vld [vmem:[#allocation79_spill] sm:$0xff]  ;;  %v13812_v17 = vmul.f32 %v13563_v39, %v15688_v19  ;;  %v13816_v12 = vmul.f32 %v13566_v0, %v13301_v10  ;;  %v13824_v62 = vmul.f32 %v13563_v39, %v15691_v40 }
 0x5af   :  { %15683 = vst [vmem:[#allocation52_spill] sm:$0xff] %v13792_v51  ;;  %15686 = vst [vmem:[#allocation50_spill] sm:$0xff] %v13804_v52  ;;  %v13808_v18 = vmul.f32 %v13560_v49, %v15687_v8  ;;  %v15690_v51 = vld [vmem:[#allocation82_spill] sm:$0xff]  ;;  %v13828_v8 = vmul.f32 %v13566_v0, %v13310_v3  ;;  %v15693_v52 = vld [vmem:[#allocation81_spill] sm:$0xff]  ;;  %v13836_v10 = vmul.f32 %v13563_v39, %v15694_v20 }
 0x5b0   :  { %15689 = vst [vmem:[#allocation54_spill] sm:$0xff] %v13816_v12  ;;  %v13820_v11 = vmul.f32 %v13560_v49, %v15690_v51  ;;  %v13832_v19 = vmul.f32 %v13560_v49, %v15693_v52  ;;  %v15696_v12 = vld [vmem:[#allocation7_spill] sm:$0xff]  ;;  %v13844_v40 = vmul.f32 %v13560_v49, %v15698_v55  ;;  %v13848_v3 = vmul.f32 %v13563_v39, %v15700_v9 }
 0x5b1   :  { %15692 = vst [vmem:[#allocation56_spill] sm:$0xff] %v13828_v8  ;;  %15695 = vst [vmem:[#allocation59_spill] sm:$0xff] %v13836_v10  ;;  %v13840_v51 = vmul.f32 %v13566_v0, %v15696_v12  ;;  %v15702_v8 = vld [vmem:[#allocation86_spill] sm:$0xff]  ;;  %v13856_v20 = vmul.f32 %v13560_v49, %v15704_v2  ;;  %v15705_v10 = vld [vmem:[#allocation85_spill] sm:$0xff]  ;;  %v13876_v2 = vmul.f32 %v13566_v0, %v13398_v5 }
 0x5b2   :  { %15699 = vst [vmem:[#allocation57_spill] sm:$0xff] %v13844_v40  ;;  %15701 = vst [vmem:[#allocation58_spill] sm:$0xff] %v13848_v3  ;;  %v13852_v52 = vmul.f32 %v13566_v0, %v15702_v8  ;;  %v13860_v12 = vmul.f32 %v13563_v39, %v15705_v10  ;;  %v15709_v40 = vld [vmem:[#allocation9_spill] sm:$0xff]  ;;  %v15710_v3 = vld [vmem:[#allocation88_spill] sm:$0xff]  ;;  %v13896_v5 = vmul.f32 %v13563_v39, %v13427_v6 }
 0x5b3   :  { %15697 = vst [vmem:[#allocation60_spill] sm:$0xff] %v13840_v51  ;;  %v15707_v51 = vld [vmem:[#allocation12_spill] sm:$0xff]  ;;  %v13868_v9 = vmul.f32 %v13560_v49, %v15709_v40  ;;  %v13872_v8 = vmul.f32 %v13563_v39, %v15710_v3  ;;  %15711 = vst [vmem:[#allocation64_spill] sm:$0xff] %v13876_v2  ;;  %v13888_v40 = vmul.f32 %v13566_v0, %v13433_v47 }
 0x5b4   :  { %15703 = vst [vmem:[#allocation61_spill] sm:$0xff] %v13852_v52  ;;  %15706 = vst [vmem:[#allocation62_spill] sm:$0xff] %v13860_v12  ;;  %v13864_v55 = vmul.f32 %v13566_v0, %v15707_v51  ;;  %v15712_v52 = vld [vmem:[#allocation87_spill] sm:$0xff]  ;;  %v15720_v2 = vld [vmem:[#allocation92_spill] sm:$0xff] }
 0x5b5   :  { %v13880_v10 = vmul.f32 %v13560_v49, %v15712_v52  ;;  %v15713_v12 = vld [vmem:[#allocation11_spill] sm:$0xff]  ;;  %15715 = vst [vmem:[#allocation68_spill] sm:$0xff] %v13888_v40  ;;  %15718 = vst [vmem:[#allocation55_spill] sm:$0xff] %v13896_v5  ;;  %v13900_v52 = vmul.f32 %v13566_v0, %v13445_v24  ;;  %v15724_v40 = vld [vmem:[#allocation94_spill] sm:$0xff] }
 0x5b6   :  { %15708 = vst [vmem:[#allocation63_spill] sm:$0xff] %v13864_v55  ;;  %v13884_v51 = vmul.f32 %v13563_v39, %v15713_v12  ;;  %v15716_v55 = vld [vmem:[#allocation14_spill] sm:$0xff]  ;;  %v13904_v12 = vmul.f32 %v13560_v49, %v15720_v2  ;;  %v15728_v5 = vld [vmem:[#allocation16_spill] sm:$0xff] }
 0x5b7   :  { %v13892_v3 = vmul.f32 %v13560_v49, %v15716_v55  ;;  %15719 = vst [vmem:[#allocation66_spill] sm:$0xff] %v13900_v52  ;;  %v13912_v55 = vmul.f32 %v13566_v0, %v15724_v40  ;;  %v13920_v24 = vmul.f32 %v13563_v39, %v15728_v5  ;;  %v15730_v52 = vld [vmem:[#allocation18_spill] sm:$0xff] }
 0x5b8   :  { %15714 = vst [vmem:[#allocation67_spill] sm:$0xff] %v13884_v51  ;;  %15721 = vst [vmem:[#allocation89_spill] sm:$0xff] %v13904_v12  ;;  %v15722_v51 = vld [vmem:[#allocation13_spill] sm:$0xff]  ;;  %v13924_v2 = vmul.f32 %v13566_v0, %v15730_v52 }
 0x5b9   :  { %15717 = vst [vmem:[#allocation65_spill] sm:$0xff] %v13892_v3  ;;  %v13908_v47 = vmul.f32 %v13563_v39, %v15722_v51  ;;  %15725 = vst [vmem:[#allocation101_spill] sm:$0xff] %v13912_v55  ;;  %v15726_v3 = vld [vmem:[#allocation91_spill] sm:$0xff]  ;;  %v15732_v12 = vld [vmem:[#allocation93_spill] sm:$0xff] }
 0x5ba   :  { %v13916_v6 = vmul.f32 %v13560_v49, %v15726_v3  ;;  %15729 = vst [vmem:[#allocation103_spill] sm:$0xff] %v13920_v24  ;;  %15731 = vst [vmem:[#allocation90_spill] sm:$0xff] %v13924_v2  ;;  %v13928_v51 = vmul.f32 %v13560_v49, %v15732_v12  ;;  %v15736_v55 = vld [vmem:[#allocation19_spill] sm:$0xff]  ;;  %v15740_v24 = vld [vmem:[#allocation22_spill] sm:$0xff] }
 0x5bb   :  { %15723 = vst [vmem:[#allocation100_spill] sm:$0xff] %v13908_v47  ;;  %v15734_v47 = vld [vmem:[#allocation17_spill] sm:$0xff]  ;;  %v13936_v3 = vmul.f32 %v13566_v0, %v15736_v55  ;;  %v13944_v52 = vmul.f32 %v13563_v39, %v15740_v24 }
 0x5bc   :  { %15727 = vst [vmem:[#allocation102_spill] sm:$0xff] %v13916_v6  ;;  %15733 = vst [vmem:[#allocation96_spill] sm:$0xff] %v13928_v51  ;;  %v13932_v40 = vmul.f32 %v13563_v39, %v15734_v47  ;;  %v15738_v6 = vld [vmem:[#allocation20_spill] sm:$0xff]  ;;  %v15742_v2 = vld [vmem:[#allocation21_spill] sm:$0xff] }
 0x5bd   :  { %15737 = vst [vmem:[#allocation95_spill] sm:$0xff] %v13936_v3  ;;  %v13940_v5 = vmul.f32 %v13560_v49, %v15738_v6  ;;  %15741 = vst [vmem:[#allocation24_spill] sm:$0xff] %v13944_v52  ;;  %v13948_v12 = vmul.f32 %v13566_v0, %v15742_v2  ;;  %v15743_v51 = vld [vmem:[#allocation23_spill] sm:$0xff]  ;;  %v15745_v3 = vld [vmem:[#allocation29_spill] sm:$0xff] }
 0x5be   :  { %15735 = vst [vmem:[#allocation98_spill] sm:$0xff] %v13932_v40  ;;  %v13952_v47 = vmul.f32 %v13560_v49, %v15743_v51  ;;  %v15744_v40 = vld [vmem:[#allocation28_spill] sm:$0xff]  ;;  %v13960_v6 = vmul.f32 %v13566_v0, %v15745_v3  ;;  %v15747_v52 = vld [vmem:[#allocation27_spill] sm:$0xff]  ;;  %v13972_v51 = vadd.f32 %v13734_v48, %v13577_v30  ;;  %v13980_v0 = vadd.f32 %v13734_v48, %v13589_v42 }
 0x5bf   :  { %15739 = vst [vmem:[#allocation97_spill] sm:$0xff] %v13940_v5  ;;  %v13956_v55 = vmul.f32 %v13563_v39, %v15744_v40  ;;  %v15746_v5 = vld [vmem:[#allocation99_spill] sm:$0xff]  ;;  %v13968_v2 = vmul.f32 %v13563_v39, %v15747_v52  ;;  %v13976_v40 = vadd.f32 %v13737_v13, %v13581_v29  ;;  %v13988_v39 = vadd.f32 %v13734_v48, %v13602_v46  ;;  %v15752_v52 = vld [vmem:[#allocation58_spill] sm:$0xff] }
 0x5c0   :  { %v13964_v24 = vmul.f32 %v13560_v49, %v15746_v5  ;;  %v13984_v49 = vadd.f32 %v13737_v13, %v13594_v63  ;;  %v13992_v30 = vadd.f32 %v13737_v13, %v13606_v34  ;;  %v13996_v29 = vadd.f32 %v13740_v27, %v13610_v14  ;;  %v15749_v3 = vld [vmem:[#allocation59_spill] sm:$0xff]  ;;  %v15750_v5 = vld [vmem:[#allocation57_spill] sm:$0xff] }
 0x5c1   :  { %v14000_v42 = vadd.f32 %v13734_v48, %v13614_v21  ;;  %v14004_v63 = vadd.f32 %v13737_v13, %v13619_v4  ;;  %v14008_v46 = vadd.f32 %v13740_v27, %v13623_v54  ;;  %v14012_v34 = vadd.f32 %v13734_v48, %v13627_v16 }
 0x5c2   :  { %v14016_v14 = vadd.f32 %v13737_v13, %v13631_v37  ;;  %v14020_v21 = vadd.f32 %v13734_v48, %v13639_v32  ;;  %v14024_v4 = vadd.f32 %v13737_v13, %v13643_v28  ;;  %v14028_v54 = vadd.f32 %v13734_v48, %v13651_v53 }
 0x5c3   :  { %v14032_v16 = vadd.f32 %v13737_v13, %v13655_v43  ;;  %v14036_v37 = vadd.f32 %v13734_v48, %v13666_v36  ;;  %v14040_v32 = vadd.f32 %v13737_v13, %v13670_v31  ;;  %v14044_v28 = vadd.f32 %v13734_v48, %v13679_v7 }
 0x5c4   :  { %v14048_v53 = vadd.f32 %v13737_v13, %v13683_v60  ;;  %v14052_v43 = vadd.f32 %v13734_v48, %v13691_v61  ;;  %v14056_v36 = vadd.f32 %v13737_v13, %v13695_v22  ;;  %v14060_v31 = vadd.f32 %v13734_v48, %v13703_v45 }
 0x5c5   :  { %v14064_v7 = vadd.f32 %v13737_v13, %v13707_v25  ;;  %v14068_v60 = vadd.f32 %v13734_v48, %v13715_v1  ;;  %v14072_v61 = vadd.f32 %v13737_v13, %v13719_v44  ;;  %v14076_v22 = vadd.f32 %v13734_v48, %v13727_v15 }
 0x5c6   :  { %v14080_v45 = vadd.f32 %v13737_v13, %v13731_v50  ;;  %v14084_v25 = vadd.f32 %v13734_v48, %v13748_v57  ;;  %v14088_v1 = vadd.f32 %v13737_v13, %v13752_v58  ;;  %v14092_v44 = vadd.f32 %v13734_v48, %v13760_v26 }
 0x5c7   :  { %v14096_v15 = vadd.f32 %v13737_v13, %v13764_v35  ;;  %v14100_v50 = vadd.f32 %v13734_v48, %v13772_v56  ;;  %v14104_v57 = vadd.f32 %v13737_v13, %v13776_v33  ;;  %v14108_v58 = vadd.f32 %v13734_v48, %v13784_v41 }
 0x5c8   :  { %v14112_v26 = vadd.f32 %v13737_v13, %v13788_v59  ;;  %v14116_v35 = vadd.f32 %v13734_v48, %v13796_v38  ;;  %v14120_v56 = vadd.f32 %v13737_v13, %v13800_v23  ;;  %v14124_v33 = vadd.f32 %v13734_v48, %v13808_v18 }
 0x5c9   :  { %v14128_v41 = vadd.f32 %v13737_v13, %v13812_v17  ;;  %v14132_v59 = vadd.f32 %v13734_v48, %v13820_v11  ;;  %v14136_v38 = vadd.f32 %v13737_v13, %v13824_v62  ;;  %v14140_v23 = vadd.f32 %v13734_v48, %v13832_v19 }
 0x5ca   :  { %v14144_v18 = vadd.f32 %v13737_v13, %v15749_v3  ;;  %v14148_v17 = vadd.f32 %v13734_v48, %v15750_v5  ;;  %v14152_v11 = vadd.f32 %v13737_v13, %v15752_v52  ;;  %v14156_v62 = vadd.f32 %v13734_v48, %v13856_v20 }
 0x5cb   :  { %15748 = vst [vmem:[#allocation31_spill] sm:$0xff] %v14132_v59  ;;  %v15754_v59 = vld [vmem:[#allocation62_spill] sm:$0xff]  ;;  %v14164_v3 = vadd.f32 %v13734_v48, %v13868_v9  ;;  %v14168_v5 = vadd.f32 %v13737_v13, %v13872_v8  ;;  %v14172_v52 = vadd.f32 %v13734_v48, %v13880_v10 }
 0x5cc   :  { %15751 = vst [vmem:[#allocation25_spill] sm:$0xff] %v14148_v17  ;;  %15753 = vst [vmem:[#allocation30_spill] sm:$0xff] %v14156_v62  ;;  %v14160_v19 = vadd.f32 %v13737_v13, %v15754_v59  ;;  %v15759_v17 = vld [vmem:[#allocation67_spill] sm:$0xff]  ;;  %v15761_v62 = vld [vmem:[#allocation65_spill] sm:$0xff] }
 0x5cd   :  { %15756 = vst [vmem:[#allocation39_spill] sm:$0xff] %v14164_v3  ;;  %15757 = vst [vmem:[#allocation36_spill] sm:$0xff] %v14168_v5  ;;  %v14176_v20 = vadd.f32 %v13737_v13, %v15759_v17  ;;  %v14180_v59 = vadd.f32 %v13734_v48, %v15761_v62  ;;  %v15765_v3 = vld [vmem:[#allocation89_spill] sm:$0xff]  ;;  %v15767_v5 = vld [vmem:[#allocation100_spill] sm:$0xff] }
 0x5ce   :  { %15755 = vst [vmem:[#allocation33_spill] sm:$0xff] %v14160_v19  ;;  %15758 = vst [vmem:[#allocation38_spill] sm:$0xff] %v14172_v52  ;;  %v15763_v19 = vld [vmem:[#allocation55_spill] sm:$0xff]  ;;  %v14188_v8 = vadd.f32 %v13734_v48, %v15765_v3  ;;  %v14192_v10 = vadd.f32 %v13737_v13, %v15767_v5  ;;  %v15769_v52 = vld [vmem:[#allocation102_spill] sm:$0xff] }
 0x5cf   :  { %15760 = vst [vmem:[#allocation41_spill] sm:$0xff] %v14176_v20  ;;  %15762 = vst [vmem:[#allocation44_spill] sm:$0xff] %v14180_v59  ;;  %v14184_v9 = vadd.f32 %v13737_v13, %v15763_v19  ;;  %v14196_v17 = vadd.f32 %v13734_v48, %v15769_v52  ;;  %v15770_v20 = vld [vmem:[#allocation103_spill] sm:$0xff]  ;;  %v15771_v59 = vld [vmem:[#allocation96_spill] sm:$0xff] }
 0x5d0   :  { %15766 = vst [vmem:[#allocation72_spill] sm:$0xff] %v14188_v8  ;;  %15768 = vst [vmem:[#allocation15_spill] sm:$0xff] %v14192_v10  ;;  %v14200_v62 = vadd.f32 %v13737_v13, %v15770_v20  ;;  %v14204_v19 = vadd.f32 %v13734_v48, %v15771_v59  ;;  %v15775_v8 = vld [vmem:[#allocation97_spill] sm:$0xff]  ;;  %v15777_v10 = vld [vmem:[#allocation24_spill] sm:$0xff]  ;;  %v14220_v20 = vadd.f32 %v13734_v48, %v13952_v47  ;;  %v6123_v47 = vmax.f32 %v14008_v46, 0.0 }
 0x5d1   :  { %15764 = vst [vmem:[#allocation70_spill] sm:$0xff] %v14184_v9  ;;  %v15773_v9 = vld [vmem:[#allocation98_spill] sm:$0xff]  ;;  %v14212_v5 = vadd.f32 %v13734_v48, %v15775_v8  ;;  %v14216_v52 = vadd.f32 %v13737_v13, %v15777_v10  ;;  %v14224_v59 = vadd.f32 %v13737_v13, %v13956_v55  ;;  %v14232_v8 = vadd.f32 %v13737_v13, %v13968_v2 }
 0x5d2   :  { %15772 = vst [vmem:[#allocation69_spill] sm:$0xff] %v14204_v19  ;;  %v14208_v3 = vadd.f32 %v13737_v13, %v15773_v9  ;;  %15779 = vst [vmem:[#allocation75_spill] sm:$0xff] %v14220_v20  ;;  %v14228_v9 = vadd.f32 %v13734_v48, %v13964_v24  ;;  %v6115_v10 = vmax.f32 %v13980_v0, 0.0  ;;  %v6120_v19 = vmax.f32 %v13996_v29, 0.0  ;;  %v15784_v24 = vld [vmem:[#allocation32_spill] sm:$0xff]  ;;  %v15785_v29 = vld [vmem:[#allocation37_spill] sm:$0xff] }
 0x5d3   :  { %15776 = vst [vmem:[#allocation76_spill] sm:$0xff] %v14212_v5  ;;  %15778 = vst [vmem:[#allocation74_spill] sm:$0xff] %v14216_v52  ;;  %v6112_v5 = vmax.f32 %v13972_v51, 0.0  ;;  %v6113_v20 = vmax.f32 %v13976_v40, 0.0  ;;  %v6116_v55 = vmax.f32 %v13984_v49, 0.0  ;;  %v15783_v52 = vld [vmem:[#allocation26_spill] sm:$0xff]  ;;  %v6021_v13 = vadd.f32 %v13740_v27, %v15784_v24 }
 0x5d4   :  { %15774 = vst [vmem:[#allocation71_spill] sm:$0xff] %v14208_v3  ;;  %15780 = vst [vmem:[#allocation73_spill] sm:$0xff] %v14224_v59  ;;  %v6018_v48 = vadd.f32 %v13740_v27, %v15783_v52  ;;  %v6119_v2 = vmax.f32 %v13992_v30, 0.0  ;;  %v6213_v51 = vpack.c.bf16 %v6123_v47, %v6120_v19  ;;  %v6122_v0 = vmax.f32 %v14004_v63, 0.0  ;;  %v15786_v3 = vld [vmem:[#allocation43_spill] sm:$0xff]  ;;  %v15787_v30 = vld [vmem:[#allocation34_spill] sm:$0xff] }
 0x5d5   :  { %15781 = vst [vmem:[#allocation78_spill] sm:$0xff] %v14228_v9  ;;  %15782 = vst [vmem:[#allocation80_spill] sm:$0xff] %v14232_v8  ;;  %v6208_v59 = vpack.c.bf16 %v6115_v10, %v6112_v5  ;;  %v6209_v9 = vpack.c.bf16 %v6116_v55, %v6113_v20  ;;  %v6030_v46 = vadd.f32 %v13740_v27, %v15785_v29  ;;  %v6117_v40 = vmax.f32 %v6021_v13, 0.0  ;;  %v15788_v47 = vld [vmem:[#allocation40_spill] sm:$0xff]  ;;  %v15790_v29 = vld [vmem:[#allocation42_spill] sm:$0xff] }
 0x5d6   :  { %v6114_v8 = vmax.f32 %v6018_v48, 0.0  ;;  %v6033_v49 = vadd.f32 %v13740_v27, %v15786_v3  ;;  %v6118_v5 = vmax.f32 %v13988_v39, 0.0  ;;  %v6212_v52 = vpack.c.bf16 %v6122_v0, %v6119_v2 }
 0x5d7   :  { %6487 = vmatprep.mubr.bf16.mxu0 %v6209_v9  ;;  %v6126_v10 = vmax.f32 %v6030_v46, 0.0  ;;  %v6121_v24 = vmax.f32 %v14000_v42, 0.0  ;;  %v6036_v19 = vadd.f32 %v13740_v27, %v15787_v30  ;;  %v6039_v55 = vadd.f32 %v13740_v27, %v15788_v47  ;;  %v15789_v9 = vld [vmem:[#allocation45_spill] sm:$0xff] }
 0x5d8   :  { %v6210_v20 = vpack.c.bf16 %v6117_v40, %v6114_v8  ;;  %6488 = vmatmul.mubr.bf16.vlgmr.msra.gmra.mrb[128].mxu0 %v6208_v59  ;;  %v6129_v63 = vmax.f32 %v6033_v49, 0.0  ;;  %v6125_v48 = vmax.f32 %v14016_v14, 0.0  ;;  %v6128_v39 = vmax.f32 %v14024_v4, 0.0  ;;  %v15791_v49 = vld [vmem:[#allocation47_spill] sm:$0xff] }
 0x5d9   :  { %6495 = vmatprep.mubr.bf16.mxu0 %v6212_v52  ;;  %v6211_v3 = vpack.c.bf16 %v6121_v24, %v6118_v5  ;;  %v6132_v13 = vmax.f32 %v6036_v19, 0.0  ;;  %v6042_v2 = vadd.f32 %v13740_v27, %v15789_v9  ;;  %v6135_v0 = vmax.f32 %v6039_v55, 0.0  ;;  %v15792_v24 = vld [vmem:[#allocation46_spill] sm:$0xff]  ;;  %v15794_v55 = vld [vmem:[#allocation48_spill] sm:$0xff] }
 0x5da   :  { %7937 = vmatprep.mubr.bf16.mxu1 %v6210_v20  ;;  %v6216_v42 = vpack.c.bf16 %v6129_v63, %v6126_v10  ;;  %v6045_v59 = vadd.f32 %v13740_v27, %v15790_v29  ;;  %v6124_v8 = vmax.f32 %v14012_v34, 0.0  ;;  %v6215_v46 = vpack.c.bf16 %v6128_v39, %v6125_v48  ;;  %v15796_v29 = vld [vmem:[#allocation53_spill] sm:$0xff] }
 0x5db   :  { %7938 = vmatmul.mubr.bf16.vlgmr.msra.gmra.mrb[224].mxu1 %v6213_v51  ;;  %v6138_v40 = vmax.f32 %v6042_v2, 0.0  ;;  %v6127_v14 = vmax.f32 %v14020_v21, 0.0  ;;  %v6048_v5 = vadd.f32 %v13740_v27, %v15791_v49  ;;  %v6219_v4 = vpack.c.bf16 %v6135_v0, %v6132_v13  ;;  %v15793_v51 = vld [vmem:[#allocation49_spill] sm:$0xff]  ;;  %v15797_v49 = vld [vmem:[#allocation52_spill] sm:$0xff] }
 0x5dc   :  { %7941 = vmatprep.mubr.bf16.mxu1 %v6216_v42  ;;  %v6141_v52 = vmax.f32 %v6045_v59, 0.0  ;;  %v6051_v10 = vadd.f32 %v13740_v27, %v15792_v24  ;;  %v6131_v30 = vmax.f32 %v14032_v16, 0.0  ;;  %v6134_v34 = vmax.f32 %v14040_v32, 0.0  ;;  %v15795_v42 = vld [vmem:[#allocation51_spill] sm:$0xff]  ;;  %v15798_v24 = vld [vmem:[#allocation50_spill] sm:$0xff] }
 0x5dd   :  { %v6214_v19 = vpack.c.bf16 %v6127_v14, %v6124_v8  ;;  %v6144_v20 = vmax.f32 %v6048_v5, 0.0  ;;  %v6054_v63 = vadd.f32 %v13740_v27, %v15793_v51  ;;  %v6057_v48 = vadd.f32 %v13740_v27, %v15794_v55 }
 0x5de   :  { %v6222_v47 = vpack.c.bf16 %v6141_v52, %v6138_v40  ;;  %v6147_v21 = vmax.f32 %v6051_v10, 0.0  ;;  %v6130_v13 = vmax.f32 %v14028_v54, 0.0  ;;  %v6218_v39 = vpack.c.bf16 %v6134_v34, %v6131_v30 }
 0x5df   :  { %v6150_v9 = vmax.f32 %v6054_v63, 0.0  ;;  %v6133_v2 = vmax.f32 %v14036_v37, 0.0  ;;  %v6060_v16 = vadd.f32 %v13740_v27, %v15795_v42  ;;  %v6153_v32 = vmax.f32 %v6057_v48, 0.0  ;;  %v15800_v63 = vld [vmem:[#allocation56_spill] sm:$0xff]  ;;  %v15802_v42 = vld [vmem:[#allocation61_spill] sm:$0xff] }
 0x5e0   :  { %6496 = vmatmul.mubr.bf16.gmra.mrb[132].mxu0 %v6211_v3  ;;  %v6225_v0 = vpack.c.bf16 %v6147_v21, %v6144_v20  ;;  %v6063_v59 = vadd.f32 %v13740_v27, %v15796_v29  ;;  %v6137_v8 = vmax.f32 %v14048_v53, 0.0  ;;  %v6140_v54 = vmax.f32 %v14056_v36, 0.0 }
 0x5e1   :  { %6503 = vmatprep.mubr.bf16.mxu0 %v6215_v46  ;;  %v14281_v40 = vpack.c.bf16 %v6133_v2, %v6130_v13  ;;  %v6156_v14 = vmax.f32 %v6060_v16, 0.0  ;;  %v6066_v37 = vadd.f32 %v13740_v27, %v15797_v49  ;;  %v6228_v5 = vpack.c.bf16 %v6153_v32, %v6150_v9  ;;  %v15799_v46 = vld [vmem:[#allocation54_spill] sm:$0xff]  ;;  %v15801_v13 = vld [vmem:[#allocation60_spill] sm:$0xff] }
 0x5e2   :  { %v6159_v52 = vmax.f32 %v6063_v59, 0.0  ;;  %v6069_v3 = vadd.f32 %v13740_v27, %v15798_v24  ;;  %v6136_v10 = vmax.f32 %v14044_v28, 0.0  ;;  %v6221_v30 = vpack.c.bf16 %v6140_v54, %v6137_v8  ;;  %v15803_v59 = vld [vmem:[#allocation63_spill] sm:$0xff]  ;;  %v15804_v54 = vld [vmem:[#allocation64_spill] sm:$0xff] }
 0x5e3   :  { %7942 = vmatmul.mubr.bf16.gmra.mrb[228].mxu1 %v6219_v4  ;;  %v6162_v20 = vmax.f32 %v6066_v37, 0.0  ;;  %v6139_v53 = vmax.f32 %v14052_v43, 0.0  ;;  %v6072_v34 = vadd.f32 %v13740_v27, %v15799_v46  ;;  %v6075_v21 = vadd.f32 %v13740_v27, %v15800_v63 }
 0x5e4   :  { %7945 = vmatprep.mubr.bf16.mxu1 %v6222_v47  ;;  %v14292_v36 = vpack.c.bf16 %v6159_v52, %v6156_v14  ;;  %v6165_v51 = vmax.f32 %v6069_v3, 0.0  ;;  %v6143_v55 = vmax.f32 %v14064_v7, 0.0  ;;  %v6146_v4 = vmax.f32 %v14072_v61, 0.0  ;;  %v15805_v3 = vld [vmem:[#allocation68_spill] sm:$0xff] }
 0x5e5   :  { %v14297_v48 = vpack.c.bf16 %v6139_v53, %v6136_v10  ;;  %v6168_v28 = vmax.f32 %v6072_v34, 0.0  ;;  %v6078_v43 = vadd.f32 %v13740_v27, %v15801_v13  ;;  %v6171_v2 = vmax.f32 %v6075_v21, 0.0 }
 0x5e6   :  { %v6234_v9 = vpack.c.bf16 %v6165_v51, %v6162_v20  ;;  %v6081_v47 = vadd.f32 %v13740_v27, %v15802_v42  ;;  %v6142_v16 = vmax.f32 %v14060_v31, 0.0  ;;  %v14305_v32 = vpack.c.bf16 %v6146_v4, %v6143_v55  ;;  %v15806_v20 = vld [vmem:[#allocation66_spill] sm:$0xff]  ;;  %v15807_v51 = vld [vmem:[#allocation101_spill] sm:$0xff] }
 0x5e7   :  { %v6174_v29 = vmax.f32 %v6078_v43, 0.0  ;;  %v6145_v7 = vmax.f32 %v14068_v60, 0.0  ;;  %v6084_v8 = vadd.f32 %v13740_v27, %v15803_v59  ;;  %v14310_v61 = vpack.c.bf16 %v6171_v2, %v6168_v28  ;;  %v15808_v55 = vld [vmem:[#allocation90_spill] sm:$0xff]  ;;  %v15809_v43 = vld [vmem:[#allocation95_spill] sm:$0xff] }
 0x5e8   :  { %6504 = vmatmul.mubr.bf16.gmra.mrb[136].mxu0 %v6214_v19  ;;  %v6177_v14 = vmax.f32 %v6081_v47, 0.0  ;;  %v6087_v49 = vadd.f32 %v13740_v27, %v15804_v54  ;;  %v6149_v37 = vmax.f32 %v14080_v45, 0.0  ;;  %v6152_v24 = vmax.f32 %v14088_v1, 0.0 }
 0x5e9   :  { %6511 = vmatprep.mubr.bf16.mxu0 %v6218_v39  ;;  %v14315_v52 = vpack.c.bf16 %v6145_v7, %v6142_v16  ;;  %v6180_v31 = vmax.f32 %v6084_v8, 0.0  ;;  %v6090_v60 = vadd.f32 %v13740_v27, %v15805_v3  ;;  %v6093_v53 = vadd.f32 %v13740_v27, %v15806_v20  ;;  %v15810_v8 = vld [vmem:[#allocation35_spill] sm:$0xff] }
 0x5ea   :  { %v14320_v10 = vpack.c.bf16 %v6177_v14, %v6174_v29  ;;  %v6183_v19 = vmax.f32 %v6087_v49, 0.0  ;;  %v6148_v46 = vmax.f32 %v14076_v22, 0.0  ;;  %v14325_v34 = vpack.c.bf16 %v6152_v24, %v6149_v37 }
 0x5eb   :  { %7946 = vmatmul.mubr.bf16.gmra.mrb[232].mxu1 %v6225_v0  ;;  %v6186_v45 = vmax.f32 %v6090_v60, 0.0  ;;  %v6151_v39 = vmax.f32 %v14084_v25, 0.0  ;;  %v6096_v1 = vadd.f32 %v13740_v27, %v15807_v51  ;;  %v6189_v21 = vmax.f32 %v6093_v53, 0.0  ;;  %v15812_v53 = vld [vmem:[#allocation25_spill] sm:$0xff]  ;;  %v15815_v51 = vld [vmem:[#allocation30_spill] sm:$0xff] }
 0x5ec   :  { %7949 = vmatprep.mubr.bf16.mxu1 %v6228_v5  ;;  %v14330_v63 = vpack.c.bf16 %v6183_v19, %v6180_v31  ;;  %v6099_v28 = vadd.f32 %v13740_v27, %v15808_v55  ;;  %v6155_v4 = vmax.f32 %v14096_v15, 0.0  ;;  %v6158_v0 = vmax.f32 %v14104_v57, 0.0 }
 0x5ed   :  { %v14335_v13 = vpack.c.bf16 %v6151_v39, %v6148_v46  ;;  %v6192_v22 = vmax.f32 %v6096_v1, 0.0  ;;  %v6102_v25 = vadd.f32 %v13740_v27, %v15809_v43  ;;  %v14340_v2 = vpack.c.bf16 %v6189_v21, %v6186_v45  ;;  %v15813_v45 = vld [vmem:[#allocation33_spill] sm:$0xff]  ;;  %v15814_v39 = vld [vmem:[#allocation36_spill] sm:$0xff]  ;;  %v15816_v21 = vld [vmem:[#allocation39_spill] sm:$0xff] }
 0x5ee   :  { %v6195_v42 = vmax.f32 %v6099_v28, 0.0  ;;  %v6105_v5 = vadd.f32 %v13740_v27, %v13948_v12  ;;  %v6154_v47 = vmax.f32 %v14092_v44, 0.0  ;;  %v14345_v16 = vpack.c.bf16 %v6158_v0, %v6155_v4  ;;  %v15817_v28 = vld [vmem:[#allocation41_spill] sm:$0xff]  ;;  %v15818_v4 = vld [vmem:[#allocation70_spill] sm:$0xff]  ;;  %v15820_v43 = vld [vmem:[#allocation44_spill] sm:$0xff] }
 0x5ef   :  { %v6198_v29 = vmax.f32 %v6102_v25, 0.0  ;;  %v6157_v15 = vmax.f32 %v14100_v50, 0.0  ;;  %v6108_v7 = vadd.f32 %v13740_v27, %v13960_v6  ;;  %v6111_v14 = vadd.f32 %v13740_v27, %v15810_v8 }
 0x5f0   :  { %6512 = vmatmul.mubr.bf16.gmra.mrb[140].mxu0 %v14281_v40  ;;  %v14351_v57 = vpack.c.bf16 %v6195_v42, %v6192_v22  ;;  %v6201_v59 = vmax.f32 %v6105_v5, 0.0  ;;  %v6161_v12 = vmax.f32 %v14112_v26, 0.0  ;;  %v6164_v49 = vmax.f32 %v14120_v56, 0.0  ;;  %v15821_v42 = vld [vmem:[#allocation15_spill] sm:$0xff] }
 0x5f1   :  { %6519 = vmatprep.mubr.bf16.mxu0 %v6221_v30  ;;  %v14356_v44 = vpack.c.bf16 %v6157_v15, %v6154_v47  ;;  %v6204_v54 = vmax.f32 %v6108_v7, 0.0  ;;  %v6160_v50 = vmax.f32 %v14108_v58, 0.0  ;;  %v6207_v6 = vmax.f32 %v6111_v14, 0.0  ;;  %v15811_v30 = vld [vmem:[#allocation31_spill] sm:$0xff]  ;;  %v15822_v7 = vld [vmem:[#allocation72_spill] sm:$0xff] }
 0x5f2   :  { %v6252_v37 = vpack.c.bf16 %v6201_v59, %v6198_v29  ;;  %v6163_v40 = vmax.f32 %v14116_v35, 0.0  ;;  %v6167_v31 = vmax.f32 %v14128_v41, 0.0  ;;  %v6233_v24 = vpack.c.bf16 %v6164_v49, %v6161_v12  ;;  %v15823_v12 = vld [vmem:[#allocation71_spill] sm:$0xff] }
 0x5f3   :  { %7950 = vmatmul.mubr.bf16.gmra.mrb[236].mxu1 %v14292_v36  ;;  %v6170_v27 = vmax.f32 %v14136_v38, 0.0  ;;  %v6166_v26 = vmax.f32 %v14124_v33, 0.0  ;;  %v6169_v3 = vmax.f32 %v15811_v30, 0.0  ;;  %v6255_v60 = vpack.c.bf16 %v6207_v6, %v6204_v54  ;;  %v15824_v54 = vld [vmem:[#allocation74_spill] sm:$0xff]  ;;  %v15825_v6 = vld [vmem:[#allocation69_spill] sm:$0xff] }
 0x5f4   :  { %7953 = vmatprep.mubr.bf16.mxu1 %v6234_v9  ;;  %v6232_v56 = vpack.c.bf16 %v6163_v40, %v6160_v50  ;;  %v6173_v58 = vmax.f32 %v14144_v18, 0.0  ;;  %v6176_v19 = vmax.f32 %v14152_v11, 0.0  ;;  %v6172_v41 = vmax.f32 %v14140_v23, 0.0  ;;  %v15819_v23 = vld [vmem:[#allocation38_spill] sm:$0xff] }
 0x5f5   :  { %v6236_v20 = vpack.c.bf16 %v6170_v27, %v6167_v31  ;;  %v6235_v35 = vpack.c.bf16 %v6169_v3, %v6166_v26  ;;  %v6175_v36 = vmax.f32 %v15812_v53, 0.0  ;;  %v6179_v38 = vmax.f32 %v15813_v45, 0.0  ;;  %v15826_v31 = vld [vmem:[#allocation76_spill] sm:$0xff]  ;;  %v15827_v27 = vld [vmem:[#allocation73_spill] sm:$0xff]  ;;  %v15830_v53 = vld [vmem:[#allocation78_spill] sm:$0xff] }
 0x5f6   :  { %v6239_v46 = vpack.c.bf16 %v6176_v19, %v6173_v58  ;;  %v6182_v33 = vmax.f32 %v15814_v39, 0.0  ;;  %v6178_v1 = vmax.f32 %v15815_v51, 0.0  ;;  %v6181_v55 = vmax.f32 %v15816_v21, 0.0  ;;  %v15828_v3 = vld [vmem:[#allocation80_spill] sm:$0xff] }
 0x5f7   :  { %v6238_v9 = vpack.c.bf16 %v6175_v36, %v6172_v41  ;;  %v6185_v18 = vmax.f32 %v15817_v28, 0.0  ;;  %v6188_v11 = vmax.f32 %v15818_v4, 0.0  ;;  %v6184_v0 = vmax.f32 %v15819_v23, 0.0 }
 0x5f8   :  { %6520 = vmatmul.mubr.bf16.gmra.mrb[144].mxu0 %v14297_v48  ;;  %v6242_v22 = vpack.c.bf16 %v6182_v33, %v6179_v38  ;;  %v6187_v25 = vmax.f32 %v15820_v43, 0.0  ;;  %v6191_v5 = vmax.f32 %v15821_v42, 0.0  ;;  %v6241_v47 = vpack.c.bf16 %v6181_v55, %v6178_v1 }
 0x5f9   :  { %6527 = vmatprep.mubr.bf16.mxu0 %v14305_v32  ;;  %v6245_v29 = vpack.c.bf16 %v6188_v11, %v6185_v18  ;;  %v6194_v15 = vmax.f32 %v14200_v62, 0.0  ;;  %v6190_v59 = vmax.f32 %v15822_v7, 0.0  ;;  %v6193_v14 = vmax.f32 %v14196_v17, 0.0  ;;  %v15829_v17 = vld [vmem:[#allocation75_spill] sm:$0xff] }
 0x5fa   :  { %v6244_v8 = vpack.c.bf16 %v6187_v25, %v6184_v0  ;;  %v6197_v48 = vmax.f32 %v15823_v12, 0.0  ;;  %v6200_v49 = vmax.f32 %v15824_v54, 0.0  ;;  %v6196_v40 = vmax.f32 %v15825_v6, 0.0 }
 0x5fb   :  { %7954 = vmatmul.mubr.bf16.gmra.mrb[240].mxu1 %v14310_v61  ;;  %v6248_v50 = vpack.c.bf16 %v6194_v15, %v6191_v5  ;;  %v6199_v32 = vmax.f32 %v15826_v31, 0.0  ;;  %v6203_v26 = vmax.f32 %v15827_v27, 0.0  ;;  %v6247_v62 = vpack.c.bf16 %v6193_v14, %v6190_v59 }
 0x5fc   :  { %7957 = vmatprep.mubr.bf16.mxu1 %v14320_v10  ;;  %v6251_v30 = vpack.c.bf16 %v6200_v49, %v6197_v48  ;;  %v6206_v58 = vmax.f32 %v15828_v3, 0.0  ;;  %v6202_v19 = vmax.f32 %v15829_v17, 0.0  ;;  %v6205_v36 = vmax.f32 %v15830_v53, 0.0 }
 0x5fd   :  { %v6250_v41 = vpack.c.bf16 %v6199_v32, %v6196_v40  ;;  %v15831_v10 = vlaneseq }
 0x5fe   :  { %v6254_v45 = vpack.c.bf16 %v6206_v58, %v6203_v26  ;;  %v6253_v61 = vpack.c.bf16 %v6205_v36, %v6202_v19 }
 0x600   :  { %6528 = vmatmul.mubr.bf16.gmra.mrb[148].mxu0 %v14315_v52 }
 0x601   :  { %6535 = vmatprep.mubr.bf16.mxu0 %v14325_v34  ;;  %v14403_v34 = vand.u32 127, %v15831_v10 }
 0x603   :  { %7958 = vmatmul.mubr.bf16.gmra.mrb[244].mxu1 %v14330_v63  ;;  %vm6779_vm1 = vcmp.lt.s32.totalorder %v14403_v34, 10 }
 0x604   :  { %7961 = vmatprep.mubr.bf16.mxu1 %v14340_v2 }
 0x608   :  { %6536 = vmatmul.mubr.bf16.gmra.mrb[152].mxu0 %v14335_v13  ;;  %v14408_v13 = vld [vmem:[%s14904_s8] ss:$0 sm:$0xff]  ;;  %s9040_s8 = smov [#allocation2]  }
 0x609   :  { %6543 = vmatprep.mubr.bf16.mxu0 %v14345_v16  ;;  %s7201_s29 = sshll.u32 %s9040_s8, 4  ;;  %s7202_s29 = int_to_ptr.vmem [resolvable:$true] %s7201_s29 }
 0x60a   :  { %s9014_s4 = scalar_lea.vmem %s7202_s29, 4096  ;;  %p9019_p1 = scmp.lt.s32.totalorder %s7202_s29, %s7202_s29 }
 0x60b   :  { %7962 = vmatmul.mubr.bf16.gmra.mrb[248].mxu1 %v14351_v57  ;;  %p9015_p0 = scmp.ne.s32.totalorder %s7202_s29, %s9014_s4  ;;  %p9020_p2 = scmp.lt.s32.totalorder %s9014_s4, %s9014_s4 }
 0x60c   :  { %7965 = vmatprep.mubr.bf16.mxu1 %v6252_v37 }
 0x60d   :  { %p9021_p3 = por %p9020_p2, %p9019_p1 }
 0x60f   :  { %p9022_p4 = pnand %p9021_p3, %p9015_p0 }
 0x610   :  { %6544 = vmatmul.mubr.bf16.gmra.mrb[156].mxu0 %v14356_v44 }
 0x611   :  { %6551 = vmatprep.mubr.bf16.mxu0 %v6233_v24 }
 0x613   :  { %7966 = vmatmul.mubr.bf16.gmra.mrb[252].mxu1 %v6255_v60 }
 0x618   :  { %6552 = vmatmul.mubr.bf16.gmra.mrb[160].mxu0 %v6232_v56 }
 0x619   :  { %6559 = vmatprep.mubr.bf16.mxu0 %v6236_v20 }
 0x620   :  { %6560 = vmatmul.mubr.bf16.gmra.mrb[164].mxu0 %v6235_v35 }
 0x621   :  { %6567 = vmatprep.mubr.bf16.mxu0 %v6239_v46 }
 0x628   :  { %6568 = vmatmul.mubr.bf16.gmra.mrb[168].mxu0 %v6238_v9 }
 0x629   :  { %6575 = vmatprep.mubr.bf16.mxu0 %v6242_v22 }
 0x630   :  { %6576 = vmatmul.mubr.bf16.gmra.mrb[172].mxu0 %v6241_v47 }
 0x631   :  { %6583 = vmatprep.mubr.bf16.mxu0 %v6245_v29 }
 0x638   :  { %6584 = vmatmul.mubr.bf16.gmra.mrb[176].mxu0 %v6244_v8 }
 0x639   :  { %6591 = vmatprep.mubr.bf16.mxu0 %v6248_v50 }
 0x640   :  { %6592 = vmatmul.mubr.bf16.gmra.mrb[180].mxu0 %v6247_v62 }
 0x641   :  { %6599 = vmatprep.mubr.bf16.mxu0 %v6251_v30 }
 0x648   :  { %6600 = vmatmul.mubr.bf16.gmra.mrb[184].mxu0 %v6250_v41 }
 0x649   :  { %6607 = vmatprep.mubr.bf16.mxu0 %v6254_v45 }
 0x650   :  { %6608 = vmatmul.mubr.bf16.gmra.mrb[188].mxu0 %v6253_v61 }
 0x6ab   :  { %v7801_v52 = vpop.f32.mrb[128].mxu0 }
 0x6ac   :  { %v7802_v63 = vpop.f32.mrb[129].mxu0 }
 0x6ad   :  { %v7803_v2 = vadd.f32 %v7802_v63, %v7801_v52  ;;  %v7804_v16 = vpop.f32.mrb[130].mxu0 }
 0x6ae   :  { %v7939_v57 = vpop.f32.mrb[224].mxu1  ;;  %v7805_v44 = vpop.f32.mrb[131].mxu0 }
 0x6af   :  { %v6490_v37 = vadd.f32 %v7803_v2, %v14408_v13  ;;  %v6650_v24 = vpop.f32.mrb[225].mxu1  ;;  %v7806_v60 = vadd.f32 %v7805_v44, %v7804_v16 }
 0x6b0   :  { %v7940_v56 = vpop.f32.mrb[226].mxu1 }
 0x6b1   :  { %v6651_v20 = vadd.f32 %v6650_v24, %v6490_v37  ;;  %v6493_v35 = vadd.f32 %v7806_v60, %v14408_v13  ;;  %v6653_v46 = vpop.f32.mrb[227].mxu1 }
 0x6b3   :  { %v6654_v38 = vadd.f32 %v6653_v46, %v6493_v35  ;;  %v7807_v39 = vpop.f32.mrb[132].mxu0  ;;  %v14415_v33 = vsel %vm6779_vm1, %v6651_v20, -inf }
 0x6b4   :  { %v7808_v51 = vpop.f32.mrb[133].mxu0  ;;  %6812 = vmax.xlane.f32.xlu0 %v14415_v33 }
 0x6b5   :  { %v7809_v1 = vadd.f32 %v7808_v51, %v7807_v39  ;;  %v7810_v9 = vpop.f32.mrb[134].mxu0  ;;  %v14421_v11 = vsel %vm6779_vm1, %v6654_v38, -inf }
 0x6b6   :  { %v7943_v21 = vpop.f32.mrb[228].mxu1  ;;  %v7811_v55 = vpop.f32.mrb[135].mxu0 }
 0x6b7   :  { %v6498_v28 = vadd.f32 %v7809_v1, %v14408_v13  ;;  %v6666_v18 = vpop.f32.mrb[229].mxu1  ;;  %v7812_v4 = vadd.f32 %v7811_v55, %v7810_v9 }
 0x6b8   :  { %v7944_v22 = vpop.f32.mrb[230].mxu1  ;;  %6814 = vmax.xlane.f32.xlu0 %v14421_v11 }
 0x6b9   :  { %v6501_v23 = vadd.f32 %v7812_v4, %v14408_v13  ;;  %v6669_v0 = vpop.f32.mrb[231].mxu1  ;;  %v6659_v43 = vadd.f32 %v7939_v57, %v6498_v28 }
 0x6bb   :  { %v7813_v25 = vpop.f32.mrb[136].mxu0  ;;  %v14427_v42 = vsel %vm6779_vm1, %v6659_v43, -inf  ;;  %v6662_v5 = vadd.f32 %v7940_v56, %v6501_v23 }
 0x6bc   :  { %v7814_v47 = vpop.f32.mrb[137].mxu0  ;;  %6816 = vmax.xlane.f32.xlu1 %v14427_v42 }
 0x6bd   :  { %v7815_v29 = vadd.f32 %v7814_v47, %v7813_v25  ;;  %v7816_v15 = vpop.f32.mrb[138].mxu0  ;;  %v14435_v48 = vsel %vm6779_vm1, %v6662_v5, -inf }
 0x6be   :  { %v14430_v7 = vpop.f32.mrb[232].mxu1  ;;  %v7817_v59 = vpop.f32.mrb[139].mxu0 }
 0x6bf   :  { %v6506_v8 = vadd.f32 %v7815_v29, %v14408_v13  ;;  %v6682_v14 = vpop.f32.mrb[233].mxu1  ;;  %v7818_v12 = vadd.f32 %v7817_v59, %v7816_v15 }
 0x6c0   :  { %v7948_v54 = vpop.f32.mrb[234].mxu1  ;;  %6818 = vmax.xlane.f32.xlu1 %v14435_v48 }
 0x6c1   :  { %v6509_v49 = vadd.f32 %v7818_v12, %v14408_v13  ;;  %v6685_v50 = vpop.f32.mrb[235].mxu1  ;;  %v6667_v6 = vadd.f32 %v6666_v18, %v6506_v8 }
 0x6c3   :  { %v7819_v40 = vpop.f32.mrb[140].mxu0  ;;  %v14441_v31 = vsel %vm6779_vm1, %v6667_v6, -inf  ;;  %v6670_v32 = vadd.f32 %v6669_v0, %v6509_v49 }
 0x6c4   :  { %v7820_v27 = vpop.f32.mrb[141].mxu0  ;;  %6820 = vmax.xlane.f32.xlu0 %v14441_v31 }
 0x6c5   :  { %v7821_v26 = vadd.f32 %v7820_v27, %v7819_v40  ;;  %v7822_v62 = vpop.f32.mrb[142].mxu0  ;;  %v14446_v30 = vsel %vm6779_vm1, %v6670_v32, -inf }
 0x6c6   :  { %v14448_v3 = vpop.f32.mrb[236].mxu1  ;;  %v7823_v58 = vpop.f32.mrb[143].mxu0  ;;  %6822 = vmax.xlane.f32.xlu1 %v14446_v30 }
 0x6c7   :  { %v6514_v17 = vadd.f32 %v7821_v26, %v14408_v13  ;;  %v6698_v19 = vpop.f32.mrb[237].mxu1  ;;  %v7824_v41 = vadd.f32 %v7823_v58, %v7822_v62 }
 0x6c8   :  { %v14452_v53 = vpop.f32.mrb[238].mxu1 }
 0x6c9   :  { %v6517_v36 = vadd.f32 %v7824_v41, %v14408_v13  ;;  %v6701_v45 = vpop.f32.mrb[239].mxu1  ;;  %v6675_v61 = vadd.f32 %v7943_v21, %v6514_v17 }
 0x6cb   :  { %v7825_v52 = vpop.f32.mrb[144].mxu0  ;;  %v14457_v10 = vsel %vm6779_vm1, %v6675_v61, -inf  ;;  %v6678_v63 = vadd.f32 %v7944_v22, %v6517_v36 }
 0x6cc   :  { %v7826_v2 = vpop.f32.mrb[145].mxu0  ;;  %6824 = vmax.xlane.f32.xlu0 %v14457_v10 }
 0x6cd   :  { %v7827_v16 = vadd.f32 %v7826_v2, %v7825_v52  ;;  %v7828_v57 = vpop.f32.mrb[146].mxu0  ;;  %v14462_v44 = vsel %vm6779_vm1, %v6678_v63, -inf }
 0x6ce   :  { %v14464_v37 = vpop.f32.mrb[240].mxu1  ;;  %v7829_v24 = vpop.f32.mrb[147].mxu0  ;;  %6826 = vmax.xlane.f32.xlu1 %v14462_v44 }
 0x6cf   :  { %v6522_v60 = vadd.f32 %v7827_v16, %v14408_v13  ;;  %v14468_v56 = vpop.f32.mrb[241].mxu1  ;;  %v7830_v20 = vadd.f32 %v7829_v24, %v7828_v57 }
 0x6d0   :  { %v14470_v35 = vpop.f32.mrb[242].mxu1 }
 0x6d1   :  { %v6525_v46 = vadd.f32 %v7830_v20, %v14408_v13  ;;  %v14473_v38 = vpop.f32.mrb[243].mxu1  ;;  %v6683_v39 = vadd.f32 %v6682_v14, %v6522_v60 }
 0x6d3   :  { %v7831_v51 = vpop.f32.mrb[148].mxu0  ;;  %v14477_v1 = vsel %vm6779_vm1, %v6683_v39, -inf  ;;  %v6686_v9 = vadd.f32 %v6685_v50, %v6525_v46 }
 0x6d4   :  { %v7832_v21 = vpop.f32.mrb[149].mxu0  ;;  %6828 = vmax.xlane.f32.xlu0 %v14477_v1 }
 0x6d5   :  { %v7833_v55 = vadd.f32 %v7832_v21, %v7831_v51  ;;  %v7834_v28 = vpop.f32.mrb[150].mxu0  ;;  %v14482_v18 = vsel %vm6779_vm1, %v6686_v9, -inf }
 0x6d6   :  { %v14484_v4 = vpop.f32.mrb[244].mxu1  ;;  %v7835_v22 = vpop.f32.mrb[151].mxu0  ;;  %6830 = vmax.xlane.f32.xlu1 %v14482_v18 }
 0x6d7   :  { %v6530_v23 = vadd.f32 %v7833_v55, %v14408_v13  ;;  %v14488_v0 = vpop.f32.mrb[245].mxu1  ;;  %v7836_v43 = vadd.f32 %v7835_v22, %v7834_v28 }
 0x6d8   :  { %v14490_v25 = vpop.f32.mrb[246].mxu1 }
 0x6d9   :  { %v6533_v5 = vadd.f32 %v7836_v43, %v14408_v13  ;;  %v14493_v47 = vpop.f32.mrb[247].mxu1  ;;  %v6691_v29 = vadd.f32 %v14430_v7, %v6530_v23 }
 0x6db   :  { %v7837_v15 = vpop.f32.mrb[152].mxu0  ;;  %v14498_v59 = vsel %vm6779_vm1, %v6691_v29, -inf  ;;  %v6694_v8 = vadd.f32 %v7948_v54, %v6533_v5 }
 0x6dc   :  { %v7838_v14 = vpop.f32.mrb[153].mxu0  ;;  %6832 = vmax.xlane.f32.xlu0 %v14498_v59 }
 0x6dd   :  { %v7839_v12 = vadd.f32 %v7838_v14, %v7837_v15  ;;  %v7840_v49 = vpop.f32.mrb[154].mxu0  ;;  %v14503_v50 = vsel %vm6779_vm1, %v6694_v8, -inf }
 0x6de   :  { %v14505_v6 = vpop.f32.mrb[248].mxu1  ;;  %v7841_v40 = vpop.f32.mrb[155].mxu0  ;;  %6834 = vmax.xlane.f32.xlu1 %v14503_v50 }
 0x6df   :  { %v6538_v7 = vadd.f32 %v7839_v12, %v14408_v13  ;;  %v14509_v32 = vpop.f32.mrb[249].mxu1  ;;  %v7842_v27 = vadd.f32 %v7841_v40, %v7840_v49 }
 0x6e0   :  { %v14511_v54 = vpop.f32.mrb[250].mxu1 }
 0x6e1   :  { %v6541_v26 = vadd.f32 %v7842_v27, %v14408_v13  ;;  %v14514_v62 = vpop.f32.mrb[251].mxu1  ;;  %v6699_v58 = vadd.f32 %v6698_v19, %v6538_v7 }
 0x6e3   :  { %v7843_v17 = vpop.f32.mrb[156].mxu0  ;;  %v14518_v41 = vsel %vm6779_vm1, %v6699_v58, -inf  ;;  %v6702_v36 = vadd.f32 %v6701_v45, %v6541_v26 }
 0x6e4   :  { %v7844_v61 = vpop.f32.mrb[157].mxu0  ;;  %6836 = vmax.xlane.f32.xlu0 %v14518_v41 }
 0x6e5   :  { %v7845_v52 = vadd.f32 %v7844_v61, %v7843_v17  ;;  %v7846_v63 = vpop.f32.mrb[158].mxu0  ;;  %v14523_v2 = vsel %vm6779_vm1, %v6702_v36, -inf }
 0x6e6   :  { %v14525_v16 = vpop.f32.mrb[252].mxu1  ;;  %v7847_v57 = vpop.f32.mrb[159].mxu0  ;;  %6838 = vmax.xlane.f32.xlu1 %v14523_v2 }
 0x6e7   :  { %v6546_v19 = vadd.f32 %v7845_v52, %v14408_v13  ;;  %v14529_v24 = vpop.f32.mrb[253].mxu1  ;;  %v7848_v60 = vadd.f32 %v7847_v57, %v7846_v63 }
 0x6e8   :  { %v14531_v45 = vpop.f32.mrb[254].mxu1 }
 0x6e9   :  { %v6549_v20 = vadd.f32 %v7848_v60, %v14408_v13  ;;  %v14534_v46 = vpop.f32.mrb[255].mxu1  ;;  %v6707_v39 = vadd.f32 %v14448_v3, %v6546_v19 }
 0x6eb   :  { %v7849_v51 = vpop.f32.mrb[160].mxu0  ;;  %v14539_v9 = vsel %vm6779_vm1, %v6707_v39, -inf  ;;  %v6710_v21 = vadd.f32 %v14452_v53, %v6549_v20 }
 0x6ec   :  { %v7850_v55 = vpop.f32.mrb[161].mxu0  ;;  %6840 = vmax.xlane.f32.xlu0 %v14539_v9 }
 0x6ed   :  { %v7851_v28 = vadd.f32 %v7850_v55, %v7849_v51  ;;  %v7852_v22 = vpop.f32.mrb[162].mxu0  ;;  %v14545_v23 = vsel %vm6779_vm1, %v6710_v21, -inf }
 0x6ee   :  { %v7853_v43 = vpop.f32.mrb[163].mxu0  ;;  %6842 = vmax.xlane.f32.xlu1 %v14545_v23 }
 0x6ef   :  { %v6554_v3 = vadd.f32 %v7851_v28, %v14408_v13  ;;  %v7854_v5 = vadd.f32 %v7853_v43, %v7852_v22 }
 0x6f1   :  { %v6557_v29 = vadd.f32 %v7854_v5, %v14408_v13  ;;  %v6715_v15 = vadd.f32 %v14468_v56, %v6554_v3 }
 0x6f3   :  { %v7855_v53 = vpop.f32.mrb[164].mxu0  ;;  %v14553_v8 = vsel %vm6779_vm1, %v6715_v15, -inf  ;;  %v6718_v14 = vadd.f32 %v14473_v38, %v6557_v29 }
 0x6f4   :  { %v7856_v12 = vpop.f32.mrb[165].mxu0  ;;  %6844 = vmax.xlane.f32.xlu0 %v14553_v8 }
 0x6f5   :  { %v7857_v49 = vadd.f32 %v7856_v12, %v7855_v53  ;;  %v7858_v40 = vpop.f32.mrb[166].mxu0  ;;  %v14559_v7 = vsel %vm6779_vm1, %v6718_v14, -inf }
 0x6f6   :  { %v7859_v27 = vpop.f32.mrb[167].mxu0  ;;  %6846 = vmax.xlane.f32.xlu1 %v14559_v7 }
 0x6f7   :  { %v6562_v56 = vadd.f32 %v7857_v49, %v14408_v13  ;;  %v7860_v26 = vadd.f32 %v7859_v27, %v7858_v40 }
 0x6f9   :  { %v6565_v58 = vadd.f32 %v7860_v26, %v14408_v13  ;;  %v6723_v17 = vadd.f32 %v14464_v37, %v6562_v56 }
 0x6fb   :  { %v7861_v38 = vpop.f32.mrb[168].mxu0  ;;  %v14567_v36 = vsel %vm6779_vm1, %v6723_v17, -inf  ;;  %v6726_v61 = vadd.f32 %v14470_v35, %v6565_v58 }
 0x6fc   :  { %v7862_v52 = vpop.f32.mrb[169].mxu0  ;;  %6848 = vmax.xlane.f32.xlu0 %v14567_v36 }
 0x6fd   :  { %v7863_v63 = vadd.f32 %v7862_v52, %v7861_v38  ;;  %v7864_v57 = vpop.f32.mrb[170].mxu0  ;;  %v14573_v19 = vsel %vm6779_vm1, %v6726_v61, -inf }
 0x6fe   :  { %v7865_v60 = vpop.f32.mrb[171].mxu0  ;;  %6850 = vmax.xlane.f32.xlu1 %v14573_v19 }
 0x6ff   :  { %v6570_v37 = vadd.f32 %v7863_v63, %v14408_v13  ;;  %v7866_v20 = vadd.f32 %v7865_v60, %v7864_v57 }
 0x701   :  { %v6573_v39 = vadd.f32 %v7866_v20, %v14408_v13  ;;  %v6731_v51 = vadd.f32 %v14488_v0, %v6570_v37 }
 0x703   :  { %v7867_v35 = vpop.f32.mrb[172].mxu0  ;;  %v14581_v21 = vsel %vm6779_vm1, %v6731_v51, -inf  ;;  %v6734_v55 = vadd.f32 %v14493_v47, %v6573_v39 }
 0x704   :  { %v7868_v28 = vpop.f32.mrb[173].mxu0  ;;  %6852 = vmax.xlane.f32.xlu0 %v14581_v21 }
 0x705   :  { %v7869_v22 = vadd.f32 %v7868_v28, %v7867_v35  ;;  %v7870_v43 = vpop.f32.mrb[174].mxu0  ;;  %v14587_v3 = vsel %vm6779_vm1, %v6734_v55, -inf }
 0x706   :  { %v7871_v5 = vpop.f32.mrb[175].mxu0  ;;  %6854 = vmax.xlane.f32.xlu1 %v14587_v3 }
 0x707   :  { %v6578_v0 = vadd.f32 %v7869_v22, %v14408_v13  ;;  %v7872_v29 = vadd.f32 %v7871_v5, %v7870_v43 }
 0x709   :  { %v6581_v15 = vadd.f32 %v7872_v29, %v14408_v13  ;;  %v6739_v53 = vadd.f32 %v14484_v4, %v6578_v0 }
 0x70b   :  { %v7873_v47 = vpop.f32.mrb[176].mxu0  ;;  %v14595_v14 = vsel %vm6779_vm1, %v6739_v53, -inf  ;;  %v6742_v12 = vadd.f32 %v14490_v25, %v6581_v15 }
 0x70c   :  { %v7874_v49 = vpop.f32.mrb[177].mxu0  ;;  %6856 = vmax.xlane.f32.xlu0 %v14595_v14 }
 0x70d   :  { %v7875_v40 = vadd.f32 %v7874_v49, %v7873_v47  ;;  %v7876_v27 = vpop.f32.mrb[178].mxu0  ;;  %v14601_v56 = vsel %vm6779_vm1, %v6742_v12, -inf }
 0x70e   :  { %v7877_v26 = vpop.f32.mrb[179].mxu0  ;;  %6858 = vmax.xlane.f32.xlu1 %v14601_v56 }
 0x70f   :  { %v6586_v4 = vadd.f32 %v7875_v40, %v14408_v13  ;;  %v7878_v58 = vadd.f32 %v7877_v26, %v7876_v27 }
 0x711   :  { %v6589_v17 = vadd.f32 %v7878_v58, %v14408_v13  ;;  %v6747_v38 = vadd.f32 %v14509_v32, %v6586_v4 }
 0x713   :  { %v7879_v25 = vpop.f32.mrb[180].mxu0  ;;  %v14609_v61 = vsel %vm6779_vm1, %v6747_v38, -inf  ;;  %v6750_v52 = vadd.f32 %v14514_v62, %v6589_v17 }
 0x714   :  { %v7880_v63 = vpop.f32.mrb[181].mxu0  ;;  %6860 = vmax.xlane.f32.xlu0 %v14609_v61 }
 0x715   :  { %v7881_v57 = vadd.f32 %v7880_v63, %v7879_v25  ;;  %v7882_v60 = vpop.f32.mrb[182].mxu0  ;;  %v14615_v37 = vsel %vm6779_vm1, %v6750_v52, -inf }
 0x716   :  { %v7883_v20 = vpop.f32.mrb[183].mxu0  ;;  %6862 = vmax.xlane.f32.xlu1 %v14615_v37 }
 0x717   :  { %v6594_v32 = vadd.f32 %v7881_v57, %v14408_v13  ;;  %v7884_v39 = vadd.f32 %v7883_v20, %v7882_v60 }
 0x719   :  { %v6597_v51 = vadd.f32 %v7884_v39, %v14408_v13  ;;  %v6755_v35 = vadd.f32 %v14505_v6, %v6594_v32 }
 0x71b   :  { %v7885_v62 = vpop.f32.mrb[184].mxu0  ;;  %v14623_v55 = vsel %vm6779_vm1, %v6755_v35, -inf  ;;  %v6758_v28 = vadd.f32 %v14511_v54, %v6597_v51 }
 0x71c   :  { %v7886_v22 = vpop.f32.mrb[185].mxu0  ;;  %6864 = vmax.xlane.f32.xlu0 %v14623_v55 }
 0x71d   :  { %v7887_v43 = vadd.f32 %v7886_v22, %v7885_v62  ;;  %v7888_v5 = vpop.f32.mrb[186].mxu0  ;;  %v14629_v0 = vsel %vm6779_vm1, %v6758_v28, -inf }
 0x71e   :  { %v7889_v29 = vpop.f32.mrb[187].mxu0  ;;  %6866 = vmax.xlane.f32.xlu1 %v14629_v0 }
 0x71f   :  { %v6602_v6 = vadd.f32 %v7887_v43, %v14408_v13  ;;  %v7890_v15 = vadd.f32 %v7889_v29, %v7888_v5 }
 0x721   :  { %v6605_v53 = vadd.f32 %v7890_v15, %v14408_v13  ;;  %v6763_v47 = vadd.f32 %v14529_v24, %v6602_v6 }
 0x723   :  { %v7891_v54 = vpop.f32.mrb[188].mxu0  ;;  %v14637_v12 = vsel %vm6779_vm1, %v6763_v47, -inf  ;;  %v6766_v49 = vadd.f32 %v14534_v46, %v6605_v53 }
 0x724   :  { %v7892_v40 = vpop.f32.mrb[189].mxu0  ;;  %6868 = vmax.xlane.f32.xlu0 %v14637_v12 }
 0x725   :  { %v7893_v27 = vadd.f32 %v7892_v40, %v7891_v54  ;;  %v7894_v26 = vpop.f32.mrb[190].mxu0  ;;  %v14643_v4 = vsel %vm6779_vm1, %v6766_v49, -inf }
 0x726   :  { %v7895_v58 = vpop.f32.mrb[191].mxu0  ;;  %6870 = vmax.xlane.f32.xlu1 %v14643_v4 }
 0x727   :  { %v6610_v24 = vadd.f32 %v7893_v27, %v14408_v13  ;;  %v7896_v17 = vadd.f32 %v7895_v58, %v7894_v26 }
 0x729   :  { %v6613_v38 = vadd.f32 %v7896_v17, %v14408_v13  ;;  %v6771_v25 = vadd.f32 %v14525_v16, %v6610_v24 }
 0x72b   :  { %v14651_v46 = vsel %vm6779_vm1, %v6771_v25, -inf  ;;  %v6774_v52 = vadd.f32 %v14531_v45, %v6613_v38 }
 0x72c   :  { %6872 = vmax.xlane.f32.xlu0 %v14651_v46 }
 0x72d   :  { %v14657_v63 = vsel %vm6779_vm1, %v6774_v52, -inf }
 0x72e   :  { %6874 = vmax.xlane.f32.xlu1 %v14657_v63 }
 0x741   :  { %v6813_v57 = vpop.xlane.xlu0 %6812 }
 0x742   :  { %v14661_v60 = vsub.f32 %v14415_v33, %v6813_v57 }
 0x744   :  { %v6908_v13 = vmul.f32 1.442695, %v14661_v60 }
 0x745   :  { %v6815_v16 = vpop.xlane.xlu0 %6814 }
 0x746   :  { %8884 = vpow2.f32 %v6908_v13  ;;  %v14665_v20 = vsub.f32 %v14421_v11, %v6815_v16 }
 0x748   :  { %v6910_v45 = vmul.f32 1.442695, %v14665_v20 }
 0x749   :  { %v6817_v32 = vpop.xlane.xlu1 %6816 }
 0x74a   :  { %8886 = vpow2.f32 %v6910_v45  ;;  %v14669_v39 = vsub.f32 %v14427_v42, %v6817_v32 }
 0x74c   :  { %v6912_v51 = vmul.f32 1.442695, %v14669_v39 }
 0x74d   :  { %v6819_v35 = vpop.xlane.xlu1 %6818 }
 0x74e   :  { %8888 = vpow2.f32 %v6912_v51  ;;  %v14673_v33 = vsub.f32 %v14435_v48, %v6819_v35 }
 0x750   :  { %v8885_v62 = vpop.eup %8884  ;;  %v6914_v28 = vmul.f32 1.442695, %v14673_v33 }
 0x751   :  { %6972 = vadd.xlane.f32.xlu0 %v8885_v62  ;;  %v6821_v11 = vpop.xlane.xlu0 %6820 }
 0x752   :  { %8890 = vpow2.f32 %v6914_v28  ;;  %v14677_v22 = vsub.f32 %v14441_v31, %v6821_v11 }
 0x753   :  { %v6823_v43 = vpop.xlane.xlu1 %6822 }
 0x754   :  { %v8887_v5 = vpop.eup %8886  ;;  %v6916_v42 = vmul.f32 1.442695, %v14677_v22  ;;  %v14681_v29 = vsub.f32 %v14446_v30, %v6823_v43 }
 0x755   :  { %6974 = vadd.xlane.f32.xlu1 %v8887_v5 }
 0x756   :  { %8892 = vpow2.f32 %v6916_v42  ;;  %v6918_v48 = vmul.f32 1.442695, %v14681_v29 }
 0x758   :  { %v8889_v6 = vpop.eup %8888  ;;  %8894 = vpow2.f32 %v6918_v48 }
 0x759   :  { %6976 = vadd.xlane.f32.xlu0 %v8889_v6  ;;  %v6825_v15 = vpop.xlane.xlu0 %6824 }
 0x75a   :  { %v14685_v53 = vsub.f32 %v14457_v10, %v6825_v15 }
 0x75b   :  { %v6827_v31 = vpop.xlane.xlu1 %6826 }
 0x75c   :  { %v8891_v47 = vpop.eup %8890  ;;  %v6920_v54 = vmul.f32 1.442695, %v14685_v53  ;;  %v14689_v49 = vsub.f32 %v14462_v44, %v6827_v31 }
 0x75d   :  { %6978 = vadd.xlane.f32.xlu1 %v8891_v47 }
 0x75e   :  { %8896 = vpow2.f32 %v6920_v54  ;;  %v6922_v30 = vmul.f32 1.442695, %v14689_v49 }
 0x760   :  { %v8893_v40 = vpop.eup %8892  ;;  %8898 = vpow2.f32 %v6922_v30 }
 0x761   :  { %6980 = vadd.xlane.f32.xlu0 %v8893_v40  ;;  %v6829_v27 = vpop.xlane.xlu0 %6828 }
 0x762   :  { %v8895_v26 = vpop.eup %8894  ;;  %v14693_v58 = vsub.f32 %v14477_v1, %v6829_v27 }
 0x763   :  { %v6831_v10 = vpop.xlane.xlu1 %6830  ;;  %6982 = vadd.xlane.f32.xlu1 %v8895_v26 }
 0x764   :  { %v6924_v24 = vmul.f32 1.442695, %v14693_v58  ;;  %v14697_v17 = vsub.f32 %v14482_v18, %v6831_v10 }
 0x766   :  { %8900 = vpow2.f32 %v6924_v24  ;;  %v6926_v44 = vmul.f32 1.442695, %v14697_v17 }
 0x768   :  { %v8897_v38 = vpop.eup %8896  ;;  %8902 = vpow2.f32 %v6926_v44 }
 0x769   :  { %6984 = vadd.xlane.f32.xlu0 %v8897_v38  ;;  %v6833_v25 = vpop.xlane.xlu0 %6832 }
 0x76a   :  { %v8899_v52 = vpop.eup %8898  ;;  %v14701_v57 = vsub.f32 %v14498_v59, %v6833_v25 }
 0x76b   :  { %v6835_v1 = vpop.xlane.xlu1 %6834  ;;  %6986 = vadd.xlane.f32.xlu1 %v8899_v52 }
 0x76c   :  { %v6928_v13 = vmul.f32 1.442695, %v14701_v57  ;;  %v14705_v16 = vsub.f32 %v14503_v50, %v6835_v1 }
 0x76e   :  { %8904 = vpow2.f32 %v6928_v13  ;;  %v6930_v18 = vmul.f32 1.442695, %v14705_v16 }
 0x770   :  { %v8901_v45 = vpop.eup %8900  ;;  %8906 = vpow2.f32 %v6930_v18 }
 0x771   :  { %6988 = vadd.xlane.f32.xlu0 %v8901_v45  ;;  %v6837_v32 = vpop.xlane.xlu0 %6836 }
 0x772   :  { %v8903_v51 = vpop.eup %8902  ;;  %v14709_v35 = vsub.f32 %v14518_v41, %v6837_v32 }
 0x773   :  { %v6839_v59 = vpop.xlane.xlu1 %6838  ;;  %6990 = vadd.xlane.f32.xlu1 %v8903_v51 }
 0x774   :  { %v6932_v62 = vmul.f32 1.442695, %v14709_v35  ;;  %v14713_v28 = vsub.f32 %v14523_v2, %v6839_v59 }
 0x776   :  { %8908 = vpow2.f32 %v6932_v62  ;;  %v6934_v50 = vmul.f32 1.442695, %v14713_v28 }
 0x778   :  { %v8905_v11 = vpop.eup %8904  ;;  %8910 = vpow2.f32 %v6934_v50 }
 0x779   :  { %6992 = vadd.xlane.f32.xlu0 %v8905_v11  ;;  %v6841_v43 = vpop.xlane.xlu0 %6840 }
 0x77a   :  { %v8907_v5 = vpop.eup %8906  ;;  %v14717_v42 = vsub.f32 %v14539_v9, %v6841_v43 }
 0x77b   :  { %v6843_v41 = vpop.xlane.xlu1 %6842  ;;  %6994 = vadd.xlane.f32.xlu1 %v8907_v5 }
 0x77c   :  { %v6936_v48 = vmul.f32 1.442695, %v14717_v42  ;;  %v14721_v6 = vsub.f32 %v14545_v23, %v6843_v41 }
 0x77e   :  { %8912 = vpow2.f32 %v6936_v48  ;;  %v6938_v2 = vmul.f32 1.442695, %v14721_v6 }
 0x780   :  { %v8909_v15 = vpop.eup %8908  ;;  %8914 = vpow2.f32 %v6938_v2 }
 0x781   :  { %6996 = vadd.xlane.f32.xlu0 %v8909_v15  ;;  %v6845_v31 = vpop.xlane.xlu0 %6844 }
 0x782   :  { %v8911_v47 = vpop.eup %8910  ;;  %v14725_v54 = vsub.f32 %v14553_v8, %v6845_v31 }
 0x783   :  { %v6847_v9 = vpop.xlane.xlu1 %6846  ;;  %6998 = vadd.xlane.f32.xlu1 %v8911_v47 }
 0x784   :  { %v6940_v30 = vmul.f32 1.442695, %v14725_v54  ;;  %v14729_v40 = vsub.f32 %v14559_v7, %v6847_v9 }
 0x786   :  { %8916 = vpow2.f32 %v6940_v30  ;;  %v6942_v23 = vmul.f32 1.442695, %v14729_v40 }
 0x788   :  { %v8913_v27 = vpop.eup %8912  ;;  %8918 = vpow2.f32 %v6942_v23 }
 0x789   :  { %7000 = vadd.xlane.f32.xlu0 %v8913_v27  ;;  %v6849_v26 = vpop.xlane.xlu0 %6848 }
 0x78a   :  { %v8915_v10 = vpop.eup %8914  ;;  %v14733_v24 = vsub.f32 %v14567_v36, %v6849_v26 }
 0x78b   :  { %v6851_v8 = vpop.xlane.xlu1 %6850  ;;  %7002 = vadd.xlane.f32.xlu1 %v8915_v10 }
 0x78c   :  { %v6944_v44 = vmul.f32 1.442695, %v14733_v24  ;;  %v14737_v38 = vsub.f32 %v14573_v19, %v6851_v8 }
 0x78e   :  { %8920 = vpow2.f32 %v6944_v44  ;;  %v6946_v7 = vmul.f32 1.442695, %v14737_v38 }
 0x790   :  { %v8917_v25 = vpop.eup %8916  ;;  %8922 = vpow2.f32 %v6946_v7 }
 0x791   :  { %7004 = vadd.xlane.f32.xlu0 %v8917_v25  ;;  %v6853_v52 = vpop.xlane.xlu0 %6852 }
 0x792   :  { %v8919_v1 = vpop.eup %8918  ;;  %v14741_v13 = vsub.f32 %v14581_v21, %v6853_v52 }
 0x793   :  { %v6855_v36 = vpop.xlane.xlu1 %6854  ;;  %7006 = vadd.xlane.f32.xlu1 %v8919_v1 }
 0x794   :  { %v6948_v18 = vmul.f32 1.442695, %v14741_v13  ;;  %v14745_v45 = vsub.f32 %v14587_v3, %v6855_v36 }
 0x796   :  { %8924 = vpow2.f32 %v6948_v18  ;;  %v6950_v19 = vmul.f32 1.442695, %v14745_v45 }
 0x798   :  { %v8921_v32 = vpop.eup %8920  ;;  %8926 = vpow2.f32 %v6950_v19 }
 0x799   :  { %7008 = vadd.xlane.f32.xlu0 %v8921_v32  ;;  %v6857_v51 = vpop.xlane.xlu0 %6856 }
 0x79a   :  { %v8923_v59 = vpop.eup %8922  ;;  %v14749_v62 = vsub.f32 %v14595_v14, %v6857_v51 }
 0x79b   :  { %v6859_v21 = vpop.xlane.xlu1 %6858  ;;  %7010 = vadd.xlane.f32.xlu1 %v8923_v59 }
 0x79c   :  { %v6952_v50 = vmul.f32 1.442695, %v14749_v62  ;;  %v14753_v11 = vsub.f32 %v14601_v56, %v6859_v21 }
 0x79e   :  { %8928 = vpow2.f32 %v6952_v50  ;;  %v6954_v3 = vmul.f32 1.442695, %v14753_v11 }
 0x7a0   :  { %v8925_v43 = vpop.eup %8924  ;;  %8930 = vpow2.f32 %v6954_v3 }
 0x7a1   :  { %7012 = vadd.xlane.f32.xlu0 %v8925_v43  ;;  %v6861_v5 = vpop.xlane.xlu0 %6860 }
 0x7a2   :  { %v8927_v41 = vpop.eup %8926  ;;  %v14757_v48 = vsub.f32 %v14609_v61, %v6861_v5 }
 0x7a3   :  { %v6863_v14 = vpop.xlane.xlu1 %6862  ;;  %7014 = vadd.xlane.f32.xlu1 %v8927_v41 }
 0x7a4   :  { %v6956_v2 = vmul.f32 1.442695, %v14757_v48  ;;  %v14761_v15 = vsub.f32 %v14615_v37, %v6863_v14 }
 0x7a6   :  { %8932 = vpow2.f32 %v6956_v2  ;;  %v6958_v56 = vmul.f32 1.442695, %v14761_v15 }
 0x7a8   :  { %v8929_v31 = vpop.eup %8928  ;;  %8934 = vpow2.f32 %v6958_v56 }
 0x7a9   :  { %7016 = vadd.xlane.f32.xlu0 %v8929_v31  ;;  %v6865_v47 = vpop.xlane.xlu0 %6864 }
 0x7aa   :  { %v8931_v9 = vpop.eup %8930  ;;  %v14765_v30 = vsub.f32 %v14623_v55, %v6865_v47 }
 0x7ab   :  { %v6867_v61 = vpop.xlane.xlu1 %6866  ;;  %7018 = vadd.xlane.f32.xlu1 %v8931_v9 }
 0x7ac   :  { %v6960_v23 = vmul.f32 1.442695, %v14765_v30  ;;  %v14769_v27 = vsub.f32 %v14629_v0, %v6867_v61 }
 0x7ae   :  { %8936 = vpow2.f32 %v6960_v23  ;;  %v6962_v37 = vmul.f32 1.442695, %v14769_v27 }
 0x7b0   :  { %v8933_v26 = vpop.eup %8932  ;;  %8938 = vpow2.f32 %v6962_v37 }
 0x7b1   :  { %7020 = vadd.xlane.f32.xlu0 %v8933_v26  ;;  %v6869_v10 = vpop.xlane.xlu0 %6868 }
 0x7b2   :  { %v8935_v8 = vpop.eup %8934  ;;  %v14773_v44 = vsub.f32 %v14637_v12, %v6869_v10 }
 0x7b3   :  { %v6871_v55 = vpop.xlane.xlu1 %6870  ;;  %7022 = vadd.xlane.f32.xlu1 %v8935_v8 }
 0x7b4   :  { %v6964_v7 = vmul.f32 1.442695, %v14773_v44  ;;  %v14777_v25 = vsub.f32 %v14643_v4, %v6871_v55 }
 0x7b6   :  { %8940 = vpow2.f32 %v6964_v7  ;;  %v6966_v0 = vmul.f32 1.442695, %v14777_v25 }
 0x7b8   :  { %v8937_v52 = vpop.eup %8936  ;;  %8942 = vpow2.f32 %v6966_v0 }
 0x7b9   :  { %7024 = vadd.xlane.f32.xlu0 %v8937_v52  ;;  %v6873_v1 = vpop.xlane.xlu0 %6872 }
 0x7ba   :  { %v8939_v36 = vpop.eup %8938  ;;  %v14781_v18 = vsub.f32 %v14651_v46, %v6873_v1 }
 0x7bb   :  { %v6875_v12 = vpop.xlane.xlu1 %6874  ;;  %7026 = vadd.xlane.f32.xlu1 %v8939_v36 }
 0x7bc   :  { %v6968_v19 = vmul.f32 1.442695, %v14781_v18  ;;  %v14785_v32 = vsub.f32 %v14657_v63, %v6875_v12 }
 0x7be   :  { %8944 = vpow2.f32 %v6968_v19  ;;  %v6970_v4 = vmul.f32 1.442695, %v14785_v32 }
 0x7c0   :  { %v8941_v51 = vpop.eup %8940  ;;  %8946 = vpow2.f32 %v6970_v4 }
 0x7c1   :  { %7028 = vadd.xlane.f32.xlu0 %v8941_v51 }
 0x7c2   :  { %v8943_v59 = vpop.eup %8942 }
 0x7c3   :  { %7030 = vadd.xlane.f32.xlu1 %v8943_v59 }
 0x7c8   :  { %v8945_v21 = vpop.eup %8944 }
 0x7c9   :  { %7032 = vadd.xlane.f32.xlu0 %v8945_v21 }
 0x7ca   :  { %v8947_v50 = vpop.eup %8946 }
 0x7cb   :  { %7034 = vadd.xlane.f32.xlu1 %v8947_v50 }
 0x7de   :  { %v6973_v46 = vpop.xlane.xlu0 %6972 }
 0x7df   :  { %8948 = vlog2.f32 %v6973_v46 }
 0x7e2   :  { %v6975_v3 = vpop.xlane.xlu1 %6974 }
 0x7e3   :  { %8950 = vlog2.f32 %v6975_v3 }
 0x7e6   :  { %v6977_v43 = vpop.xlane.xlu0 %6976 }
 0x7e7   :  { %8952 = vlog2.f32 %v6977_v43 }
 0x7e9   :  { %v8949_v63 = vpop.eup %8948 }
 0x7ea   :  { %v7037_v5 = vmul.f32 0.6931472, %v8949_v63  ;;  %v6979_v41 = vpop.xlane.xlu1 %6978 }
 0x7eb   :  { %8954 = vlog2.f32 %v6979_v41 }
 0x7ec   :  { %v7100_v14 = vsub.f32 %v14661_v60, %v7037_v5 }
 0x7ed   :  { %v8951_v2 = vpop.eup %8950 }
 0x7ee   :  { %v7132_v56 = vsel %vm6779_vm1, %v7100_v14, 0.0  ;;  %v7039_v31 = vmul.f32 0.6931472, %v8951_v2  ;;  %v6981_v47 = vpop.xlane.xlu0 %6980 }
 0x7ef   :  { %7164 = vst [vmem:[#allocation2] sm:$0xff] %v7132_v56  ;;  %8956 = vlog2.f32 %v6981_v47 }
 0x7f0   :  { %v7101_v9 = vsub.f32 %v14665_v20, %v7039_v31  ;;  %v6983_v61 = vpop.xlane.xlu1 %6982 }
 0x7f1   :  { %v8953_v23 = vpop.eup %8952  ;;  %8958 = vlog2.f32 %v6983_v61 }
 0x7f2   :  { %v7133_v37 = vsel %vm6779_vm1, %v7101_v9, 0.0  ;;  %v7041_v26 = vmul.f32 0.6931472, %v8953_v23 }
 0x7f3   :  { %7165 = vst [vmem:[#allocation2 + $0x8] sm:$0xff] %v7133_v37 }
 0x7f4   :  { %v7102_v60 = vsub.f32 %v14669_v39, %v7041_v26 }
 0x7f5   :  { %v8955_v10 = vpop.eup %8954 }
 0x7f6   :  { %v7134_v8 = vsel %vm6779_vm1, %v7102_v60, 0.0  ;;  %v7043_v55 = vmul.f32 0.6931472, %v8955_v10  ;;  %v6985_v7 = vpop.xlane.xlu0 %6984 }
 0x7f7   :  { %7166 = vst [vmem:[#allocation2 + $0x10] sm:$0xff] %v7134_v8  ;;  %8960 = vlog2.f32 %v6985_v7 }
 0x7f8   :  { %v7103_v20 = vsub.f32 %v14673_v33, %v7043_v55  ;;  %v6987_v0 = vpop.xlane.xlu1 %6986 }
 0x7f9   :  { %v8957_v52 = vpop.eup %8956  ;;  %8962 = vlog2.f32 %v6987_v0 }
 0x7fa   :  { %v7135_v1 = vsel %vm6779_vm1, %v7103_v20, 0.0  ;;  %v7045_v36 = vmul.f32 0.6931472, %v8957_v52 }
 0x7fb   :  { %v8959_v12 = vpop.eup %8958  ;;  %7167 = vst [vmem:[#allocation2 + $0x18] sm:$0xff] %v7135_v1 }
 0x7fc   :  { %v7104_v39 = vsub.f32 %v14677_v22, %v7045_v36  ;;  %v7047_v19 = vmul.f32 0.6931472, %v8959_v12 }
 0x7fe   :  { %v7136_v4 = vsel %vm6779_vm1, %v7104_v39, 0.0  ;;  %v7105_v51 = vsub.f32 %v14681_v29, %v7047_v19  ;;  %v6989_v59 = vpop.xlane.xlu0 %6988 }
 0x7ff   :  { %7168 = vst [vmem:[#allocation2 + $0x20] sm:$0xff] %v7136_v4  ;;  %8964 = vlog2.f32 %v6989_v59 }
 0x800   :  { %v7137_v33 = vsel %vm6779_vm1, %v7105_v51, 0.0  ;;  %v6991_v21 = vpop.xlane.xlu1 %6990 }
 0x801   :  { %v8961_v50 = vpop.eup %8960  ;;  %7169 = vst [vmem:[#allocation2 + $0x28] sm:$0xff] %v7137_v33  ;;  %8966 = vlog2.f32 %v6991_v21 }
 0x802   :  { %v7049_v46 = vmul.f32 0.6931472, %v8961_v50 }
 0x803   :  { %v8963_v3 = vpop.eup %8962 }
 0x804   :  { %v7106_v22 = vsub.f32 %v14685_v53, %v7049_v46  ;;  %v7051_v43 = vmul.f32 0.6931472, %v8963_v3 }
 0x806   :  { %v7138_v63 = vsel %vm6779_vm1, %v7106_v22, 0.0  ;;  %v7107_v29 = vsub.f32 %v14689_v49, %v7051_v43  ;;  %v6993_v5 = vpop.xlane.xlu0 %6992 }
 0x807   :  { %7170 = vst [vmem:[#allocation2 + $0x30] sm:$0xff] %v7138_v63  ;;  %8968 = vlog2.f32 %v6993_v5 }
 0x808   :  { %v7139_v41 = vsel %vm6779_vm1, %v7107_v29, 0.0  ;;  %v6995_v14 = vpop.xlane.xlu1 %6994 }
 0x809   :  { %v8965_v2 = vpop.eup %8964  ;;  %7171 = vst [vmem:[#allocation2 + $0x38] sm:$0xff] %v7139_v41  ;;  %8970 = vlog2.f32 %v6995_v14 }
 0x80a   :  { %v7053_v56 = vmul.f32 0.6931472, %v8965_v2 }
 0x80b   :  { %v8967_v31 = vpop.eup %8966 }
 0x80c   :  { %v7108_v53 = vsub.f32 %v14693_v58, %v7053_v56  ;;  %v7055_v47 = vmul.f32 0.6931472, %v8967_v31 }
 0x80e   :  { %v7140_v9 = vsel %vm6779_vm1, %v7108_v53, 0.0  ;;  %v7109_v49 = vsub.f32 %v14697_v17, %v7055_v47  ;;  %v6997_v61 = vpop.xlane.xlu0 %6996 }
 0x80f   :  { %7172 = vst [vmem:[#allocation2 + $0x40] sm:$0xff] %v7140_v9  ;;  %8972 = vlog2.f32 %v6997_v61 }
 0x810   :  { %v7141_v23 = vsel %vm6779_vm1, %v7109_v49, 0.0  ;;  %v6999_v37 = vpop.xlane.xlu1 %6998 }
 0x811   :  { %v8969_v26 = vpop.eup %8968  ;;  %7173 = vst [vmem:[#allocation2 + $0x48] sm:$0xff] %v7141_v23  ;;  %8974 = vlog2.f32 %v6999_v37 }
 0x812   :  { %v7057_v60 = vmul.f32 0.6931472, %v8969_v26 }
 0x813   :  { %v8971_v10 = vpop.eup %8970 }
 0x814   :  { %v7110_v58 = vsub.f32 %v14701_v57, %v7057_v60  ;;  %v7059_v8 = vmul.f32 0.6931472, %v8971_v10 }
 0x816   :  { %v7142_v55 = vsel %vm6779_vm1, %v7110_v58, 0.0  ;;  %v7111_v17 = vsub.f32 %v14705_v16, %v7059_v8  ;;  %v7001_v7 = vpop.xlane.xlu0 %7000 }
 0x817   :  { %7174 = vst [vmem:[#allocation2 + $0x50] sm:$0xff] %v7142_v55  ;;  %8976 = vlog2.f32 %v7001_v7 }
 0x818   :  { %v7143_v20 = vsel %vm6779_vm1, %v7111_v17, 0.0  ;;  %v7003_v0 = vpop.xlane.xlu1 %7002 }
 0x819   :  { %v8973_v52 = vpop.eup %8972  ;;  %7175 = vst [vmem:[#allocation2 + $0x58] sm:$0xff] %v7143_v20  ;;  %8978 = vlog2.f32 %v7003_v0 }
 0x81a   :  { %v7061_v1 = vmul.f32 0.6931472, %v8973_v52 }
 0x81b   :  { %v8975_v36 = vpop.eup %8974 }
 0x81c   :  { %v7112_v57 = vsub.f32 %v14709_v35, %v7061_v1  ;;  %v7063_v12 = vmul.f32 0.6931472, %v8975_v36 }
 0x81e   :  { %v7144_v39 = vsel %vm6779_vm1, %v7112_v57, 0.0  ;;  %v7113_v16 = vsub.f32 %v14713_v28, %v7063_v12  ;;  %v7005_v19 = vpop.xlane.xlu0 %7004 }
 0x81f   :  { %7176 = vst [vmem:[#allocation2 + $0x60] sm:$0xff] %v7144_v39  ;;  %8980 = vlog2.f32 %v7005_v19 }
 0x820   :  { %v7145_v4 = vsel %vm6779_vm1, %v7113_v16, 0.0  ;;  %v7007_v51 = vpop.xlane.xlu1 %7006 }
 0x821   :  { %v8977_v59 = vpop.eup %8976  ;;  %7177 = vst [vmem:[#allocation2 + $0x68] sm:$0xff] %v7145_v4  ;;  %8982 = vlog2.f32 %v7007_v51 }
 0x822   :  { %v7065_v33 = vmul.f32 0.6931472, %v8977_v59 }
 0x823   :  { %v8979_v21 = vpop.eup %8978 }
 0x824   :  { %v7114_v35 = vsub.f32 %v14717_v42, %v7065_v33  ;;  %v7067_v50 = vmul.f32 0.6931472, %v8979_v21 }
 0x826   :  { %v7146_v46 = vsel %vm6779_vm1, %v7114_v35, 0.0  ;;  %v7115_v28 = vsub.f32 %v14721_v6, %v7067_v50  ;;  %v7009_v3 = vpop.xlane.xlu0 %7008 }
 0x827   :  { %7178 = vst [vmem:[#allocation2 + $0x70] sm:$0xff] %v7146_v46  ;;  %8984 = vlog2.f32 %v7009_v3 }
 0x828   :  { %v7147_v22 = vsel %vm6779_vm1, %v7115_v28, 0.0  ;;  %v7011_v43 = vpop.xlane.xlu1 %7010 }
 0x829   :  { %v8981_v63 = vpop.eup %8980  ;;  %7179 = vst [vmem:[#allocation2 + $0x78] sm:$0xff] %v7147_v22  ;;  %8986 = vlog2.f32 %v7011_v43 }
 0x82a   :  { %v7069_v29 = vmul.f32 0.6931472, %v8981_v63 }
 0x82b   :  { %v8983_v5 = vpop.eup %8982 }
 0x82c   :  { %v7116_v42 = vsub.f32 %v14725_v54, %v7069_v29  ;;  %v7071_v41 = vmul.f32 0.6931472, %v8983_v5 }
 0x82e   :  { %v7148_v14 = vsel %vm6779_vm1, %v7116_v42, 0.0  ;;  %v7117_v6 = vsub.f32 %v14729_v40, %v7071_v41  ;;  %v7013_v2 = vpop.xlane.xlu0 %7012 }
 0x82f   :  { %7180 = vst [vmem:[#allocation2 + $0x80] sm:$0xff] %v7148_v14  ;;  %8988 = vlog2.f32 %v7013_v2 }
 0x830   :  { %v7149_v56 = vsel %vm6779_vm1, %v7117_v6, 0.0  ;;  %v7015_v31 = vpop.xlane.xlu1 %7014 }
 0x831   :  { %v8985_v53 = vpop.eup %8984  ;;  %7181 = vst [vmem:[#allocation2 + $0x88] sm:$0xff] %v7149_v56  ;;  %8990 = vlog2.f32 %v7015_v31 }
 0x832   :  { %v7073_v47 = vmul.f32 0.6931472, %v8985_v53 }
 0x833   :  { %v8987_v9 = vpop.eup %8986 }
 0x834   :  { %v7118_v54 = vsub.f32 %v14733_v24, %v7073_v47  ;;  %v7075_v49 = vmul.f32 0.6931472, %v8987_v9 }
 0x836   :  { %v7150_v61 = vsel %vm6779_vm1, %v7118_v54, 0.0  ;;  %v7119_v40 = vsub.f32 %v14737_v38, %v7075_v49  ;;  %v7017_v23 = vpop.xlane.xlu0 %7016 }
 0x837   :  { %7182 = vst [vmem:[#allocation2 + $0x90] sm:$0xff] %v7150_v61  ;;  %8992 = vlog2.f32 %v7017_v23 }
 0x838   :  { %v7151_v37 = vsel %vm6779_vm1, %v7119_v40, 0.0  ;;  %v7019_v26 = vpop.xlane.xlu1 %7018 }
 0x839   :  { %v8989_v60 = vpop.eup %8988  ;;  %7183 = vst [vmem:[#allocation2 + $0x98] sm:$0xff] %v7151_v37  ;;  %8994 = vlog2.f32 %v7019_v26 }
 0x83a   :  { %v7077_v10 = vmul.f32 0.6931472, %v8989_v60 }
 0x83b   :  { %v8991_v58 = vpop.eup %8990 }
 0x83c   :  { %v7120_v24 = vsub.f32 %v14741_v13, %v7077_v10  ;;  %v7079_v8 = vmul.f32 0.6931472, %v8991_v58 }
 0x83e   :  { %v7152_v55 = vsel %vm6779_vm1, %v7120_v24, 0.0  ;;  %v7121_v38 = vsub.f32 %v14745_v45, %v7079_v8  ;;  %v7021_v17 = vpop.xlane.xlu0 %7020 }
 0x83f   :  { %7184 = vst [vmem:[#allocation2 + $0xa0] sm:$0xff] %v7152_v55  ;;  %8996 = vlog2.f32 %v7021_v17 }
 0x840   :  { %v7153_v7 = vsel %vm6779_vm1, %v7121_v38, 0.0  ;;  %v7023_v20 = vpop.xlane.xlu1 %7022 }
 0x841   :  { %v8993_v0 = vpop.eup %8992  ;;  %7185 = vst [vmem:[#allocation2 + $0xa8] sm:$0xff] %v7153_v7  ;;  %8998 = vlog2.f32 %v7023_v20 }
 0x842   :  { %v7081_v52 = vmul.f32 0.6931472, %v8993_v0 }
 0x843   :  { %v8995_v1 = vpop.eup %8994 }
 0x844   :  { %v7122_v13 = vsub.f32 %v14749_v62, %v7081_v52  ;;  %v7083_v36 = vmul.f32 0.6931472, %v8995_v1 }
 0x846   :  { %v7154_v57 = vsel %vm6779_vm1, %v7122_v13, 0.0  ;;  %v7123_v45 = vsub.f32 %v14753_v11, %v7083_v36  ;;  %v7025_v12 = vpop.xlane.xlu0 %7024 }
 0x847   :  { %7186 = vst [vmem:[#allocation2 + $0xb0] sm:$0xff] %v7154_v57  ;;  %9000 = vlog2.f32 %v7025_v12 }
 0x848   :  { %v7155_v39 = vsel %vm6779_vm1, %v7123_v45, 0.0  ;;  %v7027_v16 = vpop.xlane.xlu1 %7026 }
 0x849   :  { %v8997_v19 = vpop.eup %8996  ;;  %7187 = vst [vmem:[#allocation2 + $0xb8] sm:$0xff] %v7155_v39  ;;  %9002 = vlog2.f32 %v7027_v16 }
 0x84a   :  { %v7085_v4 = vmul.f32 0.6931472, %v8997_v19 }
 0x84b   :  { %v8999_v51 = vpop.eup %8998 }
 0x84c   :  { %v7124_v62 = vsub.f32 %v14757_v48, %v7085_v4  ;;  %v7087_v59 = vmul.f32 0.6931472, %v8999_v51 }
 0x84e   :  { %v7156_v33 = vsel %vm6779_vm1, %v7124_v62, 0.0  ;;  %v7125_v11 = vsub.f32 %v14761_v15, %v7087_v59  ;;  %v7029_v21 = vpop.xlane.xlu0 %7028 }
 0x84f   :  { %7188 = vst [vmem:[#allocation2 + $0xc0] sm:$0xff] %v7156_v33  ;;  %9004 = vlog2.f32 %v7029_v21 }
 0x850   :  { %v7157_v35 = vsel %vm6779_vm1, %v7125_v11, 0.0  ;;  %v7031_v50 = vpop.xlane.xlu1 %7030 }
 0x851   :  { %v9001_v46 = vpop.eup %9000  ;;  %7189 = vst [vmem:[#allocation2 + $0xc8] sm:$0xff] %v7157_v35  ;;  %9006 = vlog2.f32 %v7031_v50 }
 0x852   :  { %v7089_v28 = vmul.f32 0.6931472, %v9001_v46 }
 0x853   :  { %v9003_v3 = vpop.eup %9002 }
 0x854   :  { %v7126_v48 = vsub.f32 %v14765_v30, %v7089_v28  ;;  %v7091_v22 = vmul.f32 0.6931472, %v9003_v3 }
 0x856   :  { %v7158_v43 = vsel %vm6779_vm1, %v7126_v48, 0.0  ;;  %v7127_v15 = vsub.f32 %v14769_v27, %v7091_v22  ;;  %v7033_v63 = vpop.xlane.xlu0 %7032 }
 0x857   :  { %7190 = vst [vmem:[#allocation2 + $0xd0] sm:$0xff] %v7158_v43  ;;  %9008 = vlog2.f32 %v7033_v63 }
 0x858   :  { %v7159_v29 = vsel %vm6779_vm1, %v7127_v15, 0.0  ;;  %v7035_v5 = vpop.xlane.xlu1 %7034 }
 0x859   :  { %v9005_v42 = vpop.eup %9004  ;;  %7191 = vst [vmem:[#allocation2 + $0xd8] sm:$0xff] %v7159_v29  ;;  %9010 = vlog2.f32 %v7035_v5 }
 0x85a   :  { %v7093_v41 = vmul.f32 0.6931472, %v9005_v42 }
 0x85b   :  { %v9007_v14 = vpop.eup %9006 }
 0x85c   :  { %v7128_v30 = vsub.f32 %v14773_v44, %v7093_v41  ;;  %v7095_v6 = vmul.f32 0.6931472, %v9007_v14 }
 0x85e   :  { %v7160_v2 = vsel %vm6779_vm1, %v7128_v30, 0.0  ;;  %v7129_v27 = vsub.f32 %v14777_v25, %v7095_v6 }
 0x85f   :  { %7192 = vst [vmem:[#allocation2 + $0xe0] sm:$0xff] %v7160_v2 }
 0x860   :  { %v7161_v56 = vsel %vm6779_vm1, %v7129_v27, 0.0 }
 0x861   :  { %v9009_v31 = vpop.eup %9008  ;;  %7193 = vst [vmem:[#allocation2 + $0xe8] sm:$0xff] %v7161_v56 }
 0x862   :  { %v7097_v53 = vmul.f32 0.6931472, %v9009_v31 }
 0x863   :  { %v9011_v47 = vpop.eup %9010 }
 0x864   :  { %v7130_v9 = vsub.f32 %v14781_v18, %v7097_v53  ;;  %v7099_v54 = vmul.f32 0.6931472, %v9011_v47 }
 0x866   :  { %v7162_v44 = vsel %vm6779_vm1, %v7130_v9, 0.0  ;;  %v7131_v49 = vsub.f32 %v14785_v32, %v7099_v54 }
 0x867   :  { %7194 = vst [vmem:[#allocation2 + $0xf0] sm:$0xff] %v7162_v44 }
 0x868   :  { %v7163_v25 = vsel %vm6779_vm1, %v7131_v49, 0.0 }
 0x869   :  { %7195 = vst [vmem:[#allocation2 + $0xf8] sm:$0xff] %v7163_v25 }
 0x86a   :  { %9025 = shalt.err (!%p9022_p4)
}
 0x86b   :  { %s9026_s11 = scalar_lea.hbm %s14905_s9, 4096 }
 0x86c   :  { %p9027_p5 = scmp.ne.s32.totalorder %s14905_s9, %s9026_s11  ;;  %p9030_p6 = scmp.lt.u32.totalorder %s9026_s11, %s14905_s9 }
 0x86e   :  { %p9032_p7 = pnand %p9030_p6, %p9027_p5 }
 0x870   :  { %9035 = shalt.err (!%p9032_p7)
}
 0x871   :  { %s9041_s15 = smov 128   ;;  %s9042_s3 = smov 8  }
 0x872   :  { %7207 = dma.vmem_to_hbm [thread:$0]  %s7202_s29, 4096, %s14905_s9, [#allocation3], %s9041_s15, %s9041_s15, %s9042_s3  }
 0x873   :  { %9036 = dma.done.wait [#allocation3], 4096  }
 0x874   :  { %9037 = vsyncadd [#allocation3], 4294963200 }
 0x875   :  { %7211 = vsyncpa [#allocation3], 1 }

</bundles_post_ra>
